<compile_context>
chip_gen: v7x
topology: tpu7x:2x2x1
jax: 0.10.0
libtpu: 0.0.40
codegen_flags: <defaults>
</compile_context>

<pallas_src>
import jax
import jax.numpy as jnp
from jax.experimental import pallas as pl
from jax.experimental.pallas import tpu as pltpu

IMG_FLAT = 3 * 128 * 128          # 49152
N_ACTIONS = 4
IN_DIM = IMG_FLAT + N_ACTIONS     # 49156 (PyTorch Linear fan-in)
H1, H2, OUT = 256, 128, 2

TK = 8192                         # K tile for the layer-1 matmul (49152 = 6 * 8192)
NUM_SPLITS = 2                    # leading "parallel" axis (sharded over TCs on v7x)
OUT_PAD = 128                     # lane-aligned output width

assert IMG_FLAT % (TK * NUM_SPLITS) == 0


def _layer1_kernel(x_ref, w1_ref, part_ref):
    """Partial layer-1 matmul: grid slice c reduces its half of K into part[c]."""
    k = pl.program_id(1)

    @pl.when(k == 0)
    def _():
        part_ref[...] = jnp.zeros_like(part_ref)

    # Hot loop body: a single MXU accumulate per K tile (f32 accumulation).
    part_ref[...] += jnp.dot(x_ref[...], w1_ref[...],
                             preferred_element_type=jnp.float32)


def _head_kernel(part_ref, hb_ref, w2_ref, b2_ref, w3_ref, b3_ref, o_ref):
    """Combine partial sums, add (action-row + b1), ReLU, then layers 2 and 3."""
    h1 = jnp.maximum(jnp.sum(part_ref[...], axis=0) + hb_ref[...], 0.0)
    h2 = jnp.dot(h1, w2_ref[...], preferred_element_type=jnp.float32)
    h2 = jnp.maximum(h2 + b2_ref[...], 0.0)
    o = jnp.dot(h2, w3_ref[...], preferred_element_type=jnp.float32)
    o_ref[...] = o + b3_ref[...]


def _full_spec(shape):
    nd = len(shape)
    return pl.BlockSpec(shape, lambda i: (0,) * nd)


@jax.jit
def mlp_forward(img, action, w1_img, w1_act, b1, w2, b2, w3_p, b3_p):
    b = img.shape[0]
    b_pad = max(8, -(-b // 8) * 8)                    # sublane-aligned batch

    # ---- cheap per-call glue (no large copies) ---------------------------
    x = img.reshape(b, IMG_FLAT).astype(jnp.float32)
    x_p = jnp.pad(x, ((0, b_pad - b), (0, 0)))        # ~1.5 MB, vs 50 MB before

    # one_hot(action) @ W1[IMG_FLAT:]  ==  gather of W1's action rows.
    act_rows = w1_act[action.astype(jnp.int32)]       # (b, H1)
    hb = jnp.pad(act_rows, ((0, b_pad - b), (0, 0))) + b1.reshape(1, H1)

    n_k_split = IMG_FLAT // TK // NUM_SPLITS          # 3 K tiles per split

    cost = pl.CostEstimate(
        flops=2 * b_pad * IMG_FLAT * H1,
        transcendentals=0,
        bytes_accessed=(IMG_FLAT * H1 + b_pad * IMG_FLAT
                        + NUM_SPLITS * b_pad * H1) * 4,
    )

    # ---- kernel 1: layer-1 matmul, K reduction split across NUM_SPLITS ----
    partials = pl.pallas_call(
        _layer1_kernel,
        out_shape=jax.ShapeDtypeStruct((NUM_SPLITS, b_pad, H1), jnp.float32),
        grid_spec=pltpu.PrefetchScalarGridSpec(
            num_scalar_prefetch=0,
            grid=(NUM_SPLITS, n_k_split),
            in_specs=[
                pl.BlockSpec((b_pad, TK),
                             lambda c, k: (0, c * n_k_split + k)),   # x tile
                pl.BlockSpec((TK, H1),
                             lambda c, k: (c * n_k_split + k, 0)),   # W1 tile
            ],
            out_specs=pl.BlockSpec((None, b_pad, H1),
                                   lambda c, k: (c, 0, 0)),          # partial[c]
        ),
        compiler_params=pltpu.CompilerParams(
            dimension_semantics=("parallel", "arbitrary"),
            vmem_limit_bytes=40 * 1024 * 1024),       # 8 MB W1 tiles, 2x buffered
        cost_estimate=cost,
    )(x_p, w1_img)

    # ---- kernel 2: tiny epilogue (combine, bias, ReLU, layers 2 & 3) ------
    out_padded = pl.pallas_call(
        _head_kernel,
        out_shape=jax.ShapeDtypeStruct((b_pad, OUT_PAD), jnp.float32),
        grid=(1,),
        in_specs=[
            _full_spec((NUM_SPLITS, b_pad, H1)),      # partial sums
            _full_spec((b_pad, H1)),                  # action rows + b1
            _full_spec((H1, H2)),                     # W2
            _full_spec((1, H2)),                      # b2
            _full_spec((H2, OUT_PAD)),                # W3 (lane-padded)
            _full_spec((1, OUT_PAD)),                 # b3 (lane-padded)
        ],
        out_specs=_full_spec((b_pad, OUT_PAD)),
    )(partials, hb, w2, b2.reshape(1, H2), w3_p, b3_p)

    return out_padded[:b, :OUT]


def prepare_params(w1, b1, w2, b2, w3, b3):
    """One-time (outside the per-call path) split / pad of the weights."""
    w1 = jnp.asarray(w1, jnp.float32)
    w1_img = w1[:IMG_FLAT]                                        # (49152, 256)
    w1_act = w1[IMG_FLAT:]                                        # (4, 256)
    w3_p = jnp.zeros((H2, OUT_PAD), jnp.float32).at[:, :OUT].set(w3)
    b3_p = jnp.zeros((1, OUT_PAD), jnp.float32).at[:, :OUT].set(b3.reshape(1, OUT))
    return (w1_img, w1_act, jnp.asarray(b1, jnp.float32),
            jnp.asarray(w2, jnp.float32), jnp.asarray(b2, jnp.float32),
            w3_p, b3_p)


def _init_params(key):
    """Deterministic params matching nn.Linear default init U(-1/sqrt(fan_in))."""
    ks = jax.random.split(key, 6)

    def lin(kw, kb, fan_in, fan_out):
        bound = 1.0 / jnp.sqrt(float(fan_in))
        w = jax.random.uniform(kw, (fan_in, fan_out), jnp.float32, -bound, bound)
        b = jax.random.uniform(kb, (fan_out,), jnp.float32, -bound, bound)
        return w, b

    w1, b1 = lin(ks[0], ks[1], IN_DIM, H1)
    w2, b2 = lin(ks[2], ks[3], H1, H2)
    w3, b3 = lin(ks[4], ks[5], H2, OUT)
    return w1, b1, w2, b2, w3, b3


if __name__ == "__main__":
    key = jax.random.PRNGKey(0)
    k_img, k_act, k_par = jax.random.split(key, 3)

    batch = 2
    img = jax.random.normal(k_img, (batch, 3, 128, 128), jnp.float32)  # NCHW
    action = jax.random.randint(k_act, (batch,), 0, N_ACTIONS, jnp.int32)

    params = _init_params(k_par)
    prepared = prepare_params(*params)          # one-time weight split / pad

    out = mlp_forward(img, action, *prepared)
    out = jax.block_until_ready(out)
    assert out.shape == (batch, 2), out.shape

    # Reference check in plain JAX (same math as the PyTorch module).
    w1, b1, w2, b2, w3, b3 = params
    x_ref = jnp.concatenate(
        [img.reshape(batch, -1),
         jax.nn.one_hot(action, N_ACTIONS, dtype=jnp.float32)], axis=1)
    h = jnp.maximum(x_ref @ w1 + b1, 0.0)
    h = jnp.maximum(h @ w2 + b2, 0.0)
    ref = h @ w3 + b3
    assert jnp.allclose(out, ref, atol=1e-2, rtol=1e-2), (out, ref)

    print("KERNEL_OK")
</pallas_src>

<mosaic_0001>
module attributes {stable_mosaic.version = 11 : i64} {
  func.func @_layer1_kernel(%arg0: i32, %arg1: i32, %arg2: memref<8x8192xf32, #tpu.memory_space<vmem>>, %arg3: memref<8192x256xf32, #tpu.memory_space<vmem>>, %arg4: memref<1x8x256xf32, #tpu.memory_space<vmem>>) attributes {dimension_semantics = [#tpu.dimension_semantics<parallel>, #tpu.dimension_semantics<arbitrary>], iteration_bounds = array<i64: 2, 3>, scalar_prefetch = 0 : i64, scratch_operands = 0 : i64, tpu.core_type = #tpu.core_type<tc>, window_params = [{transform_indices = @transform_0, window_bounds = array<i64: 8, 8192>}, {transform_indices = @transform_1, window_bounds = array<i64: 8192, 256>}, {transform_indices = @transform_2, window_bounds = array<i64: 1, 8, 256>}]} {
    %c0_i32 = arith.constant 0 : i32
    %0 = arith.cmpi eq, %arg1, %c0_i32 : i32
    %1 = arith.extui %0 : i1 to i32
    %c0_i32_0 = arith.constant 0 : i32
    %2 = arith.cmpi ne, %1, %c0_i32_0 : i32
    scf.if %2 {
      %cst_10 = arith.constant 0.000000e+00 : f32
      %12 = vector.broadcast %cst_10 : f32 to vector<8x256xf32>
      %c0_11 = arith.constant 0 : index
      %c0_12 = arith.constant 0 : index
      %c0_13 = arith.constant 0 : index
      %13 = vector.load %arg4[%c0_11, %c0_12, %c0_13] : memref<1x8x256xf32, #tpu.memory_space<vmem>>, vector<1x8x256xf32>
      %14 = vector.shape_cast %13 : vector<1x8x256xf32> to vector<8x256xf32>
      %15 = vector.shape_cast %12 : vector<8x256xf32> to vector<1x8x256xf32>
      tpu.vector_store %arg4[%c0_11, %c0_12, %c0_13], %15 {strides = array<i32>} : memref<1x8x256xf32, #tpu.memory_space<vmem>>, vector<1x8x256xf32>,
    } else {
    }
    %c0 = arith.constant 0 : index
    %c0_1 = arith.constant 0 : index
    %c0_2 = arith.constant 0 : index
    %3 = vector.load %arg4[%c0, %c0_1, %c0_2] : memref<1x8x256xf32, #tpu.memory_space<vmem>>, vector<1x8x256xf32>
    %4 = vector.shape_cast %3 : vector<1x8x256xf32> to vector<8x256xf32>
    %c0_3 = arith.constant 0 : index
    %c0_4 = arith.constant 0 : index
    %5 = vector.load %arg2[%c0_3, %c0_4] : memref<8x8192xf32, #tpu.memory_space<vmem>>, vector<8x8192xf32>
    %c0_5 = arith.constant 0 : index
    %c0_6 = arith.constant 0 : index
    %6 = vector.load %arg3[%c0_5, %c0_6] : memref<8192x256xf32, #tpu.memory_space<vmem>>, vector<8192x256xf32>
    %cst = arith.constant dense<0.000000e+00> : vector<8x256xf32>
    %7 = tpu.matmul %5, %6, %cst {dimension_numbers = #tpu.dot_dimension_numbers<[1], [0], [0], [1], [0, 0, 1, 1], [], []>} : vector<8x8192xf32>, vector<8192x256xf32>, vector<8x256xf32> -> vector<8x256xf32>
    %8 = arith.addf %4, %7 : vector<8x256xf32>
    %c0_7 = arith.constant 0 : index
    %c0_8 = arith.constant 0 : index
    %c0_9 = arith.constant 0 : index
    %9 = vector.load %arg4[%c0_7, %c0_8, %c0_9] : memref<1x8x256xf32, #tpu.memory_space<vmem>>, vector<1x8x256xf32>
    %10 = vector.shape_cast %9 : vector<1x8x256xf32> to vector<8x256xf32>
    %11 = vector.shape_cast %8 : vector<8x256xf32> to vector<1x8x256xf32>
    tpu.vector_store %arg4[%c0_7, %c0_8, %c0_9], %11 {strides = array<i32>} : memref<1x8x256xf32, #tpu.memory_space<vmem>>, vector<1x8x256xf32>,
    return
  }
  func.func @transform_0(%arg0: i32, %arg1: i32) -> (i32, i32) {
    %c3_i32 = arith.constant 3 : i32
    %0 = arith.muli %arg0, %c3_i32 : i32
    %1 = arith.addi %0, %arg1 : i32
    %c0_i32 = arith.constant 0 : i32
    %c0_i32_0 = arith.constant 0 : i32
    return %c0_i32, %1 : i32, i32
  }
  func.func @transform_1(%arg0: i32, %arg1: i32) -> (i32, i32) {
    %c3_i32 = arith.constant 3 : i32
    %0 = arith.muli %arg0, %c3_i32 : i32
    %1 = arith.addi %0, %arg1 : i32
    %c0_i32 = arith.constant 0 : i32
    %c0_i32_0 = arith.constant 0 : i32
    return %1, %c0_i32 : i32, i32
  }
  func.func @transform_2(%arg0: i32, %arg1: i32) -> (i32, i32, i32) {
    %c0_i32 = arith.constant 0 : i32
    %c0_i32_0 = arith.constant 0 : i32
    %c0_i32_1 = arith.constant 0 : i32
    return %arg0, %c0_i32, %c0_i32_0 : i32, i32, i32
  }
}

module attributes {stable_mosaic.version = 11 : i64} {
  func.func @_head_kernel(%arg0: i32, %arg1: memref<2x8x256xf32, #tpu.memory_space<vmem>>, %arg2: memref<8x256xf32, #tpu.memory_space<vmem>>, %arg3: memref<256x128xf32, #tpu.memory_space<vmem>>, %arg4: memref<1x128xf32, #tpu.memory_space<vmem>>, %arg5: memref<128x128xf32, #tpu.memory_space<vmem>>, %arg6: memref<1x128xf32, #tpu.memory_space<vmem>>, %arg7: memref<8x128xf32, #tpu.memory_space<vmem>>) attributes {dimension_semantics = [#tpu.dimension_semantics<arbitrary>], iteration_bounds = array<i64: 1>, scalar_prefetch = 0 : i64, scratch_operands = 0 : i64, tpu.core_type = #tpu.core_type<tc>, window_params = [{pipeline_mode = #tpu.pipeline_mode<synchronous>, transform_indices = @transform_0, window_bounds = array<i64: 2, 8, 256>}, {pipeline_mode = #tpu.pipeline_mode<synchronous>, transform_indices = @transform_1, window_bounds = array<i64: 8, 256>}, {pipeline_mode = #tpu.pipeline_mode<synchronous>, transform_indices = @transform_2, window_bounds = array<i64: 256, 128>}, {pipeline_mode = #tpu.pipeline_mode<synchronous>, transform_indices = @transform_3, window_bounds = array<i64: 1, 128>}, {pipeline_mode = #tpu.pipeline_mode<synchronous>, transform_indices = @transform_4, window_bounds = array<i64: 128, 128>}, {pipeline_mode = #tpu.pipeline_mode<synchronous>, transform_indices = @transform_5, window_bounds = array<i64: 1, 128>}, {pipeline_mode = #tpu.pipeline_mode<synchronous>, transform_indices = @transform_6, window_bounds = array<i64: 8, 128>}]} {
    %c0 = arith.constant 0 : index
    %c0_0 = arith.constant 0 : index
    %c0_1 = arith.constant 0 : index
    %0 = vector.load %arg1[%c0, %c0_0, %c0_1] : memref<2x8x256xf32, #tpu.memory_space<vmem>>, vector<2x8x256xf32>
    %cst = arith.constant dense<0.000000e+00> : vector<8x256xf32>
    %1 = vector.multi_reduction <add>, %0, %cst [0] : vector<2x8x256xf32> to vector<8x256xf32>
    %c0_2 = arith.constant 0 : index
    %c0_3 = arith.constant 0 : index
    %2 = vector.load %arg2[%c0_2, %c0_3] : memref<8x256xf32, #tpu.memory_space<vmem>>, vector<8x256xf32>
    %3 = arith.addf %1, %2 : vector<8x256xf32>
    %cst_4 = arith.constant 0.000000e+00 : f32
    %4 = vector.broadcast %cst_4 : f32 to vector<8x256xf32>
    %5 = arith.maximumf %3, %4 : vector<8x256xf32>
    %c0_5 = arith.constant 0 : index
    %c0_6 = arith.constant 0 : index
    %6 = vector.load %arg3[%c0_5, %c0_6] : memref<256x128xf32, #tpu.memory_space<vmem>>, vector<256x128xf32>
    %cst_7 = arith.constant dense<0.000000e+00> : vector<8x128xf32>
    %7 = tpu.matmul %5, %6, %cst_7 {dimension_numbers = #tpu.dot_dimension_numbers<[1], [0], [0], [1], [0, 0, 1, 1], [], []>} : vector<8x256xf32>, vector<256x128xf32>, vector<8x128xf32> -> vector<8x128xf32>
    %c0_8 = arith.constant 0 : index
    %c0_9 = arith.constant 0 : index
    %8 = vector.load %arg4[%c0_8, %c0_9] : memref<1x128xf32, #tpu.memory_space<vmem>>, vector<1x128xf32>
    %9 = vector.broadcast %8 : vector<1x128xf32> to vector<8x128xf32>
    %10 = arith.addf %7, %9 : vector<8x128xf32>
    %cst_10 = arith.constant 0.000000e+00 : f32
    %11 = vector.broadcast %cst_10 : f32 to vector<8x128xf32>
    %12 = arith.maximumf %10, %11 : vector<8x128xf32>
    %c0_11 = arith.constant 0 : index
    %c0_12 = arith.constant 0 : index
    %13 = vector.load %arg5[%c0_11, %c0_12] : memref<128x128xf32, #tpu.memory_space<vmem>>, vector<128x128xf32>
    %cst_13 = arith.constant dense<0.000000e+00> : vector<8x128xf32>
    %14 = tpu.matmul %12, %13, %cst_13 {dimension_numbers = #tpu.dot_dimension_numbers<[1], [0], [0], [1], [0, 0, 1, 1], [], []>} : vector<8x128xf32>, vector<128x128xf32>, vector<8x128xf32> -> vector<8x128xf32>
    %c0_14 = arith.constant 0 : index
    %c0_15 = arith.constant 0 : index
    %15 = vector.load %arg6[%c0_14, %c0_15] : memref<1x128xf32, #tpu.memory_space<vmem>>, vector<1x128xf32>
    %16 = vector.broadcast %15 : vector<1x128xf32> to vector<8x128xf32>
    %17 = arith.addf %14, %16 : vector<8x128xf32>
    %c0_16 = arith.constant 0 : index
    %c0_17 = arith.constant 0 : index
    %18 = vector.load %arg7[%c0_16, %c0_17] : memref<8x128xf32, #tpu.memory_space<vmem>>, vector<8x128xf32>
    tpu.vector_store %arg7[%c0_16, %c0_17], %17 {strides = array<i32>} : memref<8x128xf32, #tpu.memory_space<vmem>>, vector<8x128xf32>,
    return
  }
  func.func @transform_0(%arg0: i32) -> (i32, i32, i32) {
    %c0_i32 = arith.constant 0 : i32
    %c0_i32_0 = arith.constant 0 : i32
    %c0_i32_1 = arith.constant 0 : i32
    %c0_i32_2 = arith.constant 0 : i32
    return %c0_i32, %c0_i32_0, %c0_i32_1 : i32, i32, i32
  }
  func.func @transform_1(%arg0: i32) -> (i32, i32) {
    %c0_i32 = arith.constant 0 : i32
    %c0_i32_0 = arith.constant 0 : i32
    %c0_i32_1 = arith.constant 0 : i32
    return %c0_i32, %c0_i32_0 : i32, i32
  }
  func.func @transform_2(%arg0: i32) -> (i32, i32) {
    %c0_i32 = arith.constant 0 : i32
    %c0_i32_0 = arith.constant 0 : i32
    %c0_i32_1 = arith.constant 0 : i32
    return %c0_i32, %c0_i32_0 : i32, i32
  }
  func.func @transform_3(%arg0: i32) -> (i32, i32) {
    %c0_i32 = arith.constant 0 : i32
    %c0_i32_0 = arith.constant 0 : i32
    %c0_i32_1 = arith.constant 0 : i32
    return %c0_i32, %c0_i32_0 : i32, i32
  }
  func.func @transform_4(%arg0: i32) -> (i32, i32) {
    %c0_i32 = arith.constant 0 : i32
    %c0_i32_0 = arith.constant 0 : i32
    %c0_i32_1 = arith.constant 0 : i32
    return %c0_i32, %c0_i32_0 : i32, i32
  }
  func.func @transform_5(%arg0: i32) -> (i32, i32) {
    %c0_i32 = arith.constant 0 : i32
    %c0_i32_0 = arith.constant 0 : i32
    %c0_i32_1 = arith.constant 0 : i32
    return %c0_i32, %c0_i32_0 : i32, i32
  }
  func.func @transform_6(%arg0: i32) -> (i32, i32) {
    %c0_i32 = arith.constant 0 : i32
    %c0_i32_0 = arith.constant 0 : i32
    %c0_i32_1 = arith.constant 0 : i32
    return %c0_i32, %c0_i32_0 : i32, i32
  }
}

</mosaic_0001>

<bundles_post_ra>
// kernel: mlp_forward.3
= control target key start
LH: loop header
LB: loop body
LE: loop exit
PB: predicated region body
PF: predicated region fallthrough
CT: control target
= control target key end

     0   :  { %v391_v3 = vmov 0.0|0.0   ;;  %vm392_vm0 = vmmov 0   ;;  %s608_s2 = inlined_call_operand.vmem [shape: f32[256,128], index: 2, kind: input, shape index: {}]   ;;  %s609_s0 = inlined_call_operand.vmem [shape: f32[2,8,256], index: 0, kind: input, shape index: {}]   ;;  %s610_s1 = inlined_call_operand.vmem [shape: f32[8,256], index: 1, kind: input, shape index: {}]   ;;  %s611_s4 = inlined_call_operand.vmem [shape: f32[128,128], index: 4, kind: input, shape index: {}]   ;;  %s612_s3 = inlined_call_operand.vmem [shape: f32[1,128], index: 3, kind: input, shape index: {}]   ;;  %s613_s5 = inlined_call_operand.vmem [shape: f32[1,128], index: 5, kind: input, shape index: {}]   ;;  %s614_s6 = inlined_call_operand.vmem [shape: f32[8,128], index: 6, kind: output, shape index: {}]  }
   0x1   :  { %v51_v0 = vld [vmem:[%s608_s2 + $0x80] sm:$0xff]  ;;  %v52_v1 = vld [vmem:[%s608_s2 + $0x88] sm:$0xff]  ;;  %364 = vmatprep.subr.bf16.mxu1 %v391_v3  ;;  %v53_v6 = vld [vmem:[%s608_s2 + $0x90] sm:$0xff] }
   0x2   :  { %v35_v2 = vld [vmem:[%s608_s2] sm:$0xff]  ;;  %v332_v4 = vpack.c.bf16 %v52_v1, %v51_v0  ;;  %v36_v5 = vld [vmem:[%s608_s2 + $0x8] sm:$0xff]  ;;  %v54_v7 = vld [vmem:[%s608_s2 + $0x98] sm:$0xff] }
   0x3   :  { %v334_v8 = vpack.c.bf16 %v36_v5, %v35_v2  ;;  %v336_v9 = vpack.c.bf16 %v54_v7, %v53_v6  ;;  %v37_v10 = vld [vmem:[%s608_s2 + $0x10] sm:$0xff]  ;;  %v38_v11 = vld [vmem:[%s608_s2 + $0x18] sm:$0xff]  ;;  %v55_v12 = vld [vmem:[%s608_s2 + $0xa0] sm:$0xff] }
   0x4   :  { %333 = vmatprep.subr.bf16.mxu0 %v332_v4  ;;  %v56_v13 = vld [vmem:[%s608_s2 + $0xa8] sm:$0xff]  ;;  %v338_v14 = vpack.c.bf16 %v38_v11, %v37_v10  ;;  %v39_v16 = vld [vmem:[%s608_s2 + $0x20] sm:$0xff]  ;;  %v57_v18 = vld [vmem:[%s608_s2 + $0xb0] sm:$0xff] }
   0x5   :  { %335 = vmatpush3.bf16.msra.mxu0 %v334_v8  ;;  %v340_v15 = vpack.c.bf16 %v56_v13, %v55_v12  ;;  %v40_v17 = vld [vmem:[%s608_s2 + $0x28] sm:$0xff]  ;;  %v58_v19 = vld [vmem:[%s608_s2 + $0xb8] sm:$0xff]  ;;  %v41_v22 = vld [vmem:[%s608_s2 + $0x30] sm:$0xff] }
   0x6   :  { %337 = vmatprep.subr.bf16.mxu0 %v336_v9  ;;  %v342_v20 = vpack.c.bf16 %v40_v17, %v39_v16  ;;  %v344_v21 = vpack.c.bf16 %v58_v19, %v57_v18  ;;  %v42_v23 = vld [vmem:[%s608_s2 + $0x38] sm:$0xff]  ;;  %v59_v24 = vld [vmem:[%s608_s2 + $0xc0] sm:$0xff]  ;;  %v60_v25 = vld [vmem:[%s608_s2 + $0xc8] sm:$0xff] }
   0x7   :  { %v24_v26 = vld [vmem:[%s609_s0 + $0x8] sm:$0xff]  ;;  %v26_v27 = vld [vmem:[%s609_s0 + $0x18] sm:$0xff]  ;;  %v346_v29 = vpack.c.bf16 %v42_v23, %v41_v22  ;;  %v43_v30 = vld [vmem:[%s608_s2 + $0x40] sm:$0xff]  ;;  %v348_v34 = vpack.c.bf16 %v60_v25, %v59_v24  ;;  %v393_v22 = vmov 0.0  }
   0x8   :  { %v30_v28 = vld [vmem:[%s610_s1 + $0x8] sm:$0xff]  ;;  %v28_v32 = vadd.f32 %v26_v27, %v24_v26  ;;  %v145_v33 = vld [vmem:[%s611_s4] sm:$0xff]  ;;  %v147_v36 = vld [vmem:[%s611_s4 + $0x10] sm:$0xff]  ;;  %329 = vmatprep.mubr.msk.f32.mxu1 %vm392_vm0, %v393_v22 }
   0x9   :  { %339 = vmatpush3.bf16.msra.mxu0 %v338_v14  ;;  %v44_v31 = vld [vmem:[%s608_s2 + $0x48] sm:$0xff]  ;;  %v148_v37 = vld [vmem:[%s611_s4 + $0x18] sm:$0xff]  ;;  %v61_v38 = vld [vmem:[%s608_s2 + $0xd0] sm:$0xff] }
   0xa   :  { %341 = vmatprep.subr.bf16.mxu0 %v340_v15  ;;  %v146_v35 = vld [vmem:[%s611_s4 + $0x8] sm:$0xff]  ;;  %v62_v39 = vld [vmem:[%s608_s2 + $0xd8] sm:$0xff]  ;;  %v32_v40 = vadd.f32 %v30_v28, %v28_v32  ;;  %v350_v42 = vpack.c.bf16 %v44_v31, %v43_v30  ;;  %v45_v43 = vld [vmem:[%s608_s2 + $0x50] sm:$0xff]  ;;  %v368_v45 = vpack.c.bf16 %v148_v37, %v147_v36 }
   0xb   :  { %v365_v41 = vpack.c.bf16 %v146_v35, %v145_v33  ;;  %v352_v46 = vpack.c.bf16 %v62_v39, %v61_v38  ;;  %v46_v47 = vld [vmem:[%s608_s2 + $0x58] sm:$0xff]  ;;  %v149_v48 = vld [vmem:[%s611_s4 + $0x20] sm:$0xff]  ;;  %v150_v49 = vld [vmem:[%s611_s4 + $0x28] sm:$0xff] }
   0xc   :  { %v34_v44 = vmax.f32 %v32_v40, 0.0  ;;  %v63_v50 = vld [vmem:[%s608_s2 + $0xe0] sm:$0xff]  ;;  %v64_v51 = vld [vmem:[%s608_s2 + $0xe8] sm:$0xff]  ;;  %v354_v52 = vpack.c.bf16 %v46_v47, %v45_v43  ;;  %v25_v55 = vld [vmem:[%s609_s0 + $0x10] sm:$0xff]  ;;  %v371_v56 = vpack.c.bf16 %v150_v49, %v149_v48 }
   0xd   :  { %343 = vmatpush3.bf16.msra.mxu0 %v342_v20  ;;  %366 = vmatpush3.bf16.msra.mxu1 %v365_v41  ;;  %v47_v53 = vld [vmem:[%s608_s2 + $0x60] sm:$0xff]  ;;  %v356_v57 = vpack.c.bf16 %v64_v51, %v63_v50  ;;  %v48_v58 = vld [vmem:[%s608_s2 + $0x68] sm:$0xff]  ;;  %v151_v59 = vld [vmem:[%s611_s4 + $0x30] sm:$0xff] }
   0xe   :  { %345 = vmatprep.subr.bf16.mxu0 %v344_v21  ;;  %367 = vmatprep.subr.bf16.mxu1 %v391_v3  ;;  %v23_v54 = vld [vmem:[%s609_s0] sm:$0xff]  ;;  %v152_v60 = vld [vmem:[%s611_s4 + $0x38] sm:$0xff]  ;;  %v65_v61 = vld [vmem:[%s608_s2 + $0xf0] sm:$0xff]  ;;  %v358_v0 = vpack.c.bf16 %v48_v58, %v47_v53 }
   0xf   :  { %138 = vmatprep.mubr.f32.mxu0 %v34_v44  ;;  %v66_v62 = vld [vmem:[%s608_s2 + $0xf8] sm:$0xff]  ;;  %v27_v63 = vadd.f32 %v25_v55, %v23_v54  ;;  %v49_v1 = vld [vmem:[%s608_s2 + $0x70] sm:$0xff]  ;;  %v29_v2 = vld [vmem:[%s610_s1] sm:$0xff]  ;;  %v374_v4 = vpack.c.bf16 %v152_v60, %v151_v59 }
  0x10   :  { %v360_v5 = vpack.c.bf16 %v66_v62, %v65_v61  ;;  %v50_v6 = vld [vmem:[%s608_s2 + $0x78] sm:$0xff]  ;;  %v153_v7 = vld [vmem:[%s611_s4 + $0x40] sm:$0xff]  ;;  %v154_v8 = vld [vmem:[%s611_s4 + $0x48] sm:$0xff] }
  0x11   :  { %347 = vmatpush3.bf16.msra.mxu0 %v346_v29  ;;  %369 = vmatpush3.bf16.msra.mxu1 %v368_v45  ;;  %v31_v9 = vadd.f32 %v29_v2, %v27_v63  ;;  %v362_v10 = vpack.c.bf16 %v50_v6, %v49_v1  ;;  %v377_v11 = vpack.c.bf16 %v154_v8, %v153_v7  ;;  %v155_v12 = vld [vmem:[%s611_s4 + $0x50] sm:$0xff]  ;;  %v156_v13 = vld [vmem:[%s611_s4 + $0x58] sm:$0xff]  ;;  %v157_v16 = vld [vmem:[%s611_s4 + $0x60] sm:$0xff] }
  0x12   :  { %349 = vmatprep.subr.bf16.mxu0 %v348_v34  ;;  %370 = vmatprep.subr.bf16.mxu1 %v391_v3  ;;  %v380_v15 = vpack.c.bf16 %v156_v13, %v155_v12  ;;  %v158_v17 = vld [vmem:[%s611_s4 + $0x68] sm:$0xff]  ;;  %v159_v19 = vld [vmem:[%s611_s4 + $0x70] sm:$0xff]  ;;  %v160_v20 = vld [vmem:[%s611_s4 + $0x78] sm:$0xff] }
  0x13   :  { %v33_v14 = vmax.f32 %v31_v9, 0.0  ;;  %v383_v18 = vpack.c.bf16 %v158_v17, %v157_v16  ;;  %v386_v21 = vpack.c.bf16 %v160_v20, %v159_v19  ;;  %v243_v24 = vld [vmem:[%s612_s3] ss:$0 sm:$0xff] }
  0x14   :  { %v244_v28 = vld [vmem:[%s613_s5] ss:$0 sm:$0xff] }
  0x15   :  { %351 = vmatpush3.bf16.msra.mxu0 %v350_v42  ;;  %372 = vmatpush3.bf16.msra.mxu1 %v371_v56 }
  0x16   :  { %353 = vmatprep.subr.bf16.mxu0 %v352_v46  ;;  %373 = vmatprep.subr.bf16.mxu1 %v391_v3 }
  0x19   :  { %355 = vmatpush3.bf16.msra.mxu0 %v354_v52  ;;  %375 = vmatpush3.bf16.msra.mxu1 %v374_v4 }
  0x1a   :  { %357 = vmatprep.subr.bf16.mxu0 %v356_v57  ;;  %376 = vmatprep.subr.bf16.mxu1 %v391_v3 }
  0x1d   :  { %359 = vmatpush3.bf16.msra.mxu0 %v358_v0  ;;  %378 = vmatpush3.bf16.msra.mxu1 %v377_v11 }
  0x1e   :  { %361 = vmatprep.subr.bf16.mxu0 %v360_v5  ;;  %379 = vmatprep.subr.bf16.mxu1 %v391_v3 }
  0x21   :  { %363 = vmatpush3.bf16.msra.mxu0 %v362_v10  ;;  %381 = vmatpush3.bf16.msra.mxu1 %v380_v15 }
  0x22   :  { %382 = vmatprep.subr.bf16.mxu1 %v391_v3 }
  0x24   :  { %139 = vmatmul.mubr.f32.vlgmr.msra.gmra.mrb[0].mxu0 %v33_v14 }
  0x25   :  { %384 = vmatpush3.bf16.msra.mxu1 %v383_v18 }
  0x26   :  { %385 = vmatprep.subr.bf16.mxu1 %v391_v3 }
  0x29   :  { %387 = vmatpush3.bf16.msra.mxu1 %v386_v21 }
  0xf7   :  { %v277_v23 = vpop.f32.mrb[0].mxu0 }
  0xf8   :  { %v278_v25 = vpop.f32.mrb[1].mxu0 }
  0xf9   :  { %v279_v3 = vadd.f32 %v278_v25, %v277_v23 }
  0xfb   :  { %v141_v26 = vadd.f32 %v279_v3, %v243_v24 }
  0xfd   :  { %v144_v27 = vmax.f32 %v141_v26, 0.0 }
  0xff   :  { %330 = vmatmul.mubr.f32.vlgmr.msra.gmra.mrb[0].mxu1 %v144_v27 }
 0x1d2   :  { %v234_v29 = vpop.f32.mrb[0].mxu1 }
 0x1d3   :  { %v235_v30 = vadd.f32 %v244_v28, %v234_v29  ;;  %v331_v31 = vpop.f32.mrb[1].mxu1 }
 0x1d5   :  { %238 = vst [vmem:[%s614_s6] sm:$0xff] %v235_v30 }

// kernel: mlp_forward.2
= control target key start
LH: loop header
LB: loop body
LE: loop exit
PB: predicated region body
PF: predicated region fallthrough
CT: control target
= control target key end

     0   :  { %7 = vsyncpa [#allocation3], 0  ;;  %s9310_s0 = inlined_call_operand.vmem [shape: f32[8,49152], index: 0, kind: input, shape index: {}]   ;;  %s9311_s1 = inlined_call_operand.hbm [shape: f32[49152,256], index: 1, kind: input, shape index: {}]   ;;  %s9312_s2 = inlined_call_operand.vmem [shape: f32[2,8,256], index: 2, kind: output, shape index: {}]  }
   0x1   :  { %9 = vsyncpa [#allocation3 + $0x1], 0  ;;  %s7031_s9 = smov 0   ;;  %s7033_s10 = smov 0  }
   0x2   :  { %s7035_s11 = smov 0   ;;  %s7037_s12 = smov 0  }
   0x3   :  { %s7039_s13 = smov 0   ;;  %s7041_s14 = smov 0  }
   0x4   :  { %s7043_s15 = smov 0   ;;  %s7045_s16 = smov 0  }
   0x5 LB: > { %s4710_s17 = sadd.s32 4294967295, %s7010_s16   ;;  %s24_s18 = sadd.s32 1, %s7002_s14  ;;  %s7010_s16 = sphi %s7045_s16, %s15_s16   ;;  %s7006_s15 = sphi %s7043_s15, %s9324_s15   ;;  %s7002_s14 = sphi %s7041_s14, %s9323_s14   ;;  %s6998_s13 = sphi %s7039_s13, %s9322_s13   ;;  %s6994_s12 = sphi %s7037_s12, %s9321_s12   ;;  %s6990_s11 = sphi %s7035_s11, %s9320_s11   ;;  %s6986_s10 = sphi %s7033_s10, %s9319_s10   ;;  %s6982_s9 = sphi %s7031_s9, %s9318_s9  }
   0x6   : > { %p25_p0 = scmp.ge.s32.totalorder %s24_s18, 3  ;;  %s27_s19 = sadd.s32 1, %s7006_s15 }
   0x7   : > { %s61_s20 = smul.u32 3, %s7006_s15  ;;  %s68_s21 = sadd.s32 1, %s6990_s11 }
   0x8   : > { %s9326_s18 = smov (%p25_p0, %s24_s18), 0  ;;  %s9328_s19 = smov (!%p25_p0, %s27_s19), %s7006_s15 }
   0x9   : > { %s62_s22 = sadd.s32 %s7002_s14, %s61_s20  ;;  %p75_p1 = scmp.ne.s32.totalorder %s6990_s11, %s6986_s10 }
   0xa   : > { %p29_p2 = scmp.ge.s32.totalorder %s9328_s19, 2  ;;  %p76_p3 = scmp.eq.s32.totalorder %s7010_s16, 0 }
   0xb   : > { %p81_p4 = scmp.ne.s32.totalorder %s6986_s10, %s6982_s9  ;;  %p82_p5 = scmp.eq.s32.totalorder %s4710_s17, 0 }
   0xc   : > { %s9330_s19 = smov (%p29_p2, %s9328_s19), 0  ;;  %p7084_p6 = por %p76_p3, %p75_p1 }
   0xd   : > { %p7088_p7 = por %p82_p5, %p81_p4  ;;  %s63_s25 = smul.u32 3, %s9330_s19 }
   0xe   : > { %p6846_p8 = scmp.lt.s32.totalorder %s7010_s16, 6  ;;  %s144_s26 = sand.u32 1, %s6990_s11  }
   0xf   : > { %s64_s27 = sadd.s32 %s63_s25, %s9326_s18  ;;  %s4714_s29 = sshll.u32 %s144_s26, 14 }
  0x10   : > { %s65_s28 = ssub.s32 %s62_s22, %s64_s27  ;;  %s4728_s30 = sshll.u32 %s62_s22, 18 }
  0x11   : > { %p66_p9 = scmp.eq.s32.totalorder %s65_s28, 0  ;;  %s148_s3 = scalar_lea.vmem [#allocation2], %s4714_s29 }
  0x12   : > { %s158_s4 = sshll.u32 %s148_s3, 4  ;;  %s7102_s8 = scalar_lea.hbm %s9311_s1, %s4728_s30  ;;  %s7104_s4 = int_to_ptr.vmem [resolvable:$true] %s158_s4 }
  0x13   : > { %s7097_s5 = scalar_select %p66_p9, %s6990_s11, %s68_s21  }
  0x14   : > { %p7108_p10 = pnand %p6846_p8, %p7084_p6  ;;  %s7114_s17 = scalar_lea.sflag [#allocation3], %s144_s26 }
  0x15   : > { %s6914_s20 = scalar_lea.hbm %s7102_s8, 262144  ;;  %s6919_s23 = scalar_lea.hbm %s9311_s1, 1572864 }
  0x16   : > { %p6915_p13 = scmp.ne.s32.totalorder %s7102_s8, %s6914_s20  ;;  %p6916_p0 = pneg %p7108_p10 }
  0x17   : > { %p6920_p3 = scmp.lt.u32.totalorder %s7102_s8, %s9311_s1  ;;  %p6921_p4 = scmp.lt.u32.totalorder %s6919_s23, %s6914_s20 }
  0x18   : > { %p6917_p1 = pnand %p6916_p0, %p6915_p13  ;;  %p6923_p6 = scmp.lt.u32.totalorder %s6914_s20, %s7102_s8 }
  0x19   : > { %p6922_p5 = por %p6921_p4, %p6920_p3 }
  0x1a   : > { %p6918_p2 = pneg %p6917_p1 }
  0x1b   : > { %p6924_p8 = por %p6923_p6, %p6922_p5 }
  0x1d   : > { %p6925_p9 = pnand %p6924_p8, %p6918_p2 }
  0x1f   : > { %6928 = shalt.err (!%p6925_p9)
}
  0x20   : > { %s6929_s26 = scalar_lea.vmem %s7104_s4, 262144  ;;  %s7012_s28 = smov [#allocation2]  }
  0x21   : > { %p6930_p13 = scmp.ne.s32.totalorder %s7104_s4, %s6929_s26  ;;  %s6934_s29 = sshll.u32 %s7012_s28, 4  ;;  %s6935_s29 = int_to_ptr.vmem [resolvable:$false] %s6934_s29 }
  0x22   : > { %s6936_s30 = scalar_lea.vmem %s6935_s29, 524288  ;;  %p6937_p12 = scmp.lt.s32.totalorder %s7104_s4, %s6935_s29 }
  0x23   : > { %p6932_p1 = pnand %p6930_p13, %p6916_p0  ;;  %p6938_p3 = scmp.lt.s32.totalorder %s6936_s30, %s6929_s26 }
  0x25   : > { %p6933_p11 = pneg %p6932_p1  ;;  %p6939_p4 = por %p6938_p3, %p6937_p12 }
  0x27   : > { %p6940_p5 = pnand %p6939_p4, %p6933_p11 }
  0x29   : > { %6943 = shalt.err (!%p6940_p5)
}
  0x2a   : > { %s7013_s3 = smov 256   ;;  %s7014_s6 = smov 16  }
  0x2b   : > { %6845 = dma.hbm_to_vmem [thread:$0]  (!%p7108_p10), %s7102_s8, 262144, %s7104_s4, %s7114_s17, %s7013_s3, %s7013_s3, %s7014_s6  }
  0x2c   : > { %p9316_p0 = scmp.lt.s32.totalorder %s7010_s16, 7  ;;  %p9317_p2 = scmp.ge.s32.totalorder %s7010_s16, 1 }
  0x2e   : > { %p167_p6 = pnand %p9317_p2, %p9316_p0 }
  0x2f   : > { %s172_s7 = sand.u32 (!%p167_p6), 1, %s6986_s10  }
  0x30   : > { %170 = sbr.rel (%p167_p6) target bundleno = 1314 (0x522), region = 28  ;;  %s4719_s20 = sshll.u32 (!%p167_p6), %s172_s7, 14 }
  0x31   : > { %s173_s21 = scalar_lea.sflag (!%p167_p6), [#allocation3], %s172_s7  ;;  %s7147_s22 = scalar_lea.vmem (!%p167_p6), [#allocation2], %s4719_s20 }
  0x37   : > { %6977 = dma.done.wait (%p7088_p7), %s173_s21, 262144  }
  0x38   : > { %6979 = vsyncadd (%p7088_p7), %s173_s21, 4294705152  ;;  %s204_s4 = smul.u32 3, %s6998_s13  ;;  %p217_p10 = scmp.lt.s32.totalorder %s6998_s13, 1 }
  0x39   : > { %p4724_p7 = scmp.ne.s32.totalorder %s6994_s12, 0 }
  0x3a   : > { %s205_s8 = sadd.s32 %s6994_s12, %s204_s4  ;;  %s9332_s13 = smov (!%p217_p10, %s6998_s13), 1  ;;  %v7015_v0 = vmov (!%p4724_p7), 0.0  }
  0x3b   : > { %s4720_s9 = sshll.u32 %s205_s8, 6  ;;  %s4729_s17 = sshll.u32 %s9332_s13, 4 }
  0x3c   : > { %p207_p11 = scmp.lt.s32.totalorder %s4720_s9, 383  ;;  %s7160_s26 = scalar_lea.vmem %s9312_s2, %s4729_s17 }
  0x3d   : > { %225 = sbr.rel (%p4724_p7) target bundleno = 68 (0x44), region = 36  ;;  %226 = vst [vmem:[%s7160_s26] sm:$0xff] (!%p4724_p7), %v7015_v0  ;;  %227 = vst [vmem:[%s7160_s26 + $0x8] sm:$0xff] (!%p4724_p7), %v7015_v0 }
  0x3e   : > { %s9334_s9 = smov (!%p207_p11, %s4720_s9), 383 }
  0x3f   : > { %s4721_s23 = sshll.u32 %s9334_s9, 3 }
  0x40   : > { %s7165_s29 = scalar_lea.vmem %s9310_s0, %s4721_s23 }
  0x44 PF: > { %v295_v1 = vld [vmem:[%s7147_s22 + $0x8] sm:$0xff]  ;;  %v297_v2 = vld [vmem:[%s7147_s22 + $0x18] sm:$0xff]  ;;  %v294_v6 = vld [vmem:[%s7147_s22] sm:$0xff] }
  0x45   : > { %v1319_v3 = vld [vmem:[%s7147_s22 + $0x2008] sm:$0xff]  ;;  %v4730_v4 = vpack.c.bf16 %v297_v2, %v295_v1  ;;  %v1321_v5 = vld [vmem:[%s7147_s22 + $0x2018] sm:$0xff]  ;;  %v296_v7 = vld [vmem:[%s7147_s22 + $0x10] sm:$0xff] }
  0x46   : > { %v5754_v8 = vpack.c.bf16 %v1321_v5, %v1319_v3  ;;  %v4732_v9 = vpack.c.bf16 %v296_v7, %v294_v6  ;;  %v1318_v10 = vld [vmem:[%s7147_s22 + $0x2000] sm:$0xff]  ;;  %v1320_v11 = vld [vmem:[%s7147_s22 + $0x2010] sm:$0xff]  ;;  %v299_v12 = vld [vmem:[%s7147_s22 + $0x28] sm:$0xff] }
  0x47   : > { %4731 = vmatprep.subr.bf16.mxu1 %v4730_v4  ;;  %v5756_v13 = vpack.c.bf16 %v1320_v11, %v1318_v10  ;;  %v301_v14 = vld [vmem:[%s7147_s22 + $0x38] sm:$0xff]  ;;  %v1323_v15 = vld [vmem:[%s7147_s22 + $0x2028] sm:$0xff]  ;;  %v298_v19 = vld [vmem:[%s7147_s22 + $0x20] sm:$0xff] }
  0x48   : > { %v1325_v16 = vld [vmem:[%s7147_s22 + $0x2038] sm:$0xff]  ;;  %5755 = vmatprep.subr.bf16.mxu0 %v5754_v8  ;;  %4733 = vmatpush1.bf16.msra.mxu1 %v4732_v9  ;;  %v4734_v17 = vpack.c.bf16 %v301_v14, %v299_v12  ;;  %v300_v20 = vld [vmem:[%s7147_s22 + $0x30] sm:$0xff]  ;;  %v1322_v21 = vld [vmem:[%s7147_s22 + $0x2020] sm:$0xff] }
  0x49   : > { %v5758_v18 = vpack.c.bf16 %v1325_v16, %v1323_v15  ;;  %5757 = vmatpush1.bf16.msra.mxu0 %v5756_v13  ;;  %v4736_v22 = vpack.c.bf16 %v300_v20, %v298_v19  ;;  %v1324_v23 = vld [vmem:[%s7147_s22 + $0x2030] sm:$0xff]  ;;  %v303_v24 = vld [vmem:[%s7147_s22 + $0x48] sm:$0xff]  ;;  %v305_v25 = vld [vmem:[%s7147_s22 + $0x58] sm:$0xff] }
  0x4a   : > { %4735 = vmatprep.subr.bf16.mxu1 %v4734_v17  ;;  %v5760_v26 = vpack.c.bf16 %v1324_v23, %v1322_v21  ;;  %v4738_v27 = vpack.c.bf16 %v305_v25, %v303_v24  ;;  %v1327_v28 = vld [vmem:[%s7147_s22 + $0x2048] sm:$0xff]  ;;  %v1329_v29 = vld [vmem:[%s7147_s22 + $0x2058] sm:$0xff]  ;;  %v302_v30 = vld [vmem:[%s7147_s22 + $0x40] sm:$0xff] }
  0x4b   : > { %5759 = vmatprep.subr.bf16.mxu0 %v5758_v18  ;;  %v5762_v31 = vpack.c.bf16 %v1329_v29, %v1327_v28  ;;  %v304_v32 = vld [vmem:[%s7147_s22 + $0x50] sm:$0xff]  ;;  %v1326_v33 = vld [vmem:[%s7147_s22 + $0x2040] sm:$0xff]  ;;  %v307_v36 = vld [vmem:[%s7147_s22 + $0x68] sm:$0xff] }
  0x4c   : > { %v1328_v34 = vld [vmem:[%s7147_s22 + $0x2050] sm:$0xff]  ;;  %4737 = vmatpush1.bf16.msra.mxu1 %v4736_v22  ;;  %v4740_v35 = vpack.c.bf16 %v304_v32, %v302_v30  ;;  %v309_v37 = vld [vmem:[%s7147_s22 + $0x78] sm:$0xff]  ;;  %v1331_v38 = vld [vmem:[%s7147_s22 + $0x2068] sm:$0xff] }
  0x4d   : > { %5761 = vmatpush1.bf16.msra.mxu0 %v5760_v26  ;;  %4739 = vmatprep.subr.bf16.mxu1 %v4738_v27  ;;  %v5764_v39 = vpack.c.bf16 %v1328_v34, %v1326_v33  ;;  %v4742_v40 = vpack.c.bf16 %v309_v37, %v307_v36  ;;  %v1333_v41 = vld [vmem:[%s7147_s22 + $0x2078] sm:$0xff]  ;;  %v306_v42 = vld [vmem:[%s7147_s22 + $0x60] sm:$0xff]  ;;  %v308_v43 = vld [vmem:[%s7147_s22 + $0x70] sm:$0xff] }
  0x4e   : > { %5763 = vmatprep.subr.bf16.mxu0 %v5762_v31  ;;  %v5766_v44 = vpack.c.bf16 %v1333_v41, %v1331_v38  ;;  %v1330_v45 = vld [vmem:[%s7147_s22 + $0x2060] sm:$0xff]  ;;  %v1332_v46 = vld [vmem:[%s7147_s22 + $0x2070] sm:$0xff]  ;;  %v311_v47 = vld [vmem:[%s7147_s22 + $0x88] sm:$0xff]  ;;  %v4744_v51 = vpack.c.bf16 %v308_v43, %v306_v42 }
  0x4f   : > { %v313_v48 = vld [vmem:[%s7147_s22 + $0x98] sm:$0xff]  ;;  %v1335_v49 = vld [vmem:[%s7147_s22 + $0x2088] sm:$0xff]  ;;  %v5768_v52 = vpack.c.bf16 %v1332_v46, %v1330_v45  ;;  %v310_v54 = vld [vmem:[%s7147_s22 + $0x80] sm:$0xff] }
  0x50   : > { %v1337_v50 = vld [vmem:[%s7147_s22 + $0x2098] sm:$0xff]  ;;  %4741 = vmatpush1.bf16.msra.mxu1 %v4740_v35  ;;  %v4746_v53 = vpack.c.bf16 %v313_v48, %v311_v47  ;;  %v312_v55 = vld [vmem:[%s7147_s22 + $0x90] sm:$0xff]  ;;  %v1334_v56 = vld [vmem:[%s7147_s22 + $0x2080] sm:$0xff] }
  0x51   : > { %5765 = vmatpush1.bf16.msra.mxu0 %v5764_v39  ;;  %4743 = vmatprep.subr.bf16.mxu1 %v4742_v40  ;;  %v5770_v57 = vpack.c.bf16 %v1337_v50, %v1335_v49  ;;  %v1336_v58 = vld [vmem:[%s7147_s22 + $0x2090] sm:$0xff]  ;;  %v315_v59 = vld [vmem:[%s7147_s22 + $0xa8] sm:$0xff]  ;;  %v317_v60 = vld [vmem:[%s7147_s22 + $0xb8] sm:$0xff]  ;;  %v4748_v63 = vpack.c.bf16 %v312_v55, %v310_v54 }
  0x52   : > { %5767 = vmatprep.subr.bf16.mxu0 %v5766_v44  ;;  %v1339_v61 = vld [vmem:[%s7147_s22 + $0x20a8] sm:$0xff]  ;;  %v1341_v62 = vld [vmem:[%s7147_s22 + $0x20b8] sm:$0xff]  ;;  %v5772_v0 = vpack.c.bf16 %v1336_v58, %v1334_v56  ;;  %v4750_v1 = vpack.c.bf16 %v317_v60, %v315_v59  ;;  %v314_v2 = vld [vmem:[%s7147_s22 + $0xa0] sm:$0xff] }
  0x53   : > { %v316_v3 = vld [vmem:[%s7147_s22 + $0xb0] sm:$0xff]  ;;  %v1338_v4 = vld [vmem:[%s7147_s22 + $0x20a0] sm:$0xff]  ;;  %v5774_v5 = vpack.c.bf16 %v1341_v62, %v1339_v61  ;;  %v319_v7 = vld [vmem:[%s7147_s22 + $0xc8] sm:$0xff] }
  0x54   : > { %4745 = vmatpush1.bf16.msra.mxu1 %v4744_v51  ;;  %v1340_v6 = vld [vmem:[%s7147_s22 + $0x20b0] sm:$0xff]  ;;  %v321_v8 = vld [vmem:[%s7147_s22 + $0xd8] sm:$0xff]  ;;  %v1343_v9 = vld [vmem:[%s7147_s22 + $0x20c8] sm:$0xff]  ;;  %v4752_v11 = vpack.c.bf16 %v316_v3, %v314_v2 }
  0x55   : > { %5769 = vmatpush1.bf16.msra.mxu0 %v5768_v52  ;;  %4747 = vmatprep.subr.bf16.mxu1 %v4746_v53  ;;  %v1345_v10 = vld [vmem:[%s7147_s22 + $0x20d8] sm:$0xff]  ;;  %v5776_v12 = vpack.c.bf16 %v1340_v6, %v1338_v4  ;;  %v4754_v13 = vpack.c.bf16 %v321_v8, %v319_v7  ;;  %v318_v14 = vld [vmem:[%s7147_s22 + $0xc0] sm:$0xff]  ;;  %v320_v15 = vld [vmem:[%s7147_s22 + $0xd0] sm:$0xff] }
  0x56   : > { %5771 = vmatprep.subr.bf16.mxu0 %v5770_v57  ;;  %v1342_v16 = vld [vmem:[%s7147_s22 + $0x20c0] sm:$0xff]  ;;  %v5778_v17 = vpack.c.bf16 %v1345_v10, %v1343_v9  ;;  %v1344_v18 = vld [vmem:[%s7147_s22 + $0x20d0] sm:$0xff]  ;;  %v323_v19 = vld [vmem:[%s7147_s22 + $0xe8] sm:$0xff]  ;;  %v4756_v23 = vpack.c.bf16 %v320_v15, %v318_v14 }
  0x57   : > { %v325_v20 = vld [vmem:[%s7147_s22 + $0xf8] sm:$0xff]  ;;  %v1347_v21 = vld [vmem:[%s7147_s22 + $0x20e8] sm:$0xff]  ;;  %v5780_v24 = vpack.c.bf16 %v1344_v18, %v1342_v16  ;;  %v322_v26 = vld [vmem:[%s7147_s22 + $0xe0] sm:$0xff] }
  0x58   : > { %4749 = vmatpush1.bf16.msra.mxu1 %v4748_v63  ;;  %v1349_v22 = vld [vmem:[%s7147_s22 + $0x20f8] sm:$0xff]  ;;  %v4758_v25 = vpack.c.bf16 %v325_v20, %v323_v19  ;;  %v324_v27 = vld [vmem:[%s7147_s22 + $0xf0] sm:$0xff]  ;;  %v1346_v28 = vld [vmem:[%s7147_s22 + $0x20e0] sm:$0xff] }
  0x59   : > { %5773 = vmatpush1.bf16.msra.mxu0 %v5772_v0  ;;  %4751 = vmatprep.subr.bf16.mxu1 %v4750_v1  ;;  %v5782_v29 = vpack.c.bf16 %v1349_v22, %v1347_v21  ;;  %v1348_v30 = vld [vmem:[%s7147_s22 + $0x20f0] sm:$0xff]  ;;  %v327_v31 = vld [vmem:[%s7147_s22 + $0x108] sm:$0xff]  ;;  %v329_v32 = vld [vmem:[%s7147_s22 + $0x118] sm:$0xff]  ;;  %v4760_v35 = vpack.c.bf16 %v324_v27, %v322_v26 }
  0x5a   : > { %5775 = vmatprep.subr.bf16.mxu0 %v5774_v5  ;;  %v1351_v33 = vld [vmem:[%s7147_s22 + $0x2108] sm:$0xff]  ;;  %v1353_v34 = vld [vmem:[%s7147_s22 + $0x2118] sm:$0xff]  ;;  %v5784_v36 = vpack.c.bf16 %v1348_v30, %v1346_v28  ;;  %v4762_v37 = vpack.c.bf16 %v329_v32, %v327_v31  ;;  %v326_v38 = vld [vmem:[%s7147_s22 + $0x100] sm:$0xff] }
  0x5b   : > { %v328_v39 = vld [vmem:[%s7147_s22 + $0x110] sm:$0xff]  ;;  %v1350_v40 = vld [vmem:[%s7147_s22 + $0x2100] sm:$0xff]  ;;  %v5786_v41 = vpack.c.bf16 %v1353_v34, %v1351_v33  ;;  %v331_v43 = vld [vmem:[%s7147_s22 + $0x128] sm:$0xff] }
  0x5c   : > { %4753 = vmatpush1.bf16.msra.mxu1 %v4752_v11  ;;  %v1352_v42 = vld [vmem:[%s7147_s22 + $0x2110] sm:$0xff]  ;;  %v333_v44 = vld [vmem:[%s7147_s22 + $0x138] sm:$0xff]  ;;  %v1355_v45 = vld [vmem:[%s7147_s22 + $0x2128] sm:$0xff]  ;;  %v4764_v47 = vpack.c.bf16 %v328_v39, %v326_v38 }
  0x5d   : > { %5777 = vmatpush1.bf16.msra.mxu0 %v5776_v12  ;;  %4755 = vmatprep.subr.bf16.mxu1 %v4754_v13  ;;  %v1357_v46 = vld [vmem:[%s7147_s22 + $0x2138] sm:$0xff]  ;;  %v5788_v48 = vpack.c.bf16 %v1352_v42, %v1350_v40  ;;  %v4766_v49 = vpack.c.bf16 %v333_v44, %v331_v43  ;;  %v330_v50 = vld [vmem:[%s7147_s22 + $0x120] sm:$0xff]  ;;  %v332_v51 = vld [vmem:[%s7147_s22 + $0x130] sm:$0xff] }
  0x5e   : > { %5779 = vmatprep.subr.bf16.mxu0 %v5778_v17  ;;  %v1354_v52 = vld [vmem:[%s7147_s22 + $0x2120] sm:$0xff]  ;;  %v5790_v53 = vpack.c.bf16 %v1357_v46, %v1355_v45  ;;  %v1356_v54 = vld [vmem:[%s7147_s22 + $0x2130] sm:$0xff]  ;;  %v335_v55 = vld [vmem:[%s7147_s22 + $0x148] sm:$0xff]  ;;  %v4768_v59 = vpack.c.bf16 %v332_v51, %v330_v50 }
  0x5f   : > { %v337_v56 = vld [vmem:[%s7147_s22 + $0x158] sm:$0xff]  ;;  %v1359_v57 = vld [vmem:[%s7147_s22 + $0x2148] sm:$0xff]  ;;  %v5792_v60 = vpack.c.bf16 %v1356_v54, %v1354_v52  ;;  %v334_v62 = vld [vmem:[%s7147_s22 + $0x140] sm:$0xff] }
  0x60   : > { %4757 = vmatpush1.bf16.msra.mxu1 %v4756_v23  ;;  %v1361_v58 = vld [vmem:[%s7147_s22 + $0x2158] sm:$0xff]  ;;  %v4770_v61 = vpack.c.bf16 %v337_v56, %v335_v55  ;;  %v336_v63 = vld [vmem:[%s7147_s22 + $0x150] sm:$0xff]  ;;  %v1358_v0 = vld [vmem:[%s7147_s22 + $0x2140] sm:$0xff] }
  0x61   : > { %5781 = vmatpush1.bf16.msra.mxu0 %v5780_v24  ;;  %4759 = vmatprep.subr.bf16.mxu1 %v4758_v25  ;;  %v5794_v1 = vpack.c.bf16 %v1361_v58, %v1359_v57  ;;  %v1360_v2 = vld [vmem:[%s7147_s22 + $0x2150] sm:$0xff]  ;;  %v339_v3 = vld [vmem:[%s7147_s22 + $0x168] sm:$0xff]  ;;  %v341_v4 = vld [vmem:[%s7147_s22 + $0x178] sm:$0xff]  ;;  %v4772_v7 = vpack.c.bf16 %v336_v63, %v334_v62 }
  0x62   : > { %5783 = vmatprep.subr.bf16.mxu0 %v5782_v29  ;;  %v1363_v5 = vld [vmem:[%s7147_s22 + $0x2168] sm:$0xff]  ;;  %v1365_v6 = vld [vmem:[%s7147_s22 + $0x2178] sm:$0xff]  ;;  %v338_v8 = vld [vmem:[%s7147_s22 + $0x160] sm:$0xff]  ;;  %v5796_v9 = vpack.c.bf16 %v1360_v2, %v1358_v0  ;;  %v4774_v10 = vpack.c.bf16 %v341_v4, %v339_v3 }
  0x63   : > { %v340_v11 = vld [vmem:[%s7147_s22 + $0x170] sm:$0xff]  ;;  %v1362_v12 = vld [vmem:[%s7147_s22 + $0x2160] sm:$0xff]  ;;  %v5798_v14 = vpack.c.bf16 %v1365_v6, %v1363_v5  ;;  %v343_v15 = vld [vmem:[%s7147_s22 + $0x188] sm:$0xff] }
  0x64   : > { %4761 = vmatpush1.bf16.msra.mxu1 %v4760_v35  ;;  %v1364_v13 = vld [vmem:[%s7147_s22 + $0x2170] sm:$0xff]  ;;  %v345_v16 = vld [vmem:[%s7147_s22 + $0x198] sm:$0xff]  ;;  %v231_v17 = vld [vmem:[%s7165_s29 + $0x8] sm:$0xff]  ;;  %v4776_v21 = vpack.c.bf16 %v340_v11, %v338_v8 }
  0x65   : > { %5785 = vmatpush1.bf16.msra.mxu0 %v5784_v36  ;;  %4763 = vmatprep.subr.bf16.mxu1 %v4762_v37  ;;  %v1367_v18 = vld [vmem:[%s7147_s22 + $0x2188] sm:$0xff]  ;;  %v1369_v19 = vld [vmem:[%s7147_s22 + $0x2198] sm:$0xff]  ;;  %v263_v20 = vld [vmem:[%s7165_s29 + $0x108] sm:$0xff]  ;;  %v5800_v22 = vpack.c.bf16 %v1364_v13, %v1362_v12  ;;  %v4778_v23 = vpack.c.bf16 %v345_v16, %v343_v15 }
  0x66   : > { %5787 = vmatprep.subr.bf16.mxu0 %v5786_v41  ;;  %2406 = vmatprep.mubr.f32.mxu1 %v231_v17  ;;  %v342_v24 = vld [vmem:[%s7147_s22 + $0x180] sm:$0xff]  ;;  %v344_v25 = vld [vmem:[%s7147_s22 + $0x190] sm:$0xff]  ;;  %v5802_v27 = vpack.c.bf16 %v1369_v19, %v1367_v18  ;;  %v347_v29 = vld [vmem:[%s7147_s22 + $0x1a8] sm:$0xff] }
  0x67   : > { %3542 = vmatprep.mubr.f32.mxu0 %v263_v20  ;;  %v1366_v26 = vld [vmem:[%s7147_s22 + $0x2180] sm:$0xff]  ;;  %v1368_v28 = vld [vmem:[%s7147_s22 + $0x2190] sm:$0xff]  ;;  %v349_v30 = vld [vmem:[%s7147_s22 + $0x1b8] sm:$0xff]  ;;  %v4780_v33 = vpack.c.bf16 %v344_v25, %v342_v24 }
  0x68   : > { %4765 = vmatpush1.bf16.msra.mxu1 %v4764_v47  ;;  %v1371_v31 = vld [vmem:[%s7147_s22 + $0x21a8] sm:$0xff]  ;;  %v1373_v32 = vld [vmem:[%s7147_s22 + $0x21b8] sm:$0xff]  ;;  %v5804_v34 = vpack.c.bf16 %v1368_v28, %v1366_v26  ;;  %v4782_v35 = vpack.c.bf16 %v349_v30, %v347_v29  ;;  %v346_v36 = vld [vmem:[%s7147_s22 + $0x1a0] sm:$0xff] }
  0x69   : > { %5789 = vmatpush1.bf16.msra.mxu0 %v5788_v48  ;;  %4767 = vmatprep.subr.bf16.mxu1 %v4766_v49  ;;  %v348_v37 = vld [vmem:[%s7147_s22 + $0x1b0] sm:$0xff]  ;;  %v1370_v38 = vld [vmem:[%s7147_s22 + $0x21a0] sm:$0xff]  ;;  %v5806_v39 = vpack.c.bf16 %v1373_v32, %v1371_v31  ;;  %v351_v41 = vld [vmem:[%s7147_s22 + $0x1c8] sm:$0xff] }
  0x6a   : > { %5791 = vmatprep.subr.bf16.mxu0 %v5790_v53  ;;  %v1372_v40 = vld [vmem:[%s7147_s22 + $0x21b0] sm:$0xff]  ;;  %v353_v42 = vld [vmem:[%s7147_s22 + $0x1d8] sm:$0xff]  ;;  %v1375_v43 = vld [vmem:[%s7147_s22 + $0x21c8] sm:$0xff]  ;;  %v4784_v45 = vpack.c.bf16 %v348_v37, %v346_v36 }
  0x6b   : > { %v1377_v44 = vld [vmem:[%s7147_s22 + $0x21d8] sm:$0xff]  ;;  %v5808_v46 = vpack.c.bf16 %v1372_v40, %v1370_v38  ;;  %v4786_v47 = vpack.c.bf16 %v353_v42, %v351_v41  ;;  %v350_v48 = vld [vmem:[%s7147_s22 + $0x1c0] sm:$0xff]  ;;  %v352_v49 = vld [vmem:[%s7147_s22 + $0x1d0] sm:$0xff] }
  0x6c   : > { %4769 = vmatpush1.bf16.msra.mxu1 %v4768_v59  ;;  %v1374_v50 = vld [vmem:[%s7147_s22 + $0x21c0] sm:$0xff]  ;;  %v5810_v51 = vpack.c.bf16 %v1377_v44, %v1375_v43  ;;  %v1376_v52 = vld [vmem:[%s7147_s22 + $0x21d0] sm:$0xff]  ;;  %v355_v53 = vld [vmem:[%s7147_s22 + $0x1e8] sm:$0xff]  ;;  %v4788_v57 = vpack.c.bf16 %v352_v49, %v350_v48 }
  0x6d   : > { %5793 = vmatpush1.bf16.msra.mxu0 %v5792_v60  ;;  %4771 = vmatprep.subr.bf16.mxu1 %v4770_v61  ;;  %v357_v54 = vld [vmem:[%s7147_s22 + $0x1f8] sm:$0xff]  ;;  %v1379_v55 = vld [vmem:[%s7147_s22 + $0x21e8] sm:$0xff]  ;;  %v5812_v58 = vpack.c.bf16 %v1376_v52, %v1374_v50  ;;  %v354_v60 = vld [vmem:[%s7147_s22 + $0x1e0] sm:$0xff] }
  0x6e   : > { %5795 = vmatprep.subr.bf16.mxu0 %v5794_v1  ;;  %v1381_v56 = vld [vmem:[%s7147_s22 + $0x21f8] sm:$0xff]  ;;  %v4790_v59 = vpack.c.bf16 %v357_v54, %v355_v53  ;;  %v356_v61 = vld [vmem:[%s7147_s22 + $0x1f0] sm:$0xff]  ;;  %v1378_v62 = vld [vmem:[%s7147_s22 + $0x21e0] sm:$0xff] }
  0x6f   : > { %v5814_v63 = vpack.c.bf16 %v1381_v56, %v1379_v55  ;;  %v1380_v0 = vld [vmem:[%s7147_s22 + $0x21f0] sm:$0xff]  ;;  %v359_v1 = vld [vmem:[%s7147_s22 + $0x208] sm:$0xff]  ;;  %v361_v2 = vld [vmem:[%s7147_s22 + $0x218] sm:$0xff]  ;;  %v4792_v5 = vpack.c.bf16 %v356_v61, %v354_v60 }
  0x70   : > { %4773 = vmatpush1.bf16.msra.mxu1 %v4772_v7  ;;  %v1383_v3 = vld [vmem:[%s7147_s22 + $0x2208] sm:$0xff]  ;;  %v1385_v4 = vld [vmem:[%s7147_s22 + $0x2218] sm:$0xff]  ;;  %v5816_v6 = vpack.c.bf16 %v1380_v0, %v1378_v62  ;;  %v4794_v7 = vpack.c.bf16 %v361_v2, %v359_v1  ;;  %v358_v8 = vld [vmem:[%s7147_s22 + $0x200] sm:$0xff] }
  0x71   : > { %5797 = vmatpush1.bf16.msra.mxu0 %v5796_v9  ;;  %4775 = vmatprep.subr.bf16.mxu1 %v4774_v10  ;;  %v360_v9 = vld [vmem:[%s7147_s22 + $0x210] sm:$0xff]  ;;  %v1382_v10 = vld [vmem:[%s7147_s22 + $0x2200] sm:$0xff]  ;;  %v5818_v11 = vpack.c.bf16 %v1385_v4, %v1383_v3  ;;  %v363_v13 = vld [vmem:[%s7147_s22 + $0x228] sm:$0xff] }
  0x72   : > { %5799 = vmatprep.subr.bf16.mxu0 %v5798_v14  ;;  %v1384_v12 = vld [vmem:[%s7147_s22 + $0x2210] sm:$0xff]  ;;  %v365_v14 = vld [vmem:[%s7147_s22 + $0x238] sm:$0xff]  ;;  %v1387_v15 = vld [vmem:[%s7147_s22 + $0x2228] sm:$0xff]  ;;  %v4796_v18 = vpack.c.bf16 %v360_v9, %v358_v8 }
  0x73   : > { %v1389_v16 = vld [vmem:[%s7147_s22 + $0x2238] sm:$0xff]  ;;  %v5820_v20 = vpack.c.bf16 %v1384_v12, %v1382_v10  ;;  %v1386_v24 = vld [vmem:[%s7147_s22 + $0x2220] sm:$0xff]  ;;  %v1388_v26 = vld [vmem:[%s7147_s22 + $0x2230] sm:$0xff] }
  0x74   : > { %4777 = vmatpush1.bf16.msra.mxu1 %v4776_v21  ;;  %v230_v17 = vld [vmem:[%s7165_s29] sm:$0xff]  ;;  %v4798_v21 = vpack.c.bf16 %v365_v14, %v363_v13  ;;  %v5822_v25 = vpack.c.bf16 %v1389_v16, %v1387_v15  ;;  %v1391_v29 = vld [vmem:[%s7147_s22 + $0x2248] sm:$0xff]  ;;  %v5824_v32 = vpack.c.bf16 %v1388_v26, %v1386_v24  ;;  %v1390_v36 = vld [vmem:[%s7147_s22 + $0x2240] sm:$0xff] }
  0x75   : > { %5801 = vmatpush1.bf16.msra.mxu0 %v5800_v22  ;;  %4779 = vmatprep.subr.bf16.mxu1 %v4778_v23  ;;  %v262_v19 = vld [vmem:[%s7165_s29 + $0x100] sm:$0xff]  ;;  %v362_v22 = vld [vmem:[%s7147_s22 + $0x220] sm:$0xff]  ;;  %v364_v23 = vld [vmem:[%s7147_s22 + $0x230] sm:$0xff] }
  0x76   : > { %5803 = vmatprep.subr.bf16.mxu0 %v5802_v27  ;;  %v367_v27 = vld [vmem:[%s7147_s22 + $0x248] sm:$0xff]  ;;  %v369_v28 = vld [vmem:[%s7147_s22 + $0x258] sm:$0xff]  ;;  %v4800_v31 = vpack.c.bf16 %v364_v23, %v362_v22  ;;  %v1392_v38 = vld [vmem:[%s7147_s22 + $0x2250] sm:$0xff] }
  0x77   : > { %v1393_v30 = vld [vmem:[%s7147_s22 + $0x2258] sm:$0xff]  ;;  %v1395_v41 = vld [vmem:[%s7147_s22 + $0x2268] sm:$0xff]  ;;  %v5828_v44 = vpack.c.bf16 %v1392_v38, %v1390_v36  ;;  %v1394_v48 = vld [vmem:[%s7147_s22 + $0x2260] sm:$0xff] }
  0x78   : > { %4781 = vmatpush1.bf16.msra.mxu1 %v4780_v33  ;;  %v4802_v33 = vpack.c.bf16 %v369_v28, %v367_v27  ;;  %v5826_v37 = vpack.c.bf16 %v1393_v30, %v1391_v29  ;;  %v373_v40 = vld [vmem:[%s7147_s22 + $0x278] sm:$0xff]  ;;  %v1396_v50 = vld [vmem:[%s7147_s22 + $0x2270] sm:$0xff]  ;;  %v1399_v53 = vld [vmem:[%s7147_s22 + $0x2288] sm:$0xff] }
  0x79   : > { %5805 = vmatpush1.bf16.msra.mxu0 %v5804_v34  ;;  %4783 = vmatprep.subr.bf16.mxu1 %v4782_v35  ;;  %v366_v34 = vld [vmem:[%s7147_s22 + $0x240] sm:$0xff]  ;;  %v368_v35 = vld [vmem:[%s7147_s22 + $0x250] sm:$0xff]  ;;  %v1397_v42 = vld [vmem:[%s7147_s22 + $0x2278] sm:$0xff]  ;;  %v5832_v56 = vpack.c.bf16 %v1396_v50, %v1394_v48 }
  0x7a   : > { %5807 = vmatprep.subr.bf16.mxu0 %v5806_v39  ;;  %v371_v39 = vld [vmem:[%s7147_s22 + $0x268] sm:$0xff]  ;;  %v4804_v43 = vpack.c.bf16 %v368_v35, %v366_v34  ;;  %v5830_v49 = vpack.c.bf16 %v1397_v42, %v1395_v41  ;;  %v377_v52 = vld [vmem:[%s7147_s22 + $0x298] sm:$0xff]  ;;  %v1398_v60 = vld [vmem:[%s7147_s22 + $0x2280] sm:$0xff] }
  0x7b   : > { %v1401_v54 = vld [vmem:[%s7147_s22 + $0x2298] sm:$0xff]  ;;  %v1400_v62 = vld [vmem:[%s7147_s22 + $0x2290] sm:$0xff]  ;;  %v1403_v1 = vld [vmem:[%s7147_s22 + $0x22a8] sm:$0xff] }
  0x7c   : > { %4785 = vmatpush1.bf16.msra.mxu1 %v4784_v45  ;;  %v4806_v45 = vpack.c.bf16 %v373_v40, %v371_v39  ;;  %v5834_v61 = vpack.c.bf16 %v1401_v54, %v1399_v53  ;;  %v381_v0 = vld [vmem:[%s7147_s22 + $0x2b8] sm:$0xff]  ;;  %v5836_v4 = vpack.c.bf16 %v1400_v62, %v1398_v60  ;;  %v1402_v8 = vld [vmem:[%s7147_s22 + $0x22a0] sm:$0xff]  ;;  %v1404_v10 = vld [vmem:[%s7147_s22 + $0x22b0] sm:$0xff] }
  0x7d   : > { %5809 = vmatpush1.bf16.msra.mxu0 %v5808_v46  ;;  %4787 = vmatprep.subr.bf16.mxu1 %v4786_v47  ;;  %v370_v46 = vld [vmem:[%s7147_s22 + $0x260] sm:$0xff]  ;;  %v372_v47 = vld [vmem:[%s7147_s22 + $0x270] sm:$0xff]  ;;  %v1405_v2 = vld [vmem:[%s7147_s22 + $0x22b8] sm:$0xff] }
  0x7e   : > { %5811 = vmatprep.subr.bf16.mxu0 %v5810_v51  ;;  %v375_v51 = vld [vmem:[%s7147_s22 + $0x288] sm:$0xff]  ;;  %v4808_v55 = vpack.c.bf16 %v372_v47, %v370_v46  ;;  %v5838_v9 = vpack.c.bf16 %v1405_v2, %v1403_v1  ;;  %v385_v12 = vld [vmem:[%s7147_s22 + $0x2d8] sm:$0xff]  ;;  %v382_v16 = vld [vmem:[%s7147_s22 + $0x2c0] sm:$0xff] }
  0x7f   : > { %v1407_v13 = vld [vmem:[%s7147_s22 + $0x22c8] sm:$0xff]  ;;  %v1409_v14 = vld [vmem:[%s7147_s22 + $0x22d8] sm:$0xff]  ;;  %v265_v28 = vld [vmem:[%s7165_s29 + $0x118] sm:$0xff] }
  0x80   : > { %4789 = vmatpush1.bf16.msra.mxu1 %v4788_v57  ;;  %v4810_v57 = vpack.c.bf16 %v377_v52, %v375_v51  ;;  %v5842_v22 = vpack.c.bf16 %v1409_v14, %v1407_v13  ;;  %v387_v23 = vld [vmem:[%s7147_s22 + $0x2e8] sm:$0xff]  ;;  %v389_v24 = vld [vmem:[%s7147_s22 + $0x2f8] sm:$0xff]  ;;  %v1410_v34 = vld [vmem:[%s7147_s22 + $0x22e0] sm:$0xff] }
  0x81   : > { %5813 = vmatpush1.bf16.msra.mxu0 %v5812_v58  ;;  %4791 = vmatprep.subr.bf16.mxu1 %v4790_v59  ;;  %v374_v58 = vld [vmem:[%s7147_s22 + $0x280] sm:$0xff]  ;;  %v376_v59 = vld [vmem:[%s7147_s22 + $0x290] sm:$0xff]  ;;  %v1411_v26 = vld [vmem:[%s7147_s22 + $0x22e8] sm:$0xff] }
  0x82   : > { %5815 = vmatprep.subr.bf16.mxu0 %v5814_v63  ;;  %v379_v63 = vld [vmem:[%s7147_s22 + $0x2a8] sm:$0xff]  ;;  %v4812_v3 = vpack.c.bf16 %v376_v59, %v374_v58  ;;  %v1413_v27 = vld [vmem:[%s7147_s22 + $0x22f8] sm:$0xff]  ;;  %v1412_v36 = vld [vmem:[%s7147_s22 + $0x22f0] sm:$0xff] }
  0x83   : > { %v5846_v35 = vpack.c.bf16 %v1413_v27, %v1411_v26  ;;  %v393_v38 = vld [vmem:[%s7147_s22 + $0x318] sm:$0xff]  ;;  %v1415_v39 = vld [vmem:[%s7147_s22 + $0x2308] sm:$0xff]  ;;  %v5848_v42 = vpack.c.bf16 %v1412_v36, %v1410_v34  ;;  %v1414_v46 = vld [vmem:[%s7147_s22 + $0x2300] sm:$0xff] }
  0x84   : > { %4793 = vmatpush1.bf16.msra.mxu1 %v4792_v5  ;;  %v4814_v5 = vpack.c.bf16 %v381_v0, %v379_v63  ;;  %v1417_v40 = vld [vmem:[%s7147_s22 + $0x2318] sm:$0xff]  ;;  %v1416_v48 = vld [vmem:[%s7147_s22 + $0x2310] sm:$0xff]  ;;  %v1419_v51 = vld [vmem:[%s7147_s22 + $0x2328] sm:$0xff] }
  0x85   : > { %5817 = vmatpush1.bf16.msra.mxu0 %v5816_v6  ;;  %4795 = vmatprep.subr.bf16.mxu1 %v4794_v7  ;;  %v378_v6 = vld [vmem:[%s7147_s22 + $0x2a0] sm:$0xff]  ;;  %v380_v7 = vld [vmem:[%s7147_s22 + $0x2b0] sm:$0xff]  ;;  %v5850_v47 = vpack.c.bf16 %v1417_v40, %v1415_v39  ;;  %v397_v50 = vld [vmem:[%s7147_s22 + $0x338] sm:$0xff]  ;;  %v5852_v54 = vpack.c.bf16 %v1416_v48, %v1414_v46 }
  0x86   : > { %5819 = vmatprep.subr.bf16.mxu0 %v5818_v11  ;;  %v383_v11 = vld [vmem:[%s7147_s22 + $0x2c8] sm:$0xff]  ;;  %v4816_v15 = vpack.c.bf16 %v380_v7, %v378_v6  ;;  %v1421_v52 = vld [vmem:[%s7147_s22 + $0x2338] sm:$0xff]  ;;  %v1418_v58 = vld [vmem:[%s7147_s22 + $0x2320] sm:$0xff] }
  0x87   : > { %2407 = vmatmul.mubr.f32.vlgmr.msra.gmra.mrb[0].mxu1 %v230_v17  ;;  %v5840_v17 = vpack.c.bf16 %v1404_v10, %v1402_v8  ;;  %v5854_v59 = vpack.c.bf16 %v1421_v52, %v1419_v51  ;;  %v1420_v60 = vld [vmem:[%s7147_s22 + $0x2330] sm:$0xff]  ;;  %v401_v62 = vld [vmem:[%s7147_s22 + $0x358] sm:$0xff]  ;;  %v1423_v63 = vld [vmem:[%s7147_s22 + $0x2348] sm:$0xff] }
  0x88   : > { %4797 = vmatpush1.bf16.msra.mxu1 %v4796_v18  ;;  %3543 = vmatmul.mubr.f32.vlgmr.msra.gmra.mrb[0].mxu0 %v262_v19  ;;  %v4818_v18 = vpack.c.bf16 %v385_v12, %v383_v11  ;;  %v384_v19 = vld [vmem:[%s7147_s22 + $0x2d0] sm:$0xff]  ;;  %v1425_v0 = vld [vmem:[%s7147_s22 + $0x2358] sm:$0xff]  ;;  %v5856_v2 = vpack.c.bf16 %v1420_v60, %v1418_v58  ;;  %v1422_v6 = vld [vmem:[%s7147_s22 + $0x2340] sm:$0xff] }
  0x89   : > { %5821 = vmatpush1.bf16.msra.mxu0 %v5820_v20  ;;  %4799 = vmatprep.subr.bf16.mxu1 %v4798_v21  ;;  %v1406_v20 = vld [vmem:[%s7147_s22 + $0x22c0] sm:$0xff]  ;;  %v1408_v21 = vld [vmem:[%s7147_s22 + $0x22d0] sm:$0xff]  ;;  %v4820_v29 = vpack.c.bf16 %v384_v19, %v382_v16  ;;  %v5858_v7 = vpack.c.bf16 %v1425_v0, %v1423_v63  ;;  %v405_v10 = vld [vmem:[%s7147_s22 + $0x378] sm:$0xff] }
  0x8a   : > { %5823 = vmatprep.subr.bf16.mxu0 %v5822_v25  ;;  %v233_v25 = vld [vmem:[%s7165_s29 + $0x18] sm:$0xff]  ;;  %3613 = vmatprep.mubr.f32.mxu0 %v265_v28  ;;  %v5844_v30 = vpack.c.bf16 %v1408_v21, %v1406_v20  ;;  %v1427_v11 = vld [vmem:[%s7147_s22 + $0x2368] sm:$0xff]  ;;  %v1429_v12 = vld [vmem:[%s7147_s22 + $0x2378] sm:$0xff] }
  0x8b   : > { %2477 = vmatprep.mubr.f32.mxu1 %v233_v25  ;;  %v1424_v8 = vld [vmem:[%s7147_s22 + $0x2350] sm:$0xff]  ;;  %v402_v16 = vld [vmem:[%s7147_s22 + $0x360] sm:$0xff]  ;;  %v5862_v19 = vpack.c.bf16 %v1429_v12, %v1427_v11  ;;  %v407_v21 = vld [vmem:[%s7147_s22 + $0x388] sm:$0xff] }
  0x8c   : > { %4801 = vmatpush1.bf16.msra.mxu1 %v4800_v31  ;;  %v4822_v31 = vpack.c.bf16 %v389_v24, %v387_v23  ;;  %v5860_v14 = vpack.c.bf16 %v1424_v8, %v1422_v6  ;;  %v1428_v20 = vld [vmem:[%s7147_s22 + $0x2370] sm:$0xff]  ;;  %v1431_v23 = vld [vmem:[%s7147_s22 + $0x2388] sm:$0xff]  ;;  %v1433_v24 = vld [vmem:[%s7147_s22 + $0x2398] sm:$0xff] }
  0x8d   : > { %5825 = vmatpush1.bf16.msra.mxu0 %v5824_v32  ;;  %4803 = vmatprep.subr.bf16.mxu1 %v4802_v33  ;;  %v386_v32 = vld [vmem:[%s7147_s22 + $0x2e0] sm:$0xff]  ;;  %v388_v33 = vld [vmem:[%s7147_s22 + $0x2f0] sm:$0xff]  ;;  %v413_v34 = vld [vmem:[%s7147_s22 + $0x3b8] sm:$0xff] }
  0x8e   : > { %5827 = vmatprep.subr.bf16.mxu0 %v5826_v37  ;;  %v391_v37 = vld [vmem:[%s7147_s22 + $0x308] sm:$0xff]  ;;  %v4824_v41 = vpack.c.bf16 %v388_v33, %v386_v32  ;;  %v406_v28 = vld [vmem:[%s7147_s22 + $0x380] sm:$0xff]  ;;  %v1432_v32 = vld [vmem:[%s7147_s22 + $0x2390] sm:$0xff] }
  0x8f   : > { %v411_v33 = vld [vmem:[%s7147_s22 + $0x3a8] sm:$0xff]  ;;  %v1437_v36 = vld [vmem:[%s7147_s22 + $0x23b8] sm:$0xff]  ;;  %v410_v40 = vld [vmem:[%s7147_s22 + $0x3a0] sm:$0xff] }
  0x90   : > { %4805 = vmatpush1.bf16.msra.mxu1 %v4804_v43  ;;  %v4826_v43 = vpack.c.bf16 %v393_v38, %v391_v37  ;;  %v4846_v39 = vpack.c.bf16 %v413_v34, %v411_v33  ;;  %v417_v46 = vld [vmem:[%s7147_s22 + $0x3d8] sm:$0xff]  ;;  %v414_v52 = vld [vmem:[%s7147_s22 + $0x3c0] sm:$0xff]  ;;  %v1455_v33 = vld [vmem:[%s7147_s22 + $0x2448] sm:$0xff] }
  0x91   : > { %5829 = vmatpush1.bf16.msra.mxu0 %v5828_v44  ;;  %4807 = vmatprep.subr.bf16.mxu1 %v4806_v45  ;;  %v390_v44 = vld [vmem:[%s7147_s22 + $0x300] sm:$0xff]  ;;  %v392_v45 = vld [vmem:[%s7147_s22 + $0x310] sm:$0xff]  ;;  %v1441_v48 = vld [vmem:[%s7147_s22 + $0x23d8] sm:$0xff] }
  0x92   : > { %5831 = vmatprep.subr.bf16.mxu0 %v5830_v49  ;;  %v395_v49 = vld [vmem:[%s7147_s22 + $0x328] sm:$0xff]  ;;  %v4828_v53 = vpack.c.bf16 %v392_v45, %v390_v44  ;;  %v1436_v44 = vld [vmem:[%s7147_s22 + $0x23b0] sm:$0xff]  ;;  %v421_v58 = vld [vmem:[%s7147_s22 + $0x3f8] sm:$0xff] }
  0x93   : > { %v415_v45 = vld [vmem:[%s7147_s22 + $0x3c8] sm:$0xff]  ;;  %v1445_v60 = vld [vmem:[%s7147_s22 + $0x23f8] sm:$0xff]  ;;  %v418_v0 = vld [vmem:[%s7147_s22 + $0x3e0] sm:$0xff] }
  0x94   : > { %4809 = vmatpush1.bf16.msra.mxu1 %v4808_v55  ;;  %v4830_v55 = vpack.c.bf16 %v397_v50, %v395_v49  ;;  %v4850_v51 = vpack.c.bf16 %v417_v46, %v415_v45  ;;  %v425_v6 = vld [vmem:[%s7147_s22 + $0x418] sm:$0xff]  ;;  %v422_v12 = vld [vmem:[%s7147_s22 + $0x400] sm:$0xff]  ;;  %v435_v45 = vld [vmem:[%s7147_s22 + $0x468] sm:$0xff] }
  0x95   : > { %5833 = vmatpush1.bf16.msra.mxu0 %v5832_v56  ;;  %4811 = vmatprep.subr.bf16.mxu1 %v4810_v57  ;;  %v394_v56 = vld [vmem:[%s7147_s22 + $0x320] sm:$0xff]  ;;  %v396_v57 = vld [vmem:[%s7147_s22 + $0x330] sm:$0xff]  ;;  %v1449_v8 = vld [vmem:[%s7147_s22 + $0x2418] sm:$0xff] }
  0x96   : > { %5835 = vmatprep.subr.bf16.mxu0 %v5834_v61  ;;  %v399_v61 = vld [vmem:[%s7147_s22 + $0x348] sm:$0xff]  ;;  %v4832_v1 = vpack.c.bf16 %v396_v57, %v394_v56  ;;  %v1440_v56 = vld [vmem:[%s7147_s22 + $0x23d0] sm:$0xff]  ;;  %v1457_v34 = vld [vmem:[%s7147_s22 + $0x2458] sm:$0xff] }
  0x97   : > { %v419_v57 = vld [vmem:[%s7147_s22 + $0x3e8] sm:$0xff]  ;;  %v437_v46 = vld [vmem:[%s7147_s22 + $0x478] sm:$0xff] }
  0x98   : > { %4813 = vmatpush1.bf16.msra.mxu1 %v4812_v3  ;;  %v4834_v3 = vpack.c.bf16 %v401_v62, %v399_v61  ;;  %v4854_v63 = vpack.c.bf16 %v421_v58, %v419_v57  ;;  %v439_v57 = vld [vmem:[%s7147_s22 + $0x488] sm:$0xff]  ;;  %v441_v58 = vld [vmem:[%s7147_s22 + $0x498] sm:$0xff] }
  0x99   : > { %5837 = vmatpush1.bf16.msra.mxu0 %v5836_v4  ;;  %4815 = vmatprep.subr.bf16.mxu1 %v4814_v5  ;;  %v398_v4 = vld [vmem:[%s7147_s22 + $0x340] sm:$0xff]  ;;  %v400_v5 = vld [vmem:[%s7147_s22 + $0x350] sm:$0xff] }
  0x9a   : > { %5839 = vmatprep.subr.bf16.mxu0 %v5838_v9  ;;  %v403_v9 = vld [vmem:[%s7147_s22 + $0x368] sm:$0xff]  ;;  %v4836_v13 = vpack.c.bf16 %v400_v5, %v398_v4  ;;  %v1444_v4 = vld [vmem:[%s7147_s22 + $0x23f0] sm:$0xff] }
  0x9b   : > { %v423_v5 = vld [vmem:[%s7147_s22 + $0x408] sm:$0xff] }
  0x9c   : > { %4817 = vmatpush1.bf16.msra.mxu1 %v4816_v15  ;;  %v4838_v15 = vpack.c.bf16 %v405_v10, %v403_v9  ;;  %v4858_v11 = vpack.c.bf16 %v425_v6, %v423_v5  ;;  %v443_v5 = vld [vmem:[%s7147_s22 + $0x4a8] sm:$0xff]  ;;  %v445_v6 = vld [vmem:[%s7147_s22 + $0x4b8] sm:$0xff] }
  0x9d   : > { %5841 = vmatpush1.bf16.msra.mxu0 %v5840_v17  ;;  %4819 = vmatprep.subr.bf16.mxu1 %v4818_v18  ;;  %v404_v17 = vld [vmem:[%s7147_s22 + $0x370] sm:$0xff]  ;;  %v1426_v18 = vld [vmem:[%s7147_s22 + $0x2360] sm:$0xff] }
  0x9e   : > { %5843 = vmatprep.subr.bf16.mxu0 %v5842_v22  ;;  %v409_v22 = vld [vmem:[%s7147_s22 + $0x398] sm:$0xff]  ;;  %v4840_v25 = vpack.c.bf16 %v404_v17, %v402_v16  ;;  %v5864_v26 = vpack.c.bf16 %v1428_v20, %v1426_v18  ;;  %v1448_v16 = vld [vmem:[%s7147_s22 + $0x2410] sm:$0xff]  ;;  %v427_v17 = vld [vmem:[%s7147_s22 + $0x428] sm:$0xff] }
  0x9f   : > { %v4842_v27 = vpack.c.bf16 %v409_v22, %v407_v21  ;;  %v429_v18 = vld [vmem:[%s7147_s22 + $0x438] sm:$0xff]  ;;  %v232_v21 = vld [vmem:[%s7165_s29 + $0x10] sm:$0xff] }
  0xa0   : > { %4821 = vmatpush1.bf16.msra.mxu1 %v4820_v29  ;;  %v408_v29 = vld [vmem:[%s7147_s22 + $0x390] sm:$0xff]  ;;  %v1453_v20 = vld [vmem:[%s7147_s22 + $0x2438] sm:$0xff] }
  0xa1   : > { %5845 = vmatpush1.bf16.msra.mxu0 %v5844_v30  ;;  %4823 = vmatprep.subr.bf16.mxu1 %v4822_v31  ;;  %v1430_v30 = vld [vmem:[%s7147_s22 + $0x2380] sm:$0xff]  ;;  %v5866_v31 = vpack.c.bf16 %v1433_v24, %v1431_v23  ;;  %v4844_v37 = vpack.c.bf16 %v408_v29, %v406_v28  ;;  %v264_v23 = vld [vmem:[%s7165_s29 + $0x110] sm:$0xff] }
  0xa2   : > { %5847 = vmatprep.subr.bf16.mxu0 %v5846_v35  ;;  %v1435_v35 = vld [vmem:[%s7147_s22 + $0x23a8] sm:$0xff]  ;;  %v5868_v38 = vpack.c.bf16 %v1432_v32, %v1430_v30  ;;  %v1450_v28 = vld [vmem:[%s7147_s22 + $0x2420] sm:$0xff]  ;;  %v1452_v30 = vld [vmem:[%s7147_s22 + $0x2430] sm:$0xff] }
  0xa3   : > { %v433_v32 = vld [vmem:[%s7147_s22 + $0x458] sm:$0xff] }
  0xa4   : > { %4825 = vmatpush1.bf16.msra.mxu1 %v4824_v41  ;;  %v412_v41 = vld [vmem:[%s7147_s22 + $0x3b0] sm:$0xff] }
  0xa5   : > { %5849 = vmatpush1.bf16.msra.mxu0 %v5848_v42  ;;  %4827 = vmatprep.subr.bf16.mxu1 %v4826_v43  ;;  %v1434_v42 = vld [vmem:[%s7147_s22 + $0x23a0] sm:$0xff]  ;;  %v5870_v43 = vpack.c.bf16 %v1437_v36, %v1435_v35  ;;  %v4848_v49 = vpack.c.bf16 %v412_v41, %v410_v40  ;;  %v432_v41 = vld [vmem:[%s7147_s22 + $0x450] sm:$0xff] }
  0xa6   : > { %5851 = vmatprep.subr.bf16.mxu0 %v5850_v47  ;;  %v1439_v47 = vld [vmem:[%s7147_s22 + $0x23c8] sm:$0xff]  ;;  %v5872_v50 = vpack.c.bf16 %v1436_v44, %v1434_v42  ;;  %v235_v35 = vld [vmem:[%s7165_s29 + $0x28] sm:$0xff]  ;;  %v1456_v44 = vld [vmem:[%s7147_s22 + $0x2450] sm:$0xff] }
  0xa7   : > { %v430_v40 = vld [vmem:[%s7147_s22 + $0x440] sm:$0xff] }
  0xa8   : > { %4829 = vmatpush1.bf16.msra.mxu1 %v4828_v53  ;;  %v416_v53 = vld [vmem:[%s7147_s22 + $0x3d0] sm:$0xff]  ;;  %v1454_v42 = vld [vmem:[%s7147_s22 + $0x2440] sm:$0xff] }
  0xa9   : > { %5853 = vmatpush1.bf16.msra.mxu0 %v5852_v54  ;;  %4831 = vmatprep.subr.bf16.mxu1 %v4830_v55  ;;  %v1438_v54 = vld [vmem:[%s7147_s22 + $0x23c0] sm:$0xff]  ;;  %v5874_v55 = vpack.c.bf16 %v1441_v48, %v1439_v47  ;;  %v4852_v61 = vpack.c.bf16 %v416_v53, %v414_v52  ;;  %v1459_v47 = vld [vmem:[%s7147_s22 + $0x2468] sm:$0xff]  ;;  %v1461_v48 = vld [vmem:[%s7147_s22 + $0x2478] sm:$0xff] }
  0xaa   : > { %5855 = vmatprep.subr.bf16.mxu0 %v5854_v59  ;;  %v1443_v59 = vld [vmem:[%s7147_s22 + $0x23e8] sm:$0xff]  ;;  %v5876_v62 = vpack.c.bf16 %v1440_v56, %v1438_v54  ;;  %v434_v52 = vld [vmem:[%s7147_s22 + $0x460] sm:$0xff]  ;;  %v436_v53 = vld [vmem:[%s7147_s22 + $0x470] sm:$0xff] }
  0xab   : > { %v1458_v54 = vld [vmem:[%s7147_s22 + $0x2460] sm:$0xff]  ;;  %v1460_v56 = vld [vmem:[%s7147_s22 + $0x2470] sm:$0xff] }
  0xac   : > { %4833 = vmatpush1.bf16.msra.mxu1 %v4832_v1  ;;  %v420_v1 = vld [vmem:[%s7147_s22 + $0x3f0] sm:$0xff] }
  0xad   : > { %5857 = vmatpush1.bf16.msra.mxu0 %v5856_v2  ;;  %4835 = vmatprep.subr.bf16.mxu1 %v4834_v3  ;;  %v1442_v2 = vld [vmem:[%s7147_s22 + $0x23e0] sm:$0xff]  ;;  %v5878_v3 = vpack.c.bf16 %v1445_v60, %v1443_v59  ;;  %v4856_v9 = vpack.c.bf16 %v420_v1, %v418_v0  ;;  %v1463_v59 = vld [vmem:[%s7147_s22 + $0x2488] sm:$0xff]  ;;  %v1465_v60 = vld [vmem:[%s7147_s22 + $0x2498] sm:$0xff] }
  0xae   : > { %5859 = vmatprep.subr.bf16.mxu0 %v5858_v7  ;;  %v1447_v7 = vld [vmem:[%s7147_s22 + $0x2408] sm:$0xff]  ;;  %v5880_v10 = vpack.c.bf16 %v1444_v4, %v1442_v2  ;;  %v438_v0 = vld [vmem:[%s7147_s22 + $0x480] sm:$0xff]  ;;  %v440_v1 = vld [vmem:[%s7147_s22 + $0x490] sm:$0xff] }
  0xaf   : > { %v1462_v2 = vld [vmem:[%s7147_s22 + $0x2480] sm:$0xff]  ;;  %v1464_v4 = vld [vmem:[%s7147_s22 + $0x2490] sm:$0xff] }
  0xb0   : > { %4837 = vmatpush1.bf16.msra.mxu1 %v4836_v13  ;;  %v424_v13 = vld [vmem:[%s7147_s22 + $0x410] sm:$0xff] }
  0xb1   : > { %5861 = vmatpush1.bf16.msra.mxu0 %v5860_v14  ;;  %4839 = vmatprep.subr.bf16.mxu1 %v4838_v15  ;;  %v1446_v14 = vld [vmem:[%s7147_s22 + $0x2400] sm:$0xff]  ;;  %v5882_v15 = vpack.c.bf16 %v1449_v8, %v1447_v7  ;;  %v4860_v22 = vpack.c.bf16 %v424_v13, %v422_v12  ;;  %v1467_v7 = vld [vmem:[%s7147_s22 + $0x24a8] sm:$0xff]  ;;  %v1469_v8 = vld [vmem:[%s7147_s22 + $0x24b8] sm:$0xff] }
  0xb2   : > { %5863 = vmatprep.subr.bf16.mxu0 %v5862_v19  ;;  %v1451_v19 = vld [vmem:[%s7147_s22 + $0x2428] sm:$0xff]  ;;  %v5884_v24 = vpack.c.bf16 %v1448_v16, %v1446_v14  ;;  %v442_v12 = vld [vmem:[%s7147_s22 + $0x4a0] sm:$0xff]  ;;  %v444_v13 = vld [vmem:[%s7147_s22 + $0x4b0] sm:$0xff] }
  0xb3   : > { %v5886_v29 = vpack.c.bf16 %v1453_v20, %v1451_v19  ;;  %v1466_v14 = vld [vmem:[%s7147_s22 + $0x24a0] sm:$0xff]  ;;  %v1468_v16 = vld [vmem:[%s7147_s22 + $0x24b0] sm:$0xff]  ;;  %v1471_v19 = vld [vmem:[%s7147_s22 + $0x24c8] sm:$0xff] }
  0xb4   : > { %4841 = vmatpush1.bf16.msra.mxu1 %v4840_v25  ;;  %v4862_v25 = vpack.c.bf16 %v429_v18, %v427_v17  ;;  %v447_v17 = vld [vmem:[%s7147_s22 + $0x4c8] sm:$0xff]  ;;  %v449_v18 = vld [vmem:[%s7147_s22 + $0x4d8] sm:$0xff] }
  0xb5   : > { %5865 = vmatpush1.bf16.msra.mxu0 %v5864_v26  ;;  %4843 = vmatprep.subr.bf16.mxu1 %v4842_v27  ;;  %v426_v26 = vld [vmem:[%s7147_s22 + $0x420] sm:$0xff]  ;;  %v428_v27 = vld [vmem:[%s7147_s22 + $0x430] sm:$0xff]  ;;  %v1473_v20 = vld [vmem:[%s7147_s22 + $0x24d8] sm:$0xff] }
  0xb6   : > { %5867 = vmatprep.subr.bf16.mxu0 %v5866_v31  ;;  %v431_v31 = vld [vmem:[%s7147_s22 + $0x448] sm:$0xff]  ;;  %v4864_v36 = vpack.c.bf16 %v428_v27, %v426_v26  ;;  %v1470_v26 = vld [vmem:[%s7147_s22 + $0x24c0] sm:$0xff]  ;;  %v5906_v27 = vpack.c.bf16 %v1473_v20, %v1471_v19 }
  0xb7   : > { %v466_v20 = vld [vmem:[%s7147_s22 + $0x560] sm:$0xff] }
  0xb8   : > { %4845 = vmatpush1.bf16.msra.mxu1 %v4844_v37  ;;  %v267_v37 = vld [vmem:[%s7165_s29 + $0x128] sm:$0xff] }
  0xb9   : > { %5869 = vmatpush1.bf16.msra.mxu0 %v5868_v38  ;;  %4847 = vmatprep.subr.bf16.mxu1 %v4846_v39  ;;  %v5888_v38 = vpack.c.bf16 %v1452_v30, %v1450_v28  ;;  %v4866_v39 = vpack.c.bf16 %v433_v32, %v431_v31  ;;  %v1472_v28 = vld [vmem:[%s7147_s22 + $0x24d0] sm:$0xff]  ;;  %v453_v30 = vld [vmem:[%s7147_s22 + $0x4f8] sm:$0xff]  ;;  %v1475_v31 = vld [vmem:[%s7147_s22 + $0x24e8] sm:$0xff] }
  0xba   : > { %5871 = vmatprep.subr.bf16.mxu0 %v5870_v43  ;;  %v5890_v43 = vpack.c.bf16 %v1457_v34, %v1455_v33  ;;  %v1477_v32 = vld [vmem:[%s7147_s22 + $0x24f8] sm:$0xff]  ;;  %v5908_v34 = vpack.c.bf16 %v1472_v28, %v1470_v26 }
  0xbb   : > { %v473_v26 = vld [vmem:[%s7147_s22 + $0x598] sm:$0xff] }
  0xbc   : > { %4849 = vmatpush1.bf16.msra.mxu1 %v4848_v49  ;;  %v4868_v49 = vpack.c.bf16 %v432_v41, %v430_v40  ;;  %v1476_v40 = vld [vmem:[%s7147_s22 + $0x24f0] sm:$0xff]  ;;  %v455_v41 = vld [vmem:[%s7147_s22 + $0x508] sm:$0xff]  ;;  %v1497_v28 = vld [vmem:[%s7147_s22 + $0x2598] sm:$0xff] }
  0xbd   : > { %5873 = vmatpush1.bf16.msra.mxu0 %v5872_v50  ;;  %4851 = vmatprep.subr.bf16.mxu1 %v4850_v51  ;;  %v5892_v50 = vpack.c.bf16 %v1456_v44, %v1454_v42  ;;  %v4870_v51 = vpack.c.bf16 %v437_v46, %v435_v45  ;;  %v457_v42 = vld [vmem:[%s7147_s22 + $0x518] sm:$0xff] }
  0xbe   : > { %5875 = vmatprep.subr.bf16.mxu0 %v5874_v55  ;;  %v5894_v55 = vpack.c.bf16 %v1461_v48, %v1459_v47  ;;  %v1481_v44 = vld [vmem:[%s7147_s22 + $0x2518] sm:$0xff]  ;;  %v4890_v47 = vpack.c.bf16 %v457_v42, %v455_v41  ;;  %v454_v48 = vld [vmem:[%s7147_s22 + $0x500] sm:$0xff] }
  0xc0   : > { %4853 = vmatpush1.bf16.msra.mxu1 %v4852_v61  ;;  %v4872_v61 = vpack.c.bf16 %v436_v53, %v434_v52  ;;  %v1480_v52 = vld [vmem:[%s7147_s22 + $0x2510] sm:$0xff]  ;;  %v459_v53 = vld [vmem:[%s7147_s22 + $0x528] sm:$0xff] }
  0xc1   : > { %5877 = vmatpush1.bf16.msra.mxu0 %v5876_v62  ;;  %4855 = vmatprep.subr.bf16.mxu1 %v4854_v63  ;;  %v5896_v62 = vpack.c.bf16 %v1460_v56, %v1458_v54  ;;  %v4874_v63 = vpack.c.bf16 %v441_v58, %v439_v57  ;;  %v461_v54 = vld [vmem:[%s7147_s22 + $0x538] sm:$0xff] }
  0xc2   : > { %5879 = vmatprep.subr.bf16.mxu0 %v5878_v3  ;;  %v5898_v3 = vpack.c.bf16 %v1465_v60, %v1463_v59  ;;  %v1485_v56 = vld [vmem:[%s7147_s22 + $0x2538] sm:$0xff]  ;;  %v4894_v59 = vpack.c.bf16 %v461_v54, %v459_v53  ;;  %v458_v60 = vld [vmem:[%s7147_s22 + $0x520] sm:$0xff] }
  0xc4   : > { %4857 = vmatpush1.bf16.msra.mxu1 %v4856_v9  ;;  %v4876_v9 = vpack.c.bf16 %v440_v1, %v438_v0  ;;  %v1484_v0 = vld [vmem:[%s7147_s22 + $0x2530] sm:$0xff]  ;;  %v463_v1 = vld [vmem:[%s7147_s22 + $0x548] sm:$0xff] }
  0xc5   : > { %5881 = vmatpush1.bf16.msra.mxu0 %v5880_v10  ;;  %4859 = vmatprep.subr.bf16.mxu1 %v4858_v11  ;;  %v5900_v10 = vpack.c.bf16 %v1464_v4, %v1462_v2  ;;  %v4878_v11 = vpack.c.bf16 %v445_v6, %v443_v5  ;;  %v465_v2 = vld [vmem:[%s7147_s22 + $0x558] sm:$0xff] }
  0xc6   : > { %5883 = vmatprep.subr.bf16.mxu0 %v5882_v15  ;;  %v5902_v15 = vpack.c.bf16 %v1469_v8, %v1467_v7  ;;  %v1489_v4 = vld [vmem:[%s7147_s22 + $0x2558] sm:$0xff]  ;;  %v4898_v7 = vpack.c.bf16 %v465_v2, %v463_v1  ;;  %v462_v8 = vld [vmem:[%s7147_s22 + $0x540] sm:$0xff] }
  0xc7   : > { %2478 = vmatmul.mubr.f32.vlgmr.msra.gmra.mrb[0].mxu1 %v232_v21  ;;  %v4880_v21 = vpack.c.bf16 %v444_v13, %v442_v12  ;;  %v1488_v12 = vld [vmem:[%s7147_s22 + $0x2550] sm:$0xff]  ;;  %v467_v13 = vld [vmem:[%s7147_s22 + $0x568] sm:$0xff] }
  0xc8   : > { %4861 = vmatpush1.bf16.msra.mxu1 %v4860_v22  ;;  %3614 = vmatmul.mubr.f32.vlgmr.msra.gmra.mrb[0].mxu0 %v264_v23  ;;  %v5904_v22 = vpack.c.bf16 %v1468_v16, %v1466_v14  ;;  %v4882_v23 = vpack.c.bf16 %v449_v18, %v447_v17  ;;  %v469_v14 = vld [vmem:[%s7147_s22 + $0x578] sm:$0xff] }
  0xc9   : > { %5885 = vmatpush1.bf16.msra.mxu0 %v5884_v24  ;;  %4863 = vmatprep.subr.bf16.mxu1 %v4862_v25  ;;  %v446_v24 = vld [vmem:[%s7147_s22 + $0x4c0] sm:$0xff]  ;;  %v448_v25 = vld [vmem:[%s7147_s22 + $0x4d0] sm:$0xff]  ;;  %v1493_v16 = vld [vmem:[%s7147_s22 + $0x2578] sm:$0xff]  ;;  %v4902_v19 = vpack.c.bf16 %v469_v14, %v467_v13 }
  0xca   : > { %5887 = vmatprep.subr.bf16.mxu0 %v5886_v29  ;;  %2548 = vmatprep.mubr.f32.mxu1 %v235_v35  ;;  %v451_v29 = vld [vmem:[%s7147_s22 + $0x4e8] sm:$0xff]  ;;  %v4884_v33 = vpack.c.bf16 %v448_v25, %v446_v24  ;;  %v1492_v24 = vld [vmem:[%s7147_s22 + $0x2570] sm:$0xff] }
  0xcb   : > { %3684 = vmatprep.mubr.f32.mxu0 %v267_v37  ;;  %v4886_v35 = vpack.c.bf16 %v453_v30, %v451_v29  ;;  %v452_v37 = vld [vmem:[%s7147_s22 + $0x4f0] sm:$0xff]  ;;  %v471_v25 = vld [vmem:[%s7147_s22 + $0x588] sm:$0xff] }
  0xcc   : > { %4865 = vmatpush1.bf16.msra.mxu1 %v4864_v36  ;;  %v450_v36 = vld [vmem:[%s7147_s22 + $0x4e0] sm:$0xff] }
  0xcd   : > { %5889 = vmatpush1.bf16.msra.mxu0 %v5888_v38  ;;  %4867 = vmatprep.subr.bf16.mxu1 %v4866_v39  ;;  %v1474_v38 = vld [vmem:[%s7147_s22 + $0x24e0] sm:$0xff]  ;;  %v5910_v39 = vpack.c.bf16 %v1477_v32, %v1475_v31  ;;  %v4888_v45 = vpack.c.bf16 %v452_v37, %v450_v36  ;;  %v4906_v31 = vpack.c.bf16 %v473_v26, %v471_v25  ;;  %v1496_v36 = vld [vmem:[%s7147_s22 + $0x2590] sm:$0xff]  ;;  %v475_v37 = vld [vmem:[%s7147_s22 + $0x5a8] sm:$0xff] }
  0xce   : > { %5891 = vmatprep.subr.bf16.mxu0 %v5890_v43  ;;  %v1479_v43 = vld [vmem:[%s7147_s22 + $0x2508] sm:$0xff]  ;;  %v5912_v46 = vpack.c.bf16 %v1476_v40, %v1474_v38  ;;  %v470_v32 = vld [vmem:[%s7147_s22 + $0x580] sm:$0xff]  ;;  %v477_v38 = vld [vmem:[%s7147_s22 + $0x5b8] sm:$0xff] }
  0xcf   : > { %v1501_v40 = vld [vmem:[%s7147_s22 + $0x25b8] sm:$0xff] }
  0xd0   : > { %4869 = vmatpush1.bf16.msra.mxu1 %v4868_v49  ;;  %v456_v49 = vld [vmem:[%s7147_s22 + $0x510] sm:$0xff]  ;;  %v234_v25 = vld [vmem:[%s7165_s29 + $0x20] sm:$0xff] }
  0xd1   : > { %5893 = vmatpush1.bf16.msra.mxu0 %v5892_v50  ;;  %4871 = vmatprep.subr.bf16.mxu1 %v4870_v51  ;;  %v1478_v50 = vld [vmem:[%s7147_s22 + $0x2500] sm:$0xff]  ;;  %v5914_v51 = vpack.c.bf16 %v1481_v44, %v1479_v43  ;;  %v4892_v57 = vpack.c.bf16 %v456_v49, %v454_v48  ;;  %v4910_v43 = vpack.c.bf16 %v477_v38, %v475_v37  ;;  %v1500_v48 = vld [vmem:[%s7147_s22 + $0x25b0] sm:$0xff]  ;;  %v479_v49 = vld [vmem:[%s7147_s22 + $0x5c8] sm:$0xff] }
  0xd2   : > { %5895 = vmatprep.subr.bf16.mxu0 %v5894_v55  ;;  %v1483_v55 = vld [vmem:[%s7147_s22 + $0x2528] sm:$0xff]  ;;  %v5916_v58 = vpack.c.bf16 %v1480_v52, %v1478_v50  ;;  %v474_v44 = vld [vmem:[%s7147_s22 + $0x5a0] sm:$0xff]  ;;  %v481_v50 = vld [vmem:[%s7147_s22 + $0x5d8] sm:$0xff] }
  0xd3   : > { %v1505_v52 = vld [vmem:[%s7147_s22 + $0x25d8] sm:$0xff]  ;;  %v1519_v37 = vld [vmem:[%s7147_s22 + $0x2648] sm:$0xff] }
  0xd4   : > { %4873 = vmatpush1.bf16.msra.mxu1 %v4872_v61  ;;  %v460_v61 = vld [vmem:[%s7147_s22 + $0x530] sm:$0xff]  ;;  %v1521_v38 = vld [vmem:[%s7147_s22 + $0x2658] sm:$0xff] }
  0xd5   : > { %5897 = vmatpush1.bf16.msra.mxu0 %v5896_v62  ;;  %4875 = vmatprep.subr.bf16.mxu1 %v4874_v63  ;;  %v1482_v62 = vld [vmem:[%s7147_s22 + $0x2520] sm:$0xff]  ;;  %v5918_v63 = vpack.c.bf16 %v1485_v56, %v1483_v55  ;;  %v4896_v5 = vpack.c.bf16 %v460_v61, %v458_v60  ;;  %v4914_v55 = vpack.c.bf16 %v481_v50, %v479_v49  ;;  %v1504_v60 = vld [vmem:[%s7147_s22 + $0x25d0] sm:$0xff]  ;;  %v483_v61 = vld [vmem:[%s7147_s22 + $0x5e8] sm:$0xff] }
  0xd6   : > { %5899 = vmatprep.subr.bf16.mxu0 %v5898_v3  ;;  %v1487_v3 = vld [vmem:[%s7147_s22 + $0x2548] sm:$0xff]  ;;  %v5920_v6 = vpack.c.bf16 %v1484_v0, %v1482_v62  ;;  %v478_v56 = vld [vmem:[%s7147_s22 + $0x5c0] sm:$0xff]  ;;  %v485_v62 = vld [vmem:[%s7147_s22 + $0x5f8] sm:$0xff] }
  0xd7   : > { %v1509_v0 = vld [vmem:[%s7147_s22 + $0x25f8] sm:$0xff]  ;;  %v499_v49 = vld [vmem:[%s7147_s22 + $0x668] sm:$0xff] }
  0xd8   : > { %4877 = vmatpush1.bf16.msra.mxu1 %v4876_v9  ;;  %v464_v9 = vld [vmem:[%s7147_s22 + $0x550] sm:$0xff]  ;;  %v501_v50 = vld [vmem:[%s7147_s22 + $0x678] sm:$0xff] }
  0xd9   : > { %5901 = vmatpush1.bf16.msra.mxu0 %v5900_v10  ;;  %4879 = vmatprep.subr.bf16.mxu1 %v4878_v11  ;;  %v1486_v10 = vld [vmem:[%s7147_s22 + $0x2540] sm:$0xff]  ;;  %v5922_v11 = vpack.c.bf16 %v1489_v4, %v1487_v3  ;;  %v4900_v17 = vpack.c.bf16 %v464_v9, %v462_v8  ;;  %v4918_v3 = vpack.c.bf16 %v485_v62, %v483_v61  ;;  %v1508_v8 = vld [vmem:[%s7147_s22 + $0x25f0] sm:$0xff]  ;;  %v487_v9 = vld [vmem:[%s7147_s22 + $0x608] sm:$0xff] }
  0xda   : > { %5903 = vmatprep.subr.bf16.mxu0 %v5902_v15  ;;  %v1491_v15 = vld [vmem:[%s7147_s22 + $0x2568] sm:$0xff]  ;;  %v5924_v18 = vpack.c.bf16 %v1488_v12, %v1486_v10  ;;  %v482_v4 = vld [vmem:[%s7147_s22 + $0x5e0] sm:$0xff]  ;;  %v489_v10 = vld [vmem:[%s7147_s22 + $0x618] sm:$0xff] }
  0xdb   : > { %v1513_v12 = vld [vmem:[%s7147_s22 + $0x2618] sm:$0xff]  ;;  %v503_v61 = vld [vmem:[%s7147_s22 + $0x688] sm:$0xff] }
  0xdc   : > { %4881 = vmatpush1.bf16.msra.mxu1 %v4880_v21  ;;  %v468_v21 = vld [vmem:[%s7147_s22 + $0x570] sm:$0xff]  ;;  %v505_v62 = vld [vmem:[%s7147_s22 + $0x698] sm:$0xff] }
  0xdd   : > { %5905 = vmatpush1.bf16.msra.mxu0 %v5904_v22  ;;  %4883 = vmatprep.subr.bf16.mxu1 %v4882_v23  ;;  %v1490_v22 = vld [vmem:[%s7147_s22 + $0x2560] sm:$0xff]  ;;  %v5926_v23 = vpack.c.bf16 %v1493_v16, %v1491_v15  ;;  %v4904_v29 = vpack.c.bf16 %v468_v21, %v466_v20  ;;  %v4922_v15 = vpack.c.bf16 %v489_v10, %v487_v9  ;;  %v1512_v20 = vld [vmem:[%s7147_s22 + $0x2610] sm:$0xff]  ;;  %v491_v21 = vld [vmem:[%s7147_s22 + $0x628] sm:$0xff] }
  0xde   : > { %5907 = vmatprep.subr.bf16.mxu0 %v5906_v27  ;;  %v1495_v27 = vld [vmem:[%s7147_s22 + $0x2588] sm:$0xff]  ;;  %v5928_v30 = vpack.c.bf16 %v1492_v24, %v1490_v22  ;;  %v486_v16 = vld [vmem:[%s7147_s22 + $0x600] sm:$0xff]  ;;  %v493_v22 = vld [vmem:[%s7147_s22 + $0x638] sm:$0xff] }
  0xdf   : > { %v1517_v24 = vld [vmem:[%s7147_s22 + $0x2638] sm:$0xff]  ;;  %v507_v9 = vld [vmem:[%s7147_s22 + $0x6a8] sm:$0xff] }
  0xe0   : > { %4885 = vmatpush1.bf16.msra.mxu1 %v4884_v33  ;;  %v472_v33 = vld [vmem:[%s7147_s22 + $0x590] sm:$0xff]  ;;  %v509_v10 = vld [vmem:[%s7147_s22 + $0x6b8] sm:$0xff] }
  0xe1   : > { %5909 = vmatpush1.bf16.msra.mxu0 %v5908_v34  ;;  %4887 = vmatprep.subr.bf16.mxu1 %v4886_v35  ;;  %v1494_v34 = vld [vmem:[%s7147_s22 + $0x2580] sm:$0xff]  ;;  %v5930_v35 = vpack.c.bf16 %v1497_v28, %v1495_v27  ;;  %v4908_v41 = vpack.c.bf16 %v472_v33, %v470_v32  ;;  %v266_v27 = vld [vmem:[%s7165_s29 + $0x120] sm:$0xff] }
  0xe2   : > { %5911 = vmatprep.subr.bf16.mxu0 %v5910_v39  ;;  %v1499_v39 = vld [vmem:[%s7147_s22 + $0x25a8] sm:$0xff]  ;;  %v5932_v42 = vpack.c.bf16 %v1496_v36, %v1494_v34  ;;  %v1514_v32 = vld [vmem:[%s7147_s22 + $0x2620] sm:$0xff]  ;;  %v1516_v34 = vld [vmem:[%s7147_s22 + $0x2630] sm:$0xff] }
  0xe3   : > { %v497_v36 = vld [vmem:[%s7147_s22 + $0x658] sm:$0xff] }
  0xe4   : > { %4889 = vmatpush1.bf16.msra.mxu1 %v4888_v45  ;;  %v476_v45 = vld [vmem:[%s7147_s22 + $0x5b0] sm:$0xff] }
  0xe5   : > { %5913 = vmatpush1.bf16.msra.mxu0 %v5912_v46  ;;  %4891 = vmatprep.subr.bf16.mxu1 %v4890_v47  ;;  %v1498_v46 = vld [vmem:[%s7147_s22 + $0x25a0] sm:$0xff]  ;;  %v5934_v47 = vpack.c.bf16 %v1501_v40, %v1499_v39  ;;  %v4912_v53 = vpack.c.bf16 %v476_v45, %v474_v44  ;;  %v237_v39 = vld [vmem:[%s7165_s29 + $0x38] sm:$0xff] }
  0xe6   : > { %5915 = vmatprep.subr.bf16.mxu0 %v5914_v51  ;;  %v1503_v51 = vld [vmem:[%s7147_s22 + $0x25c8] sm:$0xff]  ;;  %v5936_v54 = vpack.c.bf16 %v1500_v48, %v1498_v46  ;;  %v494_v44 = vld [vmem:[%s7147_s22 + $0x640] sm:$0xff]  ;;  %v496_v45 = vld [vmem:[%s7147_s22 + $0x650] sm:$0xff] }
  0xe7   : > { %v1518_v46 = vld [vmem:[%s7147_s22 + $0x2640] sm:$0xff]  ;;  %v1520_v48 = vld [vmem:[%s7147_s22 + $0x2650] sm:$0xff] }
  0xe8   : > { %4893 = vmatpush1.bf16.msra.mxu1 %v4892_v57  ;;  %v480_v57 = vld [vmem:[%s7147_s22 + $0x5d0] sm:$0xff] }
  0xe9   : > { %5917 = vmatpush1.bf16.msra.mxu0 %v5916_v58  ;;  %4895 = vmatprep.subr.bf16.mxu1 %v4894_v59  ;;  %v1502_v58 = vld [vmem:[%s7147_s22 + $0x25c0] sm:$0xff]  ;;  %v5938_v59 = vpack.c.bf16 %v1505_v52, %v1503_v51  ;;  %v4916_v1 = vpack.c.bf16 %v480_v57, %v478_v56  ;;  %v1523_v51 = vld [vmem:[%s7147_s22 + $0x2668] sm:$0xff]  ;;  %v1525_v52 = vld [vmem:[%s7147_s22 + $0x2678] sm:$0xff] }
  0xea   : > { %5919 = vmatprep.subr.bf16.mxu0 %v5918_v63  ;;  %v1507_v63 = vld [vmem:[%s7147_s22 + $0x25e8] sm:$0xff]  ;;  %v5940_v2 = vpack.c.bf16 %v1504_v60, %v1502_v58  ;;  %v498_v56 = vld [vmem:[%s7147_s22 + $0x660] sm:$0xff]  ;;  %v500_v57 = vld [vmem:[%s7147_s22 + $0x670] sm:$0xff] }
  0xeb   : > { %v1522_v58 = vld [vmem:[%s7147_s22 + $0x2660] sm:$0xff]  ;;  %v1524_v60 = vld [vmem:[%s7147_s22 + $0x2670] sm:$0xff] }
  0xec   : > { %4897 = vmatpush1.bf16.msra.mxu1 %v4896_v5  ;;  %v484_v5 = vld [vmem:[%s7147_s22 + $0x5f0] sm:$0xff] }
  0xed   : > { %5921 = vmatpush1.bf16.msra.mxu0 %v5920_v6  ;;  %4899 = vmatprep.subr.bf16.mxu1 %v4898_v7  ;;  %v1506_v6 = vld [vmem:[%s7147_s22 + $0x25e0] sm:$0xff]  ;;  %v5942_v7 = vpack.c.bf16 %v1509_v0, %v1507_v63  ;;  %v4920_v13 = vpack.c.bf16 %v484_v5, %v482_v4  ;;  %v1527_v63 = vld [vmem:[%s7147_s22 + $0x2688] sm:$0xff]  ;;  %v1529_v0 = vld [vmem:[%s7147_s22 + $0x2698] sm:$0xff] }
  0xee   : > { %5923 = vmatprep.subr.bf16.mxu0 %v5922_v11  ;;  %v1511_v11 = vld [vmem:[%s7147_s22 + $0x2608] sm:$0xff]  ;;  %v5944_v14 = vpack.c.bf16 %v1508_v8, %v1506_v6  ;;  %v502_v4 = vld [vmem:[%s7147_s22 + $0x680] sm:$0xff]  ;;  %v504_v5 = vld [vmem:[%s7147_s22 + $0x690] sm:$0xff] }
  0xef   : > { %v1526_v6 = vld [vmem:[%s7147_s22 + $0x2680] sm:$0xff]  ;;  %v1528_v8 = vld [vmem:[%s7147_s22 + $0x2690] sm:$0xff] }
  0xf0   : > { %4901 = vmatpush1.bf16.msra.mxu1 %v4900_v17  ;;  %v488_v17 = vld [vmem:[%s7147_s22 + $0x610] sm:$0xff] }
  0xf1   : > { %5925 = vmatpush1.bf16.msra.mxu0 %v5924_v18  ;;  %4903 = vmatprep.subr.bf16.mxu1 %v4902_v19  ;;  %v1510_v18 = vld [vmem:[%s7147_s22 + $0x2600] sm:$0xff]  ;;  %v5946_v19 = vpack.c.bf16 %v1513_v12, %v1511_v11  ;;  %v4924_v26 = vpack.c.bf16 %v488_v17, %v486_v16  ;;  %v1531_v11 = vld [vmem:[%s7147_s22 + $0x26a8] sm:$0xff]  ;;  %v1533_v12 = vld [vmem:[%s7147_s22 + $0x26b8] sm:$0xff] }
  0xf2   : > { %5927 = vmatprep.subr.bf16.mxu0 %v5926_v23  ;;  %v1515_v23 = vld [vmem:[%s7147_s22 + $0x2628] sm:$0xff]  ;;  %v5948_v28 = vpack.c.bf16 %v1512_v20, %v1510_v18  ;;  %v506_v16 = vld [vmem:[%s7147_s22 + $0x6a0] sm:$0xff]  ;;  %v508_v17 = vld [vmem:[%s7147_s22 + $0x6b0] sm:$0xff] }
  0xf3   : > { %v5950_v33 = vpack.c.bf16 %v1517_v24, %v1515_v23  ;;  %v1530_v18 = vld [vmem:[%s7147_s22 + $0x26a0] sm:$0xff]  ;;  %v1532_v20 = vld [vmem:[%s7147_s22 + $0x26b0] sm:$0xff]  ;;  %v1535_v23 = vld [vmem:[%s7147_s22 + $0x26c8] sm:$0xff] }
  0xf4   : > { %4905 = vmatpush1.bf16.msra.mxu1 %v4904_v29  ;;  %v4926_v29 = vpack.c.bf16 %v493_v22, %v491_v21  ;;  %v511_v21 = vld [vmem:[%s7147_s22 + $0x6c8] sm:$0xff]  ;;  %v513_v22 = vld [vmem:[%s7147_s22 + $0x6d8] sm:$0xff] }
  0xf5   : > { %5929 = vmatpush1.bf16.msra.mxu0 %v5928_v30  ;;  %4907 = vmatprep.subr.bf16.mxu1 %v4906_v31  ;;  %v490_v30 = vld [vmem:[%s7147_s22 + $0x620] sm:$0xff]  ;;  %v492_v31 = vld [vmem:[%s7147_s22 + $0x630] sm:$0xff]  ;;  %v1537_v24 = vld [vmem:[%s7147_s22 + $0x26d8] sm:$0xff] }
  0xf6   : > { %5931 = vmatprep.subr.bf16.mxu0 %v5930_v35  ;;  %v495_v35 = vld [vmem:[%s7147_s22 + $0x648] sm:$0xff]  ;;  %v4928_v40 = vpack.c.bf16 %v492_v31, %v490_v30  ;;  %v1534_v30 = vld [vmem:[%s7147_s22 + $0x26c0] sm:$0xff]  ;;  %v5970_v31 = vpack.c.bf16 %v1537_v24, %v1535_v23 }
  0xf7   : > { %v530_v24 = vld [vmem:[%s7147_s22 + $0x760] sm:$0xff] }
  0xf8   : > { %4909 = vmatpush1.bf16.msra.mxu1 %v4908_v41  ;;  %v269_v41 = vld [vmem:[%s7165_s29 + $0x138] sm:$0xff] }
  0xf9   : > { %5933 = vmatpush1.bf16.msra.mxu0 %v5932_v42  ;;  %4911 = vmatprep.subr.bf16.mxu1 %v4910_v43  ;;  %v5952_v42 = vpack.c.bf16 %v1516_v34, %v1514_v32  ;;  %v4930_v43 = vpack.c.bf16 %v497_v36, %v495_v35  ;;  %v1536_v32 = vld [vmem:[%s7147_s22 + $0x26d0] sm:$0xff]  ;;  %v517_v34 = vld [vmem:[%s7147_s22 + $0x6f8] sm:$0xff]  ;;  %v1539_v35 = vld [vmem:[%s7147_s22 + $0x26e8] sm:$0xff] }
  0xfa   : > { %5935 = vmatprep.subr.bf16.mxu0 %v5934_v47  ;;  %v5954_v47 = vpack.c.bf16 %v1521_v38, %v1519_v37  ;;  %v1541_v36 = vld [vmem:[%s7147_s22 + $0x26f8] sm:$0xff]  ;;  %v5972_v38 = vpack.c.bf16 %v1536_v32, %v1534_v30 }
  0xfb   : > { %v537_v30 = vld [vmem:[%s7147_s22 + $0x798] sm:$0xff] }
  0xfc   : > { %4913 = vmatpush1.bf16.msra.mxu1 %v4912_v53  ;;  %v4932_v53 = vpack.c.bf16 %v496_v45, %v494_v44  ;;  %v1540_v44 = vld [vmem:[%s7147_s22 + $0x26f0] sm:$0xff]  ;;  %v519_v45 = vld [vmem:[%s7147_s22 + $0x708] sm:$0xff]  ;;  %v1561_v32 = vld [vmem:[%s7147_s22 + $0x2798] sm:$0xff] }
  0xfd   : > { %5937 = vmatpush1.bf16.msra.mxu0 %v5936_v54  ;;  %4915 = vmatprep.subr.bf16.mxu1 %v4914_v55  ;;  %v5956_v54 = vpack.c.bf16 %v1520_v48, %v1518_v46  ;;  %v4934_v55 = vpack.c.bf16 %v501_v50, %v499_v49  ;;  %v521_v46 = vld [vmem:[%s7147_s22 + $0x718] sm:$0xff] }
  0xfe   : > { %5939 = vmatprep.subr.bf16.mxu0 %v5938_v59  ;;  %v5958_v59 = vpack.c.bf16 %v1525_v52, %v1523_v51  ;;  %v1545_v48 = vld [vmem:[%s7147_s22 + $0x2718] sm:$0xff]  ;;  %v4954_v51 = vpack.c.bf16 %v521_v46, %v519_v45  ;;  %v518_v52 = vld [vmem:[%s7147_s22 + $0x700] sm:$0xff] }
 0x100   : > { %4917 = vmatpush1.bf16.msra.mxu1 %v4916_v1  ;;  %v4936_v1 = vpack.c.bf16 %v500_v57, %v498_v56  ;;  %v1544_v56 = vld [vmem:[%s7147_s22 + $0x2710] sm:$0xff]  ;;  %v523_v57 = vld [vmem:[%s7147_s22 + $0x728] sm:$0xff] }
 0x101   : > { %5941 = vmatpush1.bf16.msra.mxu0 %v5940_v2  ;;  %4919 = vmatprep.subr.bf16.mxu1 %v4918_v3  ;;  %v5960_v2 = vpack.c.bf16 %v1524_v60, %v1522_v58  ;;  %v4938_v3 = vpack.c.bf16 %v505_v62, %v503_v61  ;;  %v525_v58 = vld [vmem:[%s7147_s22 + $0x738] sm:$0xff] }
 0x102   : > { %5943 = vmatprep.subr.bf16.mxu0 %v5942_v7  ;;  %v5962_v7 = vpack.c.bf16 %v1529_v0, %v1527_v63  ;;  %v1549_v60 = vld [vmem:[%s7147_s22 + $0x2738] sm:$0xff]  ;;  %v4958_v63 = vpack.c.bf16 %v525_v58, %v523_v57  ;;  %v522_v0 = vld [vmem:[%s7147_s22 + $0x720] sm:$0xff] }
 0x104   : > { %4921 = vmatpush1.bf16.msra.mxu1 %v4920_v13  ;;  %v4940_v13 = vpack.c.bf16 %v504_v5, %v502_v4  ;;  %v1548_v4 = vld [vmem:[%s7147_s22 + $0x2730] sm:$0xff]  ;;  %v527_v5 = vld [vmem:[%s7147_s22 + $0x748] sm:$0xff] }
 0x105   : > { %5945 = vmatpush1.bf16.msra.mxu0 %v5944_v14  ;;  %4923 = vmatprep.subr.bf16.mxu1 %v4922_v15  ;;  %v5964_v14 = vpack.c.bf16 %v1528_v8, %v1526_v6  ;;  %v4942_v15 = vpack.c.bf16 %v509_v10, %v507_v9  ;;  %v529_v6 = vld [vmem:[%s7147_s22 + $0x758] sm:$0xff] }
 0x106   : > { %5947 = vmatprep.subr.bf16.mxu0 %v5946_v19  ;;  %v5966_v19 = vpack.c.bf16 %v1533_v12, %v1531_v11  ;;  %v1553_v8 = vld [vmem:[%s7147_s22 + $0x2758] sm:$0xff]  ;;  %v4962_v11 = vpack.c.bf16 %v529_v6, %v527_v5  ;;  %v526_v12 = vld [vmem:[%s7147_s22 + $0x740] sm:$0xff] }
 0x107   : > { %2549 = vmatmul.mubr.f32.vlgmr.msra.gmra.mrb[0].mxu1 %v234_v25  ;;  %v4944_v25 = vpack.c.bf16 %v508_v17, %v506_v16  ;;  %v1552_v16 = vld [vmem:[%s7147_s22 + $0x2750] sm:$0xff]  ;;  %v531_v17 = vld [vmem:[%s7147_s22 + $0x768] sm:$0xff] }
 0x108   : > { %4925 = vmatpush1.bf16.msra.mxu1 %v4924_v26  ;;  %3685 = vmatmul.mubr.f32.vlgmr.msra.gmra.mrb[0].mxu0 %v266_v27  ;;  %v5968_v26 = vpack.c.bf16 %v1532_v20, %v1530_v18  ;;  %v4946_v27 = vpack.c.bf16 %v513_v22, %v511_v21  ;;  %v533_v18 = vld [vmem:[%s7147_s22 + $0x778] sm:$0xff] }
 0x109   : > { %5949 = vmatpush1.bf16.msra.mxu0 %v5948_v28  ;;  %4927 = vmatprep.subr.bf16.mxu1 %v4926_v29  ;;  %v510_v28 = vld [vmem:[%s7147_s22 + $0x6c0] sm:$0xff]  ;;  %v512_v29 = vld [vmem:[%s7147_s22 + $0x6d0] sm:$0xff]  ;;  %v1557_v20 = vld [vmem:[%s7147_s22 + $0x2778] sm:$0xff]  ;;  %v4966_v23 = vpack.c.bf16 %v533_v18, %v531_v17 }
 0x10a   : > { %5951 = vmatprep.subr.bf16.mxu0 %v5950_v33  ;;  %2619 = vmatprep.mubr.f32.mxu1 %v237_v39  ;;  %v515_v33 = vld [vmem:[%s7147_s22 + $0x6e8] sm:$0xff]  ;;  %v4948_v37 = vpack.c.bf16 %v512_v29, %v510_v28  ;;  %v1556_v28 = vld [vmem:[%s7147_s22 + $0x2770] sm:$0xff] }
 0x10b   : > { %3755 = vmatprep.mubr.f32.mxu0 %v269_v41  ;;  %v4950_v39 = vpack.c.bf16 %v517_v34, %v515_v33  ;;  %v516_v41 = vld [vmem:[%s7147_s22 + $0x6f0] sm:$0xff]  ;;  %v535_v29 = vld [vmem:[%s7147_s22 + $0x788] sm:$0xff] }
 0x10c   : > { %4929 = vmatpush1.bf16.msra.mxu1 %v4928_v40  ;;  %v514_v40 = vld [vmem:[%s7147_s22 + $0x6e0] sm:$0xff] }
 0x10d   : > { %5953 = vmatpush1.bf16.msra.mxu0 %v5952_v42  ;;  %4931 = vmatprep.subr.bf16.mxu1 %v4930_v43  ;;  %v1538_v42 = vld [vmem:[%s7147_s22 + $0x26e0] sm:$0xff]  ;;  %v5974_v43 = vpack.c.bf16 %v1541_v36, %v1539_v35  ;;  %v4952_v49 = vpack.c.bf16 %v516_v41, %v514_v40  ;;  %v4970_v35 = vpack.c.bf16 %v537_v30, %v535_v29  ;;  %v1560_v40 = vld [vmem:[%s7147_s22 + $0x2790] sm:$0xff]  ;;  %v539_v41 = vld [vmem:[%s7147_s22 + $0x7a8] sm:$0xff] }
 0x10e   : > { %5955 = vmatprep.subr.bf16.mxu0 %v5954_v47  ;;  %v1543_v47 = vld [vmem:[%s7147_s22 + $0x2708] sm:$0xff]  ;;  %v5976_v50 = vpack.c.bf16 %v1540_v44, %v1538_v42  ;;  %v534_v36 = vld [vmem:[%s7147_s22 + $0x780] sm:$0xff]  ;;  %v541_v42 = vld [vmem:[%s7147_s22 + $0x7b8] sm:$0xff] }
 0x10f   : > { %v1565_v44 = vld [vmem:[%s7147_s22 + $0x27b8] sm:$0xff]  ;;  %v236_v29 = vld [vmem:[%s7165_s29 + $0x30] sm:$0xff] }
 0x110   : > { %4933 = vmatpush1.bf16.msra.mxu1 %v4932_v53  ;;  %v520_v53 = vld [vmem:[%s7147_s22 + $0x710] sm:$0xff] }
 0x111   : > { %5957 = vmatpush1.bf16.msra.mxu0 %v5956_v54  ;;  %4935 = vmatprep.subr.bf16.mxu1 %v4934_v55  ;;  %v1542_v54 = vld [vmem:[%s7147_s22 + $0x2700] sm:$0xff]  ;;  %v5978_v55 = vpack.c.bf16 %v1545_v48, %v1543_v47  ;;  %v4956_v61 = vpack.c.bf16 %v520_v53, %v518_v52  ;;  %v4974_v47 = vpack.c.bf16 %v541_v42, %v539_v41  ;;  %v1564_v52 = vld [vmem:[%s7147_s22 + $0x27b0] sm:$0xff]  ;;  %v543_v53 = vld [vmem:[%s7147_s22 + $0x7c8] sm:$0xff] }
 0x112   : > { %5959 = vmatprep.subr.bf16.mxu0 %v5958_v59  ;;  %v1547_v59 = vld [vmem:[%s7147_s22 + $0x2728] sm:$0xff]  ;;  %v5980_v62 = vpack.c.bf16 %v1544_v56, %v1542_v54  ;;  %v538_v48 = vld [vmem:[%s7147_s22 + $0x7a0] sm:$0xff]  ;;  %v545_v54 = vld [vmem:[%s7147_s22 + $0x7d8] sm:$0xff] }
 0x113   : > { %v1569_v56 = vld [vmem:[%s7147_s22 + $0x27d8] sm:$0xff]  ;;  %v1583_v41 = vld [vmem:[%s7147_s22 + $0x2848] sm:$0xff] }
 0x114   : > { %4937 = vmatpush1.bf16.msra.mxu1 %v4936_v1  ;;  %v524_v1 = vld [vmem:[%s7147_s22 + $0x730] sm:$0xff]  ;;  %v1585_v42 = vld [vmem:[%s7147_s22 + $0x2858] sm:$0xff] }
 0x115   : > { %5961 = vmatpush1.bf16.msra.mxu0 %v5960_v2  ;;  %4939 = vmatprep.subr.bf16.mxu1 %v4938_v3  ;;  %v1546_v2 = vld [vmem:[%s7147_s22 + $0x2720] sm:$0xff]  ;;  %v5982_v3 = vpack.c.bf16 %v1549_v60, %v1547_v59  ;;  %v4960_v9 = vpack.c.bf16 %v524_v1, %v522_v0  ;;  %v4978_v59 = vpack.c.bf16 %v545_v54, %v543_v53  ;;  %v1568_v0 = vld [vmem:[%s7147_s22 + $0x27d0] sm:$0xff]  ;;  %v547_v1 = vld [vmem:[%s7147_s22 + $0x7e8] sm:$0xff] }
 0x116   : > { %5963 = vmatprep.subr.bf16.mxu0 %v5962_v7  ;;  %v1551_v7 = vld [vmem:[%s7147_s22 + $0x2748] sm:$0xff]  ;;  %v5984_v10 = vpack.c.bf16 %v1548_v4, %v1546_v2  ;;  %v542_v60 = vld [vmem:[%s7147_s22 + $0x7c0] sm:$0xff]  ;;  %v549_v2 = vld [vmem:[%s7147_s22 + $0x7f8] sm:$0xff] }
 0x117   : > { %v1573_v4 = vld [vmem:[%s7147_s22 + $0x27f8] sm:$0xff]  ;;  %v563_v53 = vld [vmem:[%s7147_s22 + $0x868] sm:$0xff] }
 0x118   : > { %4941 = vmatpush1.bf16.msra.mxu1 %v4940_v13  ;;  %v528_v13 = vld [vmem:[%s7147_s22 + $0x750] sm:$0xff]  ;;  %v565_v54 = vld [vmem:[%s7147_s22 + $0x878] sm:$0xff] }
 0x119   : > { %5965 = vmatpush1.bf16.msra.mxu0 %v5964_v14  ;;  %4943 = vmatprep.subr.bf16.mxu1 %v4942_v15  ;;  %v1550_v14 = vld [vmem:[%s7147_s22 + $0x2740] sm:$0xff]  ;;  %v5986_v15 = vpack.c.bf16 %v1553_v8, %v1551_v7  ;;  %v4964_v21 = vpack.c.bf16 %v528_v13, %v526_v12  ;;  %v4982_v7 = vpack.c.bf16 %v549_v2, %v547_v1  ;;  %v1572_v12 = vld [vmem:[%s7147_s22 + $0x27f0] sm:$0xff]  ;;  %v551_v13 = vld [vmem:[%s7147_s22 + $0x808] sm:$0xff] }
 0x11a   : > { %5967 = vmatprep.subr.bf16.mxu0 %v5966_v19  ;;  %v1555_v19 = vld [vmem:[%s7147_s22 + $0x2768] sm:$0xff]  ;;  %v5988_v22 = vpack.c.bf16 %v1552_v16, %v1550_v14  ;;  %v546_v8 = vld [vmem:[%s7147_s22 + $0x7e0] sm:$0xff]  ;;  %v553_v14 = vld [vmem:[%s7147_s22 + $0x818] sm:$0xff] }
 0x11b   : > { %v1577_v16 = vld [vmem:[%s7147_s22 + $0x2818] sm:$0xff]  ;;  %v567_v1 = vld [vmem:[%s7147_s22 + $0x888] sm:$0xff] }
 0x11c   : > { %4945 = vmatpush1.bf16.msra.mxu1 %v4944_v25  ;;  %v532_v25 = vld [vmem:[%s7147_s22 + $0x770] sm:$0xff]  ;;  %v569_v2 = vld [vmem:[%s7147_s22 + $0x898] sm:$0xff] }
 0x11d   : > { %5969 = vmatpush1.bf16.msra.mxu0 %v5968_v26  ;;  %4947 = vmatprep.subr.bf16.mxu1 %v4946_v27  ;;  %v1554_v26 = vld [vmem:[%s7147_s22 + $0x2760] sm:$0xff]  ;;  %v5990_v27 = vpack.c.bf16 %v1557_v20, %v1555_v19  ;;  %v4968_v33 = vpack.c.bf16 %v532_v25, %v530_v24  ;;  %v4986_v19 = vpack.c.bf16 %v553_v14, %v551_v13  ;;  %v1576_v24 = vld [vmem:[%s7147_s22 + $0x2810] sm:$0xff]  ;;  %v555_v25 = vld [vmem:[%s7147_s22 + $0x828] sm:$0xff] }
 0x11e   : > { %5971 = vmatprep.subr.bf16.mxu0 %v5970_v31  ;;  %v1559_v31 = vld [vmem:[%s7147_s22 + $0x2788] sm:$0xff]  ;;  %v5992_v34 = vpack.c.bf16 %v1556_v28, %v1554_v26  ;;  %v550_v20 = vld [vmem:[%s7147_s22 + $0x800] sm:$0xff]  ;;  %v557_v26 = vld [vmem:[%s7147_s22 + $0x838] sm:$0xff] }
 0x11f   : > { %v1581_v28 = vld [vmem:[%s7147_s22 + $0x2838] sm:$0xff]  ;;  %v571_v13 = vld [vmem:[%s7147_s22 + $0x8a8] sm:$0xff] }
 0x120   : > { %4949 = vmatpush1.bf16.msra.mxu1 %v4948_v37  ;;  %v536_v37 = vld [vmem:[%s7147_s22 + $0x790] sm:$0xff]  ;;  %v573_v14 = vld [vmem:[%s7147_s22 + $0x8b8] sm:$0xff] }
 0x121   : > { %5973 = vmatpush1.bf16.msra.mxu0 %v5972_v38  ;;  %4951 = vmatprep.subr.bf16.mxu1 %v4950_v39  ;;  %v1558_v38 = vld [vmem:[%s7147_s22 + $0x2780] sm:$0xff]  ;;  %v5994_v39 = vpack.c.bf16 %v1561_v32, %v1559_v31  ;;  %v4972_v45 = vpack.c.bf16 %v536_v37, %v534_v36  ;;  %v268_v31 = vld [vmem:[%s7165_s29 + $0x130] sm:$0xff] }
 0x122   : > { %5975 = vmatprep.subr.bf16.mxu0 %v5974_v43  ;;  %v1563_v43 = vld [vmem:[%s7147_s22 + $0x27a8] sm:$0xff]  ;;  %v5996_v46 = vpack.c.bf16 %v1560_v40, %v1558_v38  ;;  %v1578_v36 = vld [vmem:[%s7147_s22 + $0x2820] sm:$0xff]  ;;  %v1580_v38 = vld [vmem:[%s7147_s22 + $0x2830] sm:$0xff] }
 0x123   : > { %v561_v40 = vld [vmem:[%s7147_s22 + $0x858] sm:$0xff] }
 0x124   : > { %4953 = vmatpush1.bf16.msra.mxu1 %v4952_v49  ;;  %v540_v49 = vld [vmem:[%s7147_s22 + $0x7b0] sm:$0xff] }
 0x125   : > { %5977 = vmatpush1.bf16.msra.mxu0 %v5976_v50  ;;  %4955 = vmatprep.subr.bf16.mxu1 %v4954_v51  ;;  %v1562_v50 = vld [vmem:[%s7147_s22 + $0x27a0] sm:$0xff]  ;;  %v5998_v51 = vpack.c.bf16 %v1565_v44, %v1563_v43  ;;  %v4976_v57 = vpack.c.bf16 %v540_v49, %v538_v48  ;;  %v560_v49 = vld [vmem:[%s7147_s22 + $0x850] sm:$0xff] }
 0x126   : > { %5979 = vmatprep.subr.bf16.mxu0 %v5978_v55  ;;  %v1567_v55 = vld [vmem:[%s7147_s22 + $0x27c8] sm:$0xff]  ;;  %v6000_v58 = vpack.c.bf16 %v1564_v52, %v1562_v50  ;;  %v239_v43 = vld [vmem:[%s7165_s29 + $0x48] sm:$0xff]  ;;  %v1584_v52 = vld [vmem:[%s7147_s22 + $0x2850] sm:$0xff] }
 0x127   : > { %v558_v48 = vld [vmem:[%s7147_s22 + $0x840] sm:$0xff] }
 0x128   : > { %4957 = vmatpush1.bf16.msra.mxu1 %v4956_v61  ;;  %v544_v61 = vld [vmem:[%s7147_s22 + $0x7d0] sm:$0xff]  ;;  %v1582_v50 = vld [vmem:[%s7147_s22 + $0x2840] sm:$0xff] }
 0x129   : > { %5981 = vmatpush1.bf16.msra.mxu0 %v5980_v62  ;;  %4959 = vmatprep.subr.bf16.mxu1 %v4958_v63  ;;  %v1566_v62 = vld [vmem:[%s7147_s22 + $0x27c0] sm:$0xff]  ;;  %v6002_v63 = vpack.c.bf16 %v1569_v56, %v1567_v55  ;;  %v4980_v5 = vpack.c.bf16 %v544_v61, %v542_v60  ;;  %v1587_v55 = vld [vmem:[%s7147_s22 + $0x2868] sm:$0xff]  ;;  %v1589_v56 = vld [vmem:[%s7147_s22 + $0x2878] sm:$0xff] }
 0x12a   : > { %5983 = vmatprep.subr.bf16.mxu0 %v5982_v3  ;;  %v1571_v3 = vld [vmem:[%s7147_s22 + $0x27e8] sm:$0xff]  ;;  %v6004_v6 = vpack.c.bf16 %v1568_v0, %v1566_v62  ;;  %v562_v60 = vld [vmem:[%s7147_s22 + $0x860] sm:$0xff]  ;;  %v564_v61 = vld [vmem:[%s7147_s22 + $0x870] sm:$0xff] }
 0x12b   : > { %v1586_v62 = vld [vmem:[%s7147_s22 + $0x2860] sm:$0xff]  ;;  %v1588_v0 = vld [vmem:[%s7147_s22 + $0x2870] sm:$0xff] }
 0x12c   : > { %4961 = vmatpush1.bf16.msra.mxu1 %v4960_v9  ;;  %v548_v9 = vld [vmem:[%s7147_s22 + $0x7f0] sm:$0xff] }
 0x12d   : > { %5985 = vmatpush1.bf16.msra.mxu0 %v5984_v10  ;;  %4963 = vmatprep.subr.bf16.mxu1 %v4962_v11  ;;  %v1570_v10 = vld [vmem:[%s7147_s22 + $0x27e0] sm:$0xff]  ;;  %v6006_v11 = vpack.c.bf16 %v1573_v4, %v1571_v3  ;;  %v4984_v17 = vpack.c.bf16 %v548_v9, %v546_v8  ;;  %v1591_v3 = vld [vmem:[%s7147_s22 + $0x2888] sm:$0xff]  ;;  %v1593_v4 = vld [vmem:[%s7147_s22 + $0x2898] sm:$0xff] }
 0x12e   : > { %5987 = vmatprep.subr.bf16.mxu0 %v5986_v15  ;;  %v1575_v15 = vld [vmem:[%s7147_s22 + $0x2808] sm:$0xff]  ;;  %v6008_v18 = vpack.c.bf16 %v1572_v12, %v1570_v10  ;;  %v566_v8 = vld [vmem:[%s7147_s22 + $0x880] sm:$0xff]  ;;  %v568_v9 = vld [vmem:[%s7147_s22 + $0x890] sm:$0xff] }
 0x12f   : > { %v1590_v10 = vld [vmem:[%s7147_s22 + $0x2880] sm:$0xff]  ;;  %v1592_v12 = vld [vmem:[%s7147_s22 + $0x2890] sm:$0xff] }
 0x130   : > { %4965 = vmatpush1.bf16.msra.mxu1 %v4964_v21  ;;  %v552_v21 = vld [vmem:[%s7147_s22 + $0x810] sm:$0xff] }
 0x131   : > { %5989 = vmatpush1.bf16.msra.mxu0 %v5988_v22  ;;  %4967 = vmatprep.subr.bf16.mxu1 %v4966_v23  ;;  %v1574_v22 = vld [vmem:[%s7147_s22 + $0x2800] sm:$0xff]  ;;  %v6010_v23 = vpack.c.bf16 %v1577_v16, %v1575_v15  ;;  %v4988_v30 = vpack.c.bf16 %v552_v21, %v550_v20  ;;  %v1595_v15 = vld [vmem:[%s7147_s22 + $0x28a8] sm:$0xff]  ;;  %v1597_v16 = vld [vmem:[%s7147_s22 + $0x28b8] sm:$0xff] }
 0x132   : > { %5991 = vmatprep.subr.bf16.mxu0 %v5990_v27  ;;  %v1579_v27 = vld [vmem:[%s7147_s22 + $0x2828] sm:$0xff]  ;;  %v6012_v32 = vpack.c.bf16 %v1576_v24, %v1574_v22  ;;  %v570_v20 = vld [vmem:[%s7147_s22 + $0x8a0] sm:$0xff]  ;;  %v572_v21 = vld [vmem:[%s7147_s22 + $0x8b0] sm:$0xff] }
 0x133   : > { %v6014_v37 = vpack.c.bf16 %v1581_v28, %v1579_v27  ;;  %v1594_v22 = vld [vmem:[%s7147_s22 + $0x28a0] sm:$0xff]  ;;  %v1596_v24 = vld [vmem:[%s7147_s22 + $0x28b0] sm:$0xff]  ;;  %v1599_v27 = vld [vmem:[%s7147_s22 + $0x28c8] sm:$0xff] }
 0x134   : > { %4969 = vmatpush1.bf16.msra.mxu1 %v4968_v33  ;;  %v4990_v33 = vpack.c.bf16 %v557_v26, %v555_v25  ;;  %v575_v25 = vld [vmem:[%s7147_s22 + $0x8c8] sm:$0xff]  ;;  %v577_v26 = vld [vmem:[%s7147_s22 + $0x8d8] sm:$0xff] }
 0x135   : > { %5993 = vmatpush1.bf16.msra.mxu0 %v5992_v34  ;;  %4971 = vmatprep.subr.bf16.mxu1 %v4970_v35  ;;  %v554_v34 = vld [vmem:[%s7147_s22 + $0x820] sm:$0xff]  ;;  %v556_v35 = vld [vmem:[%s7147_s22 + $0x830] sm:$0xff]  ;;  %v1601_v28 = vld [vmem:[%s7147_s22 + $0x28d8] sm:$0xff] }
 0x136   : > { %5995 = vmatprep.subr.bf16.mxu0 %v5994_v39  ;;  %v559_v39 = vld [vmem:[%s7147_s22 + $0x848] sm:$0xff]  ;;  %v4992_v44 = vpack.c.bf16 %v556_v35, %v554_v34  ;;  %v1598_v34 = vld [vmem:[%s7147_s22 + $0x28c0] sm:$0xff]  ;;  %v6034_v35 = vpack.c.bf16 %v1601_v28, %v1599_v27 }
 0x137   : > { %v594_v28 = vld [vmem:[%s7147_s22 + $0x960] sm:$0xff] }
 0x138   : > { %4973 = vmatpush1.bf16.msra.mxu1 %v4972_v45  ;;  %v271_v45 = vld [vmem:[%s7165_s29 + $0x148] sm:$0xff] }
 0x139   : > { %5997 = vmatpush1.bf16.msra.mxu0 %v5996_v46  ;;  %4975 = vmatprep.subr.bf16.mxu1 %v4974_v47  ;;  %v6016_v46 = vpack.c.bf16 %v1580_v38, %v1578_v36  ;;  %v4994_v47 = vpack.c.bf16 %v561_v40, %v559_v39  ;;  %v1600_v36 = vld [vmem:[%s7147_s22 + $0x28d0] sm:$0xff]  ;;  %v581_v38 = vld [vmem:[%s7147_s22 + $0x8f8] sm:$0xff]  ;;  %v1603_v39 = vld [vmem:[%s7147_s22 + $0x28e8] sm:$0xff] }
 0x13a   : > { %5999 = vmatprep.subr.bf16.mxu0 %v5998_v51  ;;  %v6018_v51 = vpack.c.bf16 %v1585_v42, %v1583_v41  ;;  %v1605_v40 = vld [vmem:[%s7147_s22 + $0x28f8] sm:$0xff]  ;;  %v6036_v42 = vpack.c.bf16 %v1600_v36, %v1598_v34 }
 0x13b   : > { %v601_v34 = vld [vmem:[%s7147_s22 + $0x998] sm:$0xff] }
 0x13c   : > { %4977 = vmatpush1.bf16.msra.mxu1 %v4976_v57  ;;  %v4996_v57 = vpack.c.bf16 %v560_v49, %v558_v48  ;;  %v1604_v48 = vld [vmem:[%s7147_s22 + $0x28f0] sm:$0xff]  ;;  %v583_v49 = vld [vmem:[%s7147_s22 + $0x908] sm:$0xff]  ;;  %v1625_v36 = vld [vmem:[%s7147_s22 + $0x2998] sm:$0xff] }
 0x13d   : > { %6001 = vmatpush1.bf16.msra.mxu0 %v6000_v58  ;;  %4979 = vmatprep.subr.bf16.mxu1 %v4978_v59  ;;  %v6020_v58 = vpack.c.bf16 %v1584_v52, %v1582_v50  ;;  %v4998_v59 = vpack.c.bf16 %v565_v54, %v563_v53  ;;  %v585_v50 = vld [vmem:[%s7147_s22 + $0x918] sm:$0xff] }
 0x13e   : > { %6003 = vmatprep.subr.bf16.mxu0 %v6002_v63  ;;  %v6022_v63 = vpack.c.bf16 %v1589_v56, %v1587_v55  ;;  %v1609_v52 = vld [vmem:[%s7147_s22 + $0x2918] sm:$0xff]  ;;  %v5018_v55 = vpack.c.bf16 %v585_v50, %v583_v49  ;;  %v582_v56 = vld [vmem:[%s7147_s22 + $0x900] sm:$0xff] }
 0x140   : > { %4981 = vmatpush1.bf16.msra.mxu1 %v4980_v5  ;;  %v5000_v5 = vpack.c.bf16 %v564_v61, %v562_v60  ;;  %v1608_v60 = vld [vmem:[%s7147_s22 + $0x2910] sm:$0xff]  ;;  %v587_v61 = vld [vmem:[%s7147_s22 + $0x928] sm:$0xff] }
 0x141   : > { %6005 = vmatpush1.bf16.msra.mxu0 %v6004_v6  ;;  %4983 = vmatprep.subr.bf16.mxu1 %v4982_v7  ;;  %v6024_v6 = vpack.c.bf16 %v1588_v0, %v1586_v62  ;;  %v5002_v7 = vpack.c.bf16 %v569_v2, %v567_v1  ;;  %v589_v62 = vld [vmem:[%s7147_s22 + $0x938] sm:$0xff] }
 0x142   : > { %6007 = vmatprep.subr.bf16.mxu0 %v6006_v11  ;;  %v6026_v11 = vpack.c.bf16 %v1593_v4, %v1591_v3  ;;  %v1613_v0 = vld [vmem:[%s7147_s22 + $0x2938] sm:$0xff]  ;;  %v5022_v3 = vpack.c.bf16 %v589_v62, %v587_v61  ;;  %v586_v4 = vld [vmem:[%s7147_s22 + $0x920] sm:$0xff] }
 0x144   : > { %4985 = vmatpush1.bf16.msra.mxu1 %v4984_v17  ;;  %v5004_v17 = vpack.c.bf16 %v568_v9, %v566_v8  ;;  %v1612_v8 = vld [vmem:[%s7147_s22 + $0x2930] sm:$0xff]  ;;  %v591_v9 = vld [vmem:[%s7147_s22 + $0x948] sm:$0xff] }
 0x145   : > { %6009 = vmatpush1.bf16.msra.mxu0 %v6008_v18  ;;  %4987 = vmatprep.subr.bf16.mxu1 %v4986_v19  ;;  %v6028_v18 = vpack.c.bf16 %v1592_v12, %v1590_v10  ;;  %v5006_v19 = vpack.c.bf16 %v573_v14, %v571_v13  ;;  %v593_v10 = vld [vmem:[%s7147_s22 + $0x958] sm:$0xff] }
 0x146   : > { %6011 = vmatprep.subr.bf16.mxu0 %v6010_v23  ;;  %v6030_v23 = vpack.c.bf16 %v1597_v16, %v1595_v15  ;;  %v1617_v12 = vld [vmem:[%s7147_s22 + $0x2958] sm:$0xff]  ;;  %v5026_v15 = vpack.c.bf16 %v593_v10, %v591_v9  ;;  %v590_v16 = vld [vmem:[%s7147_s22 + $0x940] sm:$0xff] }
 0x147   : > { %2620 = vmatmul.mubr.f32.vlgmr.msra.gmra.mrb[0].mxu1 %v236_v29  ;;  %v5008_v29 = vpack.c.bf16 %v572_v21, %v570_v20  ;;  %v1616_v20 = vld [vmem:[%s7147_s22 + $0x2950] sm:$0xff]  ;;  %v595_v21 = vld [vmem:[%s7147_s22 + $0x968] sm:$0xff] }
 0x148   : > { %4989 = vmatpush1.bf16.msra.mxu1 %v4988_v30  ;;  %3756 = vmatmul.mubr.f32.vlgmr.msra.gmra.mrb[0].mxu0 %v268_v31  ;;  %v6032_v30 = vpack.c.bf16 %v1596_v24, %v1594_v22  ;;  %v5010_v31 = vpack.c.bf16 %v577_v26, %v575_v25  ;;  %v597_v22 = vld [vmem:[%s7147_s22 + $0x978] sm:$0xff] }
 0x149   : > { %6013 = vmatpush1.bf16.msra.mxu0 %v6012_v32  ;;  %4991 = vmatprep.subr.bf16.mxu1 %v4990_v33  ;;  %v574_v32 = vld [vmem:[%s7147_s22 + $0x8c0] sm:$0xff]  ;;  %v576_v33 = vld [vmem:[%s7147_s22 + $0x8d0] sm:$0xff]  ;;  %v1621_v24 = vld [vmem:[%s7147_s22 + $0x2978] sm:$0xff]  ;;  %v5030_v27 = vpack.c.bf16 %v597_v22, %v595_v21 }
 0x14a   : > { %6015 = vmatprep.subr.bf16.mxu0 %v6014_v37  ;;  %2690 = vmatprep.mubr.f32.mxu1 %v239_v43  ;;  %v579_v37 = vld [vmem:[%s7147_s22 + $0x8e8] sm:$0xff]  ;;  %v5012_v41 = vpack.c.bf16 %v576_v33, %v574_v32  ;;  %v1620_v32 = vld [vmem:[%s7147_s22 + $0x2970] sm:$0xff] }
 0x14b   : > { %3826 = vmatprep.mubr.f32.mxu0 %v271_v45  ;;  %v5014_v43 = vpack.c.bf16 %v581_v38, %v579_v37  ;;  %v580_v45 = vld [vmem:[%s7147_s22 + $0x8f0] sm:$0xff]  ;;  %v599_v33 = vld [vmem:[%s7147_s22 + $0x988] sm:$0xff] }
 0x14c   : > { %4993 = vmatpush1.bf16.msra.mxu1 %v4992_v44  ;;  %v578_v44 = vld [vmem:[%s7147_s22 + $0x8e0] sm:$0xff] }
 0x14d   : > { %6017 = vmatpush1.bf16.msra.mxu0 %v6016_v46  ;;  %4995 = vmatprep.subr.bf16.mxu1 %v4994_v47  ;;  %v1602_v46 = vld [vmem:[%s7147_s22 + $0x28e0] sm:$0xff]  ;;  %v6038_v47 = vpack.c.bf16 %v1605_v40, %v1603_v39  ;;  %v5016_v53 = vpack.c.bf16 %v580_v45, %v578_v44  ;;  %v5034_v39 = vpack.c.bf16 %v601_v34, %v599_v33  ;;  %v1624_v44 = vld [vmem:[%s7147_s22 + $0x2990] sm:$0xff]  ;;  %v603_v45 = vld [vmem:[%s7147_s22 + $0x9a8] sm:$0xff] }
 0x14e   : > { %6019 = vmatprep.subr.bf16.mxu0 %v6018_v51  ;;  %v1607_v51 = vld [vmem:[%s7147_s22 + $0x2908] sm:$0xff]  ;;  %v6040_v54 = vpack.c.bf16 %v1604_v48, %v1602_v46  ;;  %v598_v40 = vld [vmem:[%s7147_s22 + $0x980] sm:$0xff]  ;;  %v605_v46 = vld [vmem:[%s7147_s22 + $0x9b8] sm:$0xff] }
 0x14f   : > { %v1629_v48 = vld [vmem:[%s7147_s22 + $0x29b8] sm:$0xff] }
 0x150   : > { %4997 = vmatpush1.bf16.msra.mxu1 %v4996_v57  ;;  %v584_v57 = vld [vmem:[%s7147_s22 + $0x910] sm:$0xff]  ;;  %v238_v33 = vld [vmem:[%s7165_s29 + $0x40] sm:$0xff] }
 0x151   : > { %6021 = vmatpush1.bf16.msra.mxu0 %v6020_v58  ;;  %4999 = vmatprep.subr.bf16.mxu1 %v4998_v59  ;;  %v1606_v58 = vld [vmem:[%s7147_s22 + $0x2900] sm:$0xff]  ;;  %v6042_v59 = vpack.c.bf16 %v1609_v52, %v1607_v51  ;;  %v5020_v1 = vpack.c.bf16 %v584_v57, %v582_v56  ;;  %v5038_v51 = vpack.c.bf16 %v605_v46, %v603_v45  ;;  %v1628_v56 = vld [vmem:[%s7147_s22 + $0x29b0] sm:$0xff]  ;;  %v607_v57 = vld [vmem:[%s7147_s22 + $0x9c8] sm:$0xff] }
 0x152   : > { %6023 = vmatprep.subr.bf16.mxu0 %v6022_v63  ;;  %v1611_v63 = vld [vmem:[%s7147_s22 + $0x2928] sm:$0xff]  ;;  %v6044_v2 = vpack.c.bf16 %v1608_v60, %v1606_v58  ;;  %v602_v52 = vld [vmem:[%s7147_s22 + $0x9a0] sm:$0xff]  ;;  %v609_v58 = vld [vmem:[%s7147_s22 + $0x9d8] sm:$0xff] }
 0x153   : > { %v1633_v60 = vld [vmem:[%s7147_s22 + $0x29d8] sm:$0xff]  ;;  %v1647_v45 = vld [vmem:[%s7147_s22 + $0x2a48] sm:$0xff] }
 0x154   : > { %5001 = vmatpush1.bf16.msra.mxu1 %v5000_v5  ;;  %v588_v5 = vld [vmem:[%s7147_s22 + $0x930] sm:$0xff]  ;;  %v1649_v46 = vld [vmem:[%s7147_s22 + $0x2a58] sm:$0xff] }
 0x155   : > { %6025 = vmatpush1.bf16.msra.mxu0 %v6024_v6  ;;  %5003 = vmatprep.subr.bf16.mxu1 %v5002_v7  ;;  %v1610_v6 = vld [vmem:[%s7147_s22 + $0x2920] sm:$0xff]  ;;  %v6046_v7 = vpack.c.bf16 %v1613_v0, %v1611_v63  ;;  %v5024_v13 = vpack.c.bf16 %v588_v5, %v586_v4  ;;  %v5042_v63 = vpack.c.bf16 %v609_v58, %v607_v57  ;;  %v1632_v4 = vld [vmem:[%s7147_s22 + $0x29d0] sm:$0xff]  ;;  %v611_v5 = vld [vmem:[%s7147_s22 + $0x9e8] sm:$0xff] }
 0x156   : > { %6027 = vmatprep.subr.bf16.mxu0 %v6026_v11  ;;  %v1615_v11 = vld [vmem:[%s7147_s22 + $0x2948] sm:$0xff]  ;;  %v6048_v14 = vpack.c.bf16 %v1612_v8, %v1610_v6  ;;  %v606_v0 = vld [vmem:[%s7147_s22 + $0x9c0] sm:$0xff]  ;;  %v613_v6 = vld [vmem:[%s7147_s22 + $0x9f8] sm:$0xff] }
 0x157   : > { %v1637_v8 = vld [vmem:[%s7147_s22 + $0x29f8] sm:$0xff]  ;;  %v627_v57 = vld [vmem:[%s7147_s22 + $0xa68] sm:$0xff] }
 0x158   : > { %5005 = vmatpush1.bf16.msra.mxu1 %v5004_v17  ;;  %v592_v17 = vld [vmem:[%s7147_s22 + $0x950] sm:$0xff]  ;;  %v629_v58 = vld [vmem:[%s7147_s22 + $0xa78] sm:$0xff] }
 0x159   : > { %6029 = vmatpush1.bf16.msra.mxu0 %v6028_v18  ;;  %5007 = vmatprep.subr.bf16.mxu1 %v5006_v19  ;;  %v1614_v18 = vld [vmem:[%s7147_s22 + $0x2940] sm:$0xff]  ;;  %v6050_v19 = vpack.c.bf16 %v1617_v12, %v1615_v11  ;;  %v5028_v25 = vpack.c.bf16 %v592_v17, %v590_v16  ;;  %v5046_v11 = vpack.c.bf16 %v613_v6, %v611_v5  ;;  %v1636_v16 = vld [vmem:[%s7147_s22 + $0x29f0] sm:$0xff]  ;;  %v615_v17 = vld [vmem:[%s7147_s22 + $0xa08] sm:$0xff] }
 0x15a   : > { %6031 = vmatprep.subr.bf16.mxu0 %v6030_v23  ;;  %v1619_v23 = vld [vmem:[%s7147_s22 + $0x2968] sm:$0xff]  ;;  %v6052_v26 = vpack.c.bf16 %v1616_v20, %v1614_v18  ;;  %v610_v12 = vld [vmem:[%s7147_s22 + $0x9e0] sm:$0xff]  ;;  %v617_v18 = vld [vmem:[%s7147_s22 + $0xa18] sm:$0xff] }
 0x15b   : > { %v1641_v20 = vld [vmem:[%s7147_s22 + $0x2a18] sm:$0xff]  ;;  %v631_v5 = vld [vmem:[%s7147_s22 + $0xa88] sm:$0xff] }
 0x15c   : > { %5009 = vmatpush1.bf16.msra.mxu1 %v5008_v29  ;;  %v596_v29 = vld [vmem:[%s7147_s22 + $0x970] sm:$0xff]  ;;  %v633_v6 = vld [vmem:[%s7147_s22 + $0xa98] sm:$0xff] }
 0x15d   : > { %6033 = vmatpush1.bf16.msra.mxu0 %v6032_v30  ;;  %5011 = vmatprep.subr.bf16.mxu1 %v5010_v31  ;;  %v1618_v30 = vld [vmem:[%s7147_s22 + $0x2960] sm:$0xff]  ;;  %v6054_v31 = vpack.c.bf16 %v1621_v24, %v1619_v23  ;;  %v5032_v37 = vpack.c.bf16 %v596_v29, %v594_v28  ;;  %v5050_v23 = vpack.c.bf16 %v617_v18, %v615_v17  ;;  %v1640_v28 = vld [vmem:[%s7147_s22 + $0x2a10] sm:$0xff]  ;;  %v619_v29 = vld [vmem:[%s7147_s22 + $0xa28] sm:$0xff] }
 0x15e   : > { %6035 = vmatprep.subr.bf16.mxu0 %v6034_v35  ;;  %v1623_v35 = vld [vmem:[%s7147_s22 + $0x2988] sm:$0xff]  ;;  %v6056_v38 = vpack.c.bf16 %v1620_v32, %v1618_v30  ;;  %v614_v24 = vld [vmem:[%s7147_s22 + $0xa00] sm:$0xff]  ;;  %v621_v30 = vld [vmem:[%s7147_s22 + $0xa38] sm:$0xff] }
 0x15f   : > { %v1645_v32 = vld [vmem:[%s7147_s22 + $0x2a38] sm:$0xff]  ;;  %v635_v17 = vld [vmem:[%s7147_s22 + $0xaa8] sm:$0xff] }
 0x160   : > { %5013 = vmatpush1.bf16.msra.mxu1 %v5012_v41  ;;  %v600_v41 = vld [vmem:[%s7147_s22 + $0x990] sm:$0xff]  ;;  %v637_v18 = vld [vmem:[%s7147_s22 + $0xab8] sm:$0xff] }
 0x161   : > { %6037 = vmatpush1.bf16.msra.mxu0 %v6036_v42  ;;  %5015 = vmatprep.subr.bf16.mxu1 %v5014_v43  ;;  %v1622_v42 = vld [vmem:[%s7147_s22 + $0x2980] sm:$0xff]  ;;  %v6058_v43 = vpack.c.bf16 %v1625_v36, %v1623_v35  ;;  %v5036_v49 = vpack.c.bf16 %v600_v41, %v598_v40  ;;  %v270_v35 = vld [vmem:[%s7165_s29 + $0x140] sm:$0xff] }
 0x162   : > { %6039 = vmatprep.subr.bf16.mxu0 %v6038_v47  ;;  %v1627_v47 = vld [vmem:[%s7147_s22 + $0x29a8] sm:$0xff]  ;;  %v6060_v50 = vpack.c.bf16 %v1624_v44, %v1622_v42  ;;  %v1642_v40 = vld [vmem:[%s7147_s22 + $0x2a20] sm:$0xff]  ;;  %v1644_v42 = vld [vmem:[%s7147_s22 + $0x2a30] sm:$0xff] }
 0x163   : > { %v625_v44 = vld [vmem:[%s7147_s22 + $0xa58] sm:$0xff] }
 0x164   : > { %5017 = vmatpush1.bf16.msra.mxu1 %v5016_v53  ;;  %v604_v53 = vld [vmem:[%s7147_s22 + $0x9b0] sm:$0xff] }
 0x165   : > { %6041 = vmatpush1.bf16.msra.mxu0 %v6040_v54  ;;  %5019 = vmatprep.subr.bf16.mxu1 %v5018_v55  ;;  %v1626_v54 = vld [vmem:[%s7147_s22 + $0x29a0] sm:$0xff]  ;;  %v6062_v55 = vpack.c.bf16 %v1629_v48, %v1627_v47  ;;  %v5040_v61 = vpack.c.bf16 %v604_v53, %v602_v52  ;;  %v241_v47 = vld [vmem:[%s7165_s29 + $0x58] sm:$0xff] }
 0x166   : > { %6043 = vmatprep.subr.bf16.mxu0 %v6042_v59  ;;  %v1631_v59 = vld [vmem:[%s7147_s22 + $0x29c8] sm:$0xff]  ;;  %v6064_v62 = vpack.c.bf16 %v1628_v56, %v1626_v54  ;;  %v622_v52 = vld [vmem:[%s7147_s22 + $0xa40] sm:$0xff]  ;;  %v624_v53 = vld [vmem:[%s7147_s22 + $0xa50] sm:$0xff] }
 0x167   : > { %v1646_v54 = vld [vmem:[%s7147_s22 + $0x2a40] sm:$0xff]  ;;  %v1648_v56 = vld [vmem:[%s7147_s22 + $0x2a50] sm:$0xff] }
 0x168   : > { %5021 = vmatpush1.bf16.msra.mxu1 %v5020_v1  ;;  %v608_v1 = vld [vmem:[%s7147_s22 + $0x9d0] sm:$0xff] }
 0x169   : > { %6045 = vmatpush1.bf16.msra.mxu0 %v6044_v2  ;;  %5023 = vmatprep.subr.bf16.mxu1 %v5022_v3  ;;  %v1630_v2 = vld [vmem:[%s7147_s22 + $0x29c0] sm:$0xff]  ;;  %v6066_v3 = vpack.c.bf16 %v1633_v60, %v1631_v59  ;;  %v5044_v9 = vpack.c.bf16 %v608_v1, %v606_v0  ;;  %v1651_v59 = vld [vmem:[%s7147_s22 + $0x2a68] sm:$0xff]  ;;  %v1653_v60 = vld [vmem:[%s7147_s22 + $0x2a78] sm:$0xff] }
 0x16a   : > { %6047 = vmatprep.subr.bf16.mxu0 %v6046_v7  ;;  %v1635_v7 = vld [vmem:[%s7147_s22 + $0x29e8] sm:$0xff]  ;;  %v6068_v10 = vpack.c.bf16 %v1632_v4, %v1630_v2  ;;  %v626_v0 = vld [vmem:[%s7147_s22 + $0xa60] sm:$0xff]  ;;  %v628_v1 = vld [vmem:[%s7147_s22 + $0xa70] sm:$0xff] }
 0x16b   : > { %v1650_v2 = vld [vmem:[%s7147_s22 + $0x2a60] sm:$0xff]  ;;  %v1652_v4 = vld [vmem:[%s7147_s22 + $0x2a70] sm:$0xff] }
 0x16c   : > { %5025 = vmatpush1.bf16.msra.mxu1 %v5024_v13  ;;  %v612_v13 = vld [vmem:[%s7147_s22 + $0x9f0] sm:$0xff] }
 0x16d   : > { %6049 = vmatpush1.bf16.msra.mxu0 %v6048_v14  ;;  %5027 = vmatprep.subr.bf16.mxu1 %v5026_v15  ;;  %v1634_v14 = vld [vmem:[%s7147_s22 + $0x29e0] sm:$0xff]  ;;  %v6070_v15 = vpack.c.bf16 %v1637_v8, %v1635_v7  ;;  %v5048_v21 = vpack.c.bf16 %v612_v13, %v610_v12  ;;  %v1655_v7 = vld [vmem:[%s7147_s22 + $0x2a88] sm:$0xff]  ;;  %v1657_v8 = vld [vmem:[%s7147_s22 + $0x2a98] sm:$0xff] }
 0x16e   : > { %6051 = vmatprep.subr.bf16.mxu0 %v6050_v19  ;;  %v1639_v19 = vld [vmem:[%s7147_s22 + $0x2a08] sm:$0xff]  ;;  %v6072_v22 = vpack.c.bf16 %v1636_v16, %v1634_v14  ;;  %v630_v12 = vld [vmem:[%s7147_s22 + $0xa80] sm:$0xff]  ;;  %v632_v13 = vld [vmem:[%s7147_s22 + $0xa90] sm:$0xff] }
 0x16f   : > { %v1654_v14 = vld [vmem:[%s7147_s22 + $0x2a80] sm:$0xff]  ;;  %v1656_v16 = vld [vmem:[%s7147_s22 + $0x2a90] sm:$0xff] }
 0x170   : > { %5029 = vmatpush1.bf16.msra.mxu1 %v5028_v25  ;;  %v616_v25 = vld [vmem:[%s7147_s22 + $0xa10] sm:$0xff] }
 0x171   : > { %6053 = vmatpush1.bf16.msra.mxu0 %v6052_v26  ;;  %5031 = vmatprep.subr.bf16.mxu1 %v5030_v27  ;;  %v1638_v26 = vld [vmem:[%s7147_s22 + $0x2a00] sm:$0xff]  ;;  %v6074_v27 = vpack.c.bf16 %v1641_v20, %v1639_v19  ;;  %v5052_v34 = vpack.c.bf16 %v616_v25, %v614_v24  ;;  %v1659_v19 = vld [vmem:[%s7147_s22 + $0x2aa8] sm:$0xff]  ;;  %v1661_v20 = vld [vmem:[%s7147_s22 + $0x2ab8] sm:$0xff] }
 0x172   : > { %6055 = vmatprep.subr.bf16.mxu0 %v6054_v31  ;;  %v1643_v31 = vld [vmem:[%s7147_s22 + $0x2a28] sm:$0xff]  ;;  %v6076_v36 = vpack.c.bf16 %v1640_v28, %v1638_v26  ;;  %v634_v24 = vld [vmem:[%s7147_s22 + $0xaa0] sm:$0xff]  ;;  %v636_v25 = vld [vmem:[%s7147_s22 + $0xab0] sm:$0xff] }
 0x173   : > { %v6078_v41 = vpack.c.bf16 %v1645_v32, %v1643_v31  ;;  %v1658_v26 = vld [vmem:[%s7147_s22 + $0x2aa0] sm:$0xff]  ;;  %v1660_v28 = vld [vmem:[%s7147_s22 + $0x2ab0] sm:$0xff]  ;;  %v1663_v31 = vld [vmem:[%s7147_s22 + $0x2ac8] sm:$0xff] }
 0x174   : > { %5033 = vmatpush1.bf16.msra.mxu1 %v5032_v37  ;;  %v5054_v37 = vpack.c.bf16 %v621_v30, %v619_v29  ;;  %v639_v29 = vld [vmem:[%s7147_s22 + $0xac8] sm:$0xff]  ;;  %v641_v30 = vld [vmem:[%s7147_s22 + $0xad8] sm:$0xff] }
 0x175   : > { %6057 = vmatpush1.bf16.msra.mxu0 %v6056_v38  ;;  %5035 = vmatprep.subr.bf16.mxu1 %v5034_v39  ;;  %v618_v38 = vld [vmem:[%s7147_s22 + $0xa20] sm:$0xff]  ;;  %v620_v39 = vld [vmem:[%s7147_s22 + $0xa30] sm:$0xff]  ;;  %v1665_v32 = vld [vmem:[%s7147_s22 + $0x2ad8] sm:$0xff] }
 0x176   : > { %6059 = vmatprep.subr.bf16.mxu0 %v6058_v43  ;;  %v623_v43 = vld [vmem:[%s7147_s22 + $0xa48] sm:$0xff]  ;;  %v5056_v48 = vpack.c.bf16 %v620_v39, %v618_v38  ;;  %v1662_v38 = vld [vmem:[%s7147_s22 + $0x2ac0] sm:$0xff]  ;;  %v6098_v39 = vpack.c.bf16 %v1665_v32, %v1663_v31 }
 0x177   : > { %v658_v32 = vld [vmem:[%s7147_s22 + $0xb60] sm:$0xff] }
 0x178   : > { %5037 = vmatpush1.bf16.msra.mxu1 %v5036_v49  ;;  %v273_v49 = vld [vmem:[%s7165_s29 + $0x158] sm:$0xff] }
 0x179   : > { %6061 = vmatpush1.bf16.msra.mxu0 %v6060_v50  ;;  %5039 = vmatprep.subr.bf16.mxu1 %v5038_v51  ;;  %v6080_v50 = vpack.c.bf16 %v1644_v42, %v1642_v40  ;;  %v5058_v51 = vpack.c.bf16 %v625_v44, %v623_v43  ;;  %v1664_v40 = vld [vmem:[%s7147_s22 + $0x2ad0] sm:$0xff]  ;;  %v645_v42 = vld [vmem:[%s7147_s22 + $0xaf8] sm:$0xff]  ;;  %v1667_v43 = vld [vmem:[%s7147_s22 + $0x2ae8] sm:$0xff] }
 0x17a   : > { %6063 = vmatprep.subr.bf16.mxu0 %v6062_v55  ;;  %v6082_v55 = vpack.c.bf16 %v1649_v46, %v1647_v45  ;;  %v1669_v44 = vld [vmem:[%s7147_s22 + $0x2af8] sm:$0xff]  ;;  %v6100_v46 = vpack.c.bf16 %v1664_v40, %v1662_v38 }
 0x17b   : > { %v665_v38 = vld [vmem:[%s7147_s22 + $0xb98] sm:$0xff] }
 0x17c   : > { %5041 = vmatpush1.bf16.msra.mxu1 %v5040_v61  ;;  %v5060_v61 = vpack.c.bf16 %v624_v53, %v622_v52  ;;  %v1668_v52 = vld [vmem:[%s7147_s22 + $0x2af0] sm:$0xff]  ;;  %v647_v53 = vld [vmem:[%s7147_s22 + $0xb08] sm:$0xff]  ;;  %v1689_v40 = vld [vmem:[%s7147_s22 + $0x2b98] sm:$0xff] }
 0x17d   : > { %6065 = vmatpush1.bf16.msra.mxu0 %v6064_v62  ;;  %5043 = vmatprep.subr.bf16.mxu1 %v5042_v63  ;;  %v6084_v62 = vpack.c.bf16 %v1648_v56, %v1646_v54  ;;  %v5062_v63 = vpack.c.bf16 %v629_v58, %v627_v57  ;;  %v649_v54 = vld [vmem:[%s7147_s22 + $0xb18] sm:$0xff] }
 0x17e   : > { %6067 = vmatprep.subr.bf16.mxu0 %v6066_v3  ;;  %v6086_v3 = vpack.c.bf16 %v1653_v60, %v1651_v59  ;;  %v1673_v56 = vld [vmem:[%s7147_s22 + $0x2b18] sm:$0xff]  ;;  %v5082_v59 = vpack.c.bf16 %v649_v54, %v647_v53  ;;  %v646_v60 = vld [vmem:[%s7147_s22 + $0xb00] sm:$0xff] }
 0x180   : > { %5045 = vmatpush1.bf16.msra.mxu1 %v5044_v9  ;;  %v5064_v9 = vpack.c.bf16 %v628_v1, %v626_v0  ;;  %v1672_v0 = vld [vmem:[%s7147_s22 + $0x2b10] sm:$0xff]  ;;  %v651_v1 = vld [vmem:[%s7147_s22 + $0xb28] sm:$0xff] }
 0x181   : > { %6069 = vmatpush1.bf16.msra.mxu0 %v6068_v10  ;;  %5047 = vmatprep.subr.bf16.mxu1 %v5046_v11  ;;  %v6088_v10 = vpack.c.bf16 %v1652_v4, %v1650_v2  ;;  %v5066_v11 = vpack.c.bf16 %v633_v6, %v631_v5  ;;  %v653_v2 = vld [vmem:[%s7147_s22 + $0xb38] sm:$0xff] }
 0x182   : > { %6071 = vmatprep.subr.bf16.mxu0 %v6070_v15  ;;  %v6090_v15 = vpack.c.bf16 %v1657_v8, %v1655_v7  ;;  %v1677_v4 = vld [vmem:[%s7147_s22 + $0x2b38] sm:$0xff]  ;;  %v5086_v7 = vpack.c.bf16 %v653_v2, %v651_v1  ;;  %v650_v8 = vld [vmem:[%s7147_s22 + $0xb20] sm:$0xff] }
 0x184   : > { %5049 = vmatpush1.bf16.msra.mxu1 %v5048_v21  ;;  %v5068_v21 = vpack.c.bf16 %v632_v13, %v630_v12  ;;  %v1676_v12 = vld [vmem:[%s7147_s22 + $0x2b30] sm:$0xff]  ;;  %v655_v13 = vld [vmem:[%s7147_s22 + $0xb48] sm:$0xff] }
 0x185   : > { %6073 = vmatpush1.bf16.msra.mxu0 %v6072_v22  ;;  %5051 = vmatprep.subr.bf16.mxu1 %v5050_v23  ;;  %v6092_v22 = vpack.c.bf16 %v1656_v16, %v1654_v14  ;;  %v5070_v23 = vpack.c.bf16 %v637_v18, %v635_v17  ;;  %v657_v14 = vld [vmem:[%s7147_s22 + $0xb58] sm:$0xff] }
 0x186   : > { %6075 = vmatprep.subr.bf16.mxu0 %v6074_v27  ;;  %v6094_v27 = vpack.c.bf16 %v1661_v20, %v1659_v19  ;;  %v1681_v16 = vld [vmem:[%s7147_s22 + $0x2b58] sm:$0xff]  ;;  %v5090_v19 = vpack.c.bf16 %v657_v14, %v655_v13  ;;  %v654_v20 = vld [vmem:[%s7147_s22 + $0xb40] sm:$0xff] }
 0x187   : > { %2691 = vmatmul.mubr.f32.vlgmr.msra.gmra.mrb[0].mxu1 %v238_v33  ;;  %v5072_v33 = vpack.c.bf16 %v636_v25, %v634_v24  ;;  %v1680_v24 = vld [vmem:[%s7147_s22 + $0x2b50] sm:$0xff]  ;;  %v659_v25 = vld [vmem:[%s7147_s22 + $0xb68] sm:$0xff] }
 0x188   : > { %5053 = vmatpush1.bf16.msra.mxu1 %v5052_v34  ;;  %3827 = vmatmul.mubr.f32.vlgmr.msra.gmra.mrb[0].mxu0 %v270_v35  ;;  %v6096_v34 = vpack.c.bf16 %v1660_v28, %v1658_v26  ;;  %v5074_v35 = vpack.c.bf16 %v641_v30, %v639_v29  ;;  %v661_v26 = vld [vmem:[%s7147_s22 + $0xb78] sm:$0xff] }
 0x189   : > { %6077 = vmatpush1.bf16.msra.mxu0 %v6076_v36  ;;  %5055 = vmatprep.subr.bf16.mxu1 %v5054_v37  ;;  %v638_v36 = vld [vmem:[%s7147_s22 + $0xac0] sm:$0xff]  ;;  %v640_v37 = vld [vmem:[%s7147_s22 + $0xad0] sm:$0xff]  ;;  %v1685_v28 = vld [vmem:[%s7147_s22 + $0x2b78] sm:$0xff]  ;;  %v5094_v31 = vpack.c.bf16 %v661_v26, %v659_v25 }
 0x18a   : > { %6079 = vmatprep.subr.bf16.mxu0 %v6078_v41  ;;  %2761 = vmatprep.mubr.f32.mxu1 %v241_v47  ;;  %v643_v41 = vld [vmem:[%s7147_s22 + $0xae8] sm:$0xff]  ;;  %v5076_v45 = vpack.c.bf16 %v640_v37, %v638_v36  ;;  %v1684_v36 = vld [vmem:[%s7147_s22 + $0x2b70] sm:$0xff] }
 0x18b   : > { %3897 = vmatprep.mubr.f32.mxu0 %v273_v49  ;;  %v5078_v47 = vpack.c.bf16 %v645_v42, %v643_v41  ;;  %v644_v49 = vld [vmem:[%s7147_s22 + $0xaf0] sm:$0xff]  ;;  %v663_v37 = vld [vmem:[%s7147_s22 + $0xb88] sm:$0xff] }
 0x18c   : > { %5057 = vmatpush1.bf16.msra.mxu1 %v5056_v48  ;;  %v642_v48 = vld [vmem:[%s7147_s22 + $0xae0] sm:$0xff] }
 0x18d   : > { %6081 = vmatpush1.bf16.msra.mxu0 %v6080_v50  ;;  %5059 = vmatprep.subr.bf16.mxu1 %v5058_v51  ;;  %v1666_v50 = vld [vmem:[%s7147_s22 + $0x2ae0] sm:$0xff]  ;;  %v6102_v51 = vpack.c.bf16 %v1669_v44, %v1667_v43  ;;  %v5080_v57 = vpack.c.bf16 %v644_v49, %v642_v48  ;;  %v5098_v43 = vpack.c.bf16 %v665_v38, %v663_v37  ;;  %v1688_v48 = vld [vmem:[%s7147_s22 + $0x2b90] sm:$0xff]  ;;  %v667_v49 = vld [vmem:[%s7147_s22 + $0xba8] sm:$0xff] }
 0x18e   : > { %6083 = vmatprep.subr.bf16.mxu0 %v6082_v55  ;;  %v1671_v55 = vld [vmem:[%s7147_s22 + $0x2b08] sm:$0xff]  ;;  %v6104_v58 = vpack.c.bf16 %v1668_v52, %v1666_v50  ;;  %v662_v44 = vld [vmem:[%s7147_s22 + $0xb80] sm:$0xff]  ;;  %v669_v50 = vld [vmem:[%s7147_s22 + $0xbb8] sm:$0xff] }
 0x18f   : > { %v1693_v52 = vld [vmem:[%s7147_s22 + $0x2bb8] sm:$0xff]  ;;  %v240_v37 = vld [vmem:[%s7165_s29 + $0x50] sm:$0xff] }
 0x190   : > { %5061 = vmatpush1.bf16.msra.mxu1 %v5060_v61  ;;  %v648_v61 = vld [vmem:[%s7147_s22 + $0xb10] sm:$0xff] }
 0x191   : > { %6085 = vmatpush1.bf16.msra.mxu0 %v6084_v62  ;;  %5063 = vmatprep.subr.bf16.mxu1 %v5062_v63  ;;  %v1670_v62 = vld [vmem:[%s7147_s22 + $0x2b00] sm:$0xff]  ;;  %v6106_v63 = vpack.c.bf16 %v1673_v56, %v1671_v55  ;;  %v5084_v5 = vpack.c.bf16 %v648_v61, %v646_v60  ;;  %v5102_v55 = vpack.c.bf16 %v669_v50, %v667_v49  ;;  %v1692_v60 = vld [vmem:[%s7147_s22 + $0x2bb0] sm:$0xff]  ;;  %v671_v61 = vld [vmem:[%s7147_s22 + $0xbc8] sm:$0xff] }
 0x192   : > { %6087 = vmatprep.subr.bf16.mxu0 %v6086_v3  ;;  %v1675_v3 = vld [vmem:[%s7147_s22 + $0x2b28] sm:$0xff]  ;;  %v6108_v6 = vpack.c.bf16 %v1672_v0, %v1670_v62  ;;  %v666_v56 = vld [vmem:[%s7147_s22 + $0xba0] sm:$0xff]  ;;  %v673_v62 = vld [vmem:[%s7147_s22 + $0xbd8] sm:$0xff] }
 0x193   : > { %v1697_v0 = vld [vmem:[%s7147_s22 + $0x2bd8] sm:$0xff]  ;;  %v1711_v49 = vld [vmem:[%s7147_s22 + $0x2c48] sm:$0xff] }
 0x194   : > { %5065 = vmatpush1.bf16.msra.mxu1 %v5064_v9  ;;  %v652_v9 = vld [vmem:[%s7147_s22 + $0xb30] sm:$0xff]  ;;  %v1713_v50 = vld [vmem:[%s7147_s22 + $0x2c58] sm:$0xff] }
 0x195   : > { %6089 = vmatpush1.bf16.msra.mxu0 %v6088_v10  ;;  %5067 = vmatprep.subr.bf16.mxu1 %v5066_v11  ;;  %v1674_v10 = vld [vmem:[%s7147_s22 + $0x2b20] sm:$0xff]  ;;  %v6110_v11 = vpack.c.bf16 %v1677_v4, %v1675_v3  ;;  %v5088_v17 = vpack.c.bf16 %v652_v9, %v650_v8  ;;  %v5106_v3 = vpack.c.bf16 %v673_v62, %v671_v61  ;;  %v1696_v8 = vld [vmem:[%s7147_s22 + $0x2bd0] sm:$0xff]  ;;  %v675_v9 = vld [vmem:[%s7147_s22 + $0xbe8] sm:$0xff] }
 0x196   : > { %6091 = vmatprep.subr.bf16.mxu0 %v6090_v15  ;;  %v1679_v15 = vld [vmem:[%s7147_s22 + $0x2b48] sm:$0xff]  ;;  %v6112_v18 = vpack.c.bf16 %v1676_v12, %v1674_v10  ;;  %v670_v4 = vld [vmem:[%s7147_s22 + $0xbc0] sm:$0xff]  ;;  %v677_v10 = vld [vmem:[%s7147_s22 + $0xbf8] sm:$0xff] }
 0x197   : > { %v1701_v12 = vld [vmem:[%s7147_s22 + $0x2bf8] sm:$0xff]  ;;  %v691_v61 = vld [vmem:[%s7147_s22 + $0xc68] sm:$0xff] }
 0x198   : > { %5069 = vmatpush1.bf16.msra.mxu1 %v5068_v21  ;;  %v656_v21 = vld [vmem:[%s7147_s22 + $0xb50] sm:$0xff]  ;;  %v693_v62 = vld [vmem:[%s7147_s22 + $0xc78] sm:$0xff] }
 0x199   : > { %6093 = vmatpush1.bf16.msra.mxu0 %v6092_v22  ;;  %5071 = vmatprep.subr.bf16.mxu1 %v5070_v23  ;;  %v1678_v22 = vld [vmem:[%s7147_s22 + $0x2b40] sm:$0xff]  ;;  %v6114_v23 = vpack.c.bf16 %v1681_v16, %v1679_v15  ;;  %v5092_v29 = vpack.c.bf16 %v656_v21, %v654_v20  ;;  %v5110_v15 = vpack.c.bf16 %v677_v10, %v675_v9  ;;  %v1700_v20 = vld [vmem:[%s7147_s22 + $0x2bf0] sm:$0xff]  ;;  %v679_v21 = vld [vmem:[%s7147_s22 + $0xc08] sm:$0xff] }
 0x19a   : > { %6095 = vmatprep.subr.bf16.mxu0 %v6094_v27  ;;  %v1683_v27 = vld [vmem:[%s7147_s22 + $0x2b68] sm:$0xff]  ;;  %v6116_v30 = vpack.c.bf16 %v1680_v24, %v1678_v22  ;;  %v674_v16 = vld [vmem:[%s7147_s22 + $0xbe0] sm:$0xff]  ;;  %v681_v22 = vld [vmem:[%s7147_s22 + $0xc18] sm:$0xff] }
 0x19b   : > { %v1705_v24 = vld [vmem:[%s7147_s22 + $0x2c18] sm:$0xff]  ;;  %v695_v9 = vld [vmem:[%s7147_s22 + $0xc88] sm:$0xff] }
 0x19c   : > { %5073 = vmatpush1.bf16.msra.mxu1 %v5072_v33  ;;  %v660_v33 = vld [vmem:[%s7147_s22 + $0xb70] sm:$0xff]  ;;  %v697_v10 = vld [vmem:[%s7147_s22 + $0xc98] sm:$0xff] }
 0x19d   : > { %6097 = vmatpush1.bf16.msra.mxu0 %v6096_v34  ;;  %5075 = vmatprep.subr.bf16.mxu1 %v5074_v35  ;;  %v1682_v34 = vld [vmem:[%s7147_s22 + $0x2b60] sm:$0xff]  ;;  %v6118_v35 = vpack.c.bf16 %v1685_v28, %v1683_v27  ;;  %v5096_v41 = vpack.c.bf16 %v660_v33, %v658_v32  ;;  %v5114_v27 = vpack.c.bf16 %v681_v22, %v679_v21  ;;  %v1704_v32 = vld [vmem:[%s7147_s22 + $0x2c10] sm:$0xff]  ;;  %v683_v33 = vld [vmem:[%s7147_s22 + $0xc28] sm:$0xff] }
 0x19e   : > { %6099 = vmatprep.subr.bf16.mxu0 %v6098_v39  ;;  %v1687_v39 = vld [vmem:[%s7147_s22 + $0x2b88] sm:$0xff]  ;;  %v6120_v42 = vpack.c.bf16 %v1684_v36, %v1682_v34  ;;  %v678_v28 = vld [vmem:[%s7147_s22 + $0xc00] sm:$0xff]  ;;  %v685_v34 = vld [vmem:[%s7147_s22 + $0xc38] sm:$0xff] }
 0x19f   : > { %v1709_v36 = vld [vmem:[%s7147_s22 + $0x2c38] sm:$0xff]  ;;  %v699_v21 = vld [vmem:[%s7147_s22 + $0xca8] sm:$0xff] }
 0x1a0   : > { %5077 = vmatpush1.bf16.msra.mxu1 %v5076_v45  ;;  %v664_v45 = vld [vmem:[%s7147_s22 + $0xb90] sm:$0xff]  ;;  %v701_v22 = vld [vmem:[%s7147_s22 + $0xcb8] sm:$0xff] }
 0x1a1   : > { %6101 = vmatpush1.bf16.msra.mxu0 %v6100_v46  ;;  %5079 = vmatprep.subr.bf16.mxu1 %v5078_v47  ;;  %v1686_v46 = vld [vmem:[%s7147_s22 + $0x2b80] sm:$0xff]  ;;  %v6122_v47 = vpack.c.bf16 %v1689_v40, %v1687_v39  ;;  %v5100_v53 = vpack.c.bf16 %v664_v45, %v662_v44  ;;  %v272_v39 = vld [vmem:[%s7165_s29 + $0x150] sm:$0xff] }
 0x1a2   : > { %6103 = vmatprep.subr.bf16.mxu0 %v6102_v51  ;;  %v1691_v51 = vld [vmem:[%s7147_s22 + $0x2ba8] sm:$0xff]  ;;  %v6124_v54 = vpack.c.bf16 %v1688_v48, %v1686_v46  ;;  %v1706_v44 = vld [vmem:[%s7147_s22 + $0x2c20] sm:$0xff]  ;;  %v1708_v46 = vld [vmem:[%s7147_s22 + $0x2c30] sm:$0xff] }
 0x1a3   : > { %v689_v48 = vld [vmem:[%s7147_s22 + $0xc58] sm:$0xff] }
 0x1a4   : > { %5081 = vmatpush1.bf16.msra.mxu1 %v5080_v57  ;;  %v668_v57 = vld [vmem:[%s7147_s22 + $0xbb0] sm:$0xff] }
 0x1a5   : > { %6105 = vmatpush1.bf16.msra.mxu0 %v6104_v58  ;;  %5083 = vmatprep.subr.bf16.mxu1 %v5082_v59  ;;  %v1690_v58 = vld [vmem:[%s7147_s22 + $0x2ba0] sm:$0xff]  ;;  %v6126_v59 = vpack.c.bf16 %v1693_v52, %v1691_v51  ;;  %v5104_v1 = vpack.c.bf16 %v668_v57, %v666_v56  ;;  %v688_v57 = vld [vmem:[%s7147_s22 + $0xc50] sm:$0xff] }
 0x1a6   : > { %6107 = vmatprep.subr.bf16.mxu0 %v6106_v63  ;;  %v1695_v63 = vld [vmem:[%s7147_s22 + $0x2bc8] sm:$0xff]  ;;  %v6128_v2 = vpack.c.bf16 %v1692_v60, %v1690_v58  ;;  %v243_v51 = vld [vmem:[%s7165_s29 + $0x68] sm:$0xff]  ;;  %v1712_v60 = vld [vmem:[%s7147_s22 + $0x2c50] sm:$0xff] }
 0x1a7   : > { %v686_v56 = vld [vmem:[%s7147_s22 + $0xc40] sm:$0xff] }
 0x1a8   : > { %5085 = vmatpush1.bf16.msra.mxu1 %v5084_v5  ;;  %v672_v5 = vld [vmem:[%s7147_s22 + $0xbd0] sm:$0xff]  ;;  %v1710_v58 = vld [vmem:[%s7147_s22 + $0x2c40] sm:$0xff] }
 0x1a9   : > { %6109 = vmatpush1.bf16.msra.mxu0 %v6108_v6  ;;  %5087 = vmatprep.subr.bf16.mxu1 %v5086_v7  ;;  %v1694_v6 = vld [vmem:[%s7147_s22 + $0x2bc0] sm:$0xff]  ;;  %v6130_v7 = vpack.c.bf16 %v1697_v0, %v1695_v63  ;;  %v5108_v13 = vpack.c.bf16 %v672_v5, %v670_v4  ;;  %v1715_v63 = vld [vmem:[%s7147_s22 + $0x2c68] sm:$0xff]  ;;  %v1717_v0 = vld [vmem:[%s7147_s22 + $0x2c78] sm:$0xff] }
 0x1aa   : > { %6111 = vmatprep.subr.bf16.mxu0 %v6110_v11  ;;  %v1699_v11 = vld [vmem:[%s7147_s22 + $0x2be8] sm:$0xff]  ;;  %v6132_v14 = vpack.c.bf16 %v1696_v8, %v1694_v6  ;;  %v690_v4 = vld [vmem:[%s7147_s22 + $0xc60] sm:$0xff]  ;;  %v692_v5 = vld [vmem:[%s7147_s22 + $0xc70] sm:$0xff] }
 0x1ab   : > { %v1714_v6 = vld [vmem:[%s7147_s22 + $0x2c60] sm:$0xff]  ;;  %v1716_v8 = vld [vmem:[%s7147_s22 + $0x2c70] sm:$0xff] }
 0x1ac   : > { %5089 = vmatpush1.bf16.msra.mxu1 %v5088_v17  ;;  %v676_v17 = vld [vmem:[%s7147_s22 + $0xbf0] sm:$0xff] }
 0x1ad   : > { %6113 = vmatpush1.bf16.msra.mxu0 %v6112_v18  ;;  %5091 = vmatprep.subr.bf16.mxu1 %v5090_v19  ;;  %v1698_v18 = vld [vmem:[%s7147_s22 + $0x2be0] sm:$0xff]  ;;  %v6134_v19 = vpack.c.bf16 %v1701_v12, %v1699_v11  ;;  %v5112_v25 = vpack.c.bf16 %v676_v17, %v674_v16  ;;  %v1719_v11 = vld [vmem:[%s7147_s22 + $0x2c88] sm:$0xff]  ;;  %v1721_v12 = vld [vmem:[%s7147_s22 + $0x2c98] sm:$0xff] }
 0x1ae   : > { %6115 = vmatprep.subr.bf16.mxu0 %v6114_v23  ;;  %v1703_v23 = vld [vmem:[%s7147_s22 + $0x2c08] sm:$0xff]  ;;  %v6136_v26 = vpack.c.bf16 %v1700_v20, %v1698_v18  ;;  %v694_v16 = vld [vmem:[%s7147_s22 + $0xc80] sm:$0xff]  ;;  %v696_v17 = vld [vmem:[%s7147_s22 + $0xc90] sm:$0xff] }
 0x1af   : > { %v1718_v18 = vld [vmem:[%s7147_s22 + $0x2c80] sm:$0xff]  ;;  %v1720_v20 = vld [vmem:[%s7147_s22 + $0x2c90] sm:$0xff] }
 0x1b0   : > { %5093 = vmatpush1.bf16.msra.mxu1 %v5092_v29  ;;  %v680_v29 = vld [vmem:[%s7147_s22 + $0xc10] sm:$0xff] }
 0x1b1   : > { %6117 = vmatpush1.bf16.msra.mxu0 %v6116_v30  ;;  %5095 = vmatprep.subr.bf16.mxu1 %v5094_v31  ;;  %v1702_v30 = vld [vmem:[%s7147_s22 + $0x2c00] sm:$0xff]  ;;  %v6138_v31 = vpack.c.bf16 %v1705_v24, %v1703_v23  ;;  %v5116_v38 = vpack.c.bf16 %v680_v29, %v678_v28  ;;  %v1723_v23 = vld [vmem:[%s7147_s22 + $0x2ca8] sm:$0xff]  ;;  %v1725_v24 = vld [vmem:[%s7147_s22 + $0x2cb8] sm:$0xff] }
 0x1b2   : > { %6119 = vmatprep.subr.bf16.mxu0 %v6118_v35  ;;  %v1707_v35 = vld [vmem:[%s7147_s22 + $0x2c28] sm:$0xff]  ;;  %v6140_v40 = vpack.c.bf16 %v1704_v32, %v1702_v30  ;;  %v698_v28 = vld [vmem:[%s7147_s22 + $0xca0] sm:$0xff]  ;;  %v700_v29 = vld [vmem:[%s7147_s22 + $0xcb0] sm:$0xff] }
 0x1b3   : > { %v6142_v45 = vpack.c.bf16 %v1709_v36, %v1707_v35  ;;  %v1722_v30 = vld [vmem:[%s7147_s22 + $0x2ca0] sm:$0xff]  ;;  %v1724_v32 = vld [vmem:[%s7147_s22 + $0x2cb0] sm:$0xff]  ;;  %v1727_v35 = vld [vmem:[%s7147_s22 + $0x2cc8] sm:$0xff] }
 0x1b4   : > { %5097 = vmatpush1.bf16.msra.mxu1 %v5096_v41  ;;  %v5118_v41 = vpack.c.bf16 %v685_v34, %v683_v33  ;;  %v703_v33 = vld [vmem:[%s7147_s22 + $0xcc8] sm:$0xff]  ;;  %v705_v34 = vld [vmem:[%s7147_s22 + $0xcd8] sm:$0xff] }
 0x1b5   : > { %6121 = vmatpush1.bf16.msra.mxu0 %v6120_v42  ;;  %5099 = vmatprep.subr.bf16.mxu1 %v5098_v43  ;;  %v682_v42 = vld [vmem:[%s7147_s22 + $0xc20] sm:$0xff]  ;;  %v684_v43 = vld [vmem:[%s7147_s22 + $0xc30] sm:$0xff]  ;;  %v1729_v36 = vld [vmem:[%s7147_s22 + $0x2cd8] sm:$0xff] }
 0x1b6   : > { %6123 = vmatprep.subr.bf16.mxu0 %v6122_v47  ;;  %v687_v47 = vld [vmem:[%s7147_s22 + $0xc48] sm:$0xff]  ;;  %v5120_v52 = vpack.c.bf16 %v684_v43, %v682_v42  ;;  %v1726_v42 = vld [vmem:[%s7147_s22 + $0x2cc0] sm:$0xff]  ;;  %v6162_v43 = vpack.c.bf16 %v1729_v36, %v1727_v35 }
 0x1b7   : > { %v722_v36 = vld [vmem:[%s7147_s22 + $0xd60] sm:$0xff] }
 0x1b8   : > { %5101 = vmatpush1.bf16.msra.mxu1 %v5100_v53  ;;  %v275_v53 = vld [vmem:[%s7165_s29 + $0x168] sm:$0xff] }
 0x1b9   : > { %6125 = vmatpush1.bf16.msra.mxu0 %v6124_v54  ;;  %5103 = vmatprep.subr.bf16.mxu1 %v5102_v55  ;;  %v6144_v54 = vpack.c.bf16 %v1708_v46, %v1706_v44  ;;  %v5122_v55 = vpack.c.bf16 %v689_v48, %v687_v47  ;;  %v1728_v44 = vld [vmem:[%s7147_s22 + $0x2cd0] sm:$0xff]  ;;  %v709_v46 = vld [vmem:[%s7147_s22 + $0xcf8] sm:$0xff]  ;;  %v1731_v47 = vld [vmem:[%s7147_s22 + $0x2ce8] sm:$0xff] }
 0x1ba   : > { %6127 = vmatprep.subr.bf16.mxu0 %v6126_v59  ;;  %v6146_v59 = vpack.c.bf16 %v1713_v50, %v1711_v49  ;;  %v1733_v48 = vld [vmem:[%s7147_s22 + $0x2cf8] sm:$0xff]  ;;  %v6164_v50 = vpack.c.bf16 %v1728_v44, %v1726_v42 }
 0x1bb   : > { %v729_v42 = vld [vmem:[%s7147_s22 + $0xd98] sm:$0xff] }
 0x1bc   : > { %5105 = vmatpush1.bf16.msra.mxu1 %v5104_v1  ;;  %v5124_v1 = vpack.c.bf16 %v688_v57, %v686_v56  ;;  %v1732_v56 = vld [vmem:[%s7147_s22 + $0x2cf0] sm:$0xff]  ;;  %v711_v57 = vld [vmem:[%s7147_s22 + $0xd08] sm:$0xff]  ;;  %v1753_v44 = vld [vmem:[%s7147_s22 + $0x2d98] sm:$0xff] }
 0x1bd   : > { %6129 = vmatpush1.bf16.msra.mxu0 %v6128_v2  ;;  %5107 = vmatprep.subr.bf16.mxu1 %v5106_v3  ;;  %v6148_v2 = vpack.c.bf16 %v1712_v60, %v1710_v58  ;;  %v5126_v3 = vpack.c.bf16 %v693_v62, %v691_v61  ;;  %v713_v58 = vld [vmem:[%s7147_s22 + $0xd18] sm:$0xff] }
 0x1be   : > { %6131 = vmatprep.subr.bf16.mxu0 %v6130_v7  ;;  %v6150_v7 = vpack.c.bf16 %v1717_v0, %v1715_v63  ;;  %v1737_v60 = vld [vmem:[%s7147_s22 + $0x2d18] sm:$0xff]  ;;  %v5146_v63 = vpack.c.bf16 %v713_v58, %v711_v57  ;;  %v710_v0 = vld [vmem:[%s7147_s22 + $0xd00] sm:$0xff] }
 0x1c0   : > { %5109 = vmatpush1.bf16.msra.mxu1 %v5108_v13  ;;  %v5128_v13 = vpack.c.bf16 %v692_v5, %v690_v4  ;;  %v1736_v4 = vld [vmem:[%s7147_s22 + $0x2d10] sm:$0xff]  ;;  %v715_v5 = vld [vmem:[%s7147_s22 + $0xd28] sm:$0xff] }
 0x1c1   : > { %6133 = vmatpush1.bf16.msra.mxu0 %v6132_v14  ;;  %5111 = vmatprep.subr.bf16.mxu1 %v5110_v15  ;;  %v6152_v14 = vpack.c.bf16 %v1716_v8, %v1714_v6  ;;  %v5130_v15 = vpack.c.bf16 %v697_v10, %v695_v9  ;;  %v717_v6 = vld [vmem:[%s7147_s22 + $0xd38] sm:$0xff] }
 0x1c2   : > { %6135 = vmatprep.subr.bf16.mxu0 %v6134_v19  ;;  %v6154_v19 = vpack.c.bf16 %v1721_v12, %v1719_v11  ;;  %v1741_v8 = vld [vmem:[%s7147_s22 + $0x2d38] sm:$0xff]  ;;  %v5150_v11 = vpack.c.bf16 %v717_v6, %v715_v5  ;;  %v714_v12 = vld [vmem:[%s7147_s22 + $0xd20] sm:$0xff] }
 0x1c4   : > { %5113 = vmatpush1.bf16.msra.mxu1 %v5112_v25  ;;  %v5132_v25 = vpack.c.bf16 %v696_v17, %v694_v16  ;;  %v1740_v16 = vld [vmem:[%s7147_s22 + $0x2d30] sm:$0xff]  ;;  %v719_v17 = vld [vmem:[%s7147_s22 + $0xd48] sm:$0xff] }
 0x1c5   : > { %6137 = vmatpush1.bf16.msra.mxu0 %v6136_v26  ;;  %5115 = vmatprep.subr.bf16.mxu1 %v5114_v27  ;;  %v6156_v26 = vpack.c.bf16 %v1720_v20, %v1718_v18  ;;  %v5134_v27 = vpack.c.bf16 %v701_v22, %v699_v21  ;;  %v721_v18 = vld [vmem:[%s7147_s22 + $0xd58] sm:$0xff] }
 0x1c6   : > { %6139 = vmatprep.subr.bf16.mxu0 %v6138_v31  ;;  %v6158_v31 = vpack.c.bf16 %v1725_v24, %v1723_v23  ;;  %v1745_v20 = vld [vmem:[%s7147_s22 + $0x2d58] sm:$0xff]  ;;  %v5154_v23 = vpack.c.bf16 %v721_v18, %v719_v17  ;;  %v718_v24 = vld [vmem:[%s7147_s22 + $0xd40] sm:$0xff] }
 0x1c7   : > { %2762 = vmatmul.mubr.f32.vlgmr.msra.gmra.mrb[0].mxu1 %v240_v37  ;;  %v5136_v37 = vpack.c.bf16 %v700_v29, %v698_v28  ;;  %v1744_v28 = vld [vmem:[%s7147_s22 + $0x2d50] sm:$0xff]  ;;  %v723_v29 = vld [vmem:[%s7147_s22 + $0xd68] sm:$0xff] }
 0x1c8   : > { %5117 = vmatpush1.bf16.msra.mxu1 %v5116_v38  ;;  %3898 = vmatmul.mubr.f32.vlgmr.msra.gmra.mrb[0].mxu0 %v272_v39  ;;  %v6160_v38 = vpack.c.bf16 %v1724_v32, %v1722_v30  ;;  %v5138_v39 = vpack.c.bf16 %v705_v34, %v703_v33  ;;  %v725_v30 = vld [vmem:[%s7147_s22 + $0xd78] sm:$0xff] }
 0x1c9   : > { %6141 = vmatpush1.bf16.msra.mxu0 %v6140_v40  ;;  %5119 = vmatprep.subr.bf16.mxu1 %v5118_v41  ;;  %v702_v40 = vld [vmem:[%s7147_s22 + $0xcc0] sm:$0xff]  ;;  %v704_v41 = vld [vmem:[%s7147_s22 + $0xcd0] sm:$0xff]  ;;  %v1749_v32 = vld [vmem:[%s7147_s22 + $0x2d78] sm:$0xff]  ;;  %v5158_v35 = vpack.c.bf16 %v725_v30, %v723_v29 }
 0x1ca   : > { %6143 = vmatprep.subr.bf16.mxu0 %v6142_v45  ;;  %2832 = vmatprep.mubr.f32.mxu1 %v243_v51  ;;  %v707_v45 = vld [vmem:[%s7147_s22 + $0xce8] sm:$0xff]  ;;  %v5140_v49 = vpack.c.bf16 %v704_v41, %v702_v40  ;;  %v1748_v40 = vld [vmem:[%s7147_s22 + $0x2d70] sm:$0xff] }
 0x1cb   : > { %3968 = vmatprep.mubr.f32.mxu0 %v275_v53  ;;  %v5142_v51 = vpack.c.bf16 %v709_v46, %v707_v45  ;;  %v708_v53 = vld [vmem:[%s7147_s22 + $0xcf0] sm:$0xff]  ;;  %v727_v41 = vld [vmem:[%s7147_s22 + $0xd88] sm:$0xff] }
 0x1cc   : > { %5121 = vmatpush1.bf16.msra.mxu1 %v5120_v52  ;;  %v706_v52 = vld [vmem:[%s7147_s22 + $0xce0] sm:$0xff] }
 0x1cd   : > { %6145 = vmatpush1.bf16.msra.mxu0 %v6144_v54  ;;  %5123 = vmatprep.subr.bf16.mxu1 %v5122_v55  ;;  %v1730_v54 = vld [vmem:[%s7147_s22 + $0x2ce0] sm:$0xff]  ;;  %v6166_v55 = vpack.c.bf16 %v1733_v48, %v1731_v47  ;;  %v5144_v61 = vpack.c.bf16 %v708_v53, %v706_v52  ;;  %v5162_v47 = vpack.c.bf16 %v729_v42, %v727_v41  ;;  %v1752_v52 = vld [vmem:[%s7147_s22 + $0x2d90] sm:$0xff]  ;;  %v731_v53 = vld [vmem:[%s7147_s22 + $0xda8] sm:$0xff] }
 0x1ce   : > { %6147 = vmatprep.subr.bf16.mxu0 %v6146_v59  ;;  %v1735_v59 = vld [vmem:[%s7147_s22 + $0x2d08] sm:$0xff]  ;;  %v6168_v62 = vpack.c.bf16 %v1732_v56, %v1730_v54  ;;  %v726_v48 = vld [vmem:[%s7147_s22 + $0xd80] sm:$0xff]  ;;  %v733_v54 = vld [vmem:[%s7147_s22 + $0xdb8] sm:$0xff] }
 0x1cf   : > { %v1757_v56 = vld [vmem:[%s7147_s22 + $0x2db8] sm:$0xff] }
 0x1d0   : > { %5125 = vmatpush1.bf16.msra.mxu1 %v5124_v1  ;;  %v712_v1 = vld [vmem:[%s7147_s22 + $0xd10] sm:$0xff]  ;;  %v242_v41 = vld [vmem:[%s7165_s29 + $0x60] sm:$0xff] }
 0x1d1   : > { %6149 = vmatpush1.bf16.msra.mxu0 %v6148_v2  ;;  %5127 = vmatprep.subr.bf16.mxu1 %v5126_v3  ;;  %v1734_v2 = vld [vmem:[%s7147_s22 + $0x2d00] sm:$0xff]  ;;  %v6170_v3 = vpack.c.bf16 %v1737_v60, %v1735_v59  ;;  %v5148_v9 = vpack.c.bf16 %v712_v1, %v710_v0  ;;  %v5166_v59 = vpack.c.bf16 %v733_v54, %v731_v53  ;;  %v1756_v0 = vld [vmem:[%s7147_s22 + $0x2db0] sm:$0xff]  ;;  %v735_v1 = vld [vmem:[%s7147_s22 + $0xdc8] sm:$0xff] }
 0x1d2   : > { %6151 = vmatprep.subr.bf16.mxu0 %v6150_v7  ;;  %v1739_v7 = vld [vmem:[%s7147_s22 + $0x2d28] sm:$0xff]  ;;  %v6172_v10 = vpack.c.bf16 %v1736_v4, %v1734_v2  ;;  %v730_v60 = vld [vmem:[%s7147_s22 + $0xda0] sm:$0xff]  ;;  %v737_v2 = vld [vmem:[%s7147_s22 + $0xdd8] sm:$0xff] }
 0x1d3   : > { %v1761_v4 = vld [vmem:[%s7147_s22 + $0x2dd8] sm:$0xff]  ;;  %v1775_v53 = vld [vmem:[%s7147_s22 + $0x2e48] sm:$0xff] }
 0x1d4   : > { %5129 = vmatpush1.bf16.msra.mxu1 %v5128_v13  ;;  %v716_v13 = vld [vmem:[%s7147_s22 + $0xd30] sm:$0xff]  ;;  %v1777_v54 = vld [vmem:[%s7147_s22 + $0x2e58] sm:$0xff] }
 0x1d5   : > { %6153 = vmatpush1.bf16.msra.mxu0 %v6152_v14  ;;  %5131 = vmatprep.subr.bf16.mxu1 %v5130_v15  ;;  %v1738_v14 = vld [vmem:[%s7147_s22 + $0x2d20] sm:$0xff]  ;;  %v6174_v15 = vpack.c.bf16 %v1741_v8, %v1739_v7  ;;  %v5152_v21 = vpack.c.bf16 %v716_v13, %v714_v12  ;;  %v5170_v7 = vpack.c.bf16 %v737_v2, %v735_v1  ;;  %v1760_v12 = vld [vmem:[%s7147_s22 + $0x2dd0] sm:$0xff]  ;;  %v739_v13 = vld [vmem:[%s7147_s22 + $0xde8] sm:$0xff] }
 0x1d6   : > { %6155 = vmatprep.subr.bf16.mxu0 %v6154_v19  ;;  %v1743_v19 = vld [vmem:[%s7147_s22 + $0x2d48] sm:$0xff]  ;;  %v6176_v22 = vpack.c.bf16 %v1740_v16, %v1738_v14  ;;  %v734_v8 = vld [vmem:[%s7147_s22 + $0xdc0] sm:$0xff]  ;;  %v741_v14 = vld [vmem:[%s7147_s22 + $0xdf8] sm:$0xff] }
 0x1d7   : > { %v1765_v16 = vld [vmem:[%s7147_s22 + $0x2df8] sm:$0xff]  ;;  %v755_v1 = vld [vmem:[%s7147_s22 + $0xe68] sm:$0xff] }
 0x1d8   : > { %5133 = vmatpush1.bf16.msra.mxu1 %v5132_v25  ;;  %v720_v25 = vld [vmem:[%s7147_s22 + $0xd50] sm:$0xff]  ;;  %v757_v2 = vld [vmem:[%s7147_s22 + $0xe78] sm:$0xff] }
 0x1d9   : > { %6157 = vmatpush1.bf16.msra.mxu0 %v6156_v26  ;;  %5135 = vmatprep.subr.bf16.mxu1 %v5134_v27  ;;  %v1742_v26 = vld [vmem:[%s7147_s22 + $0x2d40] sm:$0xff]  ;;  %v6178_v27 = vpack.c.bf16 %v1745_v20, %v1743_v19  ;;  %v5156_v33 = vpack.c.bf16 %v720_v25, %v718_v24  ;;  %v5174_v19 = vpack.c.bf16 %v741_v14, %v739_v13  ;;  %v1764_v24 = vld [vmem:[%s7147_s22 + $0x2df0] sm:$0xff]  ;;  %v743_v25 = vld [vmem:[%s7147_s22 + $0xe08] sm:$0xff] }
 0x1da   : > { %6159 = vmatprep.subr.bf16.mxu0 %v6158_v31  ;;  %v1747_v31 = vld [vmem:[%s7147_s22 + $0x2d68] sm:$0xff]  ;;  %v6180_v34 = vpack.c.bf16 %v1744_v28, %v1742_v26  ;;  %v738_v20 = vld [vmem:[%s7147_s22 + $0xde0] sm:$0xff]  ;;  %v745_v26 = vld [vmem:[%s7147_s22 + $0xe18] sm:$0xff] }
 0x1db   : > { %v1769_v28 = vld [vmem:[%s7147_s22 + $0x2e18] sm:$0xff]  ;;  %v759_v13 = vld [vmem:[%s7147_s22 + $0xe88] sm:$0xff] }
 0x1dc   : > { %5137 = vmatpush1.bf16.msra.mxu1 %v5136_v37  ;;  %v724_v37 = vld [vmem:[%s7147_s22 + $0xd70] sm:$0xff]  ;;  %v761_v14 = vld [vmem:[%s7147_s22 + $0xe98] sm:$0xff] }
 0x1dd   : > { %6161 = vmatpush1.bf16.msra.mxu0 %v6160_v38  ;;  %5139 = vmatprep.subr.bf16.mxu1 %v5138_v39  ;;  %v1746_v38 = vld [vmem:[%s7147_s22 + $0x2d60] sm:$0xff]  ;;  %v6182_v39 = vpack.c.bf16 %v1749_v32, %v1747_v31  ;;  %v5160_v45 = vpack.c.bf16 %v724_v37, %v722_v36  ;;  %v5178_v31 = vpack.c.bf16 %v745_v26, %v743_v25  ;;  %v1768_v36 = vld [vmem:[%s7147_s22 + $0x2e10] sm:$0xff]  ;;  %v747_v37 = vld [vmem:[%s7147_s22 + $0xe28] sm:$0xff] }
 0x1de   : > { %6163 = vmatprep.subr.bf16.mxu0 %v6162_v43  ;;  %v1751_v43 = vld [vmem:[%s7147_s22 + $0x2d88] sm:$0xff]  ;;  %v6184_v46 = vpack.c.bf16 %v1748_v40, %v1746_v38  ;;  %v742_v32 = vld [vmem:[%s7147_s22 + $0xe00] sm:$0xff]  ;;  %v749_v38 = vld [vmem:[%s7147_s22 + $0xe38] sm:$0xff] }
 0x1df   : > { %v1773_v40 = vld [vmem:[%s7147_s22 + $0x2e38] sm:$0xff]  ;;  %v763_v25 = vld [vmem:[%s7147_s22 + $0xea8] sm:$0xff] }
 0x1e0   : > { %5141 = vmatpush1.bf16.msra.mxu1 %v5140_v49  ;;  %v728_v49 = vld [vmem:[%s7147_s22 + $0xd90] sm:$0xff]  ;;  %v765_v26 = vld [vmem:[%s7147_s22 + $0xeb8] sm:$0xff] }
 0x1e1   : > { %6165 = vmatpush1.bf16.msra.mxu0 %v6164_v50  ;;  %5143 = vmatprep.subr.bf16.mxu1 %v5142_v51  ;;  %v1750_v50 = vld [vmem:[%s7147_s22 + $0x2d80] sm:$0xff]  ;;  %v6186_v51 = vpack.c.bf16 %v1753_v44, %v1751_v43  ;;  %v5164_v57 = vpack.c.bf16 %v728_v49, %v726_v48  ;;  %v274_v43 = vld [vmem:[%s7165_s29 + $0x160] sm:$0xff] }
 0x1e2   : > { %6167 = vmatprep.subr.bf16.mxu0 %v6166_v55  ;;  %v1755_v55 = vld [vmem:[%s7147_s22 + $0x2da8] sm:$0xff]  ;;  %v6188_v58 = vpack.c.bf16 %v1752_v52, %v1750_v50  ;;  %v1770_v48 = vld [vmem:[%s7147_s22 + $0x2e20] sm:$0xff]  ;;  %v1772_v50 = vld [vmem:[%s7147_s22 + $0x2e30] sm:$0xff] }
 0x1e3   : > { %v753_v52 = vld [vmem:[%s7147_s22 + $0xe58] sm:$0xff] }
 0x1e4   : > { %5145 = vmatpush1.bf16.msra.mxu1 %v5144_v61  ;;  %v732_v61 = vld [vmem:[%s7147_s22 + $0xdb0] sm:$0xff] }
 0x1e5   : > { %6169 = vmatpush1.bf16.msra.mxu0 %v6168_v62  ;;  %5147 = vmatprep.subr.bf16.mxu1 %v5146_v63  ;;  %v1754_v62 = vld [vmem:[%s7147_s22 + $0x2da0] sm:$0xff]  ;;  %v6190_v63 = vpack.c.bf16 %v1757_v56, %v1755_v55  ;;  %v5168_v5 = vpack.c.bf16 %v732_v61, %v730_v60  ;;  %v245_v55 = vld [vmem:[%s7165_s29 + $0x78] sm:$0xff] }
 0x1e6   : > { %6171 = vmatprep.subr.bf16.mxu0 %v6170_v3  ;;  %v1759_v3 = vld [vmem:[%s7147_s22 + $0x2dc8] sm:$0xff]  ;;  %v6192_v6 = vpack.c.bf16 %v1756_v0, %v1754_v62  ;;  %v750_v60 = vld [vmem:[%s7147_s22 + $0xe40] sm:$0xff]  ;;  %v752_v61 = vld [vmem:[%s7147_s22 + $0xe50] sm:$0xff] }
 0x1e7   : > { %v1774_v62 = vld [vmem:[%s7147_s22 + $0x2e40] sm:$0xff]  ;;  %v1776_v0 = vld [vmem:[%s7147_s22 + $0x2e50] sm:$0xff] }
 0x1e8   : > { %5149 = vmatpush1.bf16.msra.mxu1 %v5148_v9  ;;  %v736_v9 = vld [vmem:[%s7147_s22 + $0xdd0] sm:$0xff] }
 0x1e9   : > { %6173 = vmatpush1.bf16.msra.mxu0 %v6172_v10  ;;  %5151 = vmatprep.subr.bf16.mxu1 %v5150_v11  ;;  %v1758_v10 = vld [vmem:[%s7147_s22 + $0x2dc0] sm:$0xff]  ;;  %v6194_v11 = vpack.c.bf16 %v1761_v4, %v1759_v3  ;;  %v5172_v17 = vpack.c.bf16 %v736_v9, %v734_v8  ;;  %v1779_v3 = vld [vmem:[%s7147_s22 + $0x2e68] sm:$0xff]  ;;  %v1781_v4 = vld [vmem:[%s7147_s22 + $0x2e78] sm:$0xff] }
 0x1ea   : > { %6175 = vmatprep.subr.bf16.mxu0 %v6174_v15  ;;  %v1763_v15 = vld [vmem:[%s7147_s22 + $0x2de8] sm:$0xff]  ;;  %v6196_v18 = vpack.c.bf16 %v1760_v12, %v1758_v10  ;;  %v754_v8 = vld [vmem:[%s7147_s22 + $0xe60] sm:$0xff]  ;;  %v756_v9 = vld [vmem:[%s7147_s22 + $0xe70] sm:$0xff] }
 0x1eb   : > { %v1778_v10 = vld [vmem:[%s7147_s22 + $0x2e60] sm:$0xff]  ;;  %v1780_v12 = vld [vmem:[%s7147_s22 + $0x2e70] sm:$0xff] }
 0x1ec   : > { %5153 = vmatpush1.bf16.msra.mxu1 %v5152_v21  ;;  %v740_v21 = vld [vmem:[%s7147_s22 + $0xdf0] sm:$0xff] }
 0x1ed   : > { %6177 = vmatpush1.bf16.msra.mxu0 %v6176_v22  ;;  %5155 = vmatprep.subr.bf16.mxu1 %v5154_v23  ;;  %v1762_v22 = vld [vmem:[%s7147_s22 + $0x2de0] sm:$0xff]  ;;  %v6198_v23 = vpack.c.bf16 %v1765_v16, %v1763_v15  ;;  %v5176_v29 = vpack.c.bf16 %v740_v21, %v738_v20  ;;  %v1783_v15 = vld [vmem:[%s7147_s22 + $0x2e88] sm:$0xff]  ;;  %v1785_v16 = vld [vmem:[%s7147_s22 + $0x2e98] sm:$0xff] }
 0x1ee   : > { %6179 = vmatprep.subr.bf16.mxu0 %v6178_v27  ;;  %v1767_v27 = vld [vmem:[%s7147_s22 + $0x2e08] sm:$0xff]  ;;  %v6200_v30 = vpack.c.bf16 %v1764_v24, %v1762_v22  ;;  %v758_v20 = vld [vmem:[%s7147_s22 + $0xe80] sm:$0xff]  ;;  %v760_v21 = vld [vmem:[%s7147_s22 + $0xe90] sm:$0xff] }
 0x1ef   : > { %v1782_v22 = vld [vmem:[%s7147_s22 + $0x2e80] sm:$0xff]  ;;  %v1784_v24 = vld [vmem:[%s7147_s22 + $0x2e90] sm:$0xff] }
 0x1f0   : > { %5157 = vmatpush1.bf16.msra.mxu1 %v5156_v33  ;;  %v744_v33 = vld [vmem:[%s7147_s22 + $0xe10] sm:$0xff] }
 0x1f1   : > { %6181 = vmatpush1.bf16.msra.mxu0 %v6180_v34  ;;  %5159 = vmatprep.subr.bf16.mxu1 %v5158_v35  ;;  %v1766_v34 = vld [vmem:[%s7147_s22 + $0x2e00] sm:$0xff]  ;;  %v6202_v35 = vpack.c.bf16 %v1769_v28, %v1767_v27  ;;  %v5180_v42 = vpack.c.bf16 %v744_v33, %v742_v32  ;;  %v1787_v27 = vld [vmem:[%s7147_s22 + $0x2ea8] sm:$0xff]  ;;  %v1789_v28 = vld [vmem:[%s7147_s22 + $0x2eb8] sm:$0xff] }
 0x1f2   : > { %6183 = vmatprep.subr.bf16.mxu0 %v6182_v39  ;;  %v1771_v39 = vld [vmem:[%s7147_s22 + $0x2e28] sm:$0xff]  ;;  %v6204_v44 = vpack.c.bf16 %v1768_v36, %v1766_v34  ;;  %v762_v32 = vld [vmem:[%s7147_s22 + $0xea0] sm:$0xff]  ;;  %v764_v33 = vld [vmem:[%s7147_s22 + $0xeb0] sm:$0xff] }
 0x1f3   : > { %v6206_v49 = vpack.c.bf16 %v1773_v40, %v1771_v39  ;;  %v1786_v34 = vld [vmem:[%s7147_s22 + $0x2ea0] sm:$0xff]  ;;  %v1788_v36 = vld [vmem:[%s7147_s22 + $0x2eb0] sm:$0xff]  ;;  %v1791_v39 = vld [vmem:[%s7147_s22 + $0x2ec8] sm:$0xff] }
 0x1f4   : > { %5161 = vmatpush1.bf16.msra.mxu1 %v5160_v45  ;;  %v5182_v45 = vpack.c.bf16 %v749_v38, %v747_v37  ;;  %v767_v37 = vld [vmem:[%s7147_s22 + $0xec8] sm:$0xff]  ;;  %v769_v38 = vld [vmem:[%s7147_s22 + $0xed8] sm:$0xff] }
 0x1f5   : > { %6185 = vmatpush1.bf16.msra.mxu0 %v6184_v46  ;;  %5163 = vmatprep.subr.bf16.mxu1 %v5162_v47  ;;  %v746_v46 = vld [vmem:[%s7147_s22 + $0xe20] sm:$0xff]  ;;  %v748_v47 = vld [vmem:[%s7147_s22 + $0xe30] sm:$0xff]  ;;  %v1793_v40 = vld [vmem:[%s7147_s22 + $0x2ed8] sm:$0xff] }
 0x1f6   : > { %6187 = vmatprep.subr.bf16.mxu0 %v6186_v51  ;;  %v751_v51 = vld [vmem:[%s7147_s22 + $0xe48] sm:$0xff]  ;;  %v5184_v56 = vpack.c.bf16 %v748_v47, %v746_v46  ;;  %v1790_v46 = vld [vmem:[%s7147_s22 + $0x2ec0] sm:$0xff]  ;;  %v6226_v47 = vpack.c.bf16 %v1793_v40, %v1791_v39 }
 0x1f7   : > { %v786_v40 = vld [vmem:[%s7147_s22 + $0xf60] sm:$0xff] }
 0x1f8   : > { %5165 = vmatpush1.bf16.msra.mxu1 %v5164_v57  ;;  %v277_v57 = vld [vmem:[%s7165_s29 + $0x178] sm:$0xff] }
 0x1f9   : > { %6189 = vmatpush1.bf16.msra.mxu0 %v6188_v58  ;;  %5167 = vmatprep.subr.bf16.mxu1 %v5166_v59  ;;  %v6208_v58 = vpack.c.bf16 %v1772_v50, %v1770_v48  ;;  %v5186_v59 = vpack.c.bf16 %v753_v52, %v751_v51  ;;  %v1792_v48 = vld [vmem:[%s7147_s22 + $0x2ed0] sm:$0xff]  ;;  %v773_v50 = vld [vmem:[%s7147_s22 + $0xef8] sm:$0xff]  ;;  %v1795_v51 = vld [vmem:[%s7147_s22 + $0x2ee8] sm:$0xff] }
 0x1fa   : > { %6191 = vmatprep.subr.bf16.mxu0 %v6190_v63  ;;  %v6210_v63 = vpack.c.bf16 %v1777_v54, %v1775_v53  ;;  %v1797_v52 = vld [vmem:[%s7147_s22 + $0x2ef8] sm:$0xff]  ;;  %v6228_v54 = vpack.c.bf16 %v1792_v48, %v1790_v46 }
 0x1fb   : > { %v793_v46 = vld [vmem:[%s7147_s22 + $0xf98] sm:$0xff] }
 0x1fc   : > { %5169 = vmatpush1.bf16.msra.mxu1 %v5168_v5  ;;  %v5188_v5 = vpack.c.bf16 %v752_v61, %v750_v60  ;;  %v1796_v60 = vld [vmem:[%s7147_s22 + $0x2ef0] sm:$0xff]  ;;  %v775_v61 = vld [vmem:[%s7147_s22 + $0xf08] sm:$0xff]  ;;  %v1817_v48 = vld [vmem:[%s7147_s22 + $0x2f98] sm:$0xff] }
 0x1fd   : > { %6193 = vmatpush1.bf16.msra.mxu0 %v6192_v6  ;;  %5171 = vmatprep.subr.bf16.mxu1 %v5170_v7  ;;  %v6212_v6 = vpack.c.bf16 %v1776_v0, %v1774_v62  ;;  %v5190_v7 = vpack.c.bf16 %v757_v2, %v755_v1  ;;  %v777_v62 = vld [vmem:[%s7147_s22 + $0xf18] sm:$0xff] }
 0x1fe   : > { %6195 = vmatprep.subr.bf16.mxu0 %v6194_v11  ;;  %v6214_v11 = vpack.c.bf16 %v1781_v4, %v1779_v3  ;;  %v1801_v0 = vld [vmem:[%s7147_s22 + $0x2f18] sm:$0xff]  ;;  %v5210_v3 = vpack.c.bf16 %v777_v62, %v775_v61  ;;  %v774_v4 = vld [vmem:[%s7147_s22 + $0xf00] sm:$0xff] }
 0x200   : > { %5173 = vmatpush1.bf16.msra.mxu1 %v5172_v17  ;;  %v5192_v17 = vpack.c.bf16 %v756_v9, %v754_v8  ;;  %v1800_v8 = vld [vmem:[%s7147_s22 + $0x2f10] sm:$0xff]  ;;  %v779_v9 = vld [vmem:[%s7147_s22 + $0xf28] sm:$0xff] }
 0x201   : > { %6197 = vmatpush1.bf16.msra.mxu0 %v6196_v18  ;;  %5175 = vmatprep.subr.bf16.mxu1 %v5174_v19  ;;  %v6216_v18 = vpack.c.bf16 %v1780_v12, %v1778_v10  ;;  %v5194_v19 = vpack.c.bf16 %v761_v14, %v759_v13  ;;  %v781_v10 = vld [vmem:[%s7147_s22 + $0xf38] sm:$0xff] }
 0x202   : > { %6199 = vmatprep.subr.bf16.mxu0 %v6198_v23  ;;  %v6218_v23 = vpack.c.bf16 %v1785_v16, %v1783_v15  ;;  %v1805_v12 = vld [vmem:[%s7147_s22 + $0x2f38] sm:$0xff]  ;;  %v5214_v15 = vpack.c.bf16 %v781_v10, %v779_v9  ;;  %v778_v16 = vld [vmem:[%s7147_s22 + $0xf20] sm:$0xff] }
 0x204   : > { %5177 = vmatpush1.bf16.msra.mxu1 %v5176_v29  ;;  %v5196_v29 = vpack.c.bf16 %v760_v21, %v758_v20  ;;  %v1804_v20 = vld [vmem:[%s7147_s22 + $0x2f30] sm:$0xff]  ;;  %v783_v21 = vld [vmem:[%s7147_s22 + $0xf48] sm:$0xff] }
 0x205   : > { %6201 = vmatpush1.bf16.msra.mxu0 %v6200_v30  ;;  %5179 = vmatprep.subr.bf16.mxu1 %v5178_v31  ;;  %v6220_v30 = vpack.c.bf16 %v1784_v24, %v1782_v22  ;;  %v5198_v31 = vpack.c.bf16 %v765_v26, %v763_v25  ;;  %v785_v22 = vld [vmem:[%s7147_s22 + $0xf58] sm:$0xff] }
 0x206   : > { %6203 = vmatprep.subr.bf16.mxu0 %v6202_v35  ;;  %v6222_v35 = vpack.c.bf16 %v1789_v28, %v1787_v27  ;;  %v1809_v24 = vld [vmem:[%s7147_s22 + $0x2f58] sm:$0xff]  ;;  %v5218_v27 = vpack.c.bf16 %v785_v22, %v783_v21  ;;  %v782_v28 = vld [vmem:[%s7147_s22 + $0xf40] sm:$0xff] }
 0x207   : > { %2833 = vmatmul.mubr.f32.vlgmr.msra.gmra.mrb[0].mxu1 %v242_v41  ;;  %v5200_v41 = vpack.c.bf16 %v764_v33, %v762_v32  ;;  %v1808_v32 = vld [vmem:[%s7147_s22 + $0x2f50] sm:$0xff]  ;;  %v787_v33 = vld [vmem:[%s7147_s22 + $0xf68] sm:$0xff] }
 0x208   : > { %5181 = vmatpush1.bf16.msra.mxu1 %v5180_v42  ;;  %3969 = vmatmul.mubr.f32.vlgmr.msra.gmra.mrb[0].mxu0 %v274_v43  ;;  %v6224_v42 = vpack.c.bf16 %v1788_v36, %v1786_v34  ;;  %v5202_v43 = vpack.c.bf16 %v769_v38, %v767_v37  ;;  %v789_v34 = vld [vmem:[%s7147_s22 + $0xf78] sm:$0xff] }
 0x209   : > { %6205 = vmatpush1.bf16.msra.mxu0 %v6204_v44  ;;  %5183 = vmatprep.subr.bf16.mxu1 %v5182_v45  ;;  %v766_v44 = vld [vmem:[%s7147_s22 + $0xec0] sm:$0xff]  ;;  %v768_v45 = vld [vmem:[%s7147_s22 + $0xed0] sm:$0xff]  ;;  %v1813_v36 = vld [vmem:[%s7147_s22 + $0x2f78] sm:$0xff]  ;;  %v5222_v39 = vpack.c.bf16 %v789_v34, %v787_v33 }
 0x20a   : > { %6207 = vmatprep.subr.bf16.mxu0 %v6206_v49  ;;  %2903 = vmatprep.mubr.f32.mxu1 %v245_v55  ;;  %v771_v49 = vld [vmem:[%s7147_s22 + $0xee8] sm:$0xff]  ;;  %v5204_v53 = vpack.c.bf16 %v768_v45, %v766_v44  ;;  %v1812_v44 = vld [vmem:[%s7147_s22 + $0x2f70] sm:$0xff] }
 0x20b   : > { %4039 = vmatprep.mubr.f32.mxu0 %v277_v57  ;;  %v5206_v55 = vpack.c.bf16 %v773_v50, %v771_v49  ;;  %v772_v57 = vld [vmem:[%s7147_s22 + $0xef0] sm:$0xff]  ;;  %v791_v45 = vld [vmem:[%s7147_s22 + $0xf88] sm:$0xff] }
 0x20c   : > { %5185 = vmatpush1.bf16.msra.mxu1 %v5184_v56  ;;  %v770_v56 = vld [vmem:[%s7147_s22 + $0xee0] sm:$0xff] }
 0x20d   : > { %6209 = vmatpush1.bf16.msra.mxu0 %v6208_v58  ;;  %5187 = vmatprep.subr.bf16.mxu1 %v5186_v59  ;;  %v1794_v58 = vld [vmem:[%s7147_s22 + $0x2ee0] sm:$0xff]  ;;  %v6230_v59 = vpack.c.bf16 %v1797_v52, %v1795_v51  ;;  %v5208_v1 = vpack.c.bf16 %v772_v57, %v770_v56  ;;  %v5226_v51 = vpack.c.bf16 %v793_v46, %v791_v45  ;;  %v1816_v56 = vld [vmem:[%s7147_s22 + $0x2f90] sm:$0xff]  ;;  %v795_v57 = vld [vmem:[%s7147_s22 + $0xfa8] sm:$0xff] }
 0x20e   : > { %6211 = vmatprep.subr.bf16.mxu0 %v6210_v63  ;;  %v1799_v63 = vld [vmem:[%s7147_s22 + $0x2f08] sm:$0xff]  ;;  %v6232_v2 = vpack.c.bf16 %v1796_v60, %v1794_v58  ;;  %v790_v52 = vld [vmem:[%s7147_s22 + $0xf80] sm:$0xff]  ;;  %v797_v58 = vld [vmem:[%s7147_s22 + $0xfb8] sm:$0xff] }
 0x20f   : > { %v1821_v60 = vld [vmem:[%s7147_s22 + $0x2fb8] sm:$0xff]  ;;  %v244_v45 = vld [vmem:[%s7165_s29 + $0x70] sm:$0xff] }
 0x210   : > { %5189 = vmatpush1.bf16.msra.mxu1 %v5188_v5  ;;  %v776_v5 = vld [vmem:[%s7147_s22 + $0xf10] sm:$0xff] }
 0x211   : > { %6213 = vmatpush1.bf16.msra.mxu0 %v6212_v6  ;;  %5191 = vmatprep.subr.bf16.mxu1 %v5190_v7  ;;  %v1798_v6 = vld [vmem:[%s7147_s22 + $0x2f00] sm:$0xff]  ;;  %v6234_v7 = vpack.c.bf16 %v1801_v0, %v1799_v63  ;;  %v5212_v13 = vpack.c.bf16 %v776_v5, %v774_v4  ;;  %v5230_v63 = vpack.c.bf16 %v797_v58, %v795_v57  ;;  %v1820_v4 = vld [vmem:[%s7147_s22 + $0x2fb0] sm:$0xff]  ;;  %v799_v5 = vld [vmem:[%s7147_s22 + $0xfc8] sm:$0xff] }
 0x212   : > { %6215 = vmatprep.subr.bf16.mxu0 %v6214_v11  ;;  %v1803_v11 = vld [vmem:[%s7147_s22 + $0x2f28] sm:$0xff]  ;;  %v6236_v14 = vpack.c.bf16 %v1800_v8, %v1798_v6  ;;  %v794_v0 = vld [vmem:[%s7147_s22 + $0xfa0] sm:$0xff]  ;;  %v801_v6 = vld [vmem:[%s7147_s22 + $0xfd8] sm:$0xff] }
 0x213   : > { %v1825_v8 = vld [vmem:[%s7147_s22 + $0x2fd8] sm:$0xff]  ;;  %v1839_v57 = vld [vmem:[%s7147_s22 + $0x3048] sm:$0xff] }
 0x214   : > { %5193 = vmatpush1.bf16.msra.mxu1 %v5192_v17  ;;  %v780_v17 = vld [vmem:[%s7147_s22 + $0xf30] sm:$0xff]  ;;  %v1841_v58 = vld [vmem:[%s7147_s22 + $0x3058] sm:$0xff] }
 0x215   : > { %6217 = vmatpush1.bf16.msra.mxu0 %v6216_v18  ;;  %5195 = vmatprep.subr.bf16.mxu1 %v5194_v19  ;;  %v1802_v18 = vld [vmem:[%s7147_s22 + $0x2f20] sm:$0xff]  ;;  %v6238_v19 = vpack.c.bf16 %v1805_v12, %v1803_v11  ;;  %v5216_v25 = vpack.c.bf16 %v780_v17, %v778_v16  ;;  %v5234_v11 = vpack.c.bf16 %v801_v6, %v799_v5  ;;  %v1824_v16 = vld [vmem:[%s7147_s22 + $0x2fd0] sm:$0xff]  ;;  %v803_v17 = vld [vmem:[%s7147_s22 + $0xfe8] sm:$0xff] }
 0x216   : > { %6219 = vmatprep.subr.bf16.mxu0 %v6218_v23  ;;  %v1807_v23 = vld [vmem:[%s7147_s22 + $0x2f48] sm:$0xff]  ;;  %v6240_v26 = vpack.c.bf16 %v1804_v20, %v1802_v18  ;;  %v798_v12 = vld [vmem:[%s7147_s22 + $0xfc0] sm:$0xff]  ;;  %v805_v18 = vld [vmem:[%s7147_s22 + $0xff8] sm:$0xff] }
 0x217   : > { %v1829_v20 = vld [vmem:[%s7147_s22 + $0x2ff8] sm:$0xff]  ;;  %v819_v5 = vld [vmem:[%s7147_s22 + $0x1068] sm:$0xff] }
 0x218   : > { %5197 = vmatpush1.bf16.msra.mxu1 %v5196_v29  ;;  %v784_v29 = vld [vmem:[%s7147_s22 + $0xf50] sm:$0xff]  ;;  %v821_v6 = vld [vmem:[%s7147_s22 + $0x1078] sm:$0xff] }
 0x219   : > { %6221 = vmatpush1.bf16.msra.mxu0 %v6220_v30  ;;  %5199 = vmatprep.subr.bf16.mxu1 %v5198_v31  ;;  %v1806_v30 = vld [vmem:[%s7147_s22 + $0x2f40] sm:$0xff]  ;;  %v6242_v31 = vpack.c.bf16 %v1809_v24, %v1807_v23  ;;  %v5220_v37 = vpack.c.bf16 %v784_v29, %v782_v28  ;;  %v5238_v23 = vpack.c.bf16 %v805_v18, %v803_v17  ;;  %v1828_v28 = vld [vmem:[%s7147_s22 + $0x2ff0] sm:$0xff]  ;;  %v807_v29 = vld [vmem:[%s7147_s22 + $0x1008] sm:$0xff] }
 0x21a   : > { %6223 = vmatprep.subr.bf16.mxu0 %v6222_v35  ;;  %v1811_v35 = vld [vmem:[%s7147_s22 + $0x2f68] sm:$0xff]  ;;  %v6244_v38 = vpack.c.bf16 %v1808_v32, %v1806_v30  ;;  %v802_v24 = vld [vmem:[%s7147_s22 + $0xfe0] sm:$0xff]  ;;  %v809_v30 = vld [vmem:[%s7147_s22 + $0x1018] sm:$0xff] }
 0x21b   : > { %v1833_v32 = vld [vmem:[%s7147_s22 + $0x3018] sm:$0xff]  ;;  %v823_v17 = vld [vmem:[%s7147_s22 + $0x1088] sm:$0xff] }
 0x21c   : > { %5201 = vmatpush1.bf16.msra.mxu1 %v5200_v41  ;;  %v788_v41 = vld [vmem:[%s7147_s22 + $0xf70] sm:$0xff]  ;;  %v825_v18 = vld [vmem:[%s7147_s22 + $0x1098] sm:$0xff] }
 0x21d   : > { %6225 = vmatpush1.bf16.msra.mxu0 %v6224_v42  ;;  %5203 = vmatprep.subr.bf16.mxu1 %v5202_v43  ;;  %v1810_v42 = vld [vmem:[%s7147_s22 + $0x2f60] sm:$0xff]  ;;  %v6246_v43 = vpack.c.bf16 %v1813_v36, %v1811_v35  ;;  %v5224_v49 = vpack.c.bf16 %v788_v41, %v786_v40  ;;  %v5242_v35 = vpack.c.bf16 %v809_v30, %v807_v29  ;;  %v1832_v40 = vld [vmem:[%s7147_s22 + $0x3010] sm:$0xff]  ;;  %v811_v41 = vld [vmem:[%s7147_s22 + $0x1028] sm:$0xff] }
 0x21e   : > { %6227 = vmatprep.subr.bf16.mxu0 %v6226_v47  ;;  %v1815_v47 = vld [vmem:[%s7147_s22 + $0x2f88] sm:$0xff]  ;;  %v6248_v50 = vpack.c.bf16 %v1812_v44, %v1810_v42  ;;  %v806_v36 = vld [vmem:[%s7147_s22 + $0x1000] sm:$0xff]  ;;  %v813_v42 = vld [vmem:[%s7147_s22 + $0x1038] sm:$0xff] }
 0x21f   : > { %v1837_v44 = vld [vmem:[%s7147_s22 + $0x3038] sm:$0xff]  ;;  %v827_v29 = vld [vmem:[%s7147_s22 + $0x10a8] sm:$0xff] }
 0x220   : > { %5205 = vmatpush1.bf16.msra.mxu1 %v5204_v53  ;;  %v792_v53 = vld [vmem:[%s7147_s22 + $0xf90] sm:$0xff]  ;;  %v829_v30 = vld [vmem:[%s7147_s22 + $0x10b8] sm:$0xff] }
 0x221   : > { %6229 = vmatpush1.bf16.msra.mxu0 %v6228_v54  ;;  %5207 = vmatprep.subr.bf16.mxu1 %v5206_v55  ;;  %v1814_v54 = vld [vmem:[%s7147_s22 + $0x2f80] sm:$0xff]  ;;  %v6250_v55 = vpack.c.bf16 %v1817_v48, %v1815_v47  ;;  %v5228_v61 = vpack.c.bf16 %v792_v53, %v790_v52  ;;  %v276_v47 = vld [vmem:[%s7165_s29 + $0x170] sm:$0xff] }
 0x222   : > { %6231 = vmatprep.subr.bf16.mxu0 %v6230_v59  ;;  %v1819_v59 = vld [vmem:[%s7147_s22 + $0x2fa8] sm:$0xff]  ;;  %v6252_v62 = vpack.c.bf16 %v1816_v56, %v1814_v54  ;;  %v1834_v52 = vld [vmem:[%s7147_s22 + $0x3020] sm:$0xff]  ;;  %v1836_v54 = vld [vmem:[%s7147_s22 + $0x3030] sm:$0xff] }
 0x223   : > { %v817_v56 = vld [vmem:[%s7147_s22 + $0x1058] sm:$0xff] }
 0x224   : > { %5209 = vmatpush1.bf16.msra.mxu1 %v5208_v1  ;;  %v796_v1 = vld [vmem:[%s7147_s22 + $0xfb0] sm:$0xff] }
 0x225   : > { %6233 = vmatpush1.bf16.msra.mxu0 %v6232_v2  ;;  %5211 = vmatprep.subr.bf16.mxu1 %v5210_v3  ;;  %v1818_v2 = vld [vmem:[%s7147_s22 + $0x2fa0] sm:$0xff]  ;;  %v6254_v3 = vpack.c.bf16 %v1821_v60, %v1819_v59  ;;  %v5232_v9 = vpack.c.bf16 %v796_v1, %v794_v0  ;;  %v816_v1 = vld [vmem:[%s7147_s22 + $0x1050] sm:$0xff] }
 0x226   : > { %6235 = vmatprep.subr.bf16.mxu0 %v6234_v7  ;;  %v1823_v7 = vld [vmem:[%s7147_s22 + $0x2fc8] sm:$0xff]  ;;  %v6256_v10 = vpack.c.bf16 %v1820_v4, %v1818_v2  ;;  %v247_v59 = vld [vmem:[%s7165_s29 + $0x88] sm:$0xff]  ;;  %v1840_v4 = vld [vmem:[%s7147_s22 + $0x3050] sm:$0xff] }
 0x227   : > { %v814_v0 = vld [vmem:[%s7147_s22 + $0x1040] sm:$0xff] }
 0x228   : > { %5213 = vmatpush1.bf16.msra.mxu1 %v5212_v13  ;;  %v800_v13 = vld [vmem:[%s7147_s22 + $0xfd0] sm:$0xff]  ;;  %v1838_v2 = vld [vmem:[%s7147_s22 + $0x3040] sm:$0xff] }
 0x229   : > { %6237 = vmatpush1.bf16.msra.mxu0 %v6236_v14  ;;  %5215 = vmatprep.subr.bf16.mxu1 %v5214_v15  ;;  %v1822_v14 = vld [vmem:[%s7147_s22 + $0x2fc0] sm:$0xff]  ;;  %v6258_v15 = vpack.c.bf16 %v1825_v8, %v1823_v7  ;;  %v5236_v21 = vpack.c.bf16 %v800_v13, %v798_v12  ;;  %v1843_v7 = vld [vmem:[%s7147_s22 + $0x3068] sm:$0xff]  ;;  %v1845_v8 = vld [vmem:[%s7147_s22 + $0x3078] sm:$0xff] }
 0x22a   : > { %6239 = vmatprep.subr.bf16.mxu0 %v6238_v19  ;;  %v1827_v19 = vld [vmem:[%s7147_s22 + $0x2fe8] sm:$0xff]  ;;  %v6260_v22 = vpack.c.bf16 %v1824_v16, %v1822_v14  ;;  %v818_v12 = vld [vmem:[%s7147_s22 + $0x1060] sm:$0xff]  ;;  %v820_v13 = vld [vmem:[%s7147_s22 + $0x1070] sm:$0xff] }
 0x22b   : > { %v1842_v14 = vld [vmem:[%s7147_s22 + $0x3060] sm:$0xff]  ;;  %v1844_v16 = vld [vmem:[%s7147_s22 + $0x3070] sm:$0xff] }
 0x22c   : > { %5217 = vmatpush1.bf16.msra.mxu1 %v5216_v25  ;;  %v804_v25 = vld [vmem:[%s7147_s22 + $0xff0] sm:$0xff] }
 0x22d   : > { %6241 = vmatpush1.bf16.msra.mxu0 %v6240_v26  ;;  %5219 = vmatprep.subr.bf16.mxu1 %v5218_v27  ;;  %v1826_v26 = vld [vmem:[%s7147_s22 + $0x2fe0] sm:$0xff]  ;;  %v6262_v27 = vpack.c.bf16 %v1829_v20, %v1827_v19  ;;  %v5240_v33 = vpack.c.bf16 %v804_v25, %v802_v24  ;;  %v1847_v19 = vld [vmem:[%s7147_s22 + $0x3088] sm:$0xff]  ;;  %v1849_v20 = vld [vmem:[%s7147_s22 + $0x3098] sm:$0xff] }
 0x22e   : > { %6243 = vmatprep.subr.bf16.mxu0 %v6242_v31  ;;  %v1831_v31 = vld [vmem:[%s7147_s22 + $0x3008] sm:$0xff]  ;;  %v6264_v34 = vpack.c.bf16 %v1828_v28, %v1826_v26  ;;  %v822_v24 = vld [vmem:[%s7147_s22 + $0x1080] sm:$0xff]  ;;  %v824_v25 = vld [vmem:[%s7147_s22 + $0x1090] sm:$0xff] }
 0x22f   : > { %v1846_v26 = vld [vmem:[%s7147_s22 + $0x3080] sm:$0xff]  ;;  %v1848_v28 = vld [vmem:[%s7147_s22 + $0x3090] sm:$0xff] }
 0x230   : > { %5221 = vmatpush1.bf16.msra.mxu1 %v5220_v37  ;;  %v808_v37 = vld [vmem:[%s7147_s22 + $0x1010] sm:$0xff] }
 0x231   : > { %6245 = vmatpush1.bf16.msra.mxu0 %v6244_v38  ;;  %5223 = vmatprep.subr.bf16.mxu1 %v5222_v39  ;;  %v1830_v38 = vld [vmem:[%s7147_s22 + $0x3000] sm:$0xff]  ;;  %v6266_v39 = vpack.c.bf16 %v1833_v32, %v1831_v31  ;;  %v5244_v46 = vpack.c.bf16 %v808_v37, %v806_v36  ;;  %v1851_v31 = vld [vmem:[%s7147_s22 + $0x30a8] sm:$0xff]  ;;  %v1853_v32 = vld [vmem:[%s7147_s22 + $0x30b8] sm:$0xff] }
 0x232   : > { %6247 = vmatprep.subr.bf16.mxu0 %v6246_v43  ;;  %v1835_v43 = vld [vmem:[%s7147_s22 + $0x3028] sm:$0xff]  ;;  %v6268_v48 = vpack.c.bf16 %v1832_v40, %v1830_v38  ;;  %v826_v36 = vld [vmem:[%s7147_s22 + $0x10a0] sm:$0xff]  ;;  %v828_v37 = vld [vmem:[%s7147_s22 + $0x10b0] sm:$0xff] }
 0x233   : > { %v6270_v53 = vpack.c.bf16 %v1837_v44, %v1835_v43  ;;  %v1850_v38 = vld [vmem:[%s7147_s22 + $0x30a0] sm:$0xff]  ;;  %v1852_v40 = vld [vmem:[%s7147_s22 + $0x30b0] sm:$0xff]  ;;  %v1855_v43 = vld [vmem:[%s7147_s22 + $0x30c8] sm:$0xff] }
 0x234   : > { %5225 = vmatpush1.bf16.msra.mxu1 %v5224_v49  ;;  %v5246_v49 = vpack.c.bf16 %v813_v42, %v811_v41  ;;  %v831_v41 = vld [vmem:[%s7147_s22 + $0x10c8] sm:$0xff]  ;;  %v833_v42 = vld [vmem:[%s7147_s22 + $0x10d8] sm:$0xff] }
 0x235   : > { %6249 = vmatpush1.bf16.msra.mxu0 %v6248_v50  ;;  %5227 = vmatprep.subr.bf16.mxu1 %v5226_v51  ;;  %v810_v50 = vld [vmem:[%s7147_s22 + $0x1020] sm:$0xff]  ;;  %v812_v51 = vld [vmem:[%s7147_s22 + $0x1030] sm:$0xff]  ;;  %v1857_v44 = vld [vmem:[%s7147_s22 + $0x30d8] sm:$0xff] }
 0x236   : > { %6251 = vmatprep.subr.bf16.mxu0 %v6250_v55  ;;  %v815_v55 = vld [vmem:[%s7147_s22 + $0x1048] sm:$0xff]  ;;  %v5248_v60 = vpack.c.bf16 %v812_v51, %v810_v50  ;;  %v1854_v50 = vld [vmem:[%s7147_s22 + $0x30c0] sm:$0xff]  ;;  %v6290_v51 = vpack.c.bf16 %v1857_v44, %v1855_v43 }
 0x237   : > { %v850_v44 = vld [vmem:[%s7147_s22 + $0x1160] sm:$0xff] }
 0x238   : > { %5229 = vmatpush1.bf16.msra.mxu1 %v5228_v61  ;;  %v279_v61 = vld [vmem:[%s7165_s29 + $0x188] sm:$0xff] }
 0x239   : > { %6253 = vmatpush1.bf16.msra.mxu0 %v6252_v62  ;;  %5231 = vmatprep.subr.bf16.mxu1 %v5230_v63  ;;  %v6272_v62 = vpack.c.bf16 %v1836_v54, %v1834_v52  ;;  %v5250_v63 = vpack.c.bf16 %v817_v56, %v815_v55  ;;  %v1856_v52 = vld [vmem:[%s7147_s22 + $0x30d0] sm:$0xff]  ;;  %v837_v54 = vld [vmem:[%s7147_s22 + $0x10f8] sm:$0xff]  ;;  %v1859_v55 = vld [vmem:[%s7147_s22 + $0x30e8] sm:$0xff] }
 0x23a   : > { %6255 = vmatprep.subr.bf16.mxu0 %v6254_v3  ;;  %v6274_v3 = vpack.c.bf16 %v1841_v58, %v1839_v57  ;;  %v1861_v56 = vld [vmem:[%s7147_s22 + $0x30f8] sm:$0xff]  ;;  %v6292_v58 = vpack.c.bf16 %v1856_v52, %v1854_v50 }
 0x23b   : > { %v857_v50 = vld [vmem:[%s7147_s22 + $0x1198] sm:$0xff] }
 0x23c   : > { %5233 = vmatpush1.bf16.msra.mxu1 %v5232_v9  ;;  %v5252_v9 = vpack.c.bf16 %v816_v1, %v814_v0  ;;  %v1860_v0 = vld [vmem:[%s7147_s22 + $0x30f0] sm:$0xff]  ;;  %v839_v1 = vld [vmem:[%s7147_s22 + $0x1108] sm:$0xff]  ;;  %v1881_v52 = vld [vmem:[%s7147_s22 + $0x3198] sm:$0xff] }
 0x23d   : > { %6257 = vmatpush1.bf16.msra.mxu0 %v6256_v10  ;;  %5235 = vmatprep.subr.bf16.mxu1 %v5234_v11  ;;  %v6276_v10 = vpack.c.bf16 %v1840_v4, %v1838_v2  ;;  %v5254_v11 = vpack.c.bf16 %v821_v6, %v819_v5  ;;  %v841_v2 = vld [vmem:[%s7147_s22 + $0x1118] sm:$0xff] }
 0x23e   : > { %6259 = vmatprep.subr.bf16.mxu0 %v6258_v15  ;;  %v6278_v15 = vpack.c.bf16 %v1845_v8, %v1843_v7  ;;  %v1865_v4 = vld [vmem:[%s7147_s22 + $0x3118] sm:$0xff]  ;;  %v5274_v7 = vpack.c.bf16 %v841_v2, %v839_v1  ;;  %v838_v8 = vld [vmem:[%s7147_s22 + $0x1100] sm:$0xff] }
 0x240   : > { %5237 = vmatpush1.bf16.msra.mxu1 %v5236_v21  ;;  %v5256_v21 = vpack.c.bf16 %v820_v13, %v818_v12  ;;  %v1864_v12 = vld [vmem:[%s7147_s22 + $0x3110] sm:$0xff]  ;;  %v843_v13 = vld [vmem:[%s7147_s22 + $0x1128] sm:$0xff] }
 0x241   : > { %6261 = vmatpush1.bf16.msra.mxu0 %v6260_v22  ;;  %5239 = vmatprep.subr.bf16.mxu1 %v5238_v23  ;;  %v6280_v22 = vpack.c.bf16 %v1844_v16, %v1842_v14  ;;  %v5258_v23 = vpack.c.bf16 %v825_v18, %v823_v17  ;;  %v845_v14 = vld [vmem:[%s7147_s22 + $0x1138] sm:$0xff] }
 0x242   : > { %6263 = vmatprep.subr.bf16.mxu0 %v6262_v27  ;;  %v6282_v27 = vpack.c.bf16 %v1849_v20, %v1847_v19  ;;  %v1869_v16 = vld [vmem:[%s7147_s22 + $0x3138] sm:$0xff]  ;;  %v5278_v19 = vpack.c.bf16 %v845_v14, %v843_v13  ;;  %v842_v20 = vld [vmem:[%s7147_s22 + $0x1120] sm:$0xff] }
 0x244   : > { %5241 = vmatpush1.bf16.msra.mxu1 %v5240_v33  ;;  %v5260_v33 = vpack.c.bf16 %v824_v25, %v822_v24  ;;  %v1868_v24 = vld [vmem:[%s7147_s22 + $0x3130] sm:$0xff]  ;;  %v847_v25 = vld [vmem:[%s7147_s22 + $0x1148] sm:$0xff] }
 0x245   : > { %6265 = vmatpush1.bf16.msra.mxu0 %v6264_v34  ;;  %5243 = vmatprep.subr.bf16.mxu1 %v5242_v35  ;;  %v6284_v34 = vpack.c.bf16 %v1848_v28, %v1846_v26  ;;  %v5262_v35 = vpack.c.bf16 %v829_v30, %v827_v29  ;;  %v849_v26 = vld [vmem:[%s7147_s22 + $0x1158] sm:$0xff] }
 0x246   : > { %6267 = vmatprep.subr.bf16.mxu0 %v6266_v39  ;;  %v6286_v39 = vpack.c.bf16 %v1853_v32, %v1851_v31  ;;  %v1873_v28 = vld [vmem:[%s7147_s22 + $0x3158] sm:$0xff]  ;;  %v5282_v31 = vpack.c.bf16 %v849_v26, %v847_v25  ;;  %v846_v32 = vld [vmem:[%s7147_s22 + $0x1140] sm:$0xff] }
 0x247   : > { %2904 = vmatmul.mubr.f32.vlgmr.msra.gmra.mrb[0].mxu1 %v244_v45  ;;  %v5264_v45 = vpack.c.bf16 %v828_v37, %v826_v36  ;;  %v1872_v36 = vld [vmem:[%s7147_s22 + $0x3150] sm:$0xff]  ;;  %v851_v37 = vld [vmem:[%s7147_s22 + $0x1168] sm:$0xff] }
 0x248   : > { %5245 = vmatpush1.bf16.msra.mxu1 %v5244_v46  ;;  %4040 = vmatmul.mubr.f32.vlgmr.msra.gmra.mrb[0].mxu0 %v276_v47  ;;  %v6288_v46 = vpack.c.bf16 %v1852_v40, %v1850_v38  ;;  %v5266_v47 = vpack.c.bf16 %v833_v42, %v831_v41  ;;  %v853_v38 = vld [vmem:[%s7147_s22 + $0x1178] sm:$0xff] }
 0x249   : > { %6269 = vmatpush1.bf16.msra.mxu0 %v6268_v48  ;;  %5247 = vmatprep.subr.bf16.mxu1 %v5246_v49  ;;  %v830_v48 = vld [vmem:[%s7147_s22 + $0x10c0] sm:$0xff]  ;;  %v832_v49 = vld [vmem:[%s7147_s22 + $0x10d0] sm:$0xff]  ;;  %v1877_v40 = vld [vmem:[%s7147_s22 + $0x3178] sm:$0xff]  ;;  %v5286_v43 = vpack.c.bf16 %v853_v38, %v851_v37 }
 0x24a   : > { %6271 = vmatprep.subr.bf16.mxu0 %v6270_v53  ;;  %2974 = vmatprep.mubr.f32.mxu1 %v247_v59  ;;  %v835_v53 = vld [vmem:[%s7147_s22 + $0x10e8] sm:$0xff]  ;;  %v5268_v57 = vpack.c.bf16 %v832_v49, %v830_v48  ;;  %v1876_v48 = vld [vmem:[%s7147_s22 + $0x3170] sm:$0xff] }
 0x24b   : > { %4110 = vmatprep.mubr.f32.mxu0 %v279_v61  ;;  %v5270_v59 = vpack.c.bf16 %v837_v54, %v835_v53  ;;  %v836_v61 = vld [vmem:[%s7147_s22 + $0x10f0] sm:$0xff]  ;;  %v855_v49 = vld [vmem:[%s7147_s22 + $0x1188] sm:$0xff] }
 0x24c   : > { %5249 = vmatpush1.bf16.msra.mxu1 %v5248_v60  ;;  %v834_v60 = vld [vmem:[%s7147_s22 + $0x10e0] sm:$0xff] }
 0x24d   : > { %6273 = vmatpush1.bf16.msra.mxu0 %v6272_v62  ;;  %5251 = vmatprep.subr.bf16.mxu1 %v5250_v63  ;;  %v1858_v62 = vld [vmem:[%s7147_s22 + $0x30e0] sm:$0xff]  ;;  %v6294_v63 = vpack.c.bf16 %v1861_v56, %v1859_v55  ;;  %v5272_v5 = vpack.c.bf16 %v836_v61, %v834_v60  ;;  %v5290_v55 = vpack.c.bf16 %v857_v50, %v855_v49  ;;  %v1880_v60 = vld [vmem:[%s7147_s22 + $0x3190] sm:$0xff]  ;;  %v859_v61 = vld [vmem:[%s7147_s22 + $0x11a8] sm:$0xff] }
 0x24e   : > { %6275 = vmatprep.subr.bf16.mxu0 %v6274_v3  ;;  %v1863_v3 = vld [vmem:[%s7147_s22 + $0x3108] sm:$0xff]  ;;  %v6296_v6 = vpack.c.bf16 %v1860_v0, %v1858_v62  ;;  %v854_v56 = vld [vmem:[%s7147_s22 + $0x1180] sm:$0xff]  ;;  %v861_v62 = vld [vmem:[%s7147_s22 + $0x11b8] sm:$0xff] }
 0x24f   : > { %v1885_v0 = vld [vmem:[%s7147_s22 + $0x31b8] sm:$0xff] }
 0x250   : > { %5253 = vmatpush1.bf16.msra.mxu1 %v5252_v9  ;;  %v840_v9 = vld [vmem:[%s7147_s22 + $0x1110] sm:$0xff]  ;;  %v246_v49 = vld [vmem:[%s7165_s29 + $0x80] sm:$0xff] }
 0x251   : > { %6277 = vmatpush1.bf16.msra.mxu0 %v6276_v10  ;;  %5255 = vmatprep.subr.bf16.mxu1 %v5254_v11  ;;  %v1862_v10 = vld [vmem:[%s7147_s22 + $0x3100] sm:$0xff]  ;;  %v6298_v11 = vpack.c.bf16 %v1865_v4, %v1863_v3  ;;  %v5276_v17 = vpack.c.bf16 %v840_v9, %v838_v8  ;;  %v5294_v3 = vpack.c.bf16 %v861_v62, %v859_v61  ;;  %v1884_v8 = vld [vmem:[%s7147_s22 + $0x31b0] sm:$0xff]  ;;  %v863_v9 = vld [vmem:[%s7147_s22 + $0x11c8] sm:$0xff] }
 0x252   : > { %6279 = vmatprep.subr.bf16.mxu0 %v6278_v15  ;;  %v1867_v15 = vld [vmem:[%s7147_s22 + $0x3128] sm:$0xff]  ;;  %v6300_v18 = vpack.c.bf16 %v1864_v12, %v1862_v10  ;;  %v858_v4 = vld [vmem:[%s7147_s22 + $0x11a0] sm:$0xff]  ;;  %v865_v10 = vld [vmem:[%s7147_s22 + $0x11d8] sm:$0xff] }
 0x253   : > { %v1889_v12 = vld [vmem:[%s7147_s22 + $0x31d8] sm:$0xff]  ;;  %v1903_v61 = vld [vmem:[%s7147_s22 + $0x3248] sm:$0xff] }
 0x254   : > { %5257 = vmatpush1.bf16.msra.mxu1 %v5256_v21  ;;  %v844_v21 = vld [vmem:[%s7147_s22 + $0x1130] sm:$0xff]  ;;  %v1905_v62 = vld [vmem:[%s7147_s22 + $0x3258] sm:$0xff] }
 0x255   : > { %6281 = vmatpush1.bf16.msra.mxu0 %v6280_v22  ;;  %5259 = vmatprep.subr.bf16.mxu1 %v5258_v23  ;;  %v1866_v22 = vld [vmem:[%s7147_s22 + $0x3120] sm:$0xff]  ;;  %v6302_v23 = vpack.c.bf16 %v1869_v16, %v1867_v15  ;;  %v5280_v29 = vpack.c.bf16 %v844_v21, %v842_v20  ;;  %v5298_v15 = vpack.c.bf16 %v865_v10, %v863_v9  ;;  %v1888_v20 = vld [vmem:[%s7147_s22 + $0x31d0] sm:$0xff]  ;;  %v867_v21 = vld [vmem:[%s7147_s22 + $0x11e8] sm:$0xff] }
 0x256   : > { %6283 = vmatprep.subr.bf16.mxu0 %v6282_v27  ;;  %v1871_v27 = vld [vmem:[%s7147_s22 + $0x3148] sm:$0xff]  ;;  %v6304_v30 = vpack.c.bf16 %v1868_v24, %v1866_v22  ;;  %v862_v16 = vld [vmem:[%s7147_s22 + $0x11c0] sm:$0xff]  ;;  %v869_v22 = vld [vmem:[%s7147_s22 + $0x11f8] sm:$0xff] }
 0x257   : > { %v1893_v24 = vld [vmem:[%s7147_s22 + $0x31f8] sm:$0xff]  ;;  %v883_v9 = vld [vmem:[%s7147_s22 + $0x1268] sm:$0xff] }
 0x258   : > { %5261 = vmatpush1.bf16.msra.mxu1 %v5260_v33  ;;  %v848_v33 = vld [vmem:[%s7147_s22 + $0x1150] sm:$0xff]  ;;  %v885_v10 = vld [vmem:[%s7147_s22 + $0x1278] sm:$0xff] }
 0x259   : > { %6285 = vmatpush1.bf16.msra.mxu0 %v6284_v34  ;;  %5263 = vmatprep.subr.bf16.mxu1 %v5262_v35  ;;  %v1870_v34 = vld [vmem:[%s7147_s22 + $0x3140] sm:$0xff]  ;;  %v6306_v35 = vpack.c.bf16 %v1873_v28, %v1871_v27  ;;  %v5284_v41 = vpack.c.bf16 %v848_v33, %v846_v32  ;;  %v5302_v27 = vpack.c.bf16 %v869_v22, %v867_v21  ;;  %v1892_v32 = vld [vmem:[%s7147_s22 + $0x31f0] sm:$0xff]  ;;  %v871_v33 = vld [vmem:[%s7147_s22 + $0x1208] sm:$0xff] }
 0x25a   : > { %6287 = vmatprep.subr.bf16.mxu0 %v6286_v39  ;;  %v1875_v39 = vld [vmem:[%s7147_s22 + $0x3168] sm:$0xff]  ;;  %v6308_v42 = vpack.c.bf16 %v1872_v36, %v1870_v34  ;;  %v866_v28 = vld [vmem:[%s7147_s22 + $0x11e0] sm:$0xff]  ;;  %v873_v34 = vld [vmem:[%s7147_s22 + $0x1218] sm:$0xff] }
 0x25b   : > { %v1897_v36 = vld [vmem:[%s7147_s22 + $0x3218] sm:$0xff]  ;;  %v887_v21 = vld [vmem:[%s7147_s22 + $0x1288] sm:$0xff] }
 0x25c   : > { %5265 = vmatpush1.bf16.msra.mxu1 %v5264_v45  ;;  %v852_v45 = vld [vmem:[%s7147_s22 + $0x1170] sm:$0xff]  ;;  %v889_v22 = vld [vmem:[%s7147_s22 + $0x1298] sm:$0xff] }
 0x25d   : > { %6289 = vmatpush1.bf16.msra.mxu0 %v6288_v46  ;;  %5267 = vmatprep.subr.bf16.mxu1 %v5266_v47  ;;  %v1874_v46 = vld [vmem:[%s7147_s22 + $0x3160] sm:$0xff]  ;;  %v6310_v47 = vpack.c.bf16 %v1877_v40, %v1875_v39  ;;  %v5288_v53 = vpack.c.bf16 %v852_v45, %v850_v44  ;;  %v5306_v39 = vpack.c.bf16 %v873_v34, %v871_v33  ;;  %v1896_v44 = vld [vmem:[%s7147_s22 + $0x3210] sm:$0xff]  ;;  %v875_v45 = vld [vmem:[%s7147_s22 + $0x1228] sm:$0xff] }
 0x25e   : > { %6291 = vmatprep.subr.bf16.mxu0 %v6290_v51  ;;  %v1879_v51 = vld [vmem:[%s7147_s22 + $0x3188] sm:$0xff]  ;;  %v6312_v54 = vpack.c.bf16 %v1876_v48, %v1874_v46  ;;  %v870_v40 = vld [vmem:[%s7147_s22 + $0x1200] sm:$0xff]  ;;  %v877_v46 = vld [vmem:[%s7147_s22 + $0x1238] sm:$0xff] }
 0x25f   : > { %v1901_v48 = vld [vmem:[%s7147_s22 + $0x3238] sm:$0xff]  ;;  %v891_v33 = vld [vmem:[%s7147_s22 + $0x12a8] sm:$0xff] }
 0x260   : > { %5269 = vmatpush1.bf16.msra.mxu1 %v5268_v57  ;;  %v856_v57 = vld [vmem:[%s7147_s22 + $0x1190] sm:$0xff]  ;;  %v893_v34 = vld [vmem:[%s7147_s22 + $0x12b8] sm:$0xff] }
 0x261   : > { %6293 = vmatpush1.bf16.msra.mxu0 %v6292_v58  ;;  %5271 = vmatprep.subr.bf16.mxu1 %v5270_v59  ;;  %v1878_v58 = vld [vmem:[%s7147_s22 + $0x3180] sm:$0xff]  ;;  %v6314_v59 = vpack.c.bf16 %v1881_v52, %v1879_v51  ;;  %v5292_v1 = vpack.c.bf16 %v856_v57, %v854_v56  ;;  %v278_v51 = vld [vmem:[%s7165_s29 + $0x180] sm:$0xff] }
 0x262   : > { %6295 = vmatprep.subr.bf16.mxu0 %v6294_v63  ;;  %v1883_v63 = vld [vmem:[%s7147_s22 + $0x31a8] sm:$0xff]  ;;  %v6316_v2 = vpack.c.bf16 %v1880_v60, %v1878_v58  ;;  %v1898_v56 = vld [vmem:[%s7147_s22 + $0x3220] sm:$0xff]  ;;  %v1900_v58 = vld [vmem:[%s7147_s22 + $0x3230] sm:$0xff] }
 0x263   : > { %v881_v60 = vld [vmem:[%s7147_s22 + $0x1258] sm:$0xff] }
 0x264   : > { %5273 = vmatpush1.bf16.msra.mxu1 %v5272_v5  ;;  %v860_v5 = vld [vmem:[%s7147_s22 + $0x11b0] sm:$0xff] }
 0x265   : > { %6297 = vmatpush1.bf16.msra.mxu0 %v6296_v6  ;;  %5275 = vmatprep.subr.bf16.mxu1 %v5274_v7  ;;  %v1882_v6 = vld [vmem:[%s7147_s22 + $0x31a0] sm:$0xff]  ;;  %v6318_v7 = vpack.c.bf16 %v1885_v0, %v1883_v63  ;;  %v5296_v13 = vpack.c.bf16 %v860_v5, %v858_v4  ;;  %v249_v63 = vld [vmem:[%s7165_s29 + $0x98] sm:$0xff] }
 0x266   : > { %6299 = vmatprep.subr.bf16.mxu0 %v6298_v11  ;;  %v1887_v11 = vld [vmem:[%s7147_s22 + $0x31c8] sm:$0xff]  ;;  %v6320_v14 = vpack.c.bf16 %v1884_v8, %v1882_v6  ;;  %v878_v4 = vld [vmem:[%s7147_s22 + $0x1240] sm:$0xff]  ;;  %v880_v5 = vld [vmem:[%s7147_s22 + $0x1250] sm:$0xff] }
 0x267   : > { %v1902_v6 = vld [vmem:[%s7147_s22 + $0x3240] sm:$0xff]  ;;  %v1904_v8 = vld [vmem:[%s7147_s22 + $0x3250] sm:$0xff] }
 0x268   : > { %5277 = vmatpush1.bf16.msra.mxu1 %v5276_v17  ;;  %v864_v17 = vld [vmem:[%s7147_s22 + $0x11d0] sm:$0xff] }
 0x269   : > { %6301 = vmatpush1.bf16.msra.mxu0 %v6300_v18  ;;  %5279 = vmatprep.subr.bf16.mxu1 %v5278_v19  ;;  %v1886_v18 = vld [vmem:[%s7147_s22 + $0x31c0] sm:$0xff]  ;;  %v6322_v19 = vpack.c.bf16 %v1889_v12, %v1887_v11  ;;  %v5300_v25 = vpack.c.bf16 %v864_v17, %v862_v16  ;;  %v1907_v11 = vld [vmem:[%s7147_s22 + $0x3268] sm:$0xff]  ;;  %v1909_v12 = vld [vmem:[%s7147_s22 + $0x3278] sm:$0xff] }
 0x26a   : > { %6303 = vmatprep.subr.bf16.mxu0 %v6302_v23  ;;  %v1891_v23 = vld [vmem:[%s7147_s22 + $0x31e8] sm:$0xff]  ;;  %v6324_v26 = vpack.c.bf16 %v1888_v20, %v1886_v18  ;;  %v882_v16 = vld [vmem:[%s7147_s22 + $0x1260] sm:$0xff]  ;;  %v884_v17 = vld [vmem:[%s7147_s22 + $0x1270] sm:$0xff] }
 0x26b   : > { %v1906_v18 = vld [vmem:[%s7147_s22 + $0x3260] sm:$0xff]  ;;  %v1908_v20 = vld [vmem:[%s7147_s22 + $0x3270] sm:$0xff] }
 0x26c   : > { %5281 = vmatpush1.bf16.msra.mxu1 %v5280_v29  ;;  %v868_v29 = vld [vmem:[%s7147_s22 + $0x11f0] sm:$0xff] }
 0x26d   : > { %6305 = vmatpush1.bf16.msra.mxu0 %v6304_v30  ;;  %5283 = vmatprep.subr.bf16.mxu1 %v5282_v31  ;;  %v1890_v30 = vld [vmem:[%s7147_s22 + $0x31e0] sm:$0xff]  ;;  %v6326_v31 = vpack.c.bf16 %v1893_v24, %v1891_v23  ;;  %v5304_v37 = vpack.c.bf16 %v868_v29, %v866_v28  ;;  %v1911_v23 = vld [vmem:[%s7147_s22 + $0x3288] sm:$0xff]  ;;  %v1913_v24 = vld [vmem:[%s7147_s22 + $0x3298] sm:$0xff] }
 0x26e   : > { %6307 = vmatprep.subr.bf16.mxu0 %v6306_v35  ;;  %v1895_v35 = vld [vmem:[%s7147_s22 + $0x3208] sm:$0xff]  ;;  %v6328_v38 = vpack.c.bf16 %v1892_v32, %v1890_v30  ;;  %v886_v28 = vld [vmem:[%s7147_s22 + $0x1280] sm:$0xff]  ;;  %v888_v29 = vld [vmem:[%s7147_s22 + $0x1290] sm:$0xff] }
 0x26f   : > { %v1910_v30 = vld [vmem:[%s7147_s22 + $0x3280] sm:$0xff]  ;;  %v1912_v32 = vld [vmem:[%s7147_s22 + $0x3290] sm:$0xff] }
 0x270   : > { %5285 = vmatpush1.bf16.msra.mxu1 %v5284_v41  ;;  %v872_v41 = vld [vmem:[%s7147_s22 + $0x1210] sm:$0xff] }
 0x271   : > { %6309 = vmatpush1.bf16.msra.mxu0 %v6308_v42  ;;  %5287 = vmatprep.subr.bf16.mxu1 %v5286_v43  ;;  %v1894_v42 = vld [vmem:[%s7147_s22 + $0x3200] sm:$0xff]  ;;  %v6330_v43 = vpack.c.bf16 %v1897_v36, %v1895_v35  ;;  %v5308_v50 = vpack.c.bf16 %v872_v41, %v870_v40  ;;  %v1915_v35 = vld [vmem:[%s7147_s22 + $0x32a8] sm:$0xff]  ;;  %v1917_v36 = vld [vmem:[%s7147_s22 + $0x32b8] sm:$0xff] }
 0x272   : > { %6311 = vmatprep.subr.bf16.mxu0 %v6310_v47  ;;  %v1899_v47 = vld [vmem:[%s7147_s22 + $0x3228] sm:$0xff]  ;;  %v6332_v52 = vpack.c.bf16 %v1896_v44, %v1894_v42  ;;  %v890_v40 = vld [vmem:[%s7147_s22 + $0x12a0] sm:$0xff]  ;;  %v892_v41 = vld [vmem:[%s7147_s22 + $0x12b0] sm:$0xff] }
 0x273   : > { %v6334_v57 = vpack.c.bf16 %v1901_v48, %v1899_v47  ;;  %v1914_v42 = vld [vmem:[%s7147_s22 + $0x32a0] sm:$0xff]  ;;  %v1916_v44 = vld [vmem:[%s7147_s22 + $0x32b0] sm:$0xff]  ;;  %v1919_v47 = vld [vmem:[%s7147_s22 + $0x32c8] sm:$0xff] }
 0x274   : > { %5289 = vmatpush1.bf16.msra.mxu1 %v5288_v53  ;;  %v5310_v53 = vpack.c.bf16 %v877_v46, %v875_v45  ;;  %v895_v45 = vld [vmem:[%s7147_s22 + $0x12c8] sm:$0xff]  ;;  %v897_v46 = vld [vmem:[%s7147_s22 + $0x12d8] sm:$0xff] }
 0x275   : > { %6313 = vmatpush1.bf16.msra.mxu0 %v6312_v54  ;;  %5291 = vmatprep.subr.bf16.mxu1 %v5290_v55  ;;  %v874_v54 = vld [vmem:[%s7147_s22 + $0x1220] sm:$0xff]  ;;  %v876_v55 = vld [vmem:[%s7147_s22 + $0x1230] sm:$0xff]  ;;  %v1921_v48 = vld [vmem:[%s7147_s22 + $0x32d8] sm:$0xff] }
 0x276   : > { %6315 = vmatprep.subr.bf16.mxu0 %v6314_v59  ;;  %v879_v59 = vld [vmem:[%s7147_s22 + $0x1248] sm:$0xff]  ;;  %v5312_v0 = vpack.c.bf16 %v876_v55, %v874_v54  ;;  %v1918_v54 = vld [vmem:[%s7147_s22 + $0x32c0] sm:$0xff]  ;;  %v6354_v55 = vpack.c.bf16 %v1921_v48, %v1919_v47 }
 0x277   : > { %v914_v48 = vld [vmem:[%s7147_s22 + $0x1360] sm:$0xff] }
 0x278   : > { %5293 = vmatpush1.bf16.msra.mxu1 %v5292_v1  ;;  %v281_v1 = vld [vmem:[%s7165_s29 + $0x198] sm:$0xff] }
 0x279   : > { %6317 = vmatpush1.bf16.msra.mxu0 %v6316_v2  ;;  %5295 = vmatprep.subr.bf16.mxu1 %v5294_v3  ;;  %v6336_v2 = vpack.c.bf16 %v1900_v58, %v1898_v56  ;;  %v5314_v3 = vpack.c.bf16 %v881_v60, %v879_v59  ;;  %v1920_v56 = vld [vmem:[%s7147_s22 + $0x32d0] sm:$0xff]  ;;  %v901_v58 = vld [vmem:[%s7147_s22 + $0x12f8] sm:$0xff]  ;;  %v1923_v59 = vld [vmem:[%s7147_s22 + $0x32e8] sm:$0xff] }
 0x27a   : > { %6319 = vmatprep.subr.bf16.mxu0 %v6318_v7  ;;  %v6338_v7 = vpack.c.bf16 %v1905_v62, %v1903_v61  ;;  %v1925_v60 = vld [vmem:[%s7147_s22 + $0x32f8] sm:$0xff]  ;;  %v6356_v62 = vpack.c.bf16 %v1920_v56, %v1918_v54 }
 0x27b   : > { %v921_v54 = vld [vmem:[%s7147_s22 + $0x1398] sm:$0xff] }
 0x27c   : > { %5297 = vmatpush1.bf16.msra.mxu1 %v5296_v13  ;;  %v5316_v13 = vpack.c.bf16 %v880_v5, %v878_v4  ;;  %v1924_v4 = vld [vmem:[%s7147_s22 + $0x32f0] sm:$0xff]  ;;  %v903_v5 = vld [vmem:[%s7147_s22 + $0x1308] sm:$0xff]  ;;  %v1945_v56 = vld [vmem:[%s7147_s22 + $0x3398] sm:$0xff] }
 0x27d   : > { %6321 = vmatpush1.bf16.msra.mxu0 %v6320_v14  ;;  %5299 = vmatprep.subr.bf16.mxu1 %v5298_v15  ;;  %v6340_v14 = vpack.c.bf16 %v1904_v8, %v1902_v6  ;;  %v5318_v15 = vpack.c.bf16 %v885_v10, %v883_v9  ;;  %v905_v6 = vld [vmem:[%s7147_s22 + $0x1318] sm:$0xff] }
 0x27e   : > { %6323 = vmatprep.subr.bf16.mxu0 %v6322_v19  ;;  %v6342_v19 = vpack.c.bf16 %v1909_v12, %v1907_v11  ;;  %v1929_v8 = vld [vmem:[%s7147_s22 + $0x3318] sm:$0xff]  ;;  %v5338_v11 = vpack.c.bf16 %v905_v6, %v903_v5  ;;  %v902_v12 = vld [vmem:[%s7147_s22 + $0x1300] sm:$0xff] }
 0x280   : > { %5301 = vmatpush1.bf16.msra.mxu1 %v5300_v25  ;;  %v5320_v25 = vpack.c.bf16 %v884_v17, %v882_v16  ;;  %v1928_v16 = vld [vmem:[%s7147_s22 + $0x3310] sm:$0xff]  ;;  %v907_v17 = vld [vmem:[%s7147_s22 + $0x1328] sm:$0xff] }
 0x281   : > { %6325 = vmatpush1.bf16.msra.mxu0 %v6324_v26  ;;  %5303 = vmatprep.subr.bf16.mxu1 %v5302_v27  ;;  %v6344_v26 = vpack.c.bf16 %v1908_v20, %v1906_v18  ;;  %v5322_v27 = vpack.c.bf16 %v889_v22, %v887_v21  ;;  %v909_v18 = vld [vmem:[%s7147_s22 + $0x1338] sm:$0xff] }
 0x282   : > { %6327 = vmatprep.subr.bf16.mxu0 %v6326_v31  ;;  %v6346_v31 = vpack.c.bf16 %v1913_v24, %v1911_v23  ;;  %v1933_v20 = vld [vmem:[%s7147_s22 + $0x3338] sm:$0xff]  ;;  %v5342_v23 = vpack.c.bf16 %v909_v18, %v907_v17  ;;  %v906_v24 = vld [vmem:[%s7147_s22 + $0x1320] sm:$0xff] }
 0x284   : > { %5305 = vmatpush1.bf16.msra.mxu1 %v5304_v37  ;;  %v5324_v37 = vpack.c.bf16 %v888_v29, %v886_v28  ;;  %v1932_v28 = vld [vmem:[%s7147_s22 + $0x3330] sm:$0xff]  ;;  %v911_v29 = vld [vmem:[%s7147_s22 + $0x1348] sm:$0xff] }
 0x285   : > { %6329 = vmatpush1.bf16.msra.mxu0 %v6328_v38  ;;  %5307 = vmatprep.subr.bf16.mxu1 %v5306_v39  ;;  %v6348_v38 = vpack.c.bf16 %v1912_v32, %v1910_v30  ;;  %v5326_v39 = vpack.c.bf16 %v893_v34, %v891_v33  ;;  %v913_v30 = vld [vmem:[%s7147_s22 + $0x1358] sm:$0xff] }
 0x286   : > { %6331 = vmatprep.subr.bf16.mxu0 %v6330_v43  ;;  %v6350_v43 = vpack.c.bf16 %v1917_v36, %v1915_v35  ;;  %v1937_v32 = vld [vmem:[%s7147_s22 + $0x3358] sm:$0xff]  ;;  %v5346_v35 = vpack.c.bf16 %v913_v30, %v911_v29  ;;  %v910_v36 = vld [vmem:[%s7147_s22 + $0x1340] sm:$0xff] }
 0x287   : > { %2975 = vmatmul.mubr.f32.vlgmr.msra.gmra.mrb[0].mxu1 %v246_v49  ;;  %v5328_v49 = vpack.c.bf16 %v892_v41, %v890_v40  ;;  %v1936_v40 = vld [vmem:[%s7147_s22 + $0x3350] sm:$0xff]  ;;  %v915_v41 = vld [vmem:[%s7147_s22 + $0x1368] sm:$0xff] }
 0x288   : > { %5309 = vmatpush1.bf16.msra.mxu1 %v5308_v50  ;;  %4111 = vmatmul.mubr.f32.vlgmr.msra.gmra.mrb[0].mxu0 %v278_v51  ;;  %v6352_v50 = vpack.c.bf16 %v1916_v44, %v1914_v42  ;;  %v5330_v51 = vpack.c.bf16 %v897_v46, %v895_v45  ;;  %v917_v42 = vld [vmem:[%s7147_s22 + $0x1378] sm:$0xff] }
 0x289   : > { %6333 = vmatpush1.bf16.msra.mxu0 %v6332_v52  ;;  %5311 = vmatprep.subr.bf16.mxu1 %v5310_v53  ;;  %v894_v52 = vld [vmem:[%s7147_s22 + $0x12c0] sm:$0xff]  ;;  %v896_v53 = vld [vmem:[%s7147_s22 + $0x12d0] sm:$0xff]  ;;  %v1941_v44 = vld [vmem:[%s7147_s22 + $0x3378] sm:$0xff]  ;;  %v5350_v47 = vpack.c.bf16 %v917_v42, %v915_v41 }
 0x28a   : > { %6335 = vmatprep.subr.bf16.mxu0 %v6334_v57  ;;  %3045 = vmatprep.mubr.f32.mxu1 %v249_v63  ;;  %v899_v57 = vld [vmem:[%s7147_s22 + $0x12e8] sm:$0xff]  ;;  %v5332_v61 = vpack.c.bf16 %v896_v53, %v894_v52  ;;  %v1940_v52 = vld [vmem:[%s7147_s22 + $0x3370] sm:$0xff] }
 0x28b   : > { %4181 = vmatprep.mubr.f32.mxu0 %v281_v1  ;;  %v5334_v63 = vpack.c.bf16 %v901_v58, %v899_v57  ;;  %v900_v1 = vld [vmem:[%s7147_s22 + $0x12f0] sm:$0xff]  ;;  %v919_v53 = vld [vmem:[%s7147_s22 + $0x1388] sm:$0xff] }
 0x28c   : > { %5313 = vmatpush1.bf16.msra.mxu1 %v5312_v0  ;;  %v898_v0 = vld [vmem:[%s7147_s22 + $0x12e0] sm:$0xff] }
 0x28d   : > { %6337 = vmatpush1.bf16.msra.mxu0 %v6336_v2  ;;  %5315 = vmatprep.subr.bf16.mxu1 %v5314_v3  ;;  %v1922_v2 = vld [vmem:[%s7147_s22 + $0x32e0] sm:$0xff]  ;;  %v6358_v3 = vpack.c.bf16 %v1925_v60, %v1923_v59  ;;  %v5336_v9 = vpack.c.bf16 %v900_v1, %v898_v0  ;;  %v5354_v59 = vpack.c.bf16 %v921_v54, %v919_v53  ;;  %v1944_v0 = vld [vmem:[%s7147_s22 + $0x3390] sm:$0xff]  ;;  %v923_v1 = vld [vmem:[%s7147_s22 + $0x13a8] sm:$0xff] }
 0x28e   : > { %6339 = vmatprep.subr.bf16.mxu0 %v6338_v7  ;;  %v1927_v7 = vld [vmem:[%s7147_s22 + $0x3308] sm:$0xff]  ;;  %v6360_v10 = vpack.c.bf16 %v1924_v4, %v1922_v2  ;;  %v918_v60 = vld [vmem:[%s7147_s22 + $0x1380] sm:$0xff]  ;;  %v925_v2 = vld [vmem:[%s7147_s22 + $0x13b8] sm:$0xff] }
 0x28f   : > { %v1949_v4 = vld [vmem:[%s7147_s22 + $0x33b8] sm:$0xff]  ;;  %v248_v53 = vld [vmem:[%s7165_s29 + $0x90] sm:$0xff] }
 0x290   : > { %5317 = vmatpush1.bf16.msra.mxu1 %v5316_v13  ;;  %v904_v13 = vld [vmem:[%s7147_s22 + $0x1310] sm:$0xff] }
 0x291   : > { %6341 = vmatpush1.bf16.msra.mxu0 %v6340_v14  ;;  %5319 = vmatprep.subr.bf16.mxu1 %v5318_v15  ;;  %v1926_v14 = vld [vmem:[%s7147_s22 + $0x3300] sm:$0xff]  ;;  %v6362_v15 = vpack.c.bf16 %v1929_v8, %v1927_v7  ;;  %v5340_v21 = vpack.c.bf16 %v904_v13, %v902_v12  ;;  %v5358_v7 = vpack.c.bf16 %v925_v2, %v923_v1  ;;  %v1948_v12 = vld [vmem:[%s7147_s22 + $0x33b0] sm:$0xff]  ;;  %v927_v13 = vld [vmem:[%s7147_s22 + $0x13c8] sm:$0xff] }
 0x292   : > { %6343 = vmatprep.subr.bf16.mxu0 %v6342_v19  ;;  %v1931_v19 = vld [vmem:[%s7147_s22 + $0x3328] sm:$0xff]  ;;  %v6364_v22 = vpack.c.bf16 %v1928_v16, %v1926_v14  ;;  %v922_v8 = vld [vmem:[%s7147_s22 + $0x13a0] sm:$0xff]  ;;  %v929_v14 = vld [vmem:[%s7147_s22 + $0x13d8] sm:$0xff] }
 0x293   : > { %v1953_v16 = vld [vmem:[%s7147_s22 + $0x33d8] sm:$0xff]  ;;  %v1967_v1 = vld [vmem:[%s7147_s22 + $0x3448] sm:$0xff] }
 0x294   : > { %5321 = vmatpush1.bf16.msra.mxu1 %v5320_v25  ;;  %v908_v25 = vld [vmem:[%s7147_s22 + $0x1330] sm:$0xff]  ;;  %v1969_v2 = vld [vmem:[%s7147_s22 + $0x3458] sm:$0xff] }
 0x295   : > { %6345 = vmatpush1.bf16.msra.mxu0 %v6344_v26  ;;  %5323 = vmatprep.subr.bf16.mxu1 %v5322_v27  ;;  %v1930_v26 = vld [vmem:[%s7147_s22 + $0x3320] sm:$0xff]  ;;  %v6366_v27 = vpack.c.bf16 %v1933_v20, %v1931_v19  ;;  %v5344_v33 = vpack.c.bf16 %v908_v25, %v906_v24  ;;  %v5362_v19 = vpack.c.bf16 %v929_v14, %v927_v13  ;;  %v1952_v24 = vld [vmem:[%s7147_s22 + $0x33d0] sm:$0xff]  ;;  %v931_v25 = vld [vmem:[%s7147_s22 + $0x13e8] sm:$0xff] }
 0x296   : > { %6347 = vmatprep.subr.bf16.mxu0 %v6346_v31  ;;  %v1935_v31 = vld [vmem:[%s7147_s22 + $0x3348] sm:$0xff]  ;;  %v6368_v34 = vpack.c.bf16 %v1932_v28, %v1930_v26  ;;  %v926_v20 = vld [vmem:[%s7147_s22 + $0x13c0] sm:$0xff]  ;;  %v933_v26 = vld [vmem:[%s7147_s22 + $0x13f8] sm:$0xff] }
 0x297   : > { %v1957_v28 = vld [vmem:[%s7147_s22 + $0x33f8] sm:$0xff]  ;;  %v947_v13 = vld [vmem:[%s7147_s22 + $0x1468] sm:$0xff] }
 0x298   : > { %5325 = vmatpush1.bf16.msra.mxu1 %v5324_v37  ;;  %v912_v37 = vld [vmem:[%s7147_s22 + $0x1350] sm:$0xff]  ;;  %v949_v14 = vld [vmem:[%s7147_s22 + $0x1478] sm:$0xff] }
 0x299   : > { %6349 = vmatpush1.bf16.msra.mxu0 %v6348_v38  ;;  %5327 = vmatprep.subr.bf16.mxu1 %v5326_v39  ;;  %v1934_v38 = vld [vmem:[%s7147_s22 + $0x3340] sm:$0xff]  ;;  %v6370_v39 = vpack.c.bf16 %v1937_v32, %v1935_v31  ;;  %v5348_v45 = vpack.c.bf16 %v912_v37, %v910_v36  ;;  %v5366_v31 = vpack.c.bf16 %v933_v26, %v931_v25  ;;  %v1956_v36 = vld [vmem:[%s7147_s22 + $0x33f0] sm:$0xff]  ;;  %v935_v37 = vld [vmem:[%s7147_s22 + $0x1408] sm:$0xff] }
 0x29a   : > { %6351 = vmatprep.subr.bf16.mxu0 %v6350_v43  ;;  %v1939_v43 = vld [vmem:[%s7147_s22 + $0x3368] sm:$0xff]  ;;  %v6372_v46 = vpack.c.bf16 %v1936_v40, %v1934_v38  ;;  %v930_v32 = vld [vmem:[%s7147_s22 + $0x13e0] sm:$0xff]  ;;  %v937_v38 = vld [vmem:[%s7147_s22 + $0x1418] sm:$0xff] }
 0x29b   : > { %v1961_v40 = vld [vmem:[%s7147_s22 + $0x3418] sm:$0xff]  ;;  %v951_v25 = vld [vmem:[%s7147_s22 + $0x1488] sm:$0xff] }
 0x29c   : > { %5329 = vmatpush1.bf16.msra.mxu1 %v5328_v49  ;;  %v916_v49 = vld [vmem:[%s7147_s22 + $0x1370] sm:$0xff]  ;;  %v953_v26 = vld [vmem:[%s7147_s22 + $0x1498] sm:$0xff] }
 0x29d   : > { %6353 = vmatpush1.bf16.msra.mxu0 %v6352_v50  ;;  %5331 = vmatprep.subr.bf16.mxu1 %v5330_v51  ;;  %v1938_v50 = vld [vmem:[%s7147_s22 + $0x3360] sm:$0xff]  ;;  %v6374_v51 = vpack.c.bf16 %v1941_v44, %v1939_v43  ;;  %v5352_v57 = vpack.c.bf16 %v916_v49, %v914_v48  ;;  %v5370_v43 = vpack.c.bf16 %v937_v38, %v935_v37  ;;  %v1960_v48 = vld [vmem:[%s7147_s22 + $0x3410] sm:$0xff]  ;;  %v939_v49 = vld [vmem:[%s7147_s22 + $0x1428] sm:$0xff] }
 0x29e   : > { %6355 = vmatprep.subr.bf16.mxu0 %v6354_v55  ;;  %v1943_v55 = vld [vmem:[%s7147_s22 + $0x3388] sm:$0xff]  ;;  %v6376_v58 = vpack.c.bf16 %v1940_v52, %v1938_v50  ;;  %v934_v44 = vld [vmem:[%s7147_s22 + $0x1400] sm:$0xff]  ;;  %v941_v50 = vld [vmem:[%s7147_s22 + $0x1438] sm:$0xff] }
 0x29f   : > { %v1965_v52 = vld [vmem:[%s7147_s22 + $0x3438] sm:$0xff]  ;;  %v955_v37 = vld [vmem:[%s7147_s22 + $0x14a8] sm:$0xff] }
 0x2a0   : > { %5333 = vmatpush1.bf16.msra.mxu1 %v5332_v61  ;;  %v920_v61 = vld [vmem:[%s7147_s22 + $0x1390] sm:$0xff]  ;;  %v957_v38 = vld [vmem:[%s7147_s22 + $0x14b8] sm:$0xff] }
 0x2a1   : > { %6357 = vmatpush1.bf16.msra.mxu0 %v6356_v62  ;;  %5335 = vmatprep.subr.bf16.mxu1 %v5334_v63  ;;  %v1942_v62 = vld [vmem:[%s7147_s22 + $0x3380] sm:$0xff]  ;;  %v6378_v63 = vpack.c.bf16 %v1945_v56, %v1943_v55  ;;  %v5356_v5 = vpack.c.bf16 %v920_v61, %v918_v60  ;;  %v280_v55 = vld [vmem:[%s7165_s29 + $0x190] sm:$0xff] }
 0x2a2   : > { %6359 = vmatprep.subr.bf16.mxu0 %v6358_v3  ;;  %v1947_v3 = vld [vmem:[%s7147_s22 + $0x33a8] sm:$0xff]  ;;  %v6380_v6 = vpack.c.bf16 %v1944_v0, %v1942_v62  ;;  %v1962_v60 = vld [vmem:[%s7147_s22 + $0x3420] sm:$0xff]  ;;  %v1964_v62 = vld [vmem:[%s7147_s22 + $0x3430] sm:$0xff] }
 0x2a3   : > { %v945_v0 = vld [vmem:[%s7147_s22 + $0x1458] sm:$0xff] }
 0x2a4   : > { %5337 = vmatpush1.bf16.msra.mxu1 %v5336_v9  ;;  %v924_v9 = vld [vmem:[%s7147_s22 + $0x13b0] sm:$0xff] }
 0x2a5   : > { %6361 = vmatpush1.bf16.msra.mxu0 %v6360_v10  ;;  %5339 = vmatprep.subr.bf16.mxu1 %v5338_v11  ;;  %v1946_v10 = vld [vmem:[%s7147_s22 + $0x33a0] sm:$0xff]  ;;  %v6382_v11 = vpack.c.bf16 %v1949_v4, %v1947_v3  ;;  %v5360_v17 = vpack.c.bf16 %v924_v9, %v922_v8  ;;  %v944_v9 = vld [vmem:[%s7147_s22 + $0x1450] sm:$0xff] }
 0x2a6   : > { %6363 = vmatprep.subr.bf16.mxu0 %v6362_v15  ;;  %v1951_v15 = vld [vmem:[%s7147_s22 + $0x33c8] sm:$0xff]  ;;  %v6384_v18 = vpack.c.bf16 %v1948_v12, %v1946_v10  ;;  %v251_v3 = vld [vmem:[%s7165_s29 + $0xa8] sm:$0xff]  ;;  %v1968_v12 = vld [vmem:[%s7147_s22 + $0x3450] sm:$0xff] }
 0x2a7   : > { %v942_v8 = vld [vmem:[%s7147_s22 + $0x1440] sm:$0xff] }
 0x2a8   : > { %5341 = vmatpush1.bf16.msra.mxu1 %v5340_v21  ;;  %v928_v21 = vld [vmem:[%s7147_s22 + $0x13d0] sm:$0xff]  ;;  %v1966_v10 = vld [vmem:[%s7147_s22 + $0x3440] sm:$0xff] }
 0x2a9   : > { %6365 = vmatpush1.bf16.msra.mxu0 %v6364_v22  ;;  %5343 = vmatprep.subr.bf16.mxu1 %v5342_v23  ;;  %v1950_v22 = vld [vmem:[%s7147_s22 + $0x33c0] sm:$0xff]  ;;  %v6386_v23 = vpack.c.bf16 %v1953_v16, %v1951_v15  ;;  %v5364_v29 = vpack.c.bf16 %v928_v21, %v926_v20  ;;  %v1971_v15 = vld [vmem:[%s7147_s22 + $0x3468] sm:$0xff]  ;;  %v1973_v16 = vld [vmem:[%s7147_s22 + $0x3478] sm:$0xff] }
 0x2aa   : > { %6367 = vmatprep.subr.bf16.mxu0 %v6366_v27  ;;  %v1955_v27 = vld [vmem:[%s7147_s22 + $0x33e8] sm:$0xff]  ;;  %v6388_v30 = vpack.c.bf16 %v1952_v24, %v1950_v22  ;;  %v946_v20 = vld [vmem:[%s7147_s22 + $0x1460] sm:$0xff]  ;;  %v948_v21 = vld [vmem:[%s7147_s22 + $0x1470] sm:$0xff] }
 0x2ab   : > { %v1970_v22 = vld [vmem:[%s7147_s22 + $0x3460] sm:$0xff]  ;;  %v1972_v24 = vld [vmem:[%s7147_s22 + $0x3470] sm:$0xff] }
 0x2ac   : > { %5345 = vmatpush1.bf16.msra.mxu1 %v5344_v33  ;;  %v932_v33 = vld [vmem:[%s7147_s22 + $0x13f0] sm:$0xff] }
 0x2ad   : > { %6369 = vmatpush1.bf16.msra.mxu0 %v6368_v34  ;;  %5347 = vmatprep.subr.bf16.mxu1 %v5346_v35  ;;  %v1954_v34 = vld [vmem:[%s7147_s22 + $0x33e0] sm:$0xff]  ;;  %v6390_v35 = vpack.c.bf16 %v1957_v28, %v1955_v27  ;;  %v5368_v41 = vpack.c.bf16 %v932_v33, %v930_v32  ;;  %v1975_v27 = vld [vmem:[%s7147_s22 + $0x3488] sm:$0xff]  ;;  %v1977_v28 = vld [vmem:[%s7147_s22 + $0x3498] sm:$0xff] }
 0x2ae   : > { %6371 = vmatprep.subr.bf16.mxu0 %v6370_v39  ;;  %v1959_v39 = vld [vmem:[%s7147_s22 + $0x3408] sm:$0xff]  ;;  %v6392_v42 = vpack.c.bf16 %v1956_v36, %v1954_v34  ;;  %v950_v32 = vld [vmem:[%s7147_s22 + $0x1480] sm:$0xff]  ;;  %v952_v33 = vld [vmem:[%s7147_s22 + $0x1490] sm:$0xff] }
 0x2af   : > { %v1974_v34 = vld [vmem:[%s7147_s22 + $0x3480] sm:$0xff]  ;;  %v1976_v36 = vld [vmem:[%s7147_s22 + $0x3490] sm:$0xff] }
 0x2b0   : > { %5349 = vmatpush1.bf16.msra.mxu1 %v5348_v45  ;;  %v936_v45 = vld [vmem:[%s7147_s22 + $0x1410] sm:$0xff] }
 0x2b1   : > { %6373 = vmatpush1.bf16.msra.mxu0 %v6372_v46  ;;  %5351 = vmatprep.subr.bf16.mxu1 %v5350_v47  ;;  %v1958_v46 = vld [vmem:[%s7147_s22 + $0x3400] sm:$0xff]  ;;  %v6394_v47 = vpack.c.bf16 %v1961_v40, %v1959_v39  ;;  %v5372_v54 = vpack.c.bf16 %v936_v45, %v934_v44  ;;  %v1979_v39 = vld [vmem:[%s7147_s22 + $0x34a8] sm:$0xff]  ;;  %v1981_v40 = vld [vmem:[%s7147_s22 + $0x34b8] sm:$0xff] }
 0x2b2   : > { %6375 = vmatprep.subr.bf16.mxu0 %v6374_v51  ;;  %v1963_v51 = vld [vmem:[%s7147_s22 + $0x3428] sm:$0xff]  ;;  %v6396_v56 = vpack.c.bf16 %v1960_v48, %v1958_v46  ;;  %v954_v44 = vld [vmem:[%s7147_s22 + $0x14a0] sm:$0xff]  ;;  %v956_v45 = vld [vmem:[%s7147_s22 + $0x14b0] sm:$0xff] }
 0x2b3   : > { %v6398_v61 = vpack.c.bf16 %v1965_v52, %v1963_v51  ;;  %v1978_v46 = vld [vmem:[%s7147_s22 + $0x34a0] sm:$0xff]  ;;  %v1980_v48 = vld [vmem:[%s7147_s22 + $0x34b0] sm:$0xff]  ;;  %v1983_v51 = vld [vmem:[%s7147_s22 + $0x34c8] sm:$0xff] }
 0x2b4   : > { %5353 = vmatpush1.bf16.msra.mxu1 %v5352_v57  ;;  %v5374_v57 = vpack.c.bf16 %v941_v50, %v939_v49  ;;  %v959_v49 = vld [vmem:[%s7147_s22 + $0x14c8] sm:$0xff]  ;;  %v961_v50 = vld [vmem:[%s7147_s22 + $0x14d8] sm:$0xff] }
 0x2b5   : > { %6377 = vmatpush1.bf16.msra.mxu0 %v6376_v58  ;;  %5355 = vmatprep.subr.bf16.mxu1 %v5354_v59  ;;  %v938_v58 = vld [vmem:[%s7147_s22 + $0x1420] sm:$0xff]  ;;  %v940_v59 = vld [vmem:[%s7147_s22 + $0x1430] sm:$0xff]  ;;  %v1985_v52 = vld [vmem:[%s7147_s22 + $0x34d8] sm:$0xff] }
 0x2b6   : > { %6379 = vmatprep.subr.bf16.mxu0 %v6378_v63  ;;  %v943_v63 = vld [vmem:[%s7147_s22 + $0x1448] sm:$0xff]  ;;  %v5376_v4 = vpack.c.bf16 %v940_v59, %v938_v58  ;;  %v1982_v58 = vld [vmem:[%s7147_s22 + $0x34c0] sm:$0xff]  ;;  %v6418_v59 = vpack.c.bf16 %v1985_v52, %v1983_v51 }
 0x2b7   : > { %v978_v52 = vld [vmem:[%s7147_s22 + $0x1560] sm:$0xff] }
 0x2b8   : > { %5357 = vmatpush1.bf16.msra.mxu1 %v5356_v5  ;;  %v283_v5 = vld [vmem:[%s7165_s29 + $0x1a8] sm:$0xff] }
 0x2b9   : > { %6381 = vmatpush1.bf16.msra.mxu0 %v6380_v6  ;;  %5359 = vmatprep.subr.bf16.mxu1 %v5358_v7  ;;  %v6400_v6 = vpack.c.bf16 %v1964_v62, %v1962_v60  ;;  %v5378_v7 = vpack.c.bf16 %v945_v0, %v943_v63  ;;  %v1984_v60 = vld [vmem:[%s7147_s22 + $0x34d0] sm:$0xff]  ;;  %v965_v62 = vld [vmem:[%s7147_s22 + $0x14f8] sm:$0xff]  ;;  %v1987_v63 = vld [vmem:[%s7147_s22 + $0x34e8] sm:$0xff] }
 0x2ba   : > { %6383 = vmatprep.subr.bf16.mxu0 %v6382_v11  ;;  %v6402_v11 = vpack.c.bf16 %v1969_v2, %v1967_v1  ;;  %v1989_v0 = vld [vmem:[%s7147_s22 + $0x34f8] sm:$0xff]  ;;  %v6420_v2 = vpack.c.bf16 %v1984_v60, %v1982_v58 }
 0x2bb   : > { %v985_v58 = vld [vmem:[%s7147_s22 + $0x1598] sm:$0xff] }
 0x2bc   : > { %5361 = vmatpush1.bf16.msra.mxu1 %v5360_v17  ;;  %v5380_v17 = vpack.c.bf16 %v944_v9, %v942_v8  ;;  %v1988_v8 = vld [vmem:[%s7147_s22 + $0x34f0] sm:$0xff]  ;;  %v967_v9 = vld [vmem:[%s7147_s22 + $0x1508] sm:$0xff]  ;;  %v2009_v60 = vld [vmem:[%s7147_s22 + $0x3598] sm:$0xff] }
 0x2bd   : > { %6385 = vmatpush1.bf16.msra.mxu0 %v6384_v18  ;;  %5363 = vmatprep.subr.bf16.mxu1 %v5362_v19  ;;  %v6404_v18 = vpack.c.bf16 %v1968_v12, %v1966_v10  ;;  %v5382_v19 = vpack.c.bf16 %v949_v14, %v947_v13  ;;  %v969_v10 = vld [vmem:[%s7147_s22 + $0x1518] sm:$0xff] }
 0x2be   : > { %6387 = vmatprep.subr.bf16.mxu0 %v6386_v23  ;;  %v6406_v23 = vpack.c.bf16 %v1973_v16, %v1971_v15  ;;  %v1993_v12 = vld [vmem:[%s7147_s22 + $0x3518] sm:$0xff]  ;;  %v5402_v15 = vpack.c.bf16 %v969_v10, %v967_v9  ;;  %v966_v16 = vld [vmem:[%s7147_s22 + $0x1500] sm:$0xff] }
 0x2c0   : > { %5365 = vmatpush1.bf16.msra.mxu1 %v5364_v29  ;;  %v5384_v29 = vpack.c.bf16 %v948_v21, %v946_v20  ;;  %v1992_v20 = vld [vmem:[%s7147_s22 + $0x3510] sm:$0xff]  ;;  %v971_v21 = vld [vmem:[%s7147_s22 + $0x1528] sm:$0xff] }
 0x2c1   : > { %6389 = vmatpush1.bf16.msra.mxu0 %v6388_v30  ;;  %5367 = vmatprep.subr.bf16.mxu1 %v5366_v31  ;;  %v6408_v30 = vpack.c.bf16 %v1972_v24, %v1970_v22  ;;  %v5386_v31 = vpack.c.bf16 %v953_v26, %v951_v25  ;;  %v973_v22 = vld [vmem:[%s7147_s22 + $0x1538] sm:$0xff] }
 0x2c2   : > { %6391 = vmatprep.subr.bf16.mxu0 %v6390_v35  ;;  %v6410_v35 = vpack.c.bf16 %v1977_v28, %v1975_v27  ;;  %v1997_v24 = vld [vmem:[%s7147_s22 + $0x3538] sm:$0xff]  ;;  %v5406_v27 = vpack.c.bf16 %v973_v22, %v971_v21  ;;  %v970_v28 = vld [vmem:[%s7147_s22 + $0x1520] sm:$0xff] }
 0x2c4   : > { %5369 = vmatpush1.bf16.msra.mxu1 %v5368_v41  ;;  %v5388_v41 = vpack.c.bf16 %v952_v33, %v950_v32  ;;  %v1996_v32 = vld [vmem:[%s7147_s22 + $0x3530] sm:$0xff]  ;;  %v975_v33 = vld [vmem:[%s7147_s22 + $0x1548] sm:$0xff] }
 0x2c5   : > { %6393 = vmatpush1.bf16.msra.mxu0 %v6392_v42  ;;  %5371 = vmatprep.subr.bf16.mxu1 %v5370_v43  ;;  %v6412_v42 = vpack.c.bf16 %v1976_v36, %v1974_v34  ;;  %v5390_v43 = vpack.c.bf16 %v957_v38, %v955_v37  ;;  %v977_v34 = vld [vmem:[%s7147_s22 + $0x1558] sm:$0xff] }
 0x2c6   : > { %6395 = vmatprep.subr.bf16.mxu0 %v6394_v47  ;;  %v6414_v47 = vpack.c.bf16 %v1981_v40, %v1979_v39  ;;  %v2001_v36 = vld [vmem:[%s7147_s22 + $0x3558] sm:$0xff]  ;;  %v5410_v39 = vpack.c.bf16 %v977_v34, %v975_v33  ;;  %v974_v40 = vld [vmem:[%s7147_s22 + $0x1540] sm:$0xff] }
 0x2c7   : > { %3046 = vmatmul.mubr.f32.vlgmr.msra.gmra.mrb[0].mxu1 %v248_v53  ;;  %v5392_v53 = vpack.c.bf16 %v956_v45, %v954_v44  ;;  %v2000_v44 = vld [vmem:[%s7147_s22 + $0x3550] sm:$0xff]  ;;  %v979_v45 = vld [vmem:[%s7147_s22 + $0x1568] sm:$0xff] }
 0x2c8   : > { %5373 = vmatpush1.bf16.msra.mxu1 %v5372_v54  ;;  %4182 = vmatmul.mubr.f32.vlgmr.msra.gmra.mrb[0].mxu0 %v280_v55  ;;  %v6416_v54 = vpack.c.bf16 %v1980_v48, %v1978_v46  ;;  %v5394_v55 = vpack.c.bf16 %v961_v50, %v959_v49  ;;  %v981_v46 = vld [vmem:[%s7147_s22 + $0x1578] sm:$0xff] }
 0x2c9   : > { %6397 = vmatpush1.bf16.msra.mxu0 %v6396_v56  ;;  %5375 = vmatprep.subr.bf16.mxu1 %v5374_v57  ;;  %v958_v56 = vld [vmem:[%s7147_s22 + $0x14c0] sm:$0xff]  ;;  %v960_v57 = vld [vmem:[%s7147_s22 + $0x14d0] sm:$0xff]  ;;  %v2005_v48 = vld [vmem:[%s7147_s22 + $0x3578] sm:$0xff]  ;;  %v5414_v51 = vpack.c.bf16 %v981_v46, %v979_v45 }
 0x2ca   : > { %6399 = vmatprep.subr.bf16.mxu0 %v6398_v61  ;;  %3116 = vmatprep.mubr.f32.mxu1 %v251_v3  ;;  %v963_v61 = vld [vmem:[%s7147_s22 + $0x14e8] sm:$0xff]  ;;  %v5396_v1 = vpack.c.bf16 %v960_v57, %v958_v56  ;;  %v2004_v56 = vld [vmem:[%s7147_s22 + $0x3570] sm:$0xff] }
 0x2cb   : > { %4252 = vmatprep.mubr.f32.mxu0 %v283_v5  ;;  %v5398_v3 = vpack.c.bf16 %v965_v62, %v963_v61  ;;  %v964_v5 = vld [vmem:[%s7147_s22 + $0x14f0] sm:$0xff]  ;;  %v983_v57 = vld [vmem:[%s7147_s22 + $0x1588] sm:$0xff] }
 0x2cc   : > { %5377 = vmatpush1.bf16.msra.mxu1 %v5376_v4  ;;  %v962_v4 = vld [vmem:[%s7147_s22 + $0x14e0] sm:$0xff] }
 0x2cd   : > { %6401 = vmatpush1.bf16.msra.mxu0 %v6400_v6  ;;  %5379 = vmatprep.subr.bf16.mxu1 %v5378_v7  ;;  %v1986_v6 = vld [vmem:[%s7147_s22 + $0x34e0] sm:$0xff]  ;;  %v6422_v7 = vpack.c.bf16 %v1989_v0, %v1987_v63  ;;  %v5400_v13 = vpack.c.bf16 %v964_v5, %v962_v4  ;;  %v5418_v63 = vpack.c.bf16 %v985_v58, %v983_v57  ;;  %v2008_v4 = vld [vmem:[%s7147_s22 + $0x3590] sm:$0xff]  ;;  %v987_v5 = vld [vmem:[%s7147_s22 + $0x15a8] sm:$0xff] }
 0x2ce   : > { %6403 = vmatprep.subr.bf16.mxu0 %v6402_v11  ;;  %v1991_v11 = vld [vmem:[%s7147_s22 + $0x3508] sm:$0xff]  ;;  %v6424_v14 = vpack.c.bf16 %v1988_v8, %v1986_v6  ;;  %v982_v0 = vld [vmem:[%s7147_s22 + $0x1580] sm:$0xff]  ;;  %v989_v6 = vld [vmem:[%s7147_s22 + $0x15b8] sm:$0xff] }
 0x2cf   : > { %v2013_v8 = vld [vmem:[%s7147_s22 + $0x35b8] sm:$0xff] }
 0x2d0   : > { %5381 = vmatpush1.bf16.msra.mxu1 %v5380_v17  ;;  %v968_v17 = vld [vmem:[%s7147_s22 + $0x1510] sm:$0xff]  ;;  %v250_v57 = vld [vmem:[%s7165_s29 + $0xa0] sm:$0xff] }
 0x2d1   : > { %6405 = vmatpush1.bf16.msra.mxu0 %v6404_v18  ;;  %5383 = vmatprep.subr.bf16.mxu1 %v5382_v19  ;;  %v1990_v18 = vld [vmem:[%s7147_s22 + $0x3500] sm:$0xff]  ;;  %v6426_v19 = vpack.c.bf16 %v1993_v12, %v1991_v11  ;;  %v5404_v25 = vpack.c.bf16 %v968_v17, %v966_v16  ;;  %v5422_v11 = vpack.c.bf16 %v989_v6, %v987_v5  ;;  %v2012_v16 = vld [vmem:[%s7147_s22 + $0x35b0] sm:$0xff]  ;;  %v991_v17 = vld [vmem:[%s7147_s22 + $0x15c8] sm:$0xff] }
 0x2d2   : > { %6407 = vmatprep.subr.bf16.mxu0 %v6406_v23  ;;  %v1995_v23 = vld [vmem:[%s7147_s22 + $0x3528] sm:$0xff]  ;;  %v6428_v26 = vpack.c.bf16 %v1992_v20, %v1990_v18  ;;  %v986_v12 = vld [vmem:[%s7147_s22 + $0x15a0] sm:$0xff]  ;;  %v993_v18 = vld [vmem:[%s7147_s22 + $0x15d8] sm:$0xff] }
 0x2d3   : > { %v2017_v20 = vld [vmem:[%s7147_s22 + $0x35d8] sm:$0xff]  ;;  %v2031_v5 = vld [vmem:[%s7147_s22 + $0x3648] sm:$0xff] }
 0x2d4   : > { %5385 = vmatpush1.bf16.msra.mxu1 %v5384_v29  ;;  %v972_v29 = vld [vmem:[%s7147_s22 + $0x1530] sm:$0xff]  ;;  %v2033_v6 = vld [vmem:[%s7147_s22 + $0x3658] sm:$0xff] }
 0x2d5   : > { %6409 = vmatpush1.bf16.msra.mxu0 %v6408_v30  ;;  %5387 = vmatprep.subr.bf16.mxu1 %v5386_v31  ;;  %v1994_v30 = vld [vmem:[%s7147_s22 + $0x3520] sm:$0xff]  ;;  %v6430_v31 = vpack.c.bf16 %v1997_v24, %v1995_v23  ;;  %v5408_v37 = vpack.c.bf16 %v972_v29, %v970_v28  ;;  %v5426_v23 = vpack.c.bf16 %v993_v18, %v991_v17  ;;  %v2016_v28 = vld [vmem:[%s7147_s22 + $0x35d0] sm:$0xff]  ;;  %v995_v29 = vld [vmem:[%s7147_s22 + $0x15e8] sm:$0xff] }
 0x2d6   : > { %6411 = vmatprep.subr.bf16.mxu0 %v6410_v35  ;;  %v1999_v35 = vld [vmem:[%s7147_s22 + $0x3548] sm:$0xff]  ;;  %v6432_v38 = vpack.c.bf16 %v1996_v32, %v1994_v30  ;;  %v990_v24 = vld [vmem:[%s7147_s22 + $0x15c0] sm:$0xff]  ;;  %v997_v30 = vld [vmem:[%s7147_s22 + $0x15f8] sm:$0xff] }
 0x2d7   : > { %v2021_v32 = vld [vmem:[%s7147_s22 + $0x35f8] sm:$0xff]  ;;  %v1011_v17 = vld [vmem:[%s7147_s22 + $0x1668] sm:$0xff] }
 0x2d8   : > { %5389 = vmatpush1.bf16.msra.mxu1 %v5388_v41  ;;  %v976_v41 = vld [vmem:[%s7147_s22 + $0x1550] sm:$0xff]  ;;  %v1013_v18 = vld [vmem:[%s7147_s22 + $0x1678] sm:$0xff] }
 0x2d9   : > { %6413 = vmatpush1.bf16.msra.mxu0 %v6412_v42  ;;  %5391 = vmatprep.subr.bf16.mxu1 %v5390_v43  ;;  %v1998_v42 = vld [vmem:[%s7147_s22 + $0x3540] sm:$0xff]  ;;  %v6434_v43 = vpack.c.bf16 %v2001_v36, %v1999_v35  ;;  %v5412_v49 = vpack.c.bf16 %v976_v41, %v974_v40  ;;  %v5430_v35 = vpack.c.bf16 %v997_v30, %v995_v29  ;;  %v2020_v40 = vld [vmem:[%s7147_s22 + $0x35f0] sm:$0xff]  ;;  %v999_v41 = vld [vmem:[%s7147_s22 + $0x1608] sm:$0xff] }
 0x2da   : > { %6415 = vmatprep.subr.bf16.mxu0 %v6414_v47  ;;  %v2003_v47 = vld [vmem:[%s7147_s22 + $0x3568] sm:$0xff]  ;;  %v6436_v50 = vpack.c.bf16 %v2000_v44, %v1998_v42  ;;  %v994_v36 = vld [vmem:[%s7147_s22 + $0x15e0] sm:$0xff]  ;;  %v1001_v42 = vld [vmem:[%s7147_s22 + $0x1618] sm:$0xff] }
 0x2db   : > { %v2025_v44 = vld [vmem:[%s7147_s22 + $0x3618] sm:$0xff]  ;;  %v1015_v29 = vld [vmem:[%s7147_s22 + $0x1688] sm:$0xff] }
 0x2dc   : > { %5393 = vmatpush1.bf16.msra.mxu1 %v5392_v53  ;;  %v980_v53 = vld [vmem:[%s7147_s22 + $0x1570] sm:$0xff]  ;;  %v1017_v30 = vld [vmem:[%s7147_s22 + $0x1698] sm:$0xff] }
 0x2dd   : > { %6417 = vmatpush1.bf16.msra.mxu0 %v6416_v54  ;;  %5395 = vmatprep.subr.bf16.mxu1 %v5394_v55  ;;  %v2002_v54 = vld [vmem:[%s7147_s22 + $0x3560] sm:$0xff]  ;;  %v6438_v55 = vpack.c.bf16 %v2005_v48, %v2003_v47  ;;  %v5416_v61 = vpack.c.bf16 %v980_v53, %v978_v52  ;;  %v5434_v47 = vpack.c.bf16 %v1001_v42, %v999_v41  ;;  %v2024_v52 = vld [vmem:[%s7147_s22 + $0x3610] sm:$0xff]  ;;  %v1003_v53 = vld [vmem:[%s7147_s22 + $0x1628] sm:$0xff] }
 0x2de   : > { %6419 = vmatprep.subr.bf16.mxu0 %v6418_v59  ;;  %v2007_v59 = vld [vmem:[%s7147_s22 + $0x3588] sm:$0xff]  ;;  %v6440_v62 = vpack.c.bf16 %v2004_v56, %v2002_v54  ;;  %v998_v48 = vld [vmem:[%s7147_s22 + $0x1600] sm:$0xff]  ;;  %v1005_v54 = vld [vmem:[%s7147_s22 + $0x1638] sm:$0xff] }
 0x2df   : > { %v2029_v56 = vld [vmem:[%s7147_s22 + $0x3638] sm:$0xff]  ;;  %v1019_v41 = vld [vmem:[%s7147_s22 + $0x16a8] sm:$0xff] }
 0x2e0   : > { %5397 = vmatpush1.bf16.msra.mxu1 %v5396_v1  ;;  %v984_v1 = vld [vmem:[%s7147_s22 + $0x1590] sm:$0xff]  ;;  %v1021_v42 = vld [vmem:[%s7147_s22 + $0x16b8] sm:$0xff] }
 0x2e1   : > { %6421 = vmatpush1.bf16.msra.mxu0 %v6420_v2  ;;  %5399 = vmatprep.subr.bf16.mxu1 %v5398_v3  ;;  %v2006_v2 = vld [vmem:[%s7147_s22 + $0x3580] sm:$0xff]  ;;  %v6442_v3 = vpack.c.bf16 %v2009_v60, %v2007_v59  ;;  %v5420_v9 = vpack.c.bf16 %v984_v1, %v982_v0  ;;  %v282_v59 = vld [vmem:[%s7165_s29 + $0x1a0] sm:$0xff] }
 0x2e2   : > { %6423 = vmatprep.subr.bf16.mxu0 %v6422_v7  ;;  %v2011_v7 = vld [vmem:[%s7147_s22 + $0x35a8] sm:$0xff]  ;;  %v6444_v10 = vpack.c.bf16 %v2008_v4, %v2006_v2  ;;  %v2026_v0 = vld [vmem:[%s7147_s22 + $0x3620] sm:$0xff]  ;;  %v2028_v2 = vld [vmem:[%s7147_s22 + $0x3630] sm:$0xff] }
 0x2e3   : > { %v1009_v4 = vld [vmem:[%s7147_s22 + $0x1658] sm:$0xff] }
 0x2e4   : > { %5401 = vmatpush1.bf16.msra.mxu1 %v5400_v13  ;;  %v988_v13 = vld [vmem:[%s7147_s22 + $0x15b0] sm:$0xff] }
 0x2e5   : > { %6425 = vmatpush1.bf16.msra.mxu0 %v6424_v14  ;;  %5403 = vmatprep.subr.bf16.mxu1 %v5402_v15  ;;  %v2010_v14 = vld [vmem:[%s7147_s22 + $0x35a0] sm:$0xff]  ;;  %v6446_v15 = vpack.c.bf16 %v2013_v8, %v2011_v7  ;;  %v5424_v21 = vpack.c.bf16 %v988_v13, %v986_v12  ;;  %v253_v7 = vld [vmem:[%s7165_s29 + $0xb8] sm:$0xff] }
 0x2e6   : > { %6427 = vmatprep.subr.bf16.mxu0 %v6426_v19  ;;  %v2015_v19 = vld [vmem:[%s7147_s22 + $0x35c8] sm:$0xff]  ;;  %v6448_v22 = vpack.c.bf16 %v2012_v16, %v2010_v14  ;;  %v1006_v12 = vld [vmem:[%s7147_s22 + $0x1640] sm:$0xff]  ;;  %v1008_v13 = vld [vmem:[%s7147_s22 + $0x1650] sm:$0xff] }
 0x2e7   : > { %v2030_v14 = vld [vmem:[%s7147_s22 + $0x3640] sm:$0xff]  ;;  %v2032_v16 = vld [vmem:[%s7147_s22 + $0x3650] sm:$0xff] }
 0x2e8   : > { %5405 = vmatpush1.bf16.msra.mxu1 %v5404_v25  ;;  %v992_v25 = vld [vmem:[%s7147_s22 + $0x15d0] sm:$0xff] }
 0x2e9   : > { %6429 = vmatpush1.bf16.msra.mxu0 %v6428_v26  ;;  %5407 = vmatprep.subr.bf16.mxu1 %v5406_v27  ;;  %v2014_v26 = vld [vmem:[%s7147_s22 + $0x35c0] sm:$0xff]  ;;  %v6450_v27 = vpack.c.bf16 %v2017_v20, %v2015_v19  ;;  %v5428_v33 = vpack.c.bf16 %v992_v25, %v990_v24  ;;  %v2035_v19 = vld [vmem:[%s7147_s22 + $0x3668] sm:$0xff]  ;;  %v2037_v20 = vld [vmem:[%s7147_s22 + $0x3678] sm:$0xff] }
 0x2ea   : > { %6431 = vmatprep.subr.bf16.mxu0 %v6430_v31  ;;  %v2019_v31 = vld [vmem:[%s7147_s22 + $0x35e8] sm:$0xff]  ;;  %v6452_v34 = vpack.c.bf16 %v2016_v28, %v2014_v26  ;;  %v1010_v24 = vld [vmem:[%s7147_s22 + $0x1660] sm:$0xff]  ;;  %v1012_v25 = vld [vmem:[%s7147_s22 + $0x1670] sm:$0xff] }
 0x2eb   : > { %v2034_v26 = vld [vmem:[%s7147_s22 + $0x3660] sm:$0xff]  ;;  %v2036_v28 = vld [vmem:[%s7147_s22 + $0x3670] sm:$0xff] }
 0x2ec   : > { %5409 = vmatpush1.bf16.msra.mxu1 %v5408_v37  ;;  %v996_v37 = vld [vmem:[%s7147_s22 + $0x15f0] sm:$0xff] }
 0x2ed   : > { %6433 = vmatpush1.bf16.msra.mxu0 %v6432_v38  ;;  %5411 = vmatprep.subr.bf16.mxu1 %v5410_v39  ;;  %v2018_v38 = vld [vmem:[%s7147_s22 + $0x35e0] sm:$0xff]  ;;  %v6454_v39 = vpack.c.bf16 %v2021_v32, %v2019_v31  ;;  %v5432_v45 = vpack.c.bf16 %v996_v37, %v994_v36  ;;  %v2039_v31 = vld [vmem:[%s7147_s22 + $0x3688] sm:$0xff]  ;;  %v2041_v32 = vld [vmem:[%s7147_s22 + $0x3698] sm:$0xff] }
 0x2ee   : > { %6435 = vmatprep.subr.bf16.mxu0 %v6434_v43  ;;  %v2023_v43 = vld [vmem:[%s7147_s22 + $0x3608] sm:$0xff]  ;;  %v6456_v46 = vpack.c.bf16 %v2020_v40, %v2018_v38  ;;  %v1014_v36 = vld [vmem:[%s7147_s22 + $0x1680] sm:$0xff]  ;;  %v1016_v37 = vld [vmem:[%s7147_s22 + $0x1690] sm:$0xff] }
 0x2ef   : > { %v2038_v38 = vld [vmem:[%s7147_s22 + $0x3680] sm:$0xff]  ;;  %v2040_v40 = vld [vmem:[%s7147_s22 + $0x3690] sm:$0xff] }
 0x2f0   : > { %5413 = vmatpush1.bf16.msra.mxu1 %v5412_v49  ;;  %v1000_v49 = vld [vmem:[%s7147_s22 + $0x1610] sm:$0xff] }
 0x2f1   : > { %6437 = vmatpush1.bf16.msra.mxu0 %v6436_v50  ;;  %5415 = vmatprep.subr.bf16.mxu1 %v5414_v51  ;;  %v2022_v50 = vld [vmem:[%s7147_s22 + $0x3600] sm:$0xff]  ;;  %v6458_v51 = vpack.c.bf16 %v2025_v44, %v2023_v43  ;;  %v5436_v58 = vpack.c.bf16 %v1000_v49, %v998_v48  ;;  %v2043_v43 = vld [vmem:[%s7147_s22 + $0x36a8] sm:$0xff]  ;;  %v2045_v44 = vld [vmem:[%s7147_s22 + $0x36b8] sm:$0xff] }
 0x2f2   : > { %6439 = vmatprep.subr.bf16.mxu0 %v6438_v55  ;;  %v2027_v55 = vld [vmem:[%s7147_s22 + $0x3628] sm:$0xff]  ;;  %v6460_v60 = vpack.c.bf16 %v2024_v52, %v2022_v50  ;;  %v1018_v48 = vld [vmem:[%s7147_s22 + $0x16a0] sm:$0xff]  ;;  %v1020_v49 = vld [vmem:[%s7147_s22 + $0x16b0] sm:$0xff] }
 0x2f3   : > { %v6462_v1 = vpack.c.bf16 %v2029_v56, %v2027_v55  ;;  %v2042_v50 = vld [vmem:[%s7147_s22 + $0x36a0] sm:$0xff]  ;;  %v2044_v52 = vld [vmem:[%s7147_s22 + $0x36b0] sm:$0xff]  ;;  %v2047_v55 = vld [vmem:[%s7147_s22 + $0x36c8] sm:$0xff] }
 0x2f4   : > { %5417 = vmatpush1.bf16.msra.mxu1 %v5416_v61  ;;  %v5438_v61 = vpack.c.bf16 %v1005_v54, %v1003_v53  ;;  %v1023_v53 = vld [vmem:[%s7147_s22 + $0x16c8] sm:$0xff]  ;;  %v1025_v54 = vld [vmem:[%s7147_s22 + $0x16d8] sm:$0xff] }
 0x2f5   : > { %6441 = vmatpush1.bf16.msra.mxu0 %v6440_v62  ;;  %5419 = vmatprep.subr.bf16.mxu1 %v5418_v63  ;;  %v1002_v62 = vld [vmem:[%s7147_s22 + $0x1620] sm:$0xff]  ;;  %v1004_v63 = vld [vmem:[%s7147_s22 + $0x1630] sm:$0xff]  ;;  %v2049_v56 = vld [vmem:[%s7147_s22 + $0x36d8] sm:$0xff] }
 0x2f6   : > { %6443 = vmatprep.subr.bf16.mxu0 %v6442_v3  ;;  %v1007_v3 = vld [vmem:[%s7147_s22 + $0x1648] sm:$0xff]  ;;  %v5440_v8 = vpack.c.bf16 %v1004_v63, %v1002_v62  ;;  %v2046_v62 = vld [vmem:[%s7147_s22 + $0x36c0] sm:$0xff]  ;;  %v6482_v63 = vpack.c.bf16 %v2049_v56, %v2047_v55 }
 0x2f7   : > { %v1042_v56 = vld [vmem:[%s7147_s22 + $0x1760] sm:$0xff] }
 0x2f8   : > { %5421 = vmatpush1.bf16.msra.mxu1 %v5420_v9  ;;  %v285_v9 = vld [vmem:[%s7165_s29 + $0x1b8] sm:$0xff] }
 0x2f9   : > { %6445 = vmatpush1.bf16.msra.mxu0 %v6444_v10  ;;  %5423 = vmatprep.subr.bf16.mxu1 %v5422_v11  ;;  %v6464_v10 = vpack.c.bf16 %v2028_v2, %v2026_v0  ;;  %v5442_v11 = vpack.c.bf16 %v1009_v4, %v1007_v3  ;;  %v2048_v0 = vld [vmem:[%s7147_s22 + $0x36d0] sm:$0xff]  ;;  %v1029_v2 = vld [vmem:[%s7147_s22 + $0x16f8] sm:$0xff]  ;;  %v2051_v3 = vld [vmem:[%s7147_s22 + $0x36e8] sm:$0xff] }
 0x2fa   : > { %6447 = vmatprep.subr.bf16.mxu0 %v6446_v15  ;;  %v6466_v15 = vpack.c.bf16 %v2033_v6, %v2031_v5  ;;  %v2053_v4 = vld [vmem:[%s7147_s22 + $0x36f8] sm:$0xff]  ;;  %v6484_v6 = vpack.c.bf16 %v2048_v0, %v2046_v62 }
 0x2fb   : > { %v1049_v62 = vld [vmem:[%s7147_s22 + $0x1798] sm:$0xff] }
 0x2fc   : > { %5425 = vmatpush1.bf16.msra.mxu1 %v5424_v21  ;;  %v5444_v21 = vpack.c.bf16 %v1008_v13, %v1006_v12  ;;  %v2052_v12 = vld [vmem:[%s7147_s22 + $0x36f0] sm:$0xff]  ;;  %v1031_v13 = vld [vmem:[%s7147_s22 + $0x1708] sm:$0xff]  ;;  %v2073_v0 = vld [vmem:[%s7147_s22 + $0x3798] sm:$0xff] }
 0x2fd   : > { %6449 = vmatpush1.bf16.msra.mxu0 %v6448_v22  ;;  %5427 = vmatprep.subr.bf16.mxu1 %v5426_v23  ;;  %v6468_v22 = vpack.c.bf16 %v2032_v16, %v2030_v14  ;;  %v5446_v23 = vpack.c.bf16 %v1013_v18, %v1011_v17  ;;  %v1033_v14 = vld [vmem:[%s7147_s22 + $0x1718] sm:$0xff] }
 0x2fe   : > { %6451 = vmatprep.subr.bf16.mxu0 %v6450_v27  ;;  %v6470_v27 = vpack.c.bf16 %v2037_v20, %v2035_v19  ;;  %v2057_v16 = vld [vmem:[%s7147_s22 + $0x3718] sm:$0xff]  ;;  %v5466_v19 = vpack.c.bf16 %v1033_v14, %v1031_v13  ;;  %v1030_v20 = vld [vmem:[%s7147_s22 + $0x1700] sm:$0xff] }
 0x300   : > { %5429 = vmatpush1.bf16.msra.mxu1 %v5428_v33  ;;  %v5448_v33 = vpack.c.bf16 %v1012_v25, %v1010_v24  ;;  %v2056_v24 = vld [vmem:[%s7147_s22 + $0x3710] sm:$0xff]  ;;  %v1035_v25 = vld [vmem:[%s7147_s22 + $0x1728] sm:$0xff] }
 0x301   : > { %6453 = vmatpush1.bf16.msra.mxu0 %v6452_v34  ;;  %5431 = vmatprep.subr.bf16.mxu1 %v5430_v35  ;;  %v6472_v34 = vpack.c.bf16 %v2036_v28, %v2034_v26  ;;  %v5450_v35 = vpack.c.bf16 %v1017_v30, %v1015_v29  ;;  %v1037_v26 = vld [vmem:[%s7147_s22 + $0x1738] sm:$0xff] }
 0x302   : > { %6455 = vmatprep.subr.bf16.mxu0 %v6454_v39  ;;  %v6474_v39 = vpack.c.bf16 %v2041_v32, %v2039_v31  ;;  %v2061_v28 = vld [vmem:[%s7147_s22 + $0x3738] sm:$0xff]  ;;  %v5470_v31 = vpack.c.bf16 %v1037_v26, %v1035_v25  ;;  %v1034_v32 = vld [vmem:[%s7147_s22 + $0x1720] sm:$0xff] }
 0x304   : > { %5433 = vmatpush1.bf16.msra.mxu1 %v5432_v45  ;;  %v5452_v45 = vpack.c.bf16 %v1016_v37, %v1014_v36  ;;  %v2060_v36 = vld [vmem:[%s7147_s22 + $0x3730] sm:$0xff]  ;;  %v1039_v37 = vld [vmem:[%s7147_s22 + $0x1748] sm:$0xff] }
 0x305   : > { %6457 = vmatpush1.bf16.msra.mxu0 %v6456_v46  ;;  %5435 = vmatprep.subr.bf16.mxu1 %v5434_v47  ;;  %v6476_v46 = vpack.c.bf16 %v2040_v40, %v2038_v38  ;;  %v5454_v47 = vpack.c.bf16 %v1021_v42, %v1019_v41  ;;  %v1041_v38 = vld [vmem:[%s7147_s22 + $0x1758] sm:$0xff] }
 0x306   : > { %6459 = vmatprep.subr.bf16.mxu0 %v6458_v51  ;;  %v6478_v51 = vpack.c.bf16 %v2045_v44, %v2043_v43  ;;  %v2065_v40 = vld [vmem:[%s7147_s22 + $0x3758] sm:$0xff]  ;;  %v5474_v43 = vpack.c.bf16 %v1041_v38, %v1039_v37  ;;  %v1038_v44 = vld [vmem:[%s7147_s22 + $0x1740] sm:$0xff] }
 0x307   : > { %3117 = vmatmul.mubr.f32.vlgmr.msra.gmra.mrb[0].mxu1 %v250_v57  ;;  %v5456_v57 = vpack.c.bf16 %v1020_v49, %v1018_v48  ;;  %v2064_v48 = vld [vmem:[%s7147_s22 + $0x3750] sm:$0xff]  ;;  %v1043_v49 = vld [vmem:[%s7147_s22 + $0x1768] sm:$0xff] }
 0x308   : > { %5437 = vmatpush1.bf16.msra.mxu1 %v5436_v58  ;;  %4253 = vmatmul.mubr.f32.vlgmr.msra.gmra.mrb[0].mxu0 %v282_v59  ;;  %v6480_v58 = vpack.c.bf16 %v2044_v52, %v2042_v50  ;;  %v5458_v59 = vpack.c.bf16 %v1025_v54, %v1023_v53  ;;  %v1045_v50 = vld [vmem:[%s7147_s22 + $0x1778] sm:$0xff] }
 0x309   : > { %6461 = vmatpush1.bf16.msra.mxu0 %v6460_v60  ;;  %5439 = vmatprep.subr.bf16.mxu1 %v5438_v61  ;;  %v1022_v60 = vld [vmem:[%s7147_s22 + $0x16c0] sm:$0xff]  ;;  %v1024_v61 = vld [vmem:[%s7147_s22 + $0x16d0] sm:$0xff]  ;;  %v2069_v52 = vld [vmem:[%s7147_s22 + $0x3778] sm:$0xff]  ;;  %v5478_v55 = vpack.c.bf16 %v1045_v50, %v1043_v49 }
 0x30a   : > { %6463 = vmatprep.subr.bf16.mxu0 %v6462_v1  ;;  %3187 = vmatprep.mubr.f32.mxu1 %v253_v7  ;;  %v1027_v1 = vld [vmem:[%s7147_s22 + $0x16e8] sm:$0xff]  ;;  %v5460_v5 = vpack.c.bf16 %v1024_v61, %v1022_v60  ;;  %v2068_v60 = vld [vmem:[%s7147_s22 + $0x3770] sm:$0xff] }
 0x30b   : > { %4323 = vmatprep.mubr.f32.mxu0 %v285_v9  ;;  %v5462_v7 = vpack.c.bf16 %v1029_v2, %v1027_v1  ;;  %v1028_v9 = vld [vmem:[%s7147_s22 + $0x16f0] sm:$0xff]  ;;  %v1047_v61 = vld [vmem:[%s7147_s22 + $0x1788] sm:$0xff] }
 0x30c   : > { %5441 = vmatpush1.bf16.msra.mxu1 %v5440_v8  ;;  %v1026_v8 = vld [vmem:[%s7147_s22 + $0x16e0] sm:$0xff] }
 0x30d   : > { %6465 = vmatpush1.bf16.msra.mxu0 %v6464_v10  ;;  %5443 = vmatprep.subr.bf16.mxu1 %v5442_v11  ;;  %v2050_v10 = vld [vmem:[%s7147_s22 + $0x36e0] sm:$0xff]  ;;  %v6486_v11 = vpack.c.bf16 %v2053_v4, %v2051_v3  ;;  %v5464_v17 = vpack.c.bf16 %v1028_v9, %v1026_v8  ;;  %v5482_v3 = vpack.c.bf16 %v1049_v62, %v1047_v61  ;;  %v2072_v8 = vld [vmem:[%s7147_s22 + $0x3790] sm:$0xff]  ;;  %v1051_v9 = vld [vmem:[%s7147_s22 + $0x17a8] sm:$0xff] }
 0x30e   : > { %6467 = vmatprep.subr.bf16.mxu0 %v6466_v15  ;;  %v2055_v15 = vld [vmem:[%s7147_s22 + $0x3708] sm:$0xff]  ;;  %v6488_v18 = vpack.c.bf16 %v2052_v12, %v2050_v10  ;;  %v1046_v4 = vld [vmem:[%s7147_s22 + $0x1780] sm:$0xff]  ;;  %v1053_v10 = vld [vmem:[%s7147_s22 + $0x17b8] sm:$0xff] }
 0x30f   : > { %v2077_v12 = vld [vmem:[%s7147_s22 + $0x37b8] sm:$0xff]  ;;  %v252_v61 = vld [vmem:[%s7165_s29 + $0xb0] sm:$0xff] }
 0x310   : > { %5445 = vmatpush1.bf16.msra.mxu1 %v5444_v21  ;;  %v1032_v21 = vld [vmem:[%s7147_s22 + $0x1710] sm:$0xff] }
 0x311   : > { %6469 = vmatpush1.bf16.msra.mxu0 %v6468_v22  ;;  %5447 = vmatprep.subr.bf16.mxu1 %v5446_v23  ;;  %v2054_v22 = vld [vmem:[%s7147_s22 + $0x3700] sm:$0xff]  ;;  %v6490_v23 = vpack.c.bf16 %v2057_v16, %v2055_v15  ;;  %v5468_v29 = vpack.c.bf16 %v1032_v21, %v1030_v20  ;;  %v5486_v15 = vpack.c.bf16 %v1053_v10, %v1051_v9  ;;  %v2076_v20 = vld [vmem:[%s7147_s22 + $0x37b0] sm:$0xff]  ;;  %v1055_v21 = vld [vmem:[%s7147_s22 + $0x17c8] sm:$0xff] }
 0x312   : > { %6471 = vmatprep.subr.bf16.mxu0 %v6470_v27  ;;  %v2059_v27 = vld [vmem:[%s7147_s22 + $0x3728] sm:$0xff]  ;;  %v6492_v30 = vpack.c.bf16 %v2056_v24, %v2054_v22  ;;  %v1050_v16 = vld [vmem:[%s7147_s22 + $0x17a0] sm:$0xff]  ;;  %v1057_v22 = vld [vmem:[%s7147_s22 + $0x17d8] sm:$0xff] }
 0x313   : > { %v2081_v24 = vld [vmem:[%s7147_s22 + $0x37d8] sm:$0xff]  ;;  %v2095_v9 = vld [vmem:[%s7147_s22 + $0x3848] sm:$0xff] }
 0x314   : > { %5449 = vmatpush1.bf16.msra.mxu1 %v5448_v33  ;;  %v1036_v33 = vld [vmem:[%s7147_s22 + $0x1730] sm:$0xff]  ;;  %v2097_v10 = vld [vmem:[%s7147_s22 + $0x3858] sm:$0xff] }
 0x315   : > { %6473 = vmatpush1.bf16.msra.mxu0 %v6472_v34  ;;  %5451 = vmatprep.subr.bf16.mxu1 %v5450_v35  ;;  %v2058_v34 = vld [vmem:[%s7147_s22 + $0x3720] sm:$0xff]  ;;  %v6494_v35 = vpack.c.bf16 %v2061_v28, %v2059_v27  ;;  %v5472_v41 = vpack.c.bf16 %v1036_v33, %v1034_v32  ;;  %v5490_v27 = vpack.c.bf16 %v1057_v22, %v1055_v21  ;;  %v2080_v32 = vld [vmem:[%s7147_s22 + $0x37d0] sm:$0xff]  ;;  %v1059_v33 = vld [vmem:[%s7147_s22 + $0x17e8] sm:$0xff] }
 0x316   : > { %6475 = vmatprep.subr.bf16.mxu0 %v6474_v39  ;;  %v2063_v39 = vld [vmem:[%s7147_s22 + $0x3748] sm:$0xff]  ;;  %v6496_v42 = vpack.c.bf16 %v2060_v36, %v2058_v34  ;;  %v1054_v28 = vld [vmem:[%s7147_s22 + $0x17c0] sm:$0xff]  ;;  %v1061_v34 = vld [vmem:[%s7147_s22 + $0x17f8] sm:$0xff] }
 0x317   : > { %v2085_v36 = vld [vmem:[%s7147_s22 + $0x37f8] sm:$0xff]  ;;  %v1075_v21 = vld [vmem:[%s7147_s22 + $0x1868] sm:$0xff] }
 0x318   : > { %5453 = vmatpush1.bf16.msra.mxu1 %v5452_v45  ;;  %v1040_v45 = vld [vmem:[%s7147_s22 + $0x1750] sm:$0xff]  ;;  %v1077_v22 = vld [vmem:[%s7147_s22 + $0x1878] sm:$0xff] }
 0x319   : > { %6477 = vmatpush1.bf16.msra.mxu0 %v6476_v46  ;;  %5455 = vmatprep.subr.bf16.mxu1 %v5454_v47  ;;  %v2062_v46 = vld [vmem:[%s7147_s22 + $0x3740] sm:$0xff]  ;;  %v6498_v47 = vpack.c.bf16 %v2065_v40, %v2063_v39  ;;  %v5476_v53 = vpack.c.bf16 %v1040_v45, %v1038_v44  ;;  %v5494_v39 = vpack.c.bf16 %v1061_v34, %v1059_v33  ;;  %v2084_v44 = vld [vmem:[%s7147_s22 + $0x37f0] sm:$0xff]  ;;  %v1063_v45 = vld [vmem:[%s7147_s22 + $0x1808] sm:$0xff] }
 0x31a   : > { %6479 = vmatprep.subr.bf16.mxu0 %v6478_v51  ;;  %v2067_v51 = vld [vmem:[%s7147_s22 + $0x3768] sm:$0xff]  ;;  %v6500_v54 = vpack.c.bf16 %v2064_v48, %v2062_v46  ;;  %v1058_v40 = vld [vmem:[%s7147_s22 + $0x17e0] sm:$0xff]  ;;  %v1065_v46 = vld [vmem:[%s7147_s22 + $0x1818] sm:$0xff] }
 0x31b   : > { %v2089_v48 = vld [vmem:[%s7147_s22 + $0x3818] sm:$0xff]  ;;  %v1079_v33 = vld [vmem:[%s7147_s22 + $0x1888] sm:$0xff] }
 0x31c   : > { %5457 = vmatpush1.bf16.msra.mxu1 %v5456_v57  ;;  %v1044_v57 = vld [vmem:[%s7147_s22 + $0x1770] sm:$0xff]  ;;  %v1081_v34 = vld [vmem:[%s7147_s22 + $0x1898] sm:$0xff] }
 0x31d   : > { %6481 = vmatpush1.bf16.msra.mxu0 %v6480_v58  ;;  %5459 = vmatprep.subr.bf16.mxu1 %v5458_v59  ;;  %v2066_v58 = vld [vmem:[%s7147_s22 + $0x3760] sm:$0xff]  ;;  %v6502_v59 = vpack.c.bf16 %v2069_v52, %v2067_v51  ;;  %v5480_v1 = vpack.c.bf16 %v1044_v57, %v1042_v56  ;;  %v5498_v51 = vpack.c.bf16 %v1065_v46, %v1063_v45  ;;  %v2088_v56 = vld [vmem:[%s7147_s22 + $0x3810] sm:$0xff]  ;;  %v1067_v57 = vld [vmem:[%s7147_s22 + $0x1828] sm:$0xff] }
 0x31e   : > { %6483 = vmatprep.subr.bf16.mxu0 %v6482_v63  ;;  %v2071_v63 = vld [vmem:[%s7147_s22 + $0x3788] sm:$0xff]  ;;  %v6504_v2 = vpack.c.bf16 %v2068_v60, %v2066_v58  ;;  %v1062_v52 = vld [vmem:[%s7147_s22 + $0x1800] sm:$0xff]  ;;  %v1069_v58 = vld [vmem:[%s7147_s22 + $0x1838] sm:$0xff] }
 0x31f   : > { %v2093_v60 = vld [vmem:[%s7147_s22 + $0x3838] sm:$0xff]  ;;  %v1083_v45 = vld [vmem:[%s7147_s22 + $0x18a8] sm:$0xff] }
 0x320   : > { %5461 = vmatpush1.bf16.msra.mxu1 %v5460_v5  ;;  %v1048_v5 = vld [vmem:[%s7147_s22 + $0x1790] sm:$0xff]  ;;  %v1085_v46 = vld [vmem:[%s7147_s22 + $0x18b8] sm:$0xff] }
 0x321   : > { %6485 = vmatpush1.bf16.msra.mxu0 %v6484_v6  ;;  %5463 = vmatprep.subr.bf16.mxu1 %v5462_v7  ;;  %v2070_v6 = vld [vmem:[%s7147_s22 + $0x3780] sm:$0xff]  ;;  %v6506_v7 = vpack.c.bf16 %v2073_v0, %v2071_v63  ;;  %v5484_v13 = vpack.c.bf16 %v1048_v5, %v1046_v4  ;;  %v284_v63 = vld [vmem:[%s7165_s29 + $0x1b0] sm:$0xff] }
 0x322   : > { %6487 = vmatprep.subr.bf16.mxu0 %v6486_v11  ;;  %v2075_v11 = vld [vmem:[%s7147_s22 + $0x37a8] sm:$0xff]  ;;  %v6508_v14 = vpack.c.bf16 %v2072_v8, %v2070_v6  ;;  %v2090_v4 = vld [vmem:[%s7147_s22 + $0x3820] sm:$0xff]  ;;  %v2092_v6 = vld [vmem:[%s7147_s22 + $0x3830] sm:$0xff] }
 0x323   : > { %v1073_v8 = vld [vmem:[%s7147_s22 + $0x1858] sm:$0xff] }
 0x324   : > { %5465 = vmatpush1.bf16.msra.mxu1 %v5464_v17  ;;  %v1052_v17 = vld [vmem:[%s7147_s22 + $0x17b0] sm:$0xff] }
 0x325   : > { %6489 = vmatpush1.bf16.msra.mxu0 %v6488_v18  ;;  %5467 = vmatprep.subr.bf16.mxu1 %v5466_v19  ;;  %v2074_v18 = vld [vmem:[%s7147_s22 + $0x37a0] sm:$0xff]  ;;  %v6510_v19 = vpack.c.bf16 %v2077_v12, %v2075_v11  ;;  %v5488_v25 = vpack.c.bf16 %v1052_v17, %v1050_v16  ;;  %v1072_v17 = vld [vmem:[%s7147_s22 + $0x1850] sm:$0xff] }
 0x326   : > { %6491 = vmatprep.subr.bf16.mxu0 %v6490_v23  ;;  %v2079_v23 = vld [vmem:[%s7147_s22 + $0x37c8] sm:$0xff]  ;;  %v6512_v26 = vpack.c.bf16 %v2076_v20, %v2074_v18  ;;  %v255_v11 = vld [vmem:[%s7165_s29 + $0xc8] sm:$0xff]  ;;  %v2096_v20 = vld [vmem:[%s7147_s22 + $0x3850] sm:$0xff] }
 0x327   : > { %v1070_v16 = vld [vmem:[%s7147_s22 + $0x1840] sm:$0xff] }
 0x328   : > { %5469 = vmatpush1.bf16.msra.mxu1 %v5468_v29  ;;  %v1056_v29 = vld [vmem:[%s7147_s22 + $0x17d0] sm:$0xff]  ;;  %v2094_v18 = vld [vmem:[%s7147_s22 + $0x3840] sm:$0xff] }
 0x329   : > { %6493 = vmatpush1.bf16.msra.mxu0 %v6492_v30  ;;  %5471 = vmatprep.subr.bf16.mxu1 %v5470_v31  ;;  %v2078_v30 = vld [vmem:[%s7147_s22 + $0x37c0] sm:$0xff]  ;;  %v6514_v31 = vpack.c.bf16 %v2081_v24, %v2079_v23  ;;  %v5492_v37 = vpack.c.bf16 %v1056_v29, %v1054_v28  ;;  %v2099_v23 = vld [vmem:[%s7147_s22 + $0x3868] sm:$0xff]  ;;  %v2101_v24 = vld [vmem:[%s7147_s22 + $0x3878] sm:$0xff] }
 0x32a   : > { %6495 = vmatprep.subr.bf16.mxu0 %v6494_v35  ;;  %v2083_v35 = vld [vmem:[%s7147_s22 + $0x37e8] sm:$0xff]  ;;  %v6516_v38 = vpack.c.bf16 %v2080_v32, %v2078_v30  ;;  %v1074_v28 = vld [vmem:[%s7147_s22 + $0x1860] sm:$0xff]  ;;  %v1076_v29 = vld [vmem:[%s7147_s22 + $0x1870] sm:$0xff] }
 0x32b   : > { %v2098_v30 = vld [vmem:[%s7147_s22 + $0x3860] sm:$0xff]  ;;  %v2100_v32 = vld [vmem:[%s7147_s22 + $0x3870] sm:$0xff] }
 0x32c   : > { %5473 = vmatpush1.bf16.msra.mxu1 %v5472_v41  ;;  %v1060_v41 = vld [vmem:[%s7147_s22 + $0x17f0] sm:$0xff] }
 0x32d   : > { %6497 = vmatpush1.bf16.msra.mxu0 %v6496_v42  ;;  %5475 = vmatprep.subr.bf16.mxu1 %v5474_v43  ;;  %v2082_v42 = vld [vmem:[%s7147_s22 + $0x37e0] sm:$0xff]  ;;  %v6518_v43 = vpack.c.bf16 %v2085_v36, %v2083_v35  ;;  %v5496_v49 = vpack.c.bf16 %v1060_v41, %v1058_v40  ;;  %v2103_v35 = vld [vmem:[%s7147_s22 + $0x3888] sm:$0xff]  ;;  %v2105_v36 = vld [vmem:[%s7147_s22 + $0x3898] sm:$0xff] }
 0x32e   : > { %6499 = vmatprep.subr.bf16.mxu0 %v6498_v47  ;;  %v2087_v47 = vld [vmem:[%s7147_s22 + $0x3808] sm:$0xff]  ;;  %v6520_v50 = vpack.c.bf16 %v2084_v44, %v2082_v42  ;;  %v1078_v40 = vld [vmem:[%s7147_s22 + $0x1880] sm:$0xff]  ;;  %v1080_v41 = vld [vmem:[%s7147_s22 + $0x1890] sm:$0xff] }
 0x32f   : > { %v2102_v42 = vld [vmem:[%s7147_s22 + $0x3880] sm:$0xff]  ;;  %v2104_v44 = vld [vmem:[%s7147_s22 + $0x3890] sm:$0xff] }
 0x330   : > { %5477 = vmatpush1.bf16.msra.mxu1 %v5476_v53  ;;  %v1064_v53 = vld [vmem:[%s7147_s22 + $0x1810] sm:$0xff] }
 0x331   : > { %6501 = vmatpush1.bf16.msra.mxu0 %v6500_v54  ;;  %5479 = vmatprep.subr.bf16.mxu1 %v5478_v55  ;;  %v2086_v54 = vld [vmem:[%s7147_s22 + $0x3800] sm:$0xff]  ;;  %v6522_v55 = vpack.c.bf16 %v2089_v48, %v2087_v47  ;;  %v5500_v62 = vpack.c.bf16 %v1064_v53, %v1062_v52  ;;  %v2107_v47 = vld [vmem:[%s7147_s22 + $0x38a8] sm:$0xff]  ;;  %v2109_v48 = vld [vmem:[%s7147_s22 + $0x38b8] sm:$0xff] }
 0x332   : > { %6503 = vmatprep.subr.bf16.mxu0 %v6502_v59  ;;  %v2091_v59 = vld [vmem:[%s7147_s22 + $0x3828] sm:$0xff]  ;;  %v6524_v0 = vpack.c.bf16 %v2088_v56, %v2086_v54  ;;  %v1082_v52 = vld [vmem:[%s7147_s22 + $0x18a0] sm:$0xff]  ;;  %v1084_v53 = vld [vmem:[%s7147_s22 + $0x18b0] sm:$0xff] }
 0x333   : > { %v6526_v5 = vpack.c.bf16 %v2093_v60, %v2091_v59  ;;  %v2106_v54 = vld [vmem:[%s7147_s22 + $0x38a0] sm:$0xff]  ;;  %v2108_v56 = vld [vmem:[%s7147_s22 + $0x38b0] sm:$0xff]  ;;  %v2111_v59 = vld [vmem:[%s7147_s22 + $0x38c8] sm:$0xff] }
 0x334   : > { %5481 = vmatpush1.bf16.msra.mxu1 %v5480_v1  ;;  %v5502_v1 = vpack.c.bf16 %v1069_v58, %v1067_v57  ;;  %v1087_v57 = vld [vmem:[%s7147_s22 + $0x18c8] sm:$0xff]  ;;  %v1089_v58 = vld [vmem:[%s7147_s22 + $0x18d8] sm:$0xff] }
 0x335   : > { %6505 = vmatpush1.bf16.msra.mxu0 %v6504_v2  ;;  %5483 = vmatprep.subr.bf16.mxu1 %v5482_v3  ;;  %v1066_v2 = vld [vmem:[%s7147_s22 + $0x1820] sm:$0xff]  ;;  %v1068_v3 = vld [vmem:[%s7147_s22 + $0x1830] sm:$0xff]  ;;  %v2113_v60 = vld [vmem:[%s7147_s22 + $0x38d8] sm:$0xff] }
 0x336   : > { %6507 = vmatprep.subr.bf16.mxu0 %v6506_v7  ;;  %v1071_v7 = vld [vmem:[%s7147_s22 + $0x1848] sm:$0xff]  ;;  %v5504_v12 = vpack.c.bf16 %v1068_v3, %v1066_v2  ;;  %v2110_v2 = vld [vmem:[%s7147_s22 + $0x38c0] sm:$0xff]  ;;  %v6546_v3 = vpack.c.bf16 %v2113_v60, %v2111_v59 }
 0x337   : > { %v1106_v60 = vld [vmem:[%s7147_s22 + $0x1960] sm:$0xff] }
 0x338   : > { %5485 = vmatpush1.bf16.msra.mxu1 %v5484_v13  ;;  %v287_v13 = vld [vmem:[%s7165_s29 + $0x1c8] sm:$0xff] }
 0x339   : > { %6509 = vmatpush1.bf16.msra.mxu0 %v6508_v14  ;;  %5487 = vmatprep.subr.bf16.mxu1 %v5486_v15  ;;  %v6528_v14 = vpack.c.bf16 %v2092_v6, %v2090_v4  ;;  %v5506_v15 = vpack.c.bf16 %v1073_v8, %v1071_v7  ;;  %v2112_v4 = vld [vmem:[%s7147_s22 + $0x38d0] sm:$0xff]  ;;  %v1093_v6 = vld [vmem:[%s7147_s22 + $0x18f8] sm:$0xff]  ;;  %v2115_v7 = vld [vmem:[%s7147_s22 + $0x38e8] sm:$0xff] }
 0x33a   : > { %6511 = vmatprep.subr.bf16.mxu0 %v6510_v19  ;;  %v6530_v19 = vpack.c.bf16 %v2097_v10, %v2095_v9  ;;  %v2117_v8 = vld [vmem:[%s7147_s22 + $0x38f8] sm:$0xff]  ;;  %v6548_v10 = vpack.c.bf16 %v2112_v4, %v2110_v2 }
 0x33b   : > { %v1113_v2 = vld [vmem:[%s7147_s22 + $0x1998] sm:$0xff] }
 0x33c   : > { %5489 = vmatpush1.bf16.msra.mxu1 %v5488_v25  ;;  %v5508_v25 = vpack.c.bf16 %v1072_v17, %v1070_v16  ;;  %v2116_v16 = vld [vmem:[%s7147_s22 + $0x38f0] sm:$0xff]  ;;  %v1095_v17 = vld [vmem:[%s7147_s22 + $0x1908] sm:$0xff]  ;;  %v2137_v4 = vld [vmem:[%s7147_s22 + $0x3998] sm:$0xff] }
 0x33d   : > { %6513 = vmatpush1.bf16.msra.mxu0 %v6512_v26  ;;  %5491 = vmatprep.subr.bf16.mxu1 %v5490_v27  ;;  %v6532_v26 = vpack.c.bf16 %v2096_v20, %v2094_v18  ;;  %v5510_v27 = vpack.c.bf16 %v1077_v22, %v1075_v21  ;;  %v1097_v18 = vld [vmem:[%s7147_s22 + $0x1918] sm:$0xff] }
 0x33e   : > { %6515 = vmatprep.subr.bf16.mxu0 %v6514_v31  ;;  %v6534_v31 = vpack.c.bf16 %v2101_v24, %v2099_v23  ;;  %v2121_v20 = vld [vmem:[%s7147_s22 + $0x3918] sm:$0xff]  ;;  %v5530_v23 = vpack.c.bf16 %v1097_v18, %v1095_v17  ;;  %v1094_v24 = vld [vmem:[%s7147_s22 + $0x1900] sm:$0xff] }
 0x340   : > { %5493 = vmatpush1.bf16.msra.mxu1 %v5492_v37  ;;  %v5512_v37 = vpack.c.bf16 %v1076_v29, %v1074_v28  ;;  %v2120_v28 = vld [vmem:[%s7147_s22 + $0x3910] sm:$0xff]  ;;  %v1099_v29 = vld [vmem:[%s7147_s22 + $0x1928] sm:$0xff] }
 0x341   : > { %6517 = vmatpush1.bf16.msra.mxu0 %v6516_v38  ;;  %5495 = vmatprep.subr.bf16.mxu1 %v5494_v39  ;;  %v6536_v38 = vpack.c.bf16 %v2100_v32, %v2098_v30  ;;  %v5514_v39 = vpack.c.bf16 %v1081_v34, %v1079_v33  ;;  %v1101_v30 = vld [vmem:[%s7147_s22 + $0x1938] sm:$0xff] }
 0x342   : > { %6519 = vmatprep.subr.bf16.mxu0 %v6518_v43  ;;  %v6538_v43 = vpack.c.bf16 %v2105_v36, %v2103_v35  ;;  %v2125_v32 = vld [vmem:[%s7147_s22 + $0x3938] sm:$0xff]  ;;  %v5534_v35 = vpack.c.bf16 %v1101_v30, %v1099_v29  ;;  %v1098_v36 = vld [vmem:[%s7147_s22 + $0x1920] sm:$0xff] }
 0x344   : > { %5497 = vmatpush1.bf16.msra.mxu1 %v5496_v49  ;;  %v5516_v49 = vpack.c.bf16 %v1080_v41, %v1078_v40  ;;  %v2124_v40 = vld [vmem:[%s7147_s22 + $0x3930] sm:$0xff]  ;;  %v1103_v41 = vld [vmem:[%s7147_s22 + $0x1948] sm:$0xff] }
 0x345   : > { %6521 = vmatpush1.bf16.msra.mxu0 %v6520_v50  ;;  %5499 = vmatprep.subr.bf16.mxu1 %v5498_v51  ;;  %v6540_v50 = vpack.c.bf16 %v2104_v44, %v2102_v42  ;;  %v5518_v51 = vpack.c.bf16 %v1085_v46, %v1083_v45  ;;  %v1105_v42 = vld [vmem:[%s7147_s22 + $0x1958] sm:$0xff] }
 0x346   : > { %6523 = vmatprep.subr.bf16.mxu0 %v6522_v55  ;;  %v6542_v55 = vpack.c.bf16 %v2109_v48, %v2107_v47  ;;  %v2129_v44 = vld [vmem:[%s7147_s22 + $0x3958] sm:$0xff]  ;;  %v5538_v47 = vpack.c.bf16 %v1105_v42, %v1103_v41  ;;  %v1102_v48 = vld [vmem:[%s7147_s22 + $0x1940] sm:$0xff] }
 0x347   : > { %3188 = vmatmul.mubr.f32.vlgmr.msra.gmra.mrb[0].mxu1 %v252_v61  ;;  %v5520_v61 = vpack.c.bf16 %v1084_v53, %v1082_v52  ;;  %v2128_v52 = vld [vmem:[%s7147_s22 + $0x3950] sm:$0xff]  ;;  %v1107_v53 = vld [vmem:[%s7147_s22 + $0x1968] sm:$0xff] }
 0x348   : > { %5501 = vmatpush1.bf16.msra.mxu1 %v5500_v62  ;;  %4324 = vmatmul.mubr.f32.vlgmr.msra.gmra.mrb[0].mxu0 %v284_v63  ;;  %v6544_v62 = vpack.c.bf16 %v2108_v56, %v2106_v54  ;;  %v5522_v63 = vpack.c.bf16 %v1089_v58, %v1087_v57  ;;  %v1109_v54 = vld [vmem:[%s7147_s22 + $0x1978] sm:$0xff] }
 0x349   : > { %6525 = vmatpush1.bf16.msra.mxu0 %v6524_v0  ;;  %5503 = vmatprep.subr.bf16.mxu1 %v5502_v1  ;;  %v1086_v0 = vld [vmem:[%s7147_s22 + $0x18c0] sm:$0xff]  ;;  %v1088_v1 = vld [vmem:[%s7147_s22 + $0x18d0] sm:$0xff]  ;;  %v2133_v56 = vld [vmem:[%s7147_s22 + $0x3978] sm:$0xff]  ;;  %v5542_v59 = vpack.c.bf16 %v1109_v54, %v1107_v53 }
 0x34a   : > { %6527 = vmatprep.subr.bf16.mxu0 %v6526_v5  ;;  %3258 = vmatprep.mubr.f32.mxu1 %v255_v11  ;;  %v1091_v5 = vld [vmem:[%s7147_s22 + $0x18e8] sm:$0xff]  ;;  %v5524_v9 = vpack.c.bf16 %v1088_v1, %v1086_v0  ;;  %v2132_v0 = vld [vmem:[%s7147_s22 + $0x3970] sm:$0xff] }
 0x34b   : > { %4394 = vmatprep.mubr.f32.mxu0 %v287_v13  ;;  %v5526_v11 = vpack.c.bf16 %v1093_v6, %v1091_v5  ;;  %v1092_v13 = vld [vmem:[%s7147_s22 + $0x18f0] sm:$0xff]  ;;  %v1111_v1 = vld [vmem:[%s7147_s22 + $0x1988] sm:$0xff] }
 0x34c   : > { %5505 = vmatpush1.bf16.msra.mxu1 %v5504_v12  ;;  %v1090_v12 = vld [vmem:[%s7147_s22 + $0x18e0] sm:$0xff] }
 0x34d   : > { %6529 = vmatpush1.bf16.msra.mxu0 %v6528_v14  ;;  %5507 = vmatprep.subr.bf16.mxu1 %v5506_v15  ;;  %v2114_v14 = vld [vmem:[%s7147_s22 + $0x38e0] sm:$0xff]  ;;  %v6550_v15 = vpack.c.bf16 %v2117_v8, %v2115_v7  ;;  %v5528_v21 = vpack.c.bf16 %v1092_v13, %v1090_v12  ;;  %v5546_v7 = vpack.c.bf16 %v1113_v2, %v1111_v1  ;;  %v2136_v12 = vld [vmem:[%s7147_s22 + $0x3990] sm:$0xff]  ;;  %v1115_v13 = vld [vmem:[%s7147_s22 + $0x19a8] sm:$0xff] }
 0x34e   : > { %6531 = vmatprep.subr.bf16.mxu0 %v6530_v19  ;;  %v2119_v19 = vld [vmem:[%s7147_s22 + $0x3908] sm:$0xff]  ;;  %v6552_v22 = vpack.c.bf16 %v2116_v16, %v2114_v14  ;;  %v1110_v8 = vld [vmem:[%s7147_s22 + $0x1980] sm:$0xff]  ;;  %v1117_v14 = vld [vmem:[%s7147_s22 + $0x19b8] sm:$0xff] }
 0x34f   : > { %v2141_v16 = vld [vmem:[%s7147_s22 + $0x39b8] sm:$0xff] }
 0x350   : > { %5509 = vmatpush1.bf16.msra.mxu1 %v5508_v25  ;;  %v1096_v25 = vld [vmem:[%s7147_s22 + $0x1910] sm:$0xff]  ;;  %v254_v1 = vld [vmem:[%s7165_s29 + $0xc0] sm:$0xff] }
 0x351   : > { %6533 = vmatpush1.bf16.msra.mxu0 %v6532_v26  ;;  %5511 = vmatprep.subr.bf16.mxu1 %v5510_v27  ;;  %v2118_v26 = vld [vmem:[%s7147_s22 + $0x3900] sm:$0xff]  ;;  %v6554_v27 = vpack.c.bf16 %v2121_v20, %v2119_v19  ;;  %v5532_v33 = vpack.c.bf16 %v1096_v25, %v1094_v24  ;;  %v5550_v19 = vpack.c.bf16 %v1117_v14, %v1115_v13  ;;  %v2140_v24 = vld [vmem:[%s7147_s22 + $0x39b0] sm:$0xff]  ;;  %v1119_v25 = vld [vmem:[%s7147_s22 + $0x19c8] sm:$0xff] }
 0x352   : > { %6535 = vmatprep.subr.bf16.mxu0 %v6534_v31  ;;  %v2123_v31 = vld [vmem:[%s7147_s22 + $0x3928] sm:$0xff]  ;;  %v6556_v34 = vpack.c.bf16 %v2120_v28, %v2118_v26  ;;  %v1114_v20 = vld [vmem:[%s7147_s22 + $0x19a0] sm:$0xff]  ;;  %v1121_v26 = vld [vmem:[%s7147_s22 + $0x19d8] sm:$0xff] }
 0x353   : > { %v2145_v28 = vld [vmem:[%s7147_s22 + $0x39d8] sm:$0xff]  ;;  %v2159_v13 = vld [vmem:[%s7147_s22 + $0x3a48] sm:$0xff] }
 0x354   : > { %5513 = vmatpush1.bf16.msra.mxu1 %v5512_v37  ;;  %v1100_v37 = vld [vmem:[%s7147_s22 + $0x1930] sm:$0xff]  ;;  %v2161_v14 = vld [vmem:[%s7147_s22 + $0x3a58] sm:$0xff] }
 0x355   : > { %6537 = vmatpush1.bf16.msra.mxu0 %v6536_v38  ;;  %5515 = vmatprep.subr.bf16.mxu1 %v5514_v39  ;;  %v2122_v38 = vld [vmem:[%s7147_s22 + $0x3920] sm:$0xff]  ;;  %v6558_v39 = vpack.c.bf16 %v2125_v32, %v2123_v31  ;;  %v5536_v45 = vpack.c.bf16 %v1100_v37, %v1098_v36  ;;  %v5554_v31 = vpack.c.bf16 %v1121_v26, %v1119_v25  ;;  %v2144_v36 = vld [vmem:[%s7147_s22 + $0x39d0] sm:$0xff]  ;;  %v1123_v37 = vld [vmem:[%s7147_s22 + $0x19e8] sm:$0xff] }
 0x356   : > { %6539 = vmatprep.subr.bf16.mxu0 %v6538_v43  ;;  %v2127_v43 = vld [vmem:[%s7147_s22 + $0x3948] sm:$0xff]  ;;  %v6560_v46 = vpack.c.bf16 %v2124_v40, %v2122_v38  ;;  %v1118_v32 = vld [vmem:[%s7147_s22 + $0x19c0] sm:$0xff]  ;;  %v1125_v38 = vld [vmem:[%s7147_s22 + $0x19f8] sm:$0xff] }
 0x357   : > { %v2149_v40 = vld [vmem:[%s7147_s22 + $0x39f8] sm:$0xff]  ;;  %v1139_v25 = vld [vmem:[%s7147_s22 + $0x1a68] sm:$0xff] }
 0x358   : > { %5517 = vmatpush1.bf16.msra.mxu1 %v5516_v49  ;;  %v1104_v49 = vld [vmem:[%s7147_s22 + $0x1950] sm:$0xff]  ;;  %v1141_v26 = vld [vmem:[%s7147_s22 + $0x1a78] sm:$0xff] }
 0x359   : > { %6541 = vmatpush1.bf16.msra.mxu0 %v6540_v50  ;;  %5519 = vmatprep.subr.bf16.mxu1 %v5518_v51  ;;  %v2126_v50 = vld [vmem:[%s7147_s22 + $0x3940] sm:$0xff]  ;;  %v6562_v51 = vpack.c.bf16 %v2129_v44, %v2127_v43  ;;  %v5540_v57 = vpack.c.bf16 %v1104_v49, %v1102_v48  ;;  %v5558_v43 = vpack.c.bf16 %v1125_v38, %v1123_v37  ;;  %v2148_v48 = vld [vmem:[%s7147_s22 + $0x39f0] sm:$0xff]  ;;  %v1127_v49 = vld [vmem:[%s7147_s22 + $0x1a08] sm:$0xff] }
 0x35a   : > { %6543 = vmatprep.subr.bf16.mxu0 %v6542_v55  ;;  %v2131_v55 = vld [vmem:[%s7147_s22 + $0x3968] sm:$0xff]  ;;  %v6564_v58 = vpack.c.bf16 %v2128_v52, %v2126_v50  ;;  %v1122_v44 = vld [vmem:[%s7147_s22 + $0x19e0] sm:$0xff]  ;;  %v1129_v50 = vld [vmem:[%s7147_s22 + $0x1a18] sm:$0xff] }
 0x35b   : > { %v2153_v52 = vld [vmem:[%s7147_s22 + $0x3a18] sm:$0xff]  ;;  %v1143_v37 = vld [vmem:[%s7147_s22 + $0x1a88] sm:$0xff] }
 0x35c   : > { %5521 = vmatpush1.bf16.msra.mxu1 %v5520_v61  ;;  %v1108_v61 = vld [vmem:[%s7147_s22 + $0x1970] sm:$0xff]  ;;  %v1145_v38 = vld [vmem:[%s7147_s22 + $0x1a98] sm:$0xff] }
 0x35d   : > { %6545 = vmatpush1.bf16.msra.mxu0 %v6544_v62  ;;  %5523 = vmatprep.subr.bf16.mxu1 %v5522_v63  ;;  %v2130_v62 = vld [vmem:[%s7147_s22 + $0x3960] sm:$0xff]  ;;  %v6566_v63 = vpack.c.bf16 %v2133_v56, %v2131_v55  ;;  %v5544_v5 = vpack.c.bf16 %v1108_v61, %v1106_v60  ;;  %v5562_v55 = vpack.c.bf16 %v1129_v50, %v1127_v49  ;;  %v2152_v60 = vld [vmem:[%s7147_s22 + $0x3a10] sm:$0xff]  ;;  %v1131_v61 = vld [vmem:[%s7147_s22 + $0x1a28] sm:$0xff] }
 0x35e   : > { %6547 = vmatprep.subr.bf16.mxu0 %v6546_v3  ;;  %v2135_v3 = vld [vmem:[%s7147_s22 + $0x3988] sm:$0xff]  ;;  %v6568_v6 = vpack.c.bf16 %v2132_v0, %v2130_v62  ;;  %v1126_v56 = vld [vmem:[%s7147_s22 + $0x1a00] sm:$0xff]  ;;  %v1133_v62 = vld [vmem:[%s7147_s22 + $0x1a38] sm:$0xff] }
 0x35f   : > { %v2157_v0 = vld [vmem:[%s7147_s22 + $0x3a38] sm:$0xff]  ;;  %v1147_v49 = vld [vmem:[%s7147_s22 + $0x1aa8] sm:$0xff] }
 0x360   : > { %5525 = vmatpush1.bf16.msra.mxu1 %v5524_v9  ;;  %v1112_v9 = vld [vmem:[%s7147_s22 + $0x1990] sm:$0xff]  ;;  %v1149_v50 = vld [vmem:[%s7147_s22 + $0x1ab8] sm:$0xff] }
 0x361   : > { %6549 = vmatpush1.bf16.msra.mxu0 %v6548_v10  ;;  %5527 = vmatprep.subr.bf16.mxu1 %v5526_v11  ;;  %v2134_v10 = vld [vmem:[%s7147_s22 + $0x3980] sm:$0xff]  ;;  %v6570_v11 = vpack.c.bf16 %v2137_v4, %v2135_v3  ;;  %v5548_v17 = vpack.c.bf16 %v1112_v9, %v1110_v8  ;;  %v286_v3 = vld [vmem:[%s7165_s29 + $0x1c0] sm:$0xff] }
 0x362   : > { %6551 = vmatprep.subr.bf16.mxu0 %v6550_v15  ;;  %v2139_v15 = vld [vmem:[%s7147_s22 + $0x39a8] sm:$0xff]  ;;  %v6572_v18 = vpack.c.bf16 %v2136_v12, %v2134_v10  ;;  %v2154_v8 = vld [vmem:[%s7147_s22 + $0x3a20] sm:$0xff]  ;;  %v2156_v10 = vld [vmem:[%s7147_s22 + $0x3a30] sm:$0xff] }
 0x363   : > { %v1137_v12 = vld [vmem:[%s7147_s22 + $0x1a58] sm:$0xff] }
 0x364   : > { %5529 = vmatpush1.bf16.msra.mxu1 %v5528_v21  ;;  %v1116_v21 = vld [vmem:[%s7147_s22 + $0x19b0] sm:$0xff] }
 0x365   : > { %6553 = vmatpush1.bf16.msra.mxu0 %v6552_v22  ;;  %5531 = vmatprep.subr.bf16.mxu1 %v5530_v23  ;;  %v2138_v22 = vld [vmem:[%s7147_s22 + $0x39a0] sm:$0xff]  ;;  %v6574_v23 = vpack.c.bf16 %v2141_v16, %v2139_v15  ;;  %v5552_v29 = vpack.c.bf16 %v1116_v21, %v1114_v20  ;;  %v257_v15 = vld [vmem:[%s7165_s29 + $0xd8] sm:$0xff] }
 0x366   : > { %6555 = vmatprep.subr.bf16.mxu0 %v6554_v27  ;;  %v2143_v27 = vld [vmem:[%s7147_s22 + $0x39c8] sm:$0xff]  ;;  %v6576_v30 = vpack.c.bf16 %v2140_v24, %v2138_v22  ;;  %v1134_v20 = vld [vmem:[%s7147_s22 + $0x1a40] sm:$0xff]  ;;  %v1136_v21 = vld [vmem:[%s7147_s22 + $0x1a50] sm:$0xff] }
 0x367   : > { %v2158_v22 = vld [vmem:[%s7147_s22 + $0x3a40] sm:$0xff]  ;;  %v2160_v24 = vld [vmem:[%s7147_s22 + $0x3a50] sm:$0xff] }
 0x368   : > { %5533 = vmatpush1.bf16.msra.mxu1 %v5532_v33  ;;  %v1120_v33 = vld [vmem:[%s7147_s22 + $0x19d0] sm:$0xff] }
 0x369   : > { %6557 = vmatpush1.bf16.msra.mxu0 %v6556_v34  ;;  %5535 = vmatprep.subr.bf16.mxu1 %v5534_v35  ;;  %v2142_v34 = vld [vmem:[%s7147_s22 + $0x39c0] sm:$0xff]  ;;  %v6578_v35 = vpack.c.bf16 %v2145_v28, %v2143_v27  ;;  %v5556_v41 = vpack.c.bf16 %v1120_v33, %v1118_v32  ;;  %v2163_v27 = vld [vmem:[%s7147_s22 + $0x3a68] sm:$0xff]  ;;  %v2165_v28 = vld [vmem:[%s7147_s22 + $0x3a78] sm:$0xff] }
 0x36a   : > { %6559 = vmatprep.subr.bf16.mxu0 %v6558_v39  ;;  %v2147_v39 = vld [vmem:[%s7147_s22 + $0x39e8] sm:$0xff]  ;;  %v6580_v42 = vpack.c.bf16 %v2144_v36, %v2142_v34  ;;  %v1138_v32 = vld [vmem:[%s7147_s22 + $0x1a60] sm:$0xff]  ;;  %v1140_v33 = vld [vmem:[%s7147_s22 + $0x1a70] sm:$0xff] }
 0x36b   : > { %v2162_v34 = vld [vmem:[%s7147_s22 + $0x3a60] sm:$0xff]  ;;  %v2164_v36 = vld [vmem:[%s7147_s22 + $0x3a70] sm:$0xff] }
 0x36c   : > { %5537 = vmatpush1.bf16.msra.mxu1 %v5536_v45  ;;  %v1124_v45 = vld [vmem:[%s7147_s22 + $0x19f0] sm:$0xff] }
 0x36d   : > { %6561 = vmatpush1.bf16.msra.mxu0 %v6560_v46  ;;  %5539 = vmatprep.subr.bf16.mxu1 %v5538_v47  ;;  %v2146_v46 = vld [vmem:[%s7147_s22 + $0x39e0] sm:$0xff]  ;;  %v6582_v47 = vpack.c.bf16 %v2149_v40, %v2147_v39  ;;  %v5560_v53 = vpack.c.bf16 %v1124_v45, %v1122_v44  ;;  %v2167_v39 = vld [vmem:[%s7147_s22 + $0x3a88] sm:$0xff]  ;;  %v2169_v40 = vld [vmem:[%s7147_s22 + $0x3a98] sm:$0xff] }
 0x36e   : > { %6563 = vmatprep.subr.bf16.mxu0 %v6562_v51  ;;  %v2151_v51 = vld [vmem:[%s7147_s22 + $0x3a08] sm:$0xff]  ;;  %v6584_v54 = vpack.c.bf16 %v2148_v48, %v2146_v46  ;;  %v1142_v44 = vld [vmem:[%s7147_s22 + $0x1a80] sm:$0xff]  ;;  %v1144_v45 = vld [vmem:[%s7147_s22 + $0x1a90] sm:$0xff] }
 0x36f   : > { %v2166_v46 = vld [vmem:[%s7147_s22 + $0x3a80] sm:$0xff]  ;;  %v2168_v48 = vld [vmem:[%s7147_s22 + $0x3a90] sm:$0xff] }
 0x370   : > { %5541 = vmatpush1.bf16.msra.mxu1 %v5540_v57  ;;  %v1128_v57 = vld [vmem:[%s7147_s22 + $0x1a10] sm:$0xff] }
 0x371   : > { %6565 = vmatpush1.bf16.msra.mxu0 %v6564_v58  ;;  %5543 = vmatprep.subr.bf16.mxu1 %v5542_v59  ;;  %v2150_v58 = vld [vmem:[%s7147_s22 + $0x3a00] sm:$0xff]  ;;  %v6586_v59 = vpack.c.bf16 %v2153_v52, %v2151_v51  ;;  %v5564_v2 = vpack.c.bf16 %v1128_v57, %v1126_v56  ;;  %v2171_v51 = vld [vmem:[%s7147_s22 + $0x3aa8] sm:$0xff]  ;;  %v2173_v52 = vld [vmem:[%s7147_s22 + $0x3ab8] sm:$0xff] }
 0x372   : > { %6567 = vmatprep.subr.bf16.mxu0 %v6566_v63  ;;  %v2155_v63 = vld [vmem:[%s7147_s22 + $0x3a28] sm:$0xff]  ;;  %v6588_v4 = vpack.c.bf16 %v2152_v60, %v2150_v58  ;;  %v1146_v56 = vld [vmem:[%s7147_s22 + $0x1aa0] sm:$0xff]  ;;  %v1148_v57 = vld [vmem:[%s7147_s22 + $0x1ab0] sm:$0xff] }
 0x373   : > { %v6590_v9 = vpack.c.bf16 %v2157_v0, %v2155_v63  ;;  %v2170_v58 = vld [vmem:[%s7147_s22 + $0x3aa0] sm:$0xff]  ;;  %v2172_v60 = vld [vmem:[%s7147_s22 + $0x3ab0] sm:$0xff]  ;;  %v2175_v63 = vld [vmem:[%s7147_s22 + $0x3ac8] sm:$0xff] }
 0x374   : > { %5545 = vmatpush1.bf16.msra.mxu1 %v5544_v5  ;;  %v5566_v5 = vpack.c.bf16 %v1133_v62, %v1131_v61  ;;  %v1151_v61 = vld [vmem:[%s7147_s22 + $0x1ac8] sm:$0xff]  ;;  %v1153_v62 = vld [vmem:[%s7147_s22 + $0x1ad8] sm:$0xff] }
 0x375   : > { %6569 = vmatpush1.bf16.msra.mxu0 %v6568_v6  ;;  %5547 = vmatprep.subr.bf16.mxu1 %v5546_v7  ;;  %v1130_v6 = vld [vmem:[%s7147_s22 + $0x1a20] sm:$0xff]  ;;  %v1132_v7 = vld [vmem:[%s7147_s22 + $0x1a30] sm:$0xff]  ;;  %v2177_v0 = vld [vmem:[%s7147_s22 + $0x3ad8] sm:$0xff] }
 0x376   : > { %6571 = vmatprep.subr.bf16.mxu0 %v6570_v11  ;;  %v1135_v11 = vld [vmem:[%s7147_s22 + $0x1a48] sm:$0xff]  ;;  %v5568_v16 = vpack.c.bf16 %v1132_v7, %v1130_v6  ;;  %v2174_v6 = vld [vmem:[%s7147_s22 + $0x3ac0] sm:$0xff]  ;;  %v6610_v7 = vpack.c.bf16 %v2177_v0, %v2175_v63 }
 0x377   : > { %v1170_v0 = vld [vmem:[%s7147_s22 + $0x1b60] sm:$0xff] }
 0x378   : > { %5549 = vmatpush1.bf16.msra.mxu1 %v5548_v17  ;;  %v289_v17 = vld [vmem:[%s7165_s29 + $0x1d8] sm:$0xff] }
 0x379   : > { %6573 = vmatpush1.bf16.msra.mxu0 %v6572_v18  ;;  %5551 = vmatprep.subr.bf16.mxu1 %v5550_v19  ;;  %v6592_v18 = vpack.c.bf16 %v2156_v10, %v2154_v8  ;;  %v5570_v19 = vpack.c.bf16 %v1137_v12, %v1135_v11  ;;  %v2176_v8 = vld [vmem:[%s7147_s22 + $0x3ad0] sm:$0xff]  ;;  %v1157_v10 = vld [vmem:[%s7147_s22 + $0x1af8] sm:$0xff]  ;;  %v2179_v11 = vld [vmem:[%s7147_s22 + $0x3ae8] sm:$0xff] }
 0x37a   : > { %6575 = vmatprep.subr.bf16.mxu0 %v6574_v23  ;;  %v6594_v23 = vpack.c.bf16 %v2161_v14, %v2159_v13  ;;  %v2181_v12 = vld [vmem:[%s7147_s22 + $0x3af8] sm:$0xff]  ;;  %v6612_v14 = vpack.c.bf16 %v2176_v8, %v2174_v6 }
 0x37b   : > { %v1177_v6 = vld [vmem:[%s7147_s22 + $0x1b98] sm:$0xff] }
 0x37c   : > { %5553 = vmatpush1.bf16.msra.mxu1 %v5552_v29  ;;  %v5572_v29 = vpack.c.bf16 %v1136_v21, %v1134_v20  ;;  %v2180_v20 = vld [vmem:[%s7147_s22 + $0x3af0] sm:$0xff]  ;;  %v1159_v21 = vld [vmem:[%s7147_s22 + $0x1b08] sm:$0xff]  ;;  %v2201_v8 = vld [vmem:[%s7147_s22 + $0x3b98] sm:$0xff] }
 0x37d   : > { %6577 = vmatpush1.bf16.msra.mxu0 %v6576_v30  ;;  %5555 = vmatprep.subr.bf16.mxu1 %v5554_v31  ;;  %v6596_v30 = vpack.c.bf16 %v2160_v24, %v2158_v22  ;;  %v5574_v31 = vpack.c.bf16 %v1141_v26, %v1139_v25  ;;  %v1161_v22 = vld [vmem:[%s7147_s22 + $0x1b18] sm:$0xff] }
 0x37e   : > { %6579 = vmatprep.subr.bf16.mxu0 %v6578_v35  ;;  %v6598_v35 = vpack.c.bf16 %v2165_v28, %v2163_v27  ;;  %v2185_v24 = vld [vmem:[%s7147_s22 + $0x3b18] sm:$0xff]  ;;  %v5594_v27 = vpack.c.bf16 %v1161_v22, %v1159_v21  ;;  %v1158_v28 = vld [vmem:[%s7147_s22 + $0x1b00] sm:$0xff] }
 0x380   : > { %5557 = vmatpush1.bf16.msra.mxu1 %v5556_v41  ;;  %v5576_v41 = vpack.c.bf16 %v1140_v33, %v1138_v32  ;;  %v2184_v32 = vld [vmem:[%s7147_s22 + $0x3b10] sm:$0xff]  ;;  %v1163_v33 = vld [vmem:[%s7147_s22 + $0x1b28] sm:$0xff] }
 0x381   : > { %6581 = vmatpush1.bf16.msra.mxu0 %v6580_v42  ;;  %5559 = vmatprep.subr.bf16.mxu1 %v5558_v43  ;;  %v6600_v42 = vpack.c.bf16 %v2164_v36, %v2162_v34  ;;  %v5578_v43 = vpack.c.bf16 %v1145_v38, %v1143_v37  ;;  %v1165_v34 = vld [vmem:[%s7147_s22 + $0x1b38] sm:$0xff] }
 0x382   : > { %6583 = vmatprep.subr.bf16.mxu0 %v6582_v47  ;;  %v6602_v47 = vpack.c.bf16 %v2169_v40, %v2167_v39  ;;  %v2189_v36 = vld [vmem:[%s7147_s22 + $0x3b38] sm:$0xff]  ;;  %v5598_v39 = vpack.c.bf16 %v1165_v34, %v1163_v33  ;;  %v1162_v40 = vld [vmem:[%s7147_s22 + $0x1b20] sm:$0xff] }
 0x384   : > { %5561 = vmatpush1.bf16.msra.mxu1 %v5560_v53  ;;  %v5580_v53 = vpack.c.bf16 %v1144_v45, %v1142_v44  ;;  %v2188_v44 = vld [vmem:[%s7147_s22 + $0x3b30] sm:$0xff]  ;;  %v1167_v45 = vld [vmem:[%s7147_s22 + $0x1b48] sm:$0xff] }
 0x385   : > { %6585 = vmatpush1.bf16.msra.mxu0 %v6584_v54  ;;  %5563 = vmatprep.subr.bf16.mxu1 %v5562_v55  ;;  %v6604_v54 = vpack.c.bf16 %v2168_v48, %v2166_v46  ;;  %v5582_v55 = vpack.c.bf16 %v1149_v50, %v1147_v49  ;;  %v1169_v46 = vld [vmem:[%s7147_s22 + $0x1b58] sm:$0xff] }
 0x386   : > { %6587 = vmatprep.subr.bf16.mxu0 %v6586_v59  ;;  %v6606_v59 = vpack.c.bf16 %v2173_v52, %v2171_v51  ;;  %v2193_v48 = vld [vmem:[%s7147_s22 + $0x3b58] sm:$0xff]  ;;  %v5602_v51 = vpack.c.bf16 %v1169_v46, %v1167_v45  ;;  %v1166_v52 = vld [vmem:[%s7147_s22 + $0x1b40] sm:$0xff] }
 0x387   : > { %3259 = vmatmul.mubr.f32.vlgmr.msra.gmra.mrb[0].mxu1 %v254_v1  ;;  %v5584_v1 = vpack.c.bf16 %v1148_v57, %v1146_v56  ;;  %v2192_v56 = vld [vmem:[%s7147_s22 + $0x3b50] sm:$0xff]  ;;  %v1171_v57 = vld [vmem:[%s7147_s22 + $0x1b68] sm:$0xff] }
 0x388   : > { %5565 = vmatpush1.bf16.msra.mxu1 %v5564_v2  ;;  %4395 = vmatmul.mubr.f32.vlgmr.msra.gmra.mrb[0].mxu0 %v286_v3  ;;  %v6608_v2 = vpack.c.bf16 %v2172_v60, %v2170_v58  ;;  %v5586_v3 = vpack.c.bf16 %v1153_v62, %v1151_v61  ;;  %v1173_v58 = vld [vmem:[%s7147_s22 + $0x1b78] sm:$0xff] }
 0x389   : > { %6589 = vmatpush1.bf16.msra.mxu0 %v6588_v4  ;;  %5567 = vmatprep.subr.bf16.mxu1 %v5566_v5  ;;  %v1150_v4 = vld [vmem:[%s7147_s22 + $0x1ac0] sm:$0xff]  ;;  %v1152_v5 = vld [vmem:[%s7147_s22 + $0x1ad0] sm:$0xff]  ;;  %v2197_v60 = vld [vmem:[%s7147_s22 + $0x3b78] sm:$0xff]  ;;  %v5606_v63 = vpack.c.bf16 %v1173_v58, %v1171_v57 }
 0x38a   : > { %6591 = vmatprep.subr.bf16.mxu0 %v6590_v9  ;;  %3329 = vmatprep.mubr.f32.mxu1 %v257_v15  ;;  %v1155_v9 = vld [vmem:[%s7147_s22 + $0x1ae8] sm:$0xff]  ;;  %v5588_v13 = vpack.c.bf16 %v1152_v5, %v1150_v4  ;;  %v2196_v4 = vld [vmem:[%s7147_s22 + $0x3b70] sm:$0xff] }
 0x38b   : > { %4465 = vmatprep.mubr.f32.mxu0 %v289_v17  ;;  %v5590_v15 = vpack.c.bf16 %v1157_v10, %v1155_v9  ;;  %v1156_v17 = vld [vmem:[%s7147_s22 + $0x1af0] sm:$0xff]  ;;  %v1175_v5 = vld [vmem:[%s7147_s22 + $0x1b88] sm:$0xff] }
 0x38c   : > { %5569 = vmatpush1.bf16.msra.mxu1 %v5568_v16  ;;  %v1154_v16 = vld [vmem:[%s7147_s22 + $0x1ae0] sm:$0xff] }
 0x38d   : > { %6593 = vmatpush1.bf16.msra.mxu0 %v6592_v18  ;;  %5571 = vmatprep.subr.bf16.mxu1 %v5570_v19  ;;  %v2178_v18 = vld [vmem:[%s7147_s22 + $0x3ae0] sm:$0xff]  ;;  %v6614_v19 = vpack.c.bf16 %v2181_v12, %v2179_v11  ;;  %v5592_v25 = vpack.c.bf16 %v1156_v17, %v1154_v16  ;;  %v5610_v11 = vpack.c.bf16 %v1177_v6, %v1175_v5  ;;  %v2200_v16 = vld [vmem:[%s7147_s22 + $0x3b90] sm:$0xff]  ;;  %v1179_v17 = vld [vmem:[%s7147_s22 + $0x1ba8] sm:$0xff] }
 0x38e   : > { %6595 = vmatprep.subr.bf16.mxu0 %v6594_v23  ;;  %v2183_v23 = vld [vmem:[%s7147_s22 + $0x3b08] sm:$0xff]  ;;  %v6616_v26 = vpack.c.bf16 %v2180_v20, %v2178_v18  ;;  %v1174_v12 = vld [vmem:[%s7147_s22 + $0x1b80] sm:$0xff]  ;;  %v1181_v18 = vld [vmem:[%s7147_s22 + $0x1bb8] sm:$0xff] }
 0x38f   : > { %v2205_v20 = vld [vmem:[%s7147_s22 + $0x3bb8] sm:$0xff]  ;;  %v256_v5 = vld [vmem:[%s7165_s29 + $0xd0] sm:$0xff] }
 0x390   : > { %5573 = vmatpush1.bf16.msra.mxu1 %v5572_v29  ;;  %v1160_v29 = vld [vmem:[%s7147_s22 + $0x1b10] sm:$0xff] }
 0x391   : > { %6597 = vmatpush1.bf16.msra.mxu0 %v6596_v30  ;;  %5575 = vmatprep.subr.bf16.mxu1 %v5574_v31  ;;  %v2182_v30 = vld [vmem:[%s7147_s22 + $0x3b00] sm:$0xff]  ;;  %v6618_v31 = vpack.c.bf16 %v2185_v24, %v2183_v23  ;;  %v5596_v37 = vpack.c.bf16 %v1160_v29, %v1158_v28  ;;  %v5614_v23 = vpack.c.bf16 %v1181_v18, %v1179_v17  ;;  %v2204_v28 = vld [vmem:[%s7147_s22 + $0x3bb0] sm:$0xff]  ;;  %v1183_v29 = vld [vmem:[%s7147_s22 + $0x1bc8] sm:$0xff] }
 0x392   : > { %6599 = vmatprep.subr.bf16.mxu0 %v6598_v35  ;;  %v2187_v35 = vld [vmem:[%s7147_s22 + $0x3b28] sm:$0xff]  ;;  %v6620_v38 = vpack.c.bf16 %v2184_v32, %v2182_v30  ;;  %v1178_v24 = vld [vmem:[%s7147_s22 + $0x1ba0] sm:$0xff]  ;;  %v1185_v30 = vld [vmem:[%s7147_s22 + $0x1bd8] sm:$0xff] }
 0x393   : > { %v2209_v32 = vld [vmem:[%s7147_s22 + $0x3bd8] sm:$0xff]  ;;  %v2223_v17 = vld [vmem:[%s7147_s22 + $0x3c48] sm:$0xff] }
 0x394   : > { %5577 = vmatpush1.bf16.msra.mxu1 %v5576_v41  ;;  %v1164_v41 = vld [vmem:[%s7147_s22 + $0x1b30] sm:$0xff]  ;;  %v2225_v18 = vld [vmem:[%s7147_s22 + $0x3c58] sm:$0xff] }
 0x395   : > { %6601 = vmatpush1.bf16.msra.mxu0 %v6600_v42  ;;  %5579 = vmatprep.subr.bf16.mxu1 %v5578_v43  ;;  %v2186_v42 = vld [vmem:[%s7147_s22 + $0x3b20] sm:$0xff]  ;;  %v6622_v43 = vpack.c.bf16 %v2189_v36, %v2187_v35  ;;  %v5600_v49 = vpack.c.bf16 %v1164_v41, %v1162_v40  ;;  %v5618_v35 = vpack.c.bf16 %v1185_v30, %v1183_v29  ;;  %v2208_v40 = vld [vmem:[%s7147_s22 + $0x3bd0] sm:$0xff]  ;;  %v1187_v41 = vld [vmem:[%s7147_s22 + $0x1be8] sm:$0xff] }
 0x396   : > { %6603 = vmatprep.subr.bf16.mxu0 %v6602_v47  ;;  %v2191_v47 = vld [vmem:[%s7147_s22 + $0x3b48] sm:$0xff]  ;;  %v6624_v50 = vpack.c.bf16 %v2188_v44, %v2186_v42  ;;  %v1182_v36 = vld [vmem:[%s7147_s22 + $0x1bc0] sm:$0xff]  ;;  %v1189_v42 = vld [vmem:[%s7147_s22 + $0x1bf8] sm:$0xff] }
 0x397   : > { %v2213_v44 = vld [vmem:[%s7147_s22 + $0x3bf8] sm:$0xff]  ;;  %v1203_v29 = vld [vmem:[%s7147_s22 + $0x1c68] sm:$0xff] }
 0x398   : > { %5581 = vmatpush1.bf16.msra.mxu1 %v5580_v53  ;;  %v1168_v53 = vld [vmem:[%s7147_s22 + $0x1b50] sm:$0xff]  ;;  %v1205_v30 = vld [vmem:[%s7147_s22 + $0x1c78] sm:$0xff] }
 0x399   : > { %6605 = vmatpush1.bf16.msra.mxu0 %v6604_v54  ;;  %5583 = vmatprep.subr.bf16.mxu1 %v5582_v55  ;;  %v2190_v54 = vld [vmem:[%s7147_s22 + $0x3b40] sm:$0xff]  ;;  %v6626_v55 = vpack.c.bf16 %v2193_v48, %v2191_v47  ;;  %v5604_v61 = vpack.c.bf16 %v1168_v53, %v1166_v52  ;;  %v5622_v47 = vpack.c.bf16 %v1189_v42, %v1187_v41  ;;  %v2212_v52 = vld [vmem:[%s7147_s22 + $0x3bf0] sm:$0xff]  ;;  %v1191_v53 = vld [vmem:[%s7147_s22 + $0x1c08] sm:$0xff] }
 0x39a   : > { %6607 = vmatprep.subr.bf16.mxu0 %v6606_v59  ;;  %v2195_v59 = vld [vmem:[%s7147_s22 + $0x3b68] sm:$0xff]  ;;  %v6628_v62 = vpack.c.bf16 %v2192_v56, %v2190_v54  ;;  %v1186_v48 = vld [vmem:[%s7147_s22 + $0x1be0] sm:$0xff]  ;;  %v1193_v54 = vld [vmem:[%s7147_s22 + $0x1c18] sm:$0xff] }
 0x39b   : > { %v2217_v56 = vld [vmem:[%s7147_s22 + $0x3c18] sm:$0xff]  ;;  %v1207_v41 = vld [vmem:[%s7147_s22 + $0x1c88] sm:$0xff] }
 0x39c   : > { %5585 = vmatpush1.bf16.msra.mxu1 %v5584_v1  ;;  %v1172_v1 = vld [vmem:[%s7147_s22 + $0x1b70] sm:$0xff]  ;;  %v1209_v42 = vld [vmem:[%s7147_s22 + $0x1c98] sm:$0xff] }
 0x39d   : > { %6609 = vmatpush1.bf16.msra.mxu0 %v6608_v2  ;;  %5587 = vmatprep.subr.bf16.mxu1 %v5586_v3  ;;  %v2194_v2 = vld [vmem:[%s7147_s22 + $0x3b60] sm:$0xff]  ;;  %v6630_v3 = vpack.c.bf16 %v2197_v60, %v2195_v59  ;;  %v5608_v9 = vpack.c.bf16 %v1172_v1, %v1170_v0  ;;  %v5626_v59 = vpack.c.bf16 %v1193_v54, %v1191_v53  ;;  %v2216_v0 = vld [vmem:[%s7147_s22 + $0x3c10] sm:$0xff]  ;;  %v1195_v1 = vld [vmem:[%s7147_s22 + $0x1c28] sm:$0xff] }
 0x39e   : > { %6611 = vmatprep.subr.bf16.mxu0 %v6610_v7  ;;  %v2199_v7 = vld [vmem:[%s7147_s22 + $0x3b88] sm:$0xff]  ;;  %v6632_v10 = vpack.c.bf16 %v2196_v4, %v2194_v2  ;;  %v1190_v60 = vld [vmem:[%s7147_s22 + $0x1c00] sm:$0xff]  ;;  %v1197_v2 = vld [vmem:[%s7147_s22 + $0x1c38] sm:$0xff] }
 0x39f   : > { %v2221_v4 = vld [vmem:[%s7147_s22 + $0x3c38] sm:$0xff]  ;;  %v1211_v53 = vld [vmem:[%s7147_s22 + $0x1ca8] sm:$0xff] }
 0x3a0   : > { %5589 = vmatpush1.bf16.msra.mxu1 %v5588_v13  ;;  %v1176_v13 = vld [vmem:[%s7147_s22 + $0x1b90] sm:$0xff]  ;;  %v1213_v54 = vld [vmem:[%s7147_s22 + $0x1cb8] sm:$0xff] }
 0x3a1   : > { %6613 = vmatpush1.bf16.msra.mxu0 %v6612_v14  ;;  %5591 = vmatprep.subr.bf16.mxu1 %v5590_v15  ;;  %v2198_v14 = vld [vmem:[%s7147_s22 + $0x3b80] sm:$0xff]  ;;  %v6634_v15 = vpack.c.bf16 %v2201_v8, %v2199_v7  ;;  %v5612_v21 = vpack.c.bf16 %v1176_v13, %v1174_v12  ;;  %v288_v7 = vld [vmem:[%s7165_s29 + $0x1d0] sm:$0xff] }
 0x3a2   : > { %6615 = vmatprep.subr.bf16.mxu0 %v6614_v19  ;;  %v2203_v19 = vld [vmem:[%s7147_s22 + $0x3ba8] sm:$0xff]  ;;  %v6636_v22 = vpack.c.bf16 %v2200_v16, %v2198_v14  ;;  %v2218_v12 = vld [vmem:[%s7147_s22 + $0x3c20] sm:$0xff]  ;;  %v2220_v14 = vld [vmem:[%s7147_s22 + $0x3c30] sm:$0xff] }
 0x3a3   : > { %v1201_v16 = vld [vmem:[%s7147_s22 + $0x1c58] sm:$0xff] }
 0x3a4   : > { %5593 = vmatpush1.bf16.msra.mxu1 %v5592_v25  ;;  %v1180_v25 = vld [vmem:[%s7147_s22 + $0x1bb0] sm:$0xff] }
 0x3a5   : > { %6617 = vmatpush1.bf16.msra.mxu0 %v6616_v26  ;;  %5595 = vmatprep.subr.bf16.mxu1 %v5594_v27  ;;  %v2202_v26 = vld [vmem:[%s7147_s22 + $0x3ba0] sm:$0xff]  ;;  %v6638_v27 = vpack.c.bf16 %v2205_v20, %v2203_v19  ;;  %v5616_v33 = vpack.c.bf16 %v1180_v25, %v1178_v24  ;;  %v1200_v25 = vld [vmem:[%s7147_s22 + $0x1c50] sm:$0xff] }
 0x3a6   : > { %6619 = vmatprep.subr.bf16.mxu0 %v6618_v31  ;;  %v2207_v31 = vld [vmem:[%s7147_s22 + $0x3bc8] sm:$0xff]  ;;  %v6640_v34 = vpack.c.bf16 %v2204_v28, %v2202_v26  ;;  %v259_v19 = vld [vmem:[%s7165_s29 + $0xe8] sm:$0xff]  ;;  %v2224_v28 = vld [vmem:[%s7147_s22 + $0x3c50] sm:$0xff] }
 0x3a7   : > { %v1198_v24 = vld [vmem:[%s7147_s22 + $0x1c40] sm:$0xff] }
 0x3a8   : > { %5597 = vmatpush1.bf16.msra.mxu1 %v5596_v37  ;;  %v1184_v37 = vld [vmem:[%s7147_s22 + $0x1bd0] sm:$0xff]  ;;  %v2222_v26 = vld [vmem:[%s7147_s22 + $0x3c40] sm:$0xff] }
 0x3a9   : > { %6621 = vmatpush1.bf16.msra.mxu0 %v6620_v38  ;;  %5599 = vmatprep.subr.bf16.mxu1 %v5598_v39  ;;  %v2206_v38 = vld [vmem:[%s7147_s22 + $0x3bc0] sm:$0xff]  ;;  %v6642_v39 = vpack.c.bf16 %v2209_v32, %v2207_v31  ;;  %v5620_v45 = vpack.c.bf16 %v1184_v37, %v1182_v36  ;;  %v2227_v31 = vld [vmem:[%s7147_s22 + $0x3c68] sm:$0xff]  ;;  %v2229_v32 = vld [vmem:[%s7147_s22 + $0x3c78] sm:$0xff] }
 0x3aa   : > { %6623 = vmatprep.subr.bf16.mxu0 %v6622_v43  ;;  %v2211_v43 = vld [vmem:[%s7147_s22 + $0x3be8] sm:$0xff]  ;;  %v6644_v46 = vpack.c.bf16 %v2208_v40, %v2206_v38  ;;  %v1202_v36 = vld [vmem:[%s7147_s22 + $0x1c60] sm:$0xff]  ;;  %v1204_v37 = vld [vmem:[%s7147_s22 + $0x1c70] sm:$0xff] }
 0x3ab   : > { %v2226_v38 = vld [vmem:[%s7147_s22 + $0x3c60] sm:$0xff]  ;;  %v2228_v40 = vld [vmem:[%s7147_s22 + $0x3c70] sm:$0xff] }
 0x3ac   : > { %5601 = vmatpush1.bf16.msra.mxu1 %v5600_v49  ;;  %v1188_v49 = vld [vmem:[%s7147_s22 + $0x1bf0] sm:$0xff] }
 0x3ad   : > { %6625 = vmatpush1.bf16.msra.mxu0 %v6624_v50  ;;  %5603 = vmatprep.subr.bf16.mxu1 %v5602_v51  ;;  %v2210_v50 = vld [vmem:[%s7147_s22 + $0x3be0] sm:$0xff]  ;;  %v6646_v51 = vpack.c.bf16 %v2213_v44, %v2211_v43  ;;  %v5624_v57 = vpack.c.bf16 %v1188_v49, %v1186_v48  ;;  %v2231_v43 = vld [vmem:[%s7147_s22 + $0x3c88] sm:$0xff]  ;;  %v2233_v44 = vld [vmem:[%s7147_s22 + $0x3c98] sm:$0xff] }
 0x3ae   : > { %6627 = vmatprep.subr.bf16.mxu0 %v6626_v55  ;;  %v2215_v55 = vld [vmem:[%s7147_s22 + $0x3c08] sm:$0xff]  ;;  %v6648_v58 = vpack.c.bf16 %v2212_v52, %v2210_v50  ;;  %v1206_v48 = vld [vmem:[%s7147_s22 + $0x1c80] sm:$0xff]  ;;  %v1208_v49 = vld [vmem:[%s7147_s22 + $0x1c90] sm:$0xff] }
 0x3af   : > { %v2230_v50 = vld [vmem:[%s7147_s22 + $0x3c80] sm:$0xff]  ;;  %v2232_v52 = vld [vmem:[%s7147_s22 + $0x3c90] sm:$0xff] }
 0x3b0   : > { %5605 = vmatpush1.bf16.msra.mxu1 %v5604_v61  ;;  %v1192_v61 = vld [vmem:[%s7147_s22 + $0x1c10] sm:$0xff] }
 0x3b1   : > { %6629 = vmatpush1.bf16.msra.mxu0 %v6628_v62  ;;  %5607 = vmatprep.subr.bf16.mxu1 %v5606_v63  ;;  %v2214_v62 = vld [vmem:[%s7147_s22 + $0x3c00] sm:$0xff]  ;;  %v6650_v63 = vpack.c.bf16 %v2217_v56, %v2215_v55  ;;  %v5628_v6 = vpack.c.bf16 %v1192_v61, %v1190_v60  ;;  %v2235_v55 = vld [vmem:[%s7147_s22 + $0x3ca8] sm:$0xff]  ;;  %v2237_v56 = vld [vmem:[%s7147_s22 + $0x3cb8] sm:$0xff] }
 0x3b2   : > { %6631 = vmatprep.subr.bf16.mxu0 %v6630_v3  ;;  %v2219_v3 = vld [vmem:[%s7147_s22 + $0x3c28] sm:$0xff]  ;;  %v6652_v8 = vpack.c.bf16 %v2216_v0, %v2214_v62  ;;  %v1210_v60 = vld [vmem:[%s7147_s22 + $0x1ca0] sm:$0xff]  ;;  %v1212_v61 = vld [vmem:[%s7147_s22 + $0x1cb0] sm:$0xff] }
 0x3b3   : > { %v6654_v13 = vpack.c.bf16 %v2221_v4, %v2219_v3  ;;  %v2234_v62 = vld [vmem:[%s7147_s22 + $0x3ca0] sm:$0xff]  ;;  %v2236_v0 = vld [vmem:[%s7147_s22 + $0x3cb0] sm:$0xff]  ;;  %v2239_v3 = vld [vmem:[%s7147_s22 + $0x3cc8] sm:$0xff] }
 0x3b4   : > { %5609 = vmatpush1.bf16.msra.mxu1 %v5608_v9  ;;  %v5630_v9 = vpack.c.bf16 %v1197_v2, %v1195_v1  ;;  %v1215_v1 = vld [vmem:[%s7147_s22 + $0x1cc8] sm:$0xff]  ;;  %v1217_v2 = vld [vmem:[%s7147_s22 + $0x1cd8] sm:$0xff] }
 0x3b5   : > { %6633 = vmatpush1.bf16.msra.mxu0 %v6632_v10  ;;  %5611 = vmatprep.subr.bf16.mxu1 %v5610_v11  ;;  %v1194_v10 = vld [vmem:[%s7147_s22 + $0x1c20] sm:$0xff]  ;;  %v1196_v11 = vld [vmem:[%s7147_s22 + $0x1c30] sm:$0xff]  ;;  %v2241_v4 = vld [vmem:[%s7147_s22 + $0x3cd8] sm:$0xff] }
 0x3b6   : > { %6635 = vmatprep.subr.bf16.mxu0 %v6634_v15  ;;  %v1199_v15 = vld [vmem:[%s7147_s22 + $0x1c48] sm:$0xff]  ;;  %v5632_v20 = vpack.c.bf16 %v1196_v11, %v1194_v10  ;;  %v2238_v10 = vld [vmem:[%s7147_s22 + $0x3cc0] sm:$0xff]  ;;  %v6674_v11 = vpack.c.bf16 %v2241_v4, %v2239_v3 }
 0x3b7   : > { %v1234_v4 = vld [vmem:[%s7147_s22 + $0x1d60] sm:$0xff] }
 0x3b8   : > { %5613 = vmatpush1.bf16.msra.mxu1 %v5612_v21  ;;  %v291_v21 = vld [vmem:[%s7165_s29 + $0x1e8] sm:$0xff] }
 0x3b9   : > { %6637 = vmatpush1.bf16.msra.mxu0 %v6636_v22  ;;  %5615 = vmatprep.subr.bf16.mxu1 %v5614_v23  ;;  %v6656_v22 = vpack.c.bf16 %v2220_v14, %v2218_v12  ;;  %v5634_v23 = vpack.c.bf16 %v1201_v16, %v1199_v15  ;;  %v2240_v12 = vld [vmem:[%s7147_s22 + $0x3cd0] sm:$0xff]  ;;  %v1221_v14 = vld [vmem:[%s7147_s22 + $0x1cf8] sm:$0xff]  ;;  %v2243_v15 = vld [vmem:[%s7147_s22 + $0x3ce8] sm:$0xff] }
 0x3ba   : > { %6639 = vmatprep.subr.bf16.mxu0 %v6638_v27  ;;  %v6658_v27 = vpack.c.bf16 %v2225_v18, %v2223_v17  ;;  %v2245_v16 = vld [vmem:[%s7147_s22 + $0x3cf8] sm:$0xff]  ;;  %v6676_v18 = vpack.c.bf16 %v2240_v12, %v2238_v10 }
 0x3bb   : > { %v1241_v10 = vld [vmem:[%s7147_s22 + $0x1d98] sm:$0xff] }
 0x3bc   : > { %5617 = vmatpush1.bf16.msra.mxu1 %v5616_v33  ;;  %v5636_v33 = vpack.c.bf16 %v1200_v25, %v1198_v24  ;;  %v2244_v24 = vld [vmem:[%s7147_s22 + $0x3cf0] sm:$0xff]  ;;  %v1223_v25 = vld [vmem:[%s7147_s22 + $0x1d08] sm:$0xff]  ;;  %v2265_v12 = vld [vmem:[%s7147_s22 + $0x3d98] sm:$0xff] }
 0x3bd   : > { %6641 = vmatpush1.bf16.msra.mxu0 %v6640_v34  ;;  %5619 = vmatprep.subr.bf16.mxu1 %v5618_v35  ;;  %v6660_v34 = vpack.c.bf16 %v2224_v28, %v2222_v26  ;;  %v5638_v35 = vpack.c.bf16 %v1205_v30, %v1203_v29  ;;  %v1225_v26 = vld [vmem:[%s7147_s22 + $0x1d18] sm:$0xff] }
 0x3be   : > { %6643 = vmatprep.subr.bf16.mxu0 %v6642_v39  ;;  %v6662_v39 = vpack.c.bf16 %v2229_v32, %v2227_v31  ;;  %v2249_v28 = vld [vmem:[%s7147_s22 + $0x3d18] sm:$0xff]  ;;  %v5658_v31 = vpack.c.bf16 %v1225_v26, %v1223_v25  ;;  %v1222_v32 = vld [vmem:[%s7147_s22 + $0x1d00] sm:$0xff] }
 0x3c0   : > { %5621 = vmatpush1.bf16.msra.mxu1 %v5620_v45  ;;  %v5640_v45 = vpack.c.bf16 %v1204_v37, %v1202_v36  ;;  %v2248_v36 = vld [vmem:[%s7147_s22 + $0x3d10] sm:$0xff]  ;;  %v1227_v37 = vld [vmem:[%s7147_s22 + $0x1d28] sm:$0xff] }
 0x3c1   : > { %6645 = vmatpush1.bf16.msra.mxu0 %v6644_v46  ;;  %5623 = vmatprep.subr.bf16.mxu1 %v5622_v47  ;;  %v6664_v46 = vpack.c.bf16 %v2228_v40, %v2226_v38  ;;  %v5642_v47 = vpack.c.bf16 %v1209_v42, %v1207_v41  ;;  %v1229_v38 = vld [vmem:[%s7147_s22 + $0x1d38] sm:$0xff] }
 0x3c2   : > { %6647 = vmatprep.subr.bf16.mxu0 %v6646_v51  ;;  %v6666_v51 = vpack.c.bf16 %v2233_v44, %v2231_v43  ;;  %v2253_v40 = vld [vmem:[%s7147_s22 + $0x3d38] sm:$0xff]  ;;  %v5662_v43 = vpack.c.bf16 %v1229_v38, %v1227_v37  ;;  %v1226_v44 = vld [vmem:[%s7147_s22 + $0x1d20] sm:$0xff] }
 0x3c4   : > { %5625 = vmatpush1.bf16.msra.mxu1 %v5624_v57  ;;  %v5644_v57 = vpack.c.bf16 %v1208_v49, %v1206_v48  ;;  %v2252_v48 = vld [vmem:[%s7147_s22 + $0x3d30] sm:$0xff]  ;;  %v1231_v49 = vld [vmem:[%s7147_s22 + $0x1d48] sm:$0xff] }
 0x3c5   : > { %6649 = vmatpush1.bf16.msra.mxu0 %v6648_v58  ;;  %5627 = vmatprep.subr.bf16.mxu1 %v5626_v59  ;;  %v6668_v58 = vpack.c.bf16 %v2232_v52, %v2230_v50  ;;  %v5646_v59 = vpack.c.bf16 %v1213_v54, %v1211_v53  ;;  %v1233_v50 = vld [vmem:[%s7147_s22 + $0x1d58] sm:$0xff] }
 0x3c6   : > { %6651 = vmatprep.subr.bf16.mxu0 %v6650_v63  ;;  %v6670_v63 = vpack.c.bf16 %v2237_v56, %v2235_v55  ;;  %v2257_v52 = vld [vmem:[%s7147_s22 + $0x3d58] sm:$0xff]  ;;  %v5666_v55 = vpack.c.bf16 %v1233_v50, %v1231_v49  ;;  %v1230_v56 = vld [vmem:[%s7147_s22 + $0x1d40] sm:$0xff] }
 0x3c7   : > { %3330 = vmatmul.mubr.f32.vlgmr.msra.gmra.mrb[0].mxu1 %v256_v5  ;;  %v5648_v5 = vpack.c.bf16 %v1212_v61, %v1210_v60  ;;  %v2256_v60 = vld [vmem:[%s7147_s22 + $0x3d50] sm:$0xff]  ;;  %v1235_v61 = vld [vmem:[%s7147_s22 + $0x1d68] sm:$0xff] }
 0x3c8   : > { %5629 = vmatpush1.bf16.msra.mxu1 %v5628_v6  ;;  %4466 = vmatmul.mubr.f32.vlgmr.msra.gmra.mrb[0].mxu0 %v288_v7  ;;  %v6672_v6 = vpack.c.bf16 %v2236_v0, %v2234_v62  ;;  %v5650_v7 = vpack.c.bf16 %v1217_v2, %v1215_v1  ;;  %v1237_v62 = vld [vmem:[%s7147_s22 + $0x1d78] sm:$0xff] }
 0x3c9   : > { %6653 = vmatpush1.bf16.msra.mxu0 %v6652_v8  ;;  %5631 = vmatprep.subr.bf16.mxu1 %v5630_v9  ;;  %v1214_v8 = vld [vmem:[%s7147_s22 + $0x1cc0] sm:$0xff]  ;;  %v1216_v9 = vld [vmem:[%s7147_s22 + $0x1cd0] sm:$0xff]  ;;  %v2261_v0 = vld [vmem:[%s7147_s22 + $0x3d78] sm:$0xff]  ;;  %v5670_v3 = vpack.c.bf16 %v1237_v62, %v1235_v61 }
 0x3ca   : > { %6655 = vmatprep.subr.bf16.mxu0 %v6654_v13  ;;  %3400 = vmatprep.mubr.f32.mxu1 %v259_v19  ;;  %v1219_v13 = vld [vmem:[%s7147_s22 + $0x1ce8] sm:$0xff]  ;;  %v5652_v17 = vpack.c.bf16 %v1216_v9, %v1214_v8  ;;  %v2260_v8 = vld [vmem:[%s7147_s22 + $0x3d70] sm:$0xff] }
 0x3cb   : > { %4536 = vmatprep.mubr.f32.mxu0 %v291_v21  ;;  %v5654_v19 = vpack.c.bf16 %v1221_v14, %v1219_v13  ;;  %v1220_v21 = vld [vmem:[%s7147_s22 + $0x1cf0] sm:$0xff]  ;;  %v1239_v9 = vld [vmem:[%s7147_s22 + $0x1d88] sm:$0xff] }
 0x3cc   : > { %5633 = vmatpush1.bf16.msra.mxu1 %v5632_v20  ;;  %v1218_v20 = vld [vmem:[%s7147_s22 + $0x1ce0] sm:$0xff] }
 0x3cd   : > { %6657 = vmatpush1.bf16.msra.mxu0 %v6656_v22  ;;  %5635 = vmatprep.subr.bf16.mxu1 %v5634_v23  ;;  %v2242_v22 = vld [vmem:[%s7147_s22 + $0x3ce0] sm:$0xff]  ;;  %v6678_v23 = vpack.c.bf16 %v2245_v16, %v2243_v15  ;;  %v5656_v29 = vpack.c.bf16 %v1220_v21, %v1218_v20  ;;  %v5674_v15 = vpack.c.bf16 %v1241_v10, %v1239_v9  ;;  %v2264_v20 = vld [vmem:[%s7147_s22 + $0x3d90] sm:$0xff]  ;;  %v1243_v21 = vld [vmem:[%s7147_s22 + $0x1da8] sm:$0xff] }
 0x3ce   : > { %6659 = vmatprep.subr.bf16.mxu0 %v6658_v27  ;;  %v2247_v27 = vld [vmem:[%s7147_s22 + $0x3d08] sm:$0xff]  ;;  %v6680_v30 = vpack.c.bf16 %v2244_v24, %v2242_v22  ;;  %v1238_v16 = vld [vmem:[%s7147_s22 + $0x1d80] sm:$0xff]  ;;  %v1245_v22 = vld [vmem:[%s7147_s22 + $0x1db8] sm:$0xff] }
 0x3cf   : > { %v2269_v24 = vld [vmem:[%s7147_s22 + $0x3db8] sm:$0xff] }
 0x3d0   : > { %5637 = vmatpush1.bf16.msra.mxu1 %v5636_v33  ;;  %v1224_v33 = vld [vmem:[%s7147_s22 + $0x1d10] sm:$0xff]  ;;  %v258_v9 = vld [vmem:[%s7165_s29 + $0xe0] sm:$0xff] }
 0x3d1   : > { %6661 = vmatpush1.bf16.msra.mxu0 %v6660_v34  ;;  %5639 = vmatprep.subr.bf16.mxu1 %v5638_v35  ;;  %v2246_v34 = vld [vmem:[%s7147_s22 + $0x3d00] sm:$0xff]  ;;  %v6682_v35 = vpack.c.bf16 %v2249_v28, %v2247_v27  ;;  %v5660_v41 = vpack.c.bf16 %v1224_v33, %v1222_v32  ;;  %v5678_v27 = vpack.c.bf16 %v1245_v22, %v1243_v21  ;;  %v2268_v32 = vld [vmem:[%s7147_s22 + $0x3db0] sm:$0xff]  ;;  %v1247_v33 = vld [vmem:[%s7147_s22 + $0x1dc8] sm:$0xff] }
 0x3d2   : > { %6663 = vmatprep.subr.bf16.mxu0 %v6662_v39  ;;  %v2251_v39 = vld [vmem:[%s7147_s22 + $0x3d28] sm:$0xff]  ;;  %v6684_v42 = vpack.c.bf16 %v2248_v36, %v2246_v34  ;;  %v1242_v28 = vld [vmem:[%s7147_s22 + $0x1da0] sm:$0xff]  ;;  %v1249_v34 = vld [vmem:[%s7147_s22 + $0x1dd8] sm:$0xff] }
 0x3d3   : > { %v2273_v36 = vld [vmem:[%s7147_s22 + $0x3dd8] sm:$0xff]  ;;  %v2287_v21 = vld [vmem:[%s7147_s22 + $0x3e48] sm:$0xff] }
 0x3d4   : > { %5641 = vmatpush1.bf16.msra.mxu1 %v5640_v45  ;;  %v1228_v45 = vld [vmem:[%s7147_s22 + $0x1d30] sm:$0xff]  ;;  %v2289_v22 = vld [vmem:[%s7147_s22 + $0x3e58] sm:$0xff] }
 0x3d5   : > { %6665 = vmatpush1.bf16.msra.mxu0 %v6664_v46  ;;  %5643 = vmatprep.subr.bf16.mxu1 %v5642_v47  ;;  %v2250_v46 = vld [vmem:[%s7147_s22 + $0x3d20] sm:$0xff]  ;;  %v6686_v47 = vpack.c.bf16 %v2253_v40, %v2251_v39  ;;  %v5664_v53 = vpack.c.bf16 %v1228_v45, %v1226_v44  ;;  %v5682_v39 = vpack.c.bf16 %v1249_v34, %v1247_v33  ;;  %v2272_v44 = vld [vmem:[%s7147_s22 + $0x3dd0] sm:$0xff]  ;;  %v1251_v45 = vld [vmem:[%s7147_s22 + $0x1de8] sm:$0xff] }
 0x3d6   : > { %6667 = vmatprep.subr.bf16.mxu0 %v6666_v51  ;;  %v2255_v51 = vld [vmem:[%s7147_s22 + $0x3d48] sm:$0xff]  ;;  %v6688_v54 = vpack.c.bf16 %v2252_v48, %v2250_v46  ;;  %v1246_v40 = vld [vmem:[%s7147_s22 + $0x1dc0] sm:$0xff]  ;;  %v1253_v46 = vld [vmem:[%s7147_s22 + $0x1df8] sm:$0xff] }
 0x3d7   : > { %v2277_v48 = vld [vmem:[%s7147_s22 + $0x3df8] sm:$0xff]  ;;  %v1267_v33 = vld [vmem:[%s7147_s22 + $0x1e68] sm:$0xff] }
 0x3d8   : > { %5645 = vmatpush1.bf16.msra.mxu1 %v5644_v57  ;;  %v1232_v57 = vld [vmem:[%s7147_s22 + $0x1d50] sm:$0xff]  ;;  %v1269_v34 = vld [vmem:[%s7147_s22 + $0x1e78] sm:$0xff] }
 0x3d9   : > { %6669 = vmatpush1.bf16.msra.mxu0 %v6668_v58  ;;  %5647 = vmatprep.subr.bf16.mxu1 %v5646_v59  ;;  %v2254_v58 = vld [vmem:[%s7147_s22 + $0x3d40] sm:$0xff]  ;;  %v6690_v59 = vpack.c.bf16 %v2257_v52, %v2255_v51  ;;  %v5668_v1 = vpack.c.bf16 %v1232_v57, %v1230_v56  ;;  %v5686_v51 = vpack.c.bf16 %v1253_v46, %v1251_v45  ;;  %v2276_v56 = vld [vmem:[%s7147_s22 + $0x3df0] sm:$0xff]  ;;  %v1255_v57 = vld [vmem:[%s7147_s22 + $0x1e08] sm:$0xff] }
 0x3da   : > { %6671 = vmatprep.subr.bf16.mxu0 %v6670_v63  ;;  %v2259_v63 = vld [vmem:[%s7147_s22 + $0x3d68] sm:$0xff]  ;;  %v6692_v2 = vpack.c.bf16 %v2256_v60, %v2254_v58  ;;  %v1250_v52 = vld [vmem:[%s7147_s22 + $0x1de0] sm:$0xff]  ;;  %v1257_v58 = vld [vmem:[%s7147_s22 + $0x1e18] sm:$0xff] }
 0x3db   : > { %v2281_v60 = vld [vmem:[%s7147_s22 + $0x3e18] sm:$0xff]  ;;  %v1271_v45 = vld [vmem:[%s7147_s22 + $0x1e88] sm:$0xff] }
 0x3dc   : > { %5649 = vmatpush1.bf16.msra.mxu1 %v5648_v5  ;;  %v1236_v5 = vld [vmem:[%s7147_s22 + $0x1d70] sm:$0xff]  ;;  %v1273_v46 = vld [vmem:[%s7147_s22 + $0x1e98] sm:$0xff] }
 0x3dd   : > { %6673 = vmatpush1.bf16.msra.mxu0 %v6672_v6  ;;  %5651 = vmatprep.subr.bf16.mxu1 %v5650_v7  ;;  %v2258_v6 = vld [vmem:[%s7147_s22 + $0x3d60] sm:$0xff]  ;;  %v6694_v7 = vpack.c.bf16 %v2261_v0, %v2259_v63  ;;  %v5672_v13 = vpack.c.bf16 %v1236_v5, %v1234_v4  ;;  %v5690_v63 = vpack.c.bf16 %v1257_v58, %v1255_v57  ;;  %v2280_v4 = vld [vmem:[%s7147_s22 + $0x3e10] sm:$0xff]  ;;  %v1259_v5 = vld [vmem:[%s7147_s22 + $0x1e28] sm:$0xff] }
 0x3de   : > { %6675 = vmatprep.subr.bf16.mxu0 %v6674_v11  ;;  %v2263_v11 = vld [vmem:[%s7147_s22 + $0x3d88] sm:$0xff]  ;;  %v6696_v14 = vpack.c.bf16 %v2260_v8, %v2258_v6  ;;  %v1254_v0 = vld [vmem:[%s7147_s22 + $0x1e00] sm:$0xff]  ;;  %v1261_v6 = vld [vmem:[%s7147_s22 + $0x1e38] sm:$0xff] }
 0x3df   : > { %v2285_v8 = vld [vmem:[%s7147_s22 + $0x3e38] sm:$0xff]  ;;  %v1275_v57 = vld [vmem:[%s7147_s22 + $0x1ea8] sm:$0xff] }
 0x3e0   : > { %5653 = vmatpush1.bf16.msra.mxu1 %v5652_v17  ;;  %v1240_v17 = vld [vmem:[%s7147_s22 + $0x1d90] sm:$0xff]  ;;  %v1277_v58 = vld [vmem:[%s7147_s22 + $0x1eb8] sm:$0xff] }
 0x3e1   : > { %6677 = vmatpush1.bf16.msra.mxu0 %v6676_v18  ;;  %5655 = vmatprep.subr.bf16.mxu1 %v5654_v19  ;;  %v2262_v18 = vld [vmem:[%s7147_s22 + $0x3d80] sm:$0xff]  ;;  %v6698_v19 = vpack.c.bf16 %v2265_v12, %v2263_v11  ;;  %v5676_v25 = vpack.c.bf16 %v1240_v17, %v1238_v16  ;;  %v290_v11 = vld [vmem:[%s7165_s29 + $0x1e0] sm:$0xff] }
 0x3e2   : > { %6679 = vmatprep.subr.bf16.mxu0 %v6678_v23  ;;  %v2267_v23 = vld [vmem:[%s7147_s22 + $0x3da8] sm:$0xff]  ;;  %v6700_v26 = vpack.c.bf16 %v2264_v20, %v2262_v18  ;;  %v2282_v16 = vld [vmem:[%s7147_s22 + $0x3e20] sm:$0xff]  ;;  %v2284_v18 = vld [vmem:[%s7147_s22 + $0x3e30] sm:$0xff] }
 0x3e3   : > { %v1265_v20 = vld [vmem:[%s7147_s22 + $0x1e58] sm:$0xff] }
 0x3e4   : > { %5657 = vmatpush1.bf16.msra.mxu1 %v5656_v29  ;;  %v1244_v29 = vld [vmem:[%s7147_s22 + $0x1db0] sm:$0xff] }
 0x3e5   : > { %6681 = vmatpush1.bf16.msra.mxu0 %v6680_v30  ;;  %5659 = vmatprep.subr.bf16.mxu1 %v5658_v31  ;;  %v2266_v30 = vld [vmem:[%s7147_s22 + $0x3da0] sm:$0xff]  ;;  %v6702_v31 = vpack.c.bf16 %v2269_v24, %v2267_v23  ;;  %v5680_v37 = vpack.c.bf16 %v1244_v29, %v1242_v28  ;;  %v261_v23 = vld [vmem:[%s7165_s29 + $0xf8] sm:$0xff] }
 0x3e6   : > { %6683 = vmatprep.subr.bf16.mxu0 %v6682_v35  ;;  %v2271_v35 = vld [vmem:[%s7147_s22 + $0x3dc8] sm:$0xff]  ;;  %v6704_v38 = vpack.c.bf16 %v2268_v32, %v2266_v30  ;;  %v1262_v28 = vld [vmem:[%s7147_s22 + $0x1e40] sm:$0xff]  ;;  %v1264_v29 = vld [vmem:[%s7147_s22 + $0x1e50] sm:$0xff] }
 0x3e7   : > { %v2286_v30 = vld [vmem:[%s7147_s22 + $0x3e40] sm:$0xff]  ;;  %v2288_v32 = vld [vmem:[%s7147_s22 + $0x3e50] sm:$0xff] }
 0x3e8   : > { %5661 = vmatpush1.bf16.msra.mxu1 %v5660_v41  ;;  %v1248_v41 = vld [vmem:[%s7147_s22 + $0x1dd0] sm:$0xff] }
 0x3e9   : > { %6685 = vmatpush1.bf16.msra.mxu0 %v6684_v42  ;;  %5663 = vmatprep.subr.bf16.mxu1 %v5662_v43  ;;  %v2270_v42 = vld [vmem:[%s7147_s22 + $0x3dc0] sm:$0xff]  ;;  %v6706_v43 = vpack.c.bf16 %v2273_v36, %v2271_v35  ;;  %v5684_v49 = vpack.c.bf16 %v1248_v41, %v1246_v40  ;;  %v2291_v35 = vld [vmem:[%s7147_s22 + $0x3e68] sm:$0xff]  ;;  %v2293_v36 = vld [vmem:[%s7147_s22 + $0x3e78] sm:$0xff] }
 0x3ea   : > { %6687 = vmatprep.subr.bf16.mxu0 %v6686_v47  ;;  %v2275_v47 = vld [vmem:[%s7147_s22 + $0x3de8] sm:$0xff]  ;;  %v6708_v50 = vpack.c.bf16 %v2272_v44, %v2270_v42  ;;  %v1266_v40 = vld [vmem:[%s7147_s22 + $0x1e60] sm:$0xff]  ;;  %v1268_v41 = vld [vmem:[%s7147_s22 + $0x1e70] sm:$0xff] }
 0x3eb   : > { %v2290_v42 = vld [vmem:[%s7147_s22 + $0x3e60] sm:$0xff]  ;;  %v2292_v44 = vld [vmem:[%s7147_s22 + $0x3e70] sm:$0xff] }
 0x3ec   : > { %5665 = vmatpush1.bf16.msra.mxu1 %v5664_v53  ;;  %v1252_v53 = vld [vmem:[%s7147_s22 + $0x1df0] sm:$0xff] }
 0x3ed   : > { %6689 = vmatpush1.bf16.msra.mxu0 %v6688_v54  ;;  %5667 = vmatprep.subr.bf16.mxu1 %v5666_v55  ;;  %v2274_v54 = vld [vmem:[%s7147_s22 + $0x3de0] sm:$0xff]  ;;  %v6710_v55 = vpack.c.bf16 %v2277_v48, %v2275_v47  ;;  %v5688_v61 = vpack.c.bf16 %v1252_v53, %v1250_v52  ;;  %v2295_v47 = vld [vmem:[%s7147_s22 + $0x3e88] sm:$0xff]  ;;  %v2297_v48 = vld [vmem:[%s7147_s22 + $0x3e98] sm:$0xff] }
 0x3ee   : > { %6691 = vmatprep.subr.bf16.mxu0 %v6690_v59  ;;  %v2279_v59 = vld [vmem:[%s7147_s22 + $0x3e08] sm:$0xff]  ;;  %v6712_v62 = vpack.c.bf16 %v2276_v56, %v2274_v54  ;;  %v1270_v52 = vld [vmem:[%s7147_s22 + $0x1e80] sm:$0xff]  ;;  %v1272_v53 = vld [vmem:[%s7147_s22 + $0x1e90] sm:$0xff] }
 0x3ef   : > { %v2294_v54 = vld [vmem:[%s7147_s22 + $0x3e80] sm:$0xff]  ;;  %v2296_v56 = vld [vmem:[%s7147_s22 + $0x3e90] sm:$0xff] }
 0x3f0   : > { %5669 = vmatpush1.bf16.msra.mxu1 %v5668_v1  ;;  %v1256_v1 = vld [vmem:[%s7147_s22 + $0x1e10] sm:$0xff] }
 0x3f1   : > { %6693 = vmatpush1.bf16.msra.mxu0 %v6692_v2  ;;  %5671 = vmatprep.subr.bf16.mxu1 %v5670_v3  ;;  %v2278_v2 = vld [vmem:[%s7147_s22 + $0x3e00] sm:$0xff]  ;;  %v6714_v3 = vpack.c.bf16 %v2281_v60, %v2279_v59  ;;  %v5692_v10 = vpack.c.bf16 %v1256_v1, %v1254_v0  ;;  %v2299_v59 = vld [vmem:[%s7147_s22 + $0x3ea8] sm:$0xff]  ;;  %v2301_v60 = vld [vmem:[%s7147_s22 + $0x3eb8] sm:$0xff] }
 0x3f2   : > { %6695 = vmatprep.subr.bf16.mxu0 %v6694_v7  ;;  %v2283_v7 = vld [vmem:[%s7147_s22 + $0x3e28] sm:$0xff]  ;;  %v6716_v12 = vpack.c.bf16 %v2280_v4, %v2278_v2  ;;  %v1274_v0 = vld [vmem:[%s7147_s22 + $0x1ea0] sm:$0xff]  ;;  %v1276_v1 = vld [vmem:[%s7147_s22 + $0x1eb0] sm:$0xff] }
 0x3f3   : > { %v6718_v17 = vpack.c.bf16 %v2285_v8, %v2283_v7  ;;  %v2298_v2 = vld [vmem:[%s7147_s22 + $0x3ea0] sm:$0xff]  ;;  %v2300_v4 = vld [vmem:[%s7147_s22 + $0x3eb0] sm:$0xff]  ;;  %v2303_v7 = vld [vmem:[%s7147_s22 + $0x3ec8] sm:$0xff] }
 0x3f4   : > { %5673 = vmatpush1.bf16.msra.mxu1 %v5672_v13  ;;  %v5694_v13 = vpack.c.bf16 %v1261_v6, %v1259_v5  ;;  %v1279_v5 = vld [vmem:[%s7147_s22 + $0x1ec8] sm:$0xff]  ;;  %v1281_v6 = vld [vmem:[%s7147_s22 + $0x1ed8] sm:$0xff] }
 0x3f5   : > { %6697 = vmatpush1.bf16.msra.mxu0 %v6696_v14  ;;  %5675 = vmatprep.subr.bf16.mxu1 %v5674_v15  ;;  %v1258_v14 = vld [vmem:[%s7147_s22 + $0x1e20] sm:$0xff]  ;;  %v1260_v15 = vld [vmem:[%s7147_s22 + $0x1e30] sm:$0xff]  ;;  %v2305_v8 = vld [vmem:[%s7147_s22 + $0x3ed8] sm:$0xff] }
 0x3f6   : > { %6699 = vmatprep.subr.bf16.mxu0 %v6698_v19  ;;  %v1263_v19 = vld [vmem:[%s7147_s22 + $0x1e48] sm:$0xff]  ;;  %v5696_v24 = vpack.c.bf16 %v1260_v15, %v1258_v14  ;;  %v2302_v14 = vld [vmem:[%s7147_s22 + $0x3ec0] sm:$0xff]  ;;  %v6738_v15 = vpack.c.bf16 %v2305_v8, %v2303_v7 }
 0x3f7   : > { %v1298_v8 = vld [vmem:[%s7147_s22 + $0x1f60] sm:$0xff] }
 0x3f8   : > { %5677 = vmatpush1.bf16.msra.mxu1 %v5676_v25  ;;  %v293_v25 = vld [vmem:[%s7165_s29 + $0x1f8] sm:$0xff] }
 0x3f9   : > { %6701 = vmatpush1.bf16.msra.mxu0 %v6700_v26  ;;  %5679 = vmatprep.subr.bf16.mxu1 %v5678_v27  ;;  %v6720_v26 = vpack.c.bf16 %v2284_v18, %v2282_v16  ;;  %v5698_v27 = vpack.c.bf16 %v1265_v20, %v1263_v19  ;;  %v2304_v16 = vld [vmem:[%s7147_s22 + $0x3ed0] sm:$0xff]  ;;  %v1285_v18 = vld [vmem:[%s7147_s22 + $0x1ef8] sm:$0xff]  ;;  %v2307_v19 = vld [vmem:[%s7147_s22 + $0x3ee8] sm:$0xff] }
 0x3fa   : > { %6703 = vmatprep.subr.bf16.mxu0 %v6702_v31  ;;  %v6722_v31 = vpack.c.bf16 %v2289_v22, %v2287_v21  ;;  %v2309_v20 = vld [vmem:[%s7147_s22 + $0x3ef8] sm:$0xff]  ;;  %v6740_v22 = vpack.c.bf16 %v2304_v16, %v2302_v14 }
 0x3fb   : > { %v1305_v14 = vld [vmem:[%s7147_s22 + $0x1f98] sm:$0xff] }
 0x3fc   : > { %5681 = vmatpush1.bf16.msra.mxu1 %v5680_v37  ;;  %v5700_v37 = vpack.c.bf16 %v1264_v29, %v1262_v28  ;;  %v2308_v28 = vld [vmem:[%s7147_s22 + $0x3ef0] sm:$0xff]  ;;  %v1287_v29 = vld [vmem:[%s7147_s22 + $0x1f08] sm:$0xff]  ;;  %v2329_v16 = vld [vmem:[%s7147_s22 + $0x3f98] sm:$0xff] }
 0x3fd   : > { %6705 = vmatpush1.bf16.msra.mxu0 %v6704_v38  ;;  %5683 = vmatprep.subr.bf16.mxu1 %v5682_v39  ;;  %v6724_v38 = vpack.c.bf16 %v2288_v32, %v2286_v30  ;;  %v5702_v39 = vpack.c.bf16 %v1269_v34, %v1267_v33  ;;  %v1289_v30 = vld [vmem:[%s7147_s22 + $0x1f18] sm:$0xff] }
 0x3fe   : > { %6707 = vmatprep.subr.bf16.mxu0 %v6706_v43  ;;  %v6726_v43 = vpack.c.bf16 %v2293_v36, %v2291_v35  ;;  %v2313_v32 = vld [vmem:[%s7147_s22 + $0x3f18] sm:$0xff]  ;;  %v5722_v35 = vpack.c.bf16 %v1289_v30, %v1287_v29  ;;  %v1286_v36 = vld [vmem:[%s7147_s22 + $0x1f00] sm:$0xff] }
 0x400   : > { %5685 = vmatpush1.bf16.msra.mxu1 %v5684_v49  ;;  %v5704_v49 = vpack.c.bf16 %v1268_v41, %v1266_v40  ;;  %v2312_v40 = vld [vmem:[%s7147_s22 + $0x3f10] sm:$0xff]  ;;  %v1291_v41 = vld [vmem:[%s7147_s22 + $0x1f28] sm:$0xff] }
 0x401   : > { %6709 = vmatpush1.bf16.msra.mxu0 %v6708_v50  ;;  %5687 = vmatprep.subr.bf16.mxu1 %v5686_v51  ;;  %v6728_v50 = vpack.c.bf16 %v2292_v44, %v2290_v42  ;;  %v5706_v51 = vpack.c.bf16 %v1273_v46, %v1271_v45  ;;  %v1293_v42 = vld [vmem:[%s7147_s22 + $0x1f38] sm:$0xff] }
 0x402   : > { %6711 = vmatprep.subr.bf16.mxu0 %v6710_v55  ;;  %v6730_v55 = vpack.c.bf16 %v2297_v48, %v2295_v47  ;;  %v2317_v44 = vld [vmem:[%s7147_s22 + $0x3f38] sm:$0xff]  ;;  %v5726_v47 = vpack.c.bf16 %v1293_v42, %v1291_v41  ;;  %v1290_v48 = vld [vmem:[%s7147_s22 + $0x1f20] sm:$0xff] }
 0x404   : > { %5689 = vmatpush1.bf16.msra.mxu1 %v5688_v61  ;;  %v5708_v61 = vpack.c.bf16 %v1272_v53, %v1270_v52  ;;  %v2316_v52 = vld [vmem:[%s7147_s22 + $0x3f30] sm:$0xff]  ;;  %v1295_v53 = vld [vmem:[%s7147_s22 + $0x1f48] sm:$0xff] }
 0x405   : > { %6713 = vmatpush1.bf16.msra.mxu0 %v6712_v62  ;;  %5691 = vmatprep.subr.bf16.mxu1 %v5690_v63  ;;  %v6732_v62 = vpack.c.bf16 %v2296_v56, %v2294_v54  ;;  %v5710_v63 = vpack.c.bf16 %v1277_v58, %v1275_v57  ;;  %v1297_v54 = vld [vmem:[%s7147_s22 + $0x1f58] sm:$0xff] }
 0x406   : > { %6715 = vmatprep.subr.bf16.mxu0 %v6714_v3  ;;  %v6734_v3 = vpack.c.bf16 %v2301_v60, %v2299_v59  ;;  %v2321_v56 = vld [vmem:[%s7147_s22 + $0x3f58] sm:$0xff]  ;;  %v5730_v59 = vpack.c.bf16 %v1297_v54, %v1295_v53  ;;  %v1294_v60 = vld [vmem:[%s7147_s22 + $0x1f40] sm:$0xff] }
 0x407   : > { %3401 = vmatmul.mubr.f32.vlgmr.msra.gmra.mrb[0].mxu1 %v258_v9  ;;  %v5712_v9 = vpack.c.bf16 %v1276_v1, %v1274_v0  ;;  %v2320_v0 = vld [vmem:[%s7147_s22 + $0x3f50] sm:$0xff]  ;;  %v1299_v1 = vld [vmem:[%s7147_s22 + $0x1f68] sm:$0xff] }
 0x408   : > { %5693 = vmatpush1.bf16.msra.mxu1 %v5692_v10  ;;  %4537 = vmatmul.mubr.f32.vlgmr.msra.gmra.mrb[0].mxu0 %v290_v11  ;;  %v6736_v10 = vpack.c.bf16 %v2300_v4, %v2298_v2  ;;  %v5714_v11 = vpack.c.bf16 %v1281_v6, %v1279_v5  ;;  %v1301_v2 = vld [vmem:[%s7147_s22 + $0x1f78] sm:$0xff] }
 0x409   : > { %6717 = vmatpush1.bf16.msra.mxu0 %v6716_v12  ;;  %5695 = vmatprep.subr.bf16.mxu1 %v5694_v13  ;;  %v1278_v12 = vld [vmem:[%s7147_s22 + $0x1ec0] sm:$0xff]  ;;  %v1280_v13 = vld [vmem:[%s7147_s22 + $0x1ed0] sm:$0xff]  ;;  %v2325_v4 = vld [vmem:[%s7147_s22 + $0x3f78] sm:$0xff]  ;;  %v5734_v7 = vpack.c.bf16 %v1301_v2, %v1299_v1 }
 0x40a   : > { %6719 = vmatprep.subr.bf16.mxu0 %v6718_v17  ;;  %3471 = vmatprep.mubr.f32.mxu1 %v261_v23  ;;  %v1283_v17 = vld [vmem:[%s7147_s22 + $0x1ee8] sm:$0xff]  ;;  %v5716_v21 = vpack.c.bf16 %v1280_v13, %v1278_v12  ;;  %v2324_v12 = vld [vmem:[%s7147_s22 + $0x3f70] sm:$0xff]  ;;  %v228_v2 = vld [vmem:[%s7160_s26] sm:$0xff] }
 0x40b   : > { %4607 = vmatprep.mubr.f32.mxu0 %v293_v25  ;;  %v5718_v23 = vpack.c.bf16 %v1285_v18, %v1283_v17  ;;  %v1284_v25 = vld [vmem:[%s7147_s22 + $0x1ef0] sm:$0xff]  ;;  %v1303_v13 = vld [vmem:[%s7147_s22 + $0x1f88] sm:$0xff] }
 0x40c   : > { %5697 = vmatpush1.bf16.msra.mxu1 %v5696_v24  ;;  %v1282_v24 = vld [vmem:[%s7147_s22 + $0x1ee0] sm:$0xff] }
 0x40d   : > { %6721 = vmatpush1.bf16.msra.mxu0 %v6720_v26  ;;  %5699 = vmatprep.subr.bf16.mxu1 %v5698_v27  ;;  %v2306_v26 = vld [vmem:[%s7147_s22 + $0x3ee0] sm:$0xff]  ;;  %v6742_v27 = vpack.c.bf16 %v2309_v20, %v2307_v19  ;;  %v5720_v33 = vpack.c.bf16 %v1284_v25, %v1282_v24  ;;  %v5738_v19 = vpack.c.bf16 %v1305_v14, %v1303_v13  ;;  %v2328_v24 = vld [vmem:[%s7147_s22 + $0x3f90] sm:$0xff]  ;;  %v1307_v25 = vld [vmem:[%s7147_s22 + $0x1fa8] sm:$0xff] }
 0x40e   : > { %6723 = vmatprep.subr.bf16.mxu0 %v6722_v31  ;;  %v2311_v31 = vld [vmem:[%s7147_s22 + $0x3f08] sm:$0xff]  ;;  %v6744_v34 = vpack.c.bf16 %v2308_v28, %v2306_v26  ;;  %v1302_v20 = vld [vmem:[%s7147_s22 + $0x1f80] sm:$0xff]  ;;  %v1309_v26 = vld [vmem:[%s7147_s22 + $0x1fb8] sm:$0xff] }
 0x40f   : > { %v2333_v28 = vld [vmem:[%s7147_s22 + $0x3fb8] sm:$0xff] }
 0x410   : > { %5701 = vmatpush1.bf16.msra.mxu1 %v5700_v37  ;;  %v1288_v37 = vld [vmem:[%s7147_s22 + $0x1f10] sm:$0xff] }
 0x411   : > { %6725 = vmatpush1.bf16.msra.mxu0 %v6724_v38  ;;  %5703 = vmatprep.subr.bf16.mxu1 %v5702_v39  ;;  %v2310_v38 = vld [vmem:[%s7147_s22 + $0x3f00] sm:$0xff]  ;;  %v6746_v39 = vpack.c.bf16 %v2313_v32, %v2311_v31  ;;  %v5724_v45 = vpack.c.bf16 %v1288_v37, %v1286_v36  ;;  %v5742_v31 = vpack.c.bf16 %v1309_v26, %v1307_v25  ;;  %v2332_v36 = vld [vmem:[%s7147_s22 + $0x3fb0] sm:$0xff]  ;;  %v1311_v37 = vld [vmem:[%s7147_s22 + $0x1fc8] sm:$0xff] }
 0x412   : > { %6727 = vmatprep.subr.bf16.mxu0 %v6726_v43  ;;  %v2315_v43 = vld [vmem:[%s7147_s22 + $0x3f28] sm:$0xff]  ;;  %v6748_v46 = vpack.c.bf16 %v2312_v40, %v2310_v38  ;;  %v1306_v32 = vld [vmem:[%s7147_s22 + $0x1fa0] sm:$0xff]  ;;  %v1313_v38 = vld [vmem:[%s7147_s22 + $0x1fd8] sm:$0xff] }
 0x413   : > { %v2337_v40 = vld [vmem:[%s7147_s22 + $0x3fd8] sm:$0xff] }
 0x414   : > { %5705 = vmatpush1.bf16.msra.mxu1 %v5704_v49  ;;  %v1292_v49 = vld [vmem:[%s7147_s22 + $0x1f30] sm:$0xff] }
 0x415   : > { %6729 = vmatpush1.bf16.msra.mxu0 %v6728_v50  ;;  %5707 = vmatprep.subr.bf16.mxu1 %v5706_v51  ;;  %v2314_v50 = vld [vmem:[%s7147_s22 + $0x3f20] sm:$0xff]  ;;  %v6750_v51 = vpack.c.bf16 %v2317_v44, %v2315_v43  ;;  %v5728_v57 = vpack.c.bf16 %v1292_v49, %v1290_v48  ;;  %v5746_v43 = vpack.c.bf16 %v1313_v38, %v1311_v37  ;;  %v2336_v48 = vld [vmem:[%s7147_s22 + $0x3fd0] sm:$0xff]  ;;  %v1315_v49 = vld [vmem:[%s7147_s22 + $0x1fe8] sm:$0xff] }
 0x416   : > { %6731 = vmatprep.subr.bf16.mxu0 %v6730_v55  ;;  %v2319_v55 = vld [vmem:[%s7147_s22 + $0x3f48] sm:$0xff]  ;;  %v6752_v58 = vpack.c.bf16 %v2316_v52, %v2314_v50  ;;  %v1310_v44 = vld [vmem:[%s7147_s22 + $0x1fc0] sm:$0xff]  ;;  %v1317_v50 = vld [vmem:[%s7147_s22 + $0x1ff8] sm:$0xff] }
 0x417   : > { %v2341_v52 = vld [vmem:[%s7147_s22 + $0x3ff8] sm:$0xff] }
 0x418   : > { %5709 = vmatpush1.bf16.msra.mxu1 %v5708_v61  ;;  %v1296_v61 = vld [vmem:[%s7147_s22 + $0x1f50] sm:$0xff] }
 0x419   : > { %6733 = vmatpush1.bf16.msra.mxu0 %v6732_v62  ;;  %5711 = vmatprep.subr.bf16.mxu1 %v5710_v63  ;;  %v2318_v62 = vld [vmem:[%s7147_s22 + $0x3f40] sm:$0xff]  ;;  %v6754_v63 = vpack.c.bf16 %v2321_v56, %v2319_v55  ;;  %v5732_v5 = vpack.c.bf16 %v1296_v61, %v1294_v60  ;;  %v5750_v55 = vpack.c.bf16 %v1317_v50, %v1315_v49  ;;  %v2340_v60 = vld [vmem:[%s7147_s22 + $0x3ff0] sm:$0xff] }
 0x41a   : > { %6735 = vmatprep.subr.bf16.mxu0 %v6734_v3  ;;  %v2323_v3 = vld [vmem:[%s7147_s22 + $0x3f68] sm:$0xff]  ;;  %v6756_v6 = vpack.c.bf16 %v2320_v0, %v2318_v62  ;;  %v1314_v56 = vld [vmem:[%s7147_s22 + $0x1fe0] sm:$0xff] }
 0x41b   : > { %v292_v0 = vld [vmem:[%s7165_s29 + $0x1f0] sm:$0xff] }
 0x41c   : > { %5713 = vmatpush1.bf16.msra.mxu1 %v5712_v9  ;;  %v1300_v9 = vld [vmem:[%s7147_s22 + $0x1f70] sm:$0xff] }
 0x41d   : > { %6737 = vmatpush1.bf16.msra.mxu0 %v6736_v10  ;;  %5715 = vmatprep.subr.bf16.mxu1 %v5714_v11  ;;  %v2322_v10 = vld [vmem:[%s7147_s22 + $0x3f60] sm:$0xff]  ;;  %v6758_v11 = vpack.c.bf16 %v2325_v4, %v2323_v3  ;;  %v5736_v17 = vpack.c.bf16 %v1300_v9, %v1298_v8 }
 0x41e   : > { %6739 = vmatprep.subr.bf16.mxu0 %v6738_v15  ;;  %v2327_v15 = vld [vmem:[%s7147_s22 + $0x3f88] sm:$0xff]  ;;  %v6760_v18 = vpack.c.bf16 %v2324_v12, %v2322_v10 }
 0x420   : > { %5717 = vmatpush1.bf16.msra.mxu1 %v5716_v21  ;;  %v1304_v21 = vld [vmem:[%s7147_s22 + $0x1f90] sm:$0xff] }
 0x421   : > { %6741 = vmatpush1.bf16.msra.mxu0 %v6740_v22  ;;  %5719 = vmatprep.subr.bf16.mxu1 %v5718_v23  ;;  %v2326_v22 = vld [vmem:[%s7147_s22 + $0x3f80] sm:$0xff]  ;;  %v6762_v23 = vpack.c.bf16 %v2329_v16, %v2327_v15  ;;  %v5740_v29 = vpack.c.bf16 %v1304_v21, %v1302_v20 }
 0x422   : > { %6743 = vmatprep.subr.bf16.mxu0 %v6742_v27  ;;  %v2331_v27 = vld [vmem:[%s7147_s22 + $0x3fa8] sm:$0xff]  ;;  %v6764_v30 = vpack.c.bf16 %v2328_v24, %v2326_v22 }
 0x424   : > { %5721 = vmatpush1.bf16.msra.mxu1 %v5720_v33  ;;  %v1308_v33 = vld [vmem:[%s7147_s22 + $0x1fb0] sm:$0xff] }
 0x425   : > { %6745 = vmatpush1.bf16.msra.mxu0 %v6744_v34  ;;  %5723 = vmatprep.subr.bf16.mxu1 %v5722_v35  ;;  %v2330_v34 = vld [vmem:[%s7147_s22 + $0x3fa0] sm:$0xff]  ;;  %v6766_v35 = vpack.c.bf16 %v2333_v28, %v2331_v27  ;;  %v5744_v41 = vpack.c.bf16 %v1308_v33, %v1306_v32 }
 0x426   : > { %6747 = vmatprep.subr.bf16.mxu0 %v6746_v39  ;;  %v2335_v39 = vld [vmem:[%s7147_s22 + $0x3fc8] sm:$0xff]  ;;  %v6768_v42 = vpack.c.bf16 %v2332_v36, %v2330_v34 }
 0x428   : > { %5725 = vmatpush1.bf16.msra.mxu1 %v5724_v45  ;;  %v1312_v45 = vld [vmem:[%s7147_s22 + $0x1fd0] sm:$0xff] }
 0x429   : > { %6749 = vmatpush1.bf16.msra.mxu0 %v6748_v46  ;;  %5727 = vmatprep.subr.bf16.mxu1 %v5726_v47  ;;  %v2334_v46 = vld [vmem:[%s7147_s22 + $0x3fc0] sm:$0xff]  ;;  %v6770_v47 = vpack.c.bf16 %v2337_v40, %v2335_v39  ;;  %v5748_v53 = vpack.c.bf16 %v1312_v45, %v1310_v44 }
 0x42a   : > { %6751 = vmatprep.subr.bf16.mxu0 %v6750_v51  ;;  %v2339_v51 = vld [vmem:[%s7147_s22 + $0x3fe8] sm:$0xff]  ;;  %v6772_v54 = vpack.c.bf16 %v2336_v48, %v2334_v46 }
 0x42c   : > { %5729 = vmatpush1.bf16.msra.mxu1 %v5728_v57  ;;  %v1316_v57 = vld [vmem:[%s7147_s22 + $0x1ff0] sm:$0xff] }
 0x42d   : > { %6753 = vmatpush1.bf16.msra.mxu0 %v6752_v58  ;;  %5731 = vmatprep.subr.bf16.mxu1 %v5730_v59  ;;  %v6774_v58 = vpack.c.bf16 %v2341_v52, %v2339_v51  ;;  %v2338_v59 = vld [vmem:[%s7147_s22 + $0x3fe0] sm:$0xff]  ;;  %v5752_v61 = vpack.c.bf16 %v1316_v57, %v1314_v56 }
 0x42e   : > { %6755 = vmatprep.subr.bf16.mxu0 %v6754_v63  ;;  %v6776_v62 = vpack.c.bf16 %v2340_v60, %v2338_v59  ;;  %v260_v63 = vld [vmem:[%s7165_s29 + $0xf0] sm:$0xff] }
 0x430   : > { %5733 = vmatpush1.bf16.msra.mxu1 %v5732_v5 }
 0x431   : > { %6757 = vmatpush1.bf16.msra.mxu0 %v6756_v6  ;;  %5735 = vmatprep.subr.bf16.mxu1 %v5734_v7  ;;  %v229_v6 = vld [vmem:[%s7160_s26 + $0x8] sm:$0xff] }
 0x432   : > { %6759 = vmatprep.subr.bf16.mxu0 %v6758_v11 }
 0x434   : > { %5737 = vmatpush1.bf16.msra.mxu1 %v5736_v17 }
 0x435   : > { %6761 = vmatpush1.bf16.msra.mxu0 %v6760_v18  ;;  %5739 = vmatprep.subr.bf16.mxu1 %v5738_v19 }
 0x436   : > { %6763 = vmatprep.subr.bf16.mxu0 %v6762_v23 }
 0x438   : > { %5741 = vmatpush1.bf16.msra.mxu1 %v5740_v29 }
 0x439   : > { %6765 = vmatpush1.bf16.msra.mxu0 %v6764_v30  ;;  %5743 = vmatprep.subr.bf16.mxu1 %v5742_v31 }
 0x43a   : > { %6767 = vmatprep.subr.bf16.mxu0 %v6766_v35 }
 0x43c   : > { %5745 = vmatpush1.bf16.msra.mxu1 %v5744_v41 }
 0x43d   : > { %6769 = vmatpush1.bf16.msra.mxu0 %v6768_v42  ;;  %5747 = vmatprep.subr.bf16.mxu1 %v5746_v43 }
 0x43e   : > { %6771 = vmatprep.subr.bf16.mxu0 %v6770_v47 }
 0x440   : > { %5749 = vmatpush1.bf16.msra.mxu1 %v5748_v53 }
 0x441   : > { %6773 = vmatpush1.bf16.msra.mxu0 %v6772_v54  ;;  %5751 = vmatprep.subr.bf16.mxu1 %v5750_v55 }
 0x442   : > { %6775 = vmatprep.subr.bf16.mxu0 %v6774_v58 }
 0x444   : > { %5753 = vmatpush1.bf16.msra.mxu1 %v5752_v61 }
 0x445   : > { %6777 = vmatpush1.bf16.msra.mxu0 %v6776_v62 }
 0x447   : > { %3472 = vmatmul.mubr.f32.vlgmr.msra.gmra.mrb[0].mxu1 %v260_v63 }
 0x448   : > { %4608 = vmatmul.mubr.f32.vlgmr.msra.gmra.mrb[0].mxu0 %v292_v0 }
 0x51a   : > { %v3473_v1 = vpop.f32.mrb[0].mxu1 }
 0x51b   : > { %v4609_v3 = vpop.f32.mrb[0].mxu0  ;;  %v3475_v4 = vpop.f32.mrb[1].mxu1 }
 0x51c   : > { %v6778_v5 = vadd.f32 %v4609_v3, %v3473_v1  ;;  %v4611_v7 = vpop.f32.mrb[1].mxu0 }
 0x51d   : > { %v6779_v8 = vadd.f32 %v4611_v7, %v3475_v4 }
 0x51e   : > { %v4614_v9 = vadd.f32 %v6778_v5, %v228_v2 }
 0x51f   : > { %v4615_v10 = vadd.f32 %v6779_v8, %v229_v6 }
 0x520   : > { %4616 = vst [vmem:[%s7160_s26] sm:$0xff] %v4614_v9 }
 0x521   : > { %4617 = vst [vmem:[%s7160_s26 + $0x8] sm:$0xff] %v4615_v10 }
 0x522 PF: > { %s15_s16 = sadd.s32 1, %s7010_s16   ;;  %s9318_s9 = smov %s6986_s10 }
 0x523   : > { %p12_p12 = scmp.ge.s32.totalorder %s15_s16, 8   ;;  %s9319_s10 = smov %s6990_s11 }
 0x524   : > { %s9320_s11 = smov %s7097_s5  ;;  %s9321_s12 = smov %s7002_s14 }
 0x525   : > { %s9322_s13 = smov %s7006_s15  ;;  %s9323_s14 = smov %s9326_s18 }
 0x526   : > { %s9324_s15 = smov %s9330_s19  ;;  %14 = sbr.rel (!%p12_p12) target bundleno = 5 (0x5), region = 75 }
 0x52d   :  { %4639 = vsyncpa [#allocation3], 1 }
 0x52e   :  { %4641 = vsyncpa [#allocation3 + $0x1], 1 }

</bundles_post_ra>
